<compile_context>
chip_gen: v7x
topology: tpu7x:2x2x1
jax: 0.10.0
libtpu: 0.0.40
codegen_flags: <defaults>
</compile_context>

<pallas_src>
import jax
import jax.numpy as jnp
from jax.experimental import pallas as pl
from jax.experimental.pallas import tpu as pltpu

F32 = jnp.float32
BF16 = jnp.bfloat16


# ----------------------------------------------------------------------------
# Fused Pallas kernel
# ----------------------------------------------------------------------------
def gate_kernel(*refs):
    """3x (GATConv + BN(eval) + ReLU) + global_add_pool + fc1/ReLU + fc2."""
    (x_ref, ea_ref, ssrc_ref, sdst_ref, sdst_t_ref, pool_ref) = refs[:6]
    layer_refs = refs[6:27]                                    # 3 layers x 7 inputs
    (w1a_ref, w1b_ref, w1c_ref, fc1b_ref, fc2w_ref, fc2b_ref) = refs[27:33]
    out_ref = refs[33]

    # ---- layer-invariant operands (hoisted once, all bf16 MXU operands) ----
    ssrc_b = ssrc_ref[...]                       # bf16 [E, N]  one-hot src selector
    sdst_b = sdst_ref[...]                       # bf16 [E, N]  one-hot dst selector
    sdst_t_b = sdst_t_ref[...]                   # bf16 [N, E]
    ea_b = ea_ref[...]                           # bf16 [E, D]
    x_f = x_ref[...]                             # f32  [N, F0]

    def gat_bn_relu(h, lrefs):
        (w_ref, wasrc_ref, wadst_ref, weae_ref,
         expand_ref, mmat_ref, shift_ref) = lrefs

        hb = h.astype(BF16)                                                   # [N, F_in]

        # node feature projection (only feeds the messages; attention scalars
        # below come directly from h via host-folded weights)
        xp = jnp.dot(hb, w_ref[...], preferred_element_type=F32)              # [N, H*C]
        xpb = xp.astype(BF16)

        # head-batched attention scalars, K = F_in (folded on host)
        a_src = jnp.dot(hb, wasrc_ref[...], preferred_element_type=F32)       # [N, H]
        a_dst = jnp.dot(hb, wadst_ref[...], preferred_element_type=F32)       # [N, H]
        a_edge = jnp.dot(ea_b, weae_ref[...], preferred_element_type=F32)     # [E, H]

        # per-edge logits for all heads at once, LeakyReLU(0.2)
        logit = (jnp.dot(ssrc_b, a_src.astype(BF16), preferred_element_type=F32)
                 + jnp.dot(sdst_b, a_dst.astype(BF16), preferred_element_type=F32)
                 + a_edge)                                                    # [E, H]
        logit = jnp.where(logit > 0, logit, 0.2 * logit)

        # Segment softmax over edges sharing a destination.  A single global
        # per-head max is a constant shift within every destination segment,
        # so the softmax value is mathematically identical to PyG's
        # per-segment-max stabilization (numerics differ at bf16 noise level).
        gmax = jnp.max(logit, axis=0, keepdims=True)                          # [1, H]
        p = jnp.exp(logit - gmax)                                             # [E, H]
        denom_n = jnp.dot(sdst_t_b, p.astype(BF16),
                          preferred_element_type=F32)                         # [N, H]
        denom_e = jnp.dot(sdst_b, denom_n.astype(BF16),
                          preferred_element_type=F32)                         # [E, H]
        alpha = p * pl.reciprocal(denom_e + 1e-16, approx=True)               # [E, H]

        # head-batched message passing: one gather + one scatter for ALL heads
        gathered = jnp.dot(ssrc_b, xpb, preferred_element_type=F32)           # [E, H*C]
        alpha_full = jnp.dot(alpha.astype(BF16), expand_ref[...],
                             preferred_element_type=F32)                      # [E, H*C]
        weighted = alpha_full.astype(BF16) * gathered.astype(BF16)            # bf16 [E, H*C]
        agg = jnp.dot(sdst_t_b, weighted, preferred_element_type=F32)         # [N, H*C]

        # head mean + GAT bias + BatchNorm(eval) folded into mmat / shift, ReLU
        out = jnp.dot(agg.astype(BF16), mmat_ref[...],
                      preferred_element_type=F32) + shift_ref[...]            # [N, C]
        return jnp.maximum(out, 0.0)

    h1 = gat_bn_relu(x_f, layer_refs[0:7])
    h2 = gat_bn_relu(h1, layer_refs[7:14])
    h3 = gat_bn_relu(h2, layer_refs[14:21])

    # global_add_pool + fc1 (row-split fc1 weights avoid an in-kernel lane
    # concat of 32/32/512-wide pieces) + ReLU + fc2   (dropout = identity)
    pool_b = pool_ref[...]                                                    # bf16 [B, N]
    p1 = jnp.dot(pool_b, h1.astype(BF16), preferred_element_type=F32)         # [B, C1]
    p2 = jnp.dot(pool_b, h2.astype(BF16), preferred_element_type=F32)         # [B, C2]
    p3 = jnp.dot(pool_b, h3.astype(BF16), preferred_element_type=F32)         # [B, 512]
    z = (jnp.dot(p1.astype(BF16), w1a_ref[...], preferred_element_type=F32)
         + jnp.dot(p2.astype(BF16), w1b_ref[...], preferred_element_type=F32)
         + jnp.dot(p3.astype(BF16), w1c_ref[...], preferred_element_type=F32)
         + fc1b_ref[...])
    z = jnp.maximum(z, 0.0)
    out_ref[...] = (jnp.dot(z.astype(BF16), fc2w_ref[...],
                            preferred_element_type=F32) + fc2b_ref[...])


# ----------------------------------------------------------------------------
# Wrapper: host-side folding + ONE pallas_call
# ----------------------------------------------------------------------------
def _derive_gat_layer_inputs(params, heads):
    """Host-side precompute so the kernel needs no per-head slicing/matmuls."""
    (w, att_src, att_dst, we, att_edge, bias,
     bn_gamma, bn_beta, bn_mean, bn_var, bn_eps) = params
    H = heads
    C = att_src.shape[1]
    eye_h = jnp.eye(H, dtype=F32)
    # block-diagonal attention matrices: A[h*C + c, h] = att[h, c]
    a_src_m = (att_src[:, :, None] * eye_h[:, None, :]).reshape(H * C, H)
    a_dst_m = (att_dst[:, :, None] * eye_h[:, None, :]).reshape(H * C, H)
    a_edge_m = (att_edge[:, :, None] * eye_h[:, None, :]).reshape(H * C, H)
    # fold attention projections into the weights (associativity):
    #   dot(h, w) @ a_src_m == dot(h, w @ a_src_m)
    w_asrc = w @ a_src_m                                                      # [F_in, H]
    w_adst = w @ a_dst_m                                                      # [F_in, H]
    we_aedge = we @ a_edge_m                                                  # [edge_dim, H]
    # expand[h, h*C + c] = 1 : broadcasts per-head alpha over its channel block
    expand_m = jnp.kron(eye_h, jnp.ones((1, C), F32))                         # [H, H*C]
    # head-mean (1/H) with the BatchNorm(eval) scale folded in
    bn_scale = bn_gamma / jnp.sqrt(bn_var + bn_eps)                           # [1, C]
    mean_mat = jnp.kron(jnp.ones((H, 1), F32), jnp.eye(C, dtype=F32)) / H     # [H*C, C]
    mmat = mean_mat * bn_scale                                                # [H*C, C]
    shift = (bias - bn_mean) * bn_scale + bn_beta                             # [1, C]
    return [w.astype(BF16), w_asrc.astype(BF16), w_adst.astype(BF16),
            we_aedge.astype(BF16), expand_m.astype(BF16),
            mmat.astype(BF16), shift]


def gate_forward(x, ea, ssrc, sdst, pool, layer_params,
                 fc1_w, fc1_b, fc2_w, fc2_b, *, heads, hidden):
    B = pool.shape[0]
    out_ch = fc2_w.shape[1]
    inputs = [x, ea.astype(BF16), ssrc.astype(BF16), sdst.astype(BF16),
              jnp.transpose(sdst).astype(BF16), pool.astype(BF16)]
    for p in layer_params:
        inputs.extend(_derive_gat_layer_inputs(p, heads))
    inputs.extend([fc1_w[:hidden, :].astype(BF16),
                   fc1_w[hidden:2 * hidden, :].astype(BF16),
                   fc1_w[2 * hidden:, :].astype(BF16),
                   fc1_b, fc2_w.astype(BF16), fc2_b])
    vmem = pl.BlockSpec(memory_space=pltpu.MemorySpace.VMEM)
    return pl.pallas_call(
        gate_kernel,
        out_shape=jax.ShapeDtypeStruct((B, out_ch), jnp.float32),
        in_specs=[vmem] * len(inputs),
        out_specs=vmem,
    )(*inputs)


# ----------------------------------------------------------------------------
# Parameter initialization (deterministic, synthetic)
# ----------------------------------------------------------------------------
def init_gat_params(key, in_ch, out_ch, edge_dim, heads):
    ks = jax.random.split(key, 5)
    w = 0.1 * jax.random.normal(ks[0], (in_ch, heads * out_ch), F32)
    att_src = 0.1 * jax.random.normal(ks[1], (heads, out_ch), F32)
    att_dst = 0.1 * jax.random.normal(ks[2], (heads, out_ch), F32)
    we = 0.1 * jax.random.normal(ks[3], (edge_dim, heads * out_ch), F32)
    att_edge = 0.1 * jax.random.normal(ks[4], (heads, out_ch), F32)
    bias = jnp.zeros((1, out_ch), F32)
    # BatchNorm1d eval stats (defaults): gamma=1, beta=0, mean=0, var=1
    bn_gamma = jnp.ones((1, out_ch), F32)
    bn_beta = jnp.zeros((1, out_ch), F32)
    bn_mean = jnp.zeros((1, out_ch), F32)
    bn_var = jnp.ones((1, out_ch), F32)
    return (w, att_src, att_dst, we, att_edge, bias,
            bn_gamma, bn_beta, bn_mean, bn_var, 1e-5)


# ----------------------------------------------------------------------------
# Main
# ----------------------------------------------------------------------------
if __name__ == "__main__":
    key = jax.random.PRNGKey(0)
    (k_x, k_src, k_dst, k_ea, k_c1, k_c2, k_c3, k_fc1, k_fc2) = jax.random.split(key, 9)

    # small synthetic graph-batch
    N = 16          # total nodes
    E = 32          # edges (before self-loops)
    B = 2           # graphs in the batch
    in_channels = 8
    hidden = 32
    out_channels = 2
    edge_dim = 4
    heads = 4

    x = jax.random.normal(k_x, (N, in_channels), F32)
    src = jax.random.randint(k_src, (E,), 0, N)
    off = jax.random.randint(k_dst, (E,), 1, N)
    dst = (src + off) % N                       # guarantees no self-loops
    edge_attr = jax.random.normal(k_ea, (E, edge_dim), F32)
    batch = jnp.array([0] * (N // 2) + [1] * (N // 2), jnp.int32)

    # ---- glue: GATConv add_self_loops(fill_value='mean') preprocessing ----
    loop_sum = jax.ops.segment_sum(edge_attr, dst, num_segments=N)
    loop_cnt = jax.ops.segment_sum(jnp.ones((E, 1), F32), dst, num_segments=N)
    loop_attr = jnp.where(loop_cnt > 0, loop_sum / jnp.maximum(loop_cnt, 1.0), 0.0)
    src_all = jnp.concatenate([src, jnp.arange(N, dtype=src.dtype)])
    dst_all = jnp.concatenate([dst, jnp.arange(N, dtype=dst.dtype)])
    ea_all = jnp.concatenate([edge_attr, loop_attr], axis=0)           # [E+N, edge_dim]

    ssrc = jax.nn.one_hot(src_all, N, dtype=F32)                       # [E+N, N]
    sdst = jax.nn.one_hot(dst_all, N, dtype=F32)                       # [E+N, N]
    pool = jnp.transpose(jax.nn.one_hot(batch, B, dtype=F32))          # [B, N]

    # ---- parameters ----
    p1 = init_gat_params(k_c1, in_channels, hidden, edge_dim, heads)
    p2 = init_gat_params(k_c2, hidden, hidden, edge_dim, heads)
    p3 = init_gat_params(k_c3, hidden, 512, edge_dim, heads)
    readout_dim = hidden + hidden + 512
    fc1_w = 0.05 * jax.random.normal(k_fc1, (readout_dim, 1024), F32)
    fc1_b = jnp.zeros((1, 1024), F32)
    fc2_w = 0.05 * jax.random.normal(k_fc2, (1024, out_channels), F32)
    fc2_b = jnp.zeros((1, out_channels), F32)

    # ---- forward (single fused Pallas kernel) ----
    out = gate_forward(x, ea_all, ssrc, sdst, pool, [p1, p2, p3],
                       fc1_w, fc1_b, fc2_w, fc2_b, heads=heads, hidden=hidden)

    out = jax.block_until_ready(out)
    assert out.shape == (B, out_channels)
    assert bool(jnp.all(jnp.isfinite(out)))
    print("KERNEL_OK")
</pallas_src>

<mosaic_0001>
module attributes {stable_mosaic.version = 11 : i64} {
  func.func @gate_kernel(%arg0: memref<16x8xf32, #tpu.memory_space<vmem>>, %arg1: memref<48x4xbf16, #tpu.memory_space<vmem>>, %arg2: memref<48x16xbf16, #tpu.memory_space<vmem>>, %arg3: memref<48x16xbf16, #tpu.memory_space<vmem>>, %arg4: memref<16x48xbf16, #tpu.memory_space<vmem>>, %arg5: memref<2x16xbf16, #tpu.memory_space<vmem>>, %arg6: memref<8x128xbf16, #tpu.memory_space<vmem>>, %arg7: memref<8x4xbf16, #tpu.memory_space<vmem>>, %arg8: memref<8x4xbf16, #tpu.memory_space<vmem>>, %arg9: memref<4x4xbf16, #tpu.memory_space<vmem>>, %arg10: memref<4x128xbf16, #tpu.memory_space<vmem>>, %arg11: memref<128x32xbf16, #tpu.memory_space<vmem>>, %arg12: memref<1x32xf32, #tpu.memory_space<vmem>>, %arg13: memref<32x128xbf16, #tpu.memory_space<vmem>>, %arg14: memref<32x4xbf16, #tpu.memory_space<vmem>>, %arg15: memref<32x4xbf16, #tpu.memory_space<vmem>>, %arg16: memref<4x4xbf16, #tpu.memory_space<vmem>>, %arg17: memref<4x128xbf16, #tpu.memory_space<vmem>>, %arg18: memref<128x32xbf16, #tpu.memory_space<vmem>>, %arg19: memref<1x32xf32, #tpu.memory_space<vmem>>, %arg20: memref<32x2048xbf16, #tpu.memory_space<vmem>>, %arg21: memref<32x4xbf16, #tpu.memory_space<vmem>>, %arg22: memref<32x4xbf16, #tpu.memory_space<vmem>>, %arg23: memref<4x4xbf16, #tpu.memory_space<vmem>>, %arg24: memref<4x2048xbf16, #tpu.memory_space<vmem>>, %arg25: memref<2048x512xbf16, #tpu.memory_space<vmem>>, %arg26: memref<1x512xf32, #tpu.memory_space<vmem>>, %arg27: memref<32x1024xbf16, #tpu.memory_space<vmem>>, %arg28: memref<32x1024xbf16, #tpu.memory_space<vmem>>, %arg29: memref<512x1024xbf16, #tpu.memory_space<vmem>>, %arg30: memref<1x1024xf32, #tpu.memory_space<vmem>>, %arg31: memref<1024x2xbf16, #tpu.memory_space<vmem>>, %arg32: memref<1x2xf32, #tpu.memory_space<vmem>>, %arg33: memref<2x2xf32, #tpu.memory_space<vmem>>) attributes {dimension_semantics = [], scalar_prefetch = 0 : i64, scratch_operands = 0 : i64, tpu.core_type = #tpu.core_type<tc>} {
    %c0 = arith.constant 0 : index
    %c0_0 = arith.constant 0 : index
    %0 = vector.load %arg2[%c0, %c0_0] : memref<48x16xbf16, #tpu.memory_space<vmem>>, vector<48x16xbf16>
    %c0_1 = arith.constant 0 : index
    %c0_2 = arith.constant 0 : index
    %1 = vector.load %arg3[%c0_1, %c0_2] : memref<48x16xbf16, #tpu.memory_space<vmem>>, vector<48x16xbf16>
    %c0_3 = arith.constant 0 : index
    %c0_4 = arith.constant 0 : index
    %2 = vector.load %arg4[%c0_3, %c0_4] : memref<16x48xbf16, #tpu.memory_space<vmem>>, vector<16x48xbf16>
    %c0_5 = arith.constant 0 : index
    %c0_6 = arith.constant 0 : index
    %3 = vector.load %arg1[%c0_5, %c0_6] : memref<48x4xbf16, #tpu.memory_space<vmem>>, vector<48x4xbf16>
    %c0_7 = arith.constant 0 : index
    %c0_8 = arith.constant 0 : index
    %4 = vector.load %arg0[%c0_7, %c0_8] : memref<16x8xf32, #tpu.memory_space<vmem>>, vector<16x8xf32>
    %5 = arith.truncf %4 : vector<16x8xf32> to vector<16x8xbf16>
    %c0_9 = arith.constant 0 : index
    %c0_10 = arith.constant 0 : index
    %6 = vector.load %arg6[%c0_9, %c0_10] : memref<8x128xbf16, #tpu.memory_space<vmem>>, vector<8x128xbf16>
    %cst = arith.constant dense<0.000000e+00> : vector<16x128xf32>
    %7 = tpu.matmul %5, %6, %cst {dimension_numbers = #tpu.dot_dimension_numbers<[1], [0], [0], [1], [0, 0, 1, 1], [], []>} : vector<16x8xbf16>, vector<8x128xbf16>, vector<16x128xf32> -> vector<16x128xf32>
    %8 = arith.truncf %7 : vector<16x128xf32> to vector<16x128xbf16>
    %c0_11 = arith.constant 0 : index
    %c0_12 = arith.constant 0 : index
    %9 = vector.load %arg7[%c0_11, %c0_12] : memref<8x4xbf16, #tpu.memory_space<vmem>>, vector<8x4xbf16>
    %cst_13 = arith.constant dense<0.000000e+00> : vector<16x4xf32>
    %10 = tpu.matmul %5, %9, %cst_13 {dimension_numbers = #tpu.dot_dimension_numbers<[1], [0], [0], [1], [0, 0, 1, 1], [], []>} : vector<16x8xbf16>, vector<8x4xbf16>, vector<16x4xf32> -> vector<16x4xf32>
    %c0_14 = arith.constant 0 : index
    %c0_15 = arith.constant 0 : index
    %11 = vector.load %arg8[%c0_14, %c0_15] : memref<8x4xbf16, #tpu.memory_space<vmem>>, vector<8x4xbf16>
    %cst_16 = arith.constant dense<0.000000e+00> : vector<16x4xf32>
    %12 = tpu.matmul %5, %11, %cst_16 {dimension_numbers = #tpu.dot_dimension_numbers<[1], [0], [0], [1], [0, 0, 1, 1], [], []>} : vector<16x8xbf16>, vector<8x4xbf16>, vector<16x4xf32> -> vector<16x4xf32>
    %c0_17 = arith.constant 0 : index
    %c0_18 = arith.constant 0 : index
    %13 = vector.load %arg9[%c0_17, %c0_18] : memref<4x4xbf16, #tpu.memory_space<vmem>>, vector<4x4xbf16>
    %cst_19 = arith.constant dense<0.000000e+00> : vector<48x4xf32>
    %14 = tpu.matmul %3, %13, %cst_19 {dimension_numbers = #tpu.dot_dimension_numbers<[1], [0], [0], [1], [0, 0, 1, 1], [], []>} : vector<48x4xbf16>, vector<4x4xbf16>, vector<48x4xf32> -> vector<48x4xf32>
    %15 = arith.truncf %10 : vector<16x4xf32> to vector<16x4xbf16>
    %cst_20 = arith.constant dense<0.000000e+00> : vector<48x4xf32>
    %16 = tpu.matmul %0, %15, %cst_20 {dimension_numbers = #tpu.dot_dimension_numbers<[1], [0], [0], [1], [0, 0, 1, 1], [], []>} : vector<48x16xbf16>, vector<16x4xbf16>, vector<48x4xf32> -> vector<48x4xf32>
    %17 = arith.truncf %12 : vector<16x4xf32> to vector<16x4xbf16>
    %cst_21 = arith.constant dense<0.000000e+00> : vector<48x4xf32>
    %18 = tpu.matmul %1, %17, %cst_21 {dimension_numbers = #tpu.dot_dimension_numbers<[1], [0], [0], [1], [0, 0, 1, 1], [], []>} : vector<48x16xbf16>, vector<16x4xbf16>, vector<48x4xf32> -> vector<48x4xf32>
    %19 = arith.addf %16, %18 : vector<48x4xf32>
    %20 = arith.addf %19, %14 : vector<48x4xf32>
    %cst_22 = arith.constant 0.000000e+00 : f32
    %21 = vector.broadcast %cst_22 : f32 to vector<48x4xf32>
    %22 = arith.cmpf ogt, %20, %21 : vector<48x4xf32>
    %cst_23 = arith.constant 2.000000e-01 : f32
    %23 = vector.broadcast %cst_23 : f32 to vector<48x4xf32>
    %24 = arith.mulf %23, %20 : vector<48x4xf32>
    %25 = arith.select %22, %20, %24 : vector<48x4xi1>, vector<48x4xf32>
    %cst_24 = arith.constant dense<0xFF800000> : vector<4xf32>
    %26 = vector.multi_reduction <maximumf>, %25, %cst_24 [0] : vector<48x4xf32> to vector<4xf32>
    %27 = vector.shape_cast %26 : vector<4xf32> to vector<1x4xf32>
    %28 = vector.broadcast %27 : vector<1x4xf32> to vector<48x4xf32>
    %29 = arith.subf %25, %28 : vector<48x4xf32>
    %30 = math.exp %29 : vector<48x4xf32>
    %31 = arith.truncf %30 : vector<48x4xf32> to vector<48x4xbf16>
    %cst_25 = arith.constant dense<0.000000e+00> : vector<16x4xf32>
    %32 = tpu.matmul %2, %31, %cst_25 {dimension_numbers = #tpu.dot_dimension_numbers<[1], [0], [0], [1], [0, 0, 1, 1], [], []>} : vector<16x48xbf16>, vector<48x4xbf16>, vector<16x4xf32> -> vector<16x4xf32>
    %33 = arith.truncf %32 : vector<16x4xf32> to vector<16x4xbf16>
    %cst_26 = arith.constant dense<0.000000e+00> : vector<48x4xf32>
    %34 = tpu.matmul %1, %33, %cst_26 {dimension_numbers = #tpu.dot_dimension_numbers<[1], [0], [0], [1], [0, 0, 1, 1], [], []>} : vector<48x16xbf16>, vector<16x4xbf16>, vector<48x4xf32> -> vector<48x4xf32>
    %cst_27 = arith.constant 1.000000e-16 : f32
    %35 = vector.broadcast %cst_27 : f32 to vector<48x4xf32>
    %36 = arith.addf %34, %35 : vector<48x4xf32>
    %37 = tpu.reciprocal %36 {approx = true} : vector<48x4xf32> -> vector<48x4xf32>
    %38 = arith.mulf %30, %37 : vector<48x4xf32>
    %cst_28 = arith.constant dense<0.000000e+00> : vector<48x128xf32>
    %39 = tpu.matmul %0, %8, %cst_28 {dimension_numbers = #tpu.dot_dimension_numbers<[1], [0], [0], [1], [0, 0, 1, 1], [], []>} : vector<48x16xbf16>, vector<16x128xbf16>, vector<48x128xf32> -> vector<48x128xf32>
    %40 = arith.truncf %38 : vector<48x4xf32> to vector<48x4xbf16>
    %c0_29 = arith.constant 0 : index
    %c0_30 = arith.constant 0 : index
    %41 = vector.load %arg10[%c0_29, %c0_30] : memref<4x128xbf16, #tpu.memory_space<vmem>>, vector<4x128xbf16>
    %cst_31 = arith.constant dense<0.000000e+00> : vector<48x128xf32>
    %42 = tpu.matmul %40, %41, %cst_31 {dimension_numbers = #tpu.dot_dimension_numbers<[1], [0], [0], [1], [0, 0, 1, 1], [], []>} : vector<48x4xbf16>, vector<4x128xbf16>, vector<48x128xf32> -> vector<48x128xf32>
    %43 = arith.truncf %42 : vector<48x128xf32> to vector<48x128xbf16>
    %44 = arith.truncf %39 : vector<48x128xf32> to vector<48x128xbf16>
    %45 = arith.mulf %43, %44 : vector<48x128xbf16>
    %cst_32 = arith.constant dense<0.000000e+00> : vector<16x128xf32>
    %46 = tpu.matmul %2, %45, %cst_32 {dimension_numbers = #tpu.dot_dimension_numbers<[1], [0], [0], [1], [0, 0, 1, 1], [], []>} : vector<16x48xbf16>, vector<48x128xbf16>, vector<16x128xf32> -> vector<16x128xf32>
    %47 = arith.truncf %46 : vector<16x128xf32> to vector<16x128xbf16>
    %c0_33 = arith.constant 0 : index
    %c0_34 = arith.constant 0 : index
    %48 = vector.load %arg11[%c0_33, %c0_34] : memref<128x32xbf16, #tpu.memory_space<vmem>>, vector<128x32xbf16>
    %cst_35 = arith.constant dense<0.000000e+00> : vector<16x32xf32>
    %49 = tpu.matmul %47, %48, %cst_35 {dimension_numbers = #tpu.dot_dimension_numbers<[1], [0], [0], [1], [0, 0, 1, 1], [], []>} : vector<16x128xbf16>, vector<128x32xbf16>, vector<16x32xf32> -> vector<16x32xf32>
    %c0_36 = arith.constant 0 : index
    %c0_37 = arith.constant 0 : index
    %50 = vector.load %arg12[%c0_36, %c0_37] : memref<1x32xf32, #tpu.memory_space<vmem>>, vector<1x32xf32>
    %51 = vector.broadcast %50 : vector<1x32xf32> to vector<16x32xf32>
    %52 = arith.addf %49, %51 : vector<16x32xf32>
    %cst_38 = arith.constant 0.000000e+00 : f32
    %53 = vector.broadcast %cst_38 : f32 to vector<16x32xf32>
    %54 = arith.maximumf %52, %53 : vector<16x32xf32>
    %55 = arith.truncf %54 : vector<16x32xf32> to vector<16x32xbf16>
    %c0_39 = arith.constant 0 : index
    %c0_40 = arith.constant 0 : index
    %56 = vector.load %arg13[%c0_39, %c0_40] : memref<32x128xbf16, #tpu.memory_space<vmem>>, vector<32x128xbf16>
    %cst_41 = arith.constant dense<0.000000e+00> : vector<16x128xf32>
    %57 = tpu.matmul %55, %56, %cst_41 {dimension_numbers = #tpu.dot_dimension_numbers<[1], [0], [0], [1], [0, 0, 1, 1], [], []>} : vector<16x32xbf16>, vector<32x128xbf16>, vector<16x128xf32> -> vector<16x128xf32>
    %58 = arith.truncf %57 : vector<16x128xf32> to vector<16x128xbf16>
    %c0_42 = arith.constant 0 : index
    %c0_43 = arith.constant 0 : index
    %59 = vector.load %arg14[%c0_42, %c0_43] : memref<32x4xbf16, #tpu.memory_space<vmem>>, vector<32x4xbf16>
    %cst_44 = arith.constant dense<0.000000e+00> : vector<16x4xf32>
    %60 = tpu.matmul %55, %59, %cst_44 {dimension_numbers = #tpu.dot_dimension_numbers<[1], [0], [0], [1], [0, 0, 1, 1], [], []>} : vector<16x32xbf16>, vector<32x4xbf16>, vector<16x4xf32> -> vector<16x4xf32>
    %c0_45 = arith.constant 0 : index
    %c0_46 = arith.constant 0 : index
    %61 = vector.load %arg15[%c0_45, %c0_46] : memref<32x4xbf16, #tpu.memory_space<vmem>>, vector<32x4xbf16>
    %cst_47 = arith.constant dense<0.000000e+00> : vector<16x4xf32>
    %62 = tpu.matmul %55, %61, %cst_47 {dimension_numbers = #tpu.dot_dimension_numbers<[1], [0], [0], [1], [0, 0, 1, 1], [], []>} : vector<16x32xbf16>, vector<32x4xbf16>, vector<16x4xf32> -> vector<16x4xf32>
    %c0_48 = arith.constant 0 : index
    %c0_49 = arith.constant 0 : index
    %63 = vector.load %arg16[%c0_48, %c0_49] : memref<4x4xbf16, #tpu.memory_space<vmem>>, vector<4x4xbf16>
    %cst_50 = arith.constant dense<0.000000e+00> : vector<48x4xf32>
    %64 = tpu.matmul %3, %63, %cst_50 {dimension_numbers = #tpu.dot_dimension_numbers<[1], [0], [0], [1], [0, 0, 1, 1], [], []>} : vector<48x4xbf16>, vector<4x4xbf16>, vector<48x4xf32> -> vector<48x4xf32>
    %65 = arith.truncf %60 : vector<16x4xf32> to vector<16x4xbf16>
    %cst_51 = arith.constant dense<0.000000e+00> : vector<48x4xf32>
    %66 = tpu.matmul %0, %65, %cst_51 {dimension_numbers = #tpu.dot_dimension_numbers<[1], [0], [0], [1], [0, 0, 1, 1], [], []>} : vector<48x16xbf16>, vector<16x4xbf16>, vector<48x4xf32> -> vector<48x4xf32>
    %67 = arith.truncf %62 : vector<16x4xf32> to vector<16x4xbf16>
    %cst_52 = arith.constant dense<0.000000e+00> : vector<48x4xf32>
    %68 = tpu.matmul %1, %67, %cst_52 {dimension_numbers = #tpu.dot_dimension_numbers<[1], [0], [0], [1], [0, 0, 1, 1], [], []>} : vector<48x16xbf16>, vector<16x4xbf16>, vector<48x4xf32> -> vector<48x4xf32>
    %69 = arith.addf %66, %68 : vector<48x4xf32>
    %70 = arith.addf %69, %64 : vector<48x4xf32>
    %cst_53 = arith.constant 0.000000e+00 : f32
    %71 = vector.broadcast %cst_53 : f32 to vector<48x4xf32>
    %72 = arith.cmpf ogt, %70, %71 : vector<48x4xf32>
    %cst_54 = arith.constant 2.000000e-01 : f32
    %73 = vector.broadcast %cst_54 : f32 to vector<48x4xf32>
    %74 = arith.mulf %73, %70 : vector<48x4xf32>
    %75 = arith.select %72, %70, %74 : vector<48x4xi1>, vector<48x4xf32>
    %cst_55 = arith.constant dense<0xFF800000> : vector<4xf32>
    %76 = vector.multi_reduction <maximumf>, %75, %cst_55 [0] : vector<48x4xf32> to vector<4xf32>
    %77 = vector.shape_cast %76 : vector<4xf32> to vector<1x4xf32>
    %78 = vector.broadcast %77 : vector<1x4xf32> to vector<48x4xf32>
    %79 = arith.subf %75, %78 : vector<48x4xf32>
    %80 = math.exp %79 : vector<48x4xf32>
    %81 = arith.truncf %80 : vector<48x4xf32> to vector<48x4xbf16>
    %cst_56 = arith.constant dense<0.000000e+00> : vector<16x4xf32>
    %82 = tpu.matmul %2, %81, %cst_56 {dimension_numbers = #tpu.dot_dimension_numbers<[1], [0], [0], [1], [0, 0, 1, 1], [], []>} : vector<16x48xbf16>, vector<48x4xbf16>, vector<16x4xf32> -> vector<16x4xf32>
    %83 = arith.truncf %82 : vector<16x4xf32> to vector<16x4xbf16>
    %cst_57 = arith.constant dense<0.000000e+00> : vector<48x4xf32>
    %84 = tpu.matmul %1, %83, %cst_57 {dimension_numbers = #tpu.dot_dimension_numbers<[1], [0], [0], [1], [0, 0, 1, 1], [], []>} : vector<48x16xbf16>, vector<16x4xbf16>, vector<48x4xf32> -> vector<48x4xf32>
    %cst_58 = arith.constant 1.000000e-16 : f32
    %85 = vector.broadcast %cst_58 : f32 to vector<48x4xf32>
    %86 = arith.addf %84, %85 : vector<48x4xf32>
    %87 = tpu.reciprocal %86 {approx = true} : vector<48x4xf32> -> vector<48x4xf32>
    %88 = arith.mulf %80, %87 : vector<48x4xf32>
    %cst_59 = arith.constant dense<0.000000e+00> : vector<48x128xf32>
    %89 = tpu.matmul %0, %58, %cst_59 {dimension_numbers = #tpu.dot_dimension_numbers<[1], [0], [0], [1], [0, 0, 1, 1], [], []>} : vector<48x16xbf16>, vector<16x128xbf16>, vector<48x128xf32> -> vector<48x128xf32>
    %90 = arith.truncf %88 : vector<48x4xf32> to vector<48x4xbf16>
    %c0_60 = arith.constant 0 : index
    %c0_61 = arith.constant 0 : index
    %91 = vector.load %arg17[%c0_60, %c0_61] : memref<4x128xbf16, #tpu.memory_space<vmem>>, vector<4x128xbf16>
    %cst_62 = arith.constant dense<0.000000e+00> : vector<48x128xf32>
    %92 = tpu.matmul %90, %91, %cst_62 {dimension_numbers = #tpu.dot_dimension_numbers<[1], [0], [0], [1], [0, 0, 1, 1], [], []>} : vector<48x4xbf16>, vector<4x128xbf16>, vector<48x128xf32> -> vector<48x128xf32>
    %93 = arith.truncf %92 : vector<48x128xf32> to vector<48x128xbf16>
    %94 = arith.truncf %89 : vector<48x128xf32> to vector<48x128xbf16>
    %95 = arith.mulf %93, %94 : vector<48x128xbf16>
    %cst_63 = arith.constant dense<0.000000e+00> : vector<16x128xf32>
    %96 = tpu.matmul %2, %95, %cst_63 {dimension_numbers = #tpu.dot_dimension_numbers<[1], [0], [0], [1], [0, 0, 1, 1], [], []>} : vector<16x48xbf16>, vector<48x128xbf16>, vector<16x128xf32> -> vector<16x128xf32>
    %97 = arith.truncf %96 : vector<16x128xf32> to vector<16x128xbf16>
    %c0_64 = arith.constant 0 : index
    %c0_65 = arith.constant 0 : index
    %98 = vector.load %arg18[%c0_64, %c0_65] : memref<128x32xbf16, #tpu.memory_space<vmem>>, vector<128x32xbf16>
    %cst_66 = arith.constant dense<0.000000e+00> : vector<16x32xf32>
    %99 = tpu.matmul %97, %98, %cst_66 {dimension_numbers = #tpu.dot_dimension_numbers<[1], [0], [0], [1], [0, 0, 1, 1], [], []>} : vector<16x128xbf16>, vector<128x32xbf16>, vector<16x32xf32> -> vector<16x32xf32>
    %c0_67 = arith.constant 0 : index
    %c0_68 = arith.constant 0 : index
    %100 = vector.load %arg19[%c0_67, %c0_68] : memref<1x32xf32, #tpu.memory_space<vmem>>, vector<1x32xf32>
    %101 = vector.broadcast %100 : vector<1x32xf32> to vector<16x32xf32>
    %102 = arith.addf %99, %101 : vector<16x32xf32>
    %cst_69 = arith.constant 0.000000e+00 : f32
    %103 = vector.broadcast %cst_69 : f32 to vector<16x32xf32>
    %104 = arith.maximumf %102, %103 : vector<16x32xf32>
    %105 = arith.truncf %104 : vector<16x32xf32> to vector<16x32xbf16>
    %c0_70 = arith.constant 0 : index
    %c0_71 = arith.constant 0 : index
    %106 = vector.load %arg20[%c0_70, %c0_71] : memref<32x2048xbf16, #tpu.memory_space<vmem>>, vector<32x2048xbf16>
    %cst_72 = arith.constant dense<0.000000e+00> : vector<16x2048xf32>
    %107 = tpu.matmul %105, %106, %cst_72 {dimension_numbers = #tpu.dot_dimension_numbers<[1], [0], [0], [1], [0, 0, 1, 1], [], []>} : vector<16x32xbf16>, vector<32x2048xbf16>, vector<16x2048xf32> -> vector<16x2048xf32>
    %108 = arith.truncf %107 : vector<16x2048xf32> to vector<16x2048xbf16>
    %c0_73 = arith.constant 0 : index
    %c0_74 = arith.constant 0 : index
    %109 = vector.load %arg21[%c0_73, %c0_74] : memref<32x4xbf16, #tpu.memory_space<vmem>>, vector<32x4xbf16>
    %cst_75 = arith.constant dense<0.000000e+00> : vector<16x4xf32>
    %110 = tpu.matmul %105, %109, %cst_75 {dimension_numbers = #tpu.dot_dimension_numbers<[1], [0], [0], [1], [0, 0, 1, 1], [], []>} : vector<16x32xbf16>, vector<32x4xbf16>, vector<16x4xf32> -> vector<16x4xf32>
    %c0_76 = arith.constant 0 : index
    %c0_77 = arith.constant 0 : index
    %111 = vector.load %arg22[%c0_76, %c0_77] : memref<32x4xbf16, #tpu.memory_space<vmem>>, vector<32x4xbf16>
    %cst_78 = arith.constant dense<0.000000e+00> : vector<16x4xf32>
    %112 = tpu.matmul %105, %111, %cst_78 {dimension_numbers = #tpu.dot_dimension_numbers<[1], [0], [0], [1], [0, 0, 1, 1], [], []>} : vector<16x32xbf16>, vector<32x4xbf16>, vector<16x4xf32> -> vector<16x4xf32>
    %c0_79 = arith.constant 0 : index
    %c0_80 = arith.constant 0 : index
    %113 = vector.load %arg23[%c0_79, %c0_80] : memref<4x4xbf16, #tpu.memory_space<vmem>>, vector<4x4xbf16>
    %cst_81 = arith.constant dense<0.000000e+00> : vector<48x4xf32>
    %114 = tpu.matmul %3, %113, %cst_81 {dimension_numbers = #tpu.dot_dimension_numbers<[1], [0], [0], [1], [0, 0, 1, 1], [], []>} : vector<48x4xbf16>, vector<4x4xbf16>, vector<48x4xf32> -> vector<48x4xf32>
    %115 = arith.truncf %110 : vector<16x4xf32> to vector<16x4xbf16>
    %cst_82 = arith.constant dense<0.000000e+00> : vector<48x4xf32>
    %116 = tpu.matmul %0, %115, %cst_82 {dimension_numbers = #tpu.dot_dimension_numbers<[1], [0], [0], [1], [0, 0, 1, 1], [], []>} : vector<48x16xbf16>, vector<16x4xbf16>, vector<48x4xf32> -> vector<48x4xf32>
    %117 = arith.truncf %112 : vector<16x4xf32> to vector<16x4xbf16>
    %cst_83 = arith.constant dense<0.000000e+00> : vector<48x4xf32>
    %118 = tpu.matmul %1, %117, %cst_83 {dimension_numbers = #tpu.dot_dimension_numbers<[1], [0], [0], [1], [0, 0, 1, 1], [], []>} : vector<48x16xbf16>, vector<16x4xbf16>, vector<48x4xf32> -> vector<48x4xf32>
    %119 = arith.addf %116, %118 : vector<48x4xf32>
    %120 = arith.addf %119, %114 : vector<48x4xf32>
    %cst_84 = arith.constant 0.000000e+00 : f32
    %121 = vector.broadcast %cst_84 : f32 to vector<48x4xf32>
    %122 = arith.cmpf ogt, %120, %121 : vector<48x4xf32>
    %cst_85 = arith.constant 2.000000e-01 : f32
    %123 = vector.broadcast %cst_85 : f32 to vector<48x4xf32>
    %124 = arith.mulf %123, %120 : vector<48x4xf32>
    %125 = arith.select %122, %120, %124 : vector<48x4xi1>, vector<48x4xf32>
    %cst_86 = arith.constant dense<0xFF800000> : vector<4xf32>
    %126 = vector.multi_reduction <maximumf>, %125, %cst_86 [0] : vector<48x4xf32> to vector<4xf32>
    %127 = vector.shape_cast %126 : vector<4xf32> to vector<1x4xf32>
    %128 = vector.broadcast %127 : vector<1x4xf32> to vector<48x4xf32>
    %129 = arith.subf %125, %128 : vector<48x4xf32>
    %130 = math.exp %129 : vector<48x4xf32>
    %131 = arith.truncf %130 : vector<48x4xf32> to vector<48x4xbf16>
    %cst_87 = arith.constant dense<0.000000e+00> : vector<16x4xf32>
    %132 = tpu.matmul %2, %131, %cst_87 {dimension_numbers = #tpu.dot_dimension_numbers<[1], [0], [0], [1], [0, 0, 1, 1], [], []>} : vector<16x48xbf16>, vector<48x4xbf16>, vector<16x4xf32> -> vector<16x4xf32>
    %133 = arith.truncf %132 : vector<16x4xf32> to vector<16x4xbf16>
    %cst_88 = arith.constant dense<0.000000e+00> : vector<48x4xf32>
    %134 = tpu.matmul %1, %133, %cst_88 {dimension_numbers = #tpu.dot_dimension_numbers<[1], [0], [0], [1], [0, 0, 1, 1], [], []>} : vector<48x16xbf16>, vector<16x4xbf16>, vector<48x4xf32> -> vector<48x4xf32>
    %cst_89 = arith.constant 1.000000e-16 : f32
    %135 = vector.broadcast %cst_89 : f32 to vector<48x4xf32>
    %136 = arith.addf %134, %135 : vector<48x4xf32>
    %137 = tpu.reciprocal %136 {approx = true} : vector<48x4xf32> -> vector<48x4xf32>
    %138 = arith.mulf %130, %137 : vector<48x4xf32>
    %cst_90 = arith.constant dense<0.000000e+00> : vector<48x2048xf32>
    %139 = tpu.matmul %0, %108, %cst_90 {dimension_numbers = #tpu.dot_dimension_numbers<[1], [0], [0], [1], [0, 0, 1, 1], [], []>} : vector<48x16xbf16>, vector<16x2048xbf16>, vector<48x2048xf32> -> vector<48x2048xf32>
    %140 = arith.truncf %138 : vector<48x4xf32> to vector<48x4xbf16>
    %c0_91 = arith.constant 0 : index
    %c0_92 = arith.constant 0 : index
    %141 = vector.load %arg24[%c0_91, %c0_92] : memref<4x2048xbf16, #tpu.memory_space<vmem>>, vector<4x2048xbf16>
    %cst_93 = arith.constant dense<0.000000e+00> : vector<48x2048xf32>
    %142 = tpu.matmul %140, %141, %cst_93 {dimension_numbers = #tpu.dot_dimension_numbers<[1], [0], [0], [1], [0, 0, 1, 1], [], []>} : vector<48x4xbf16>, vector<4x2048xbf16>, vector<48x2048xf32> -> vector<48x2048xf32>
    %143 = arith.truncf %142 : vector<48x2048xf32> to vector<48x2048xbf16>
    %144 = arith.truncf %139 : vector<48x2048xf32> to vector<48x2048xbf16>
    %145 = arith.mulf %143, %144 : vector<48x2048xbf16>
    %cst_94 = arith.constant dense<0.000000e+00> : vector<16x2048xf32>
    %146 = tpu.matmul %2, %145, %cst_94 {dimension_numbers = #tpu.dot_dimension_numbers<[1], [0], [0], [1], [0, 0, 1, 1], [], []>} : vector<16x48xbf16>, vector<48x2048xbf16>, vector<16x2048xf32> -> vector<16x2048xf32>
    %147 = arith.truncf %146 : vector<16x2048xf32> to vector<16x2048xbf16>
    %c0_95 = arith.constant 0 : index
    %c0_96 = arith.constant 0 : index
    %148 = vector.load %arg25[%c0_95, %c0_96] : memref<2048x512xbf16, #tpu.memory_space<vmem>>, vector<2048x512xbf16>
    %cst_97 = arith.constant dense<0.000000e+00> : vector<16x512xf32>
    %149 = tpu.matmul %147, %148, %cst_97 {dimension_numbers = #tpu.dot_dimension_numbers<[1], [0], [0], [1], [0, 0, 1, 1], [], []>} : vector<16x2048xbf16>, vector<2048x512xbf16>, vector<16x512xf32> -> vector<16x512xf32>
    %c0_98 = arith.constant 0 : index
    %c0_99 = arith.constant 0 : index
    %150 = vector.load %arg26[%c0_98, %c0_99] : memref<1x512xf32, #tpu.memory_space<vmem>>, vector<1x512xf32>
    %151 = vector.broadcast %150 : vector<1x512xf32> to vector<16x512xf32>
    %152 = arith.addf %149, %151 : vector<16x512xf32>
    %cst_100 = arith.constant 0.000000e+00 : f32
    %153 = vector.broadcast %cst_100 : f32 to vector<16x512xf32>
    %154 = arith.maximumf %152, %153 : vector<16x512xf32>
    %c0_101 = arith.constant 0 : index
    %c0_102 = arith.constant 0 : index
    %155 = vector.load %arg5[%c0_101, %c0_102] : memref<2x16xbf16, #tpu.memory_space<vmem>>, vector<2x16xbf16>
    %156 = arith.truncf %54 : vector<16x32xf32> to vector<16x32xbf16>
    %cst_103 = arith.constant dense<0.000000e+00> : vector<2x32xf32>
    %157 = tpu.matmul %155, %156, %cst_103 {dimension_numbers = #tpu.dot_dimension_numbers<[1], [0], [0], [1], [0, 0, 1, 1], [], []>} : vector<2x16xbf16>, vector<16x32xbf16>, vector<2x32xf32> -> vector<2x32xf32>
    %158 = arith.truncf %104 : vector<16x32xf32> to vector<16x32xbf16>
    %cst_104 = arith.constant dense<0.000000e+00> : vector<2x32xf32>
    %159 = tpu.matmul %155, %158, %cst_104 {dimension_numbers = #tpu.dot_dimension_numbers<[1], [0], [0], [1], [0, 0, 1, 1], [], []>} : vector<2x16xbf16>, vector<16x32xbf16>, vector<2x32xf32> -> vector<2x32xf32>
    %160 = arith.truncf %154 : vector<16x512xf32> to vector<16x512xbf16>
    %cst_105 = arith.constant dense<0.000000e+00> : vector<2x512xf32>
    %161 = tpu.matmul %155, %160, %cst_105 {dimension_numbers = #tpu.dot_dimension_numbers<[1], [0], [0], [1], [0, 0, 1, 1], [], []>} : vector<2x16xbf16>, vector<16x512xbf16>, vector<2x512xf32> -> vector<2x512xf32>
    %162 = arith.truncf %157 : vector<2x32xf32> to vector<2x32xbf16>
    %c0_106 = arith.constant 0 : index
    %c0_107 = arith.constant 0 : index
    %163 = vector.load %arg27[%c0_106, %c0_107] : memref<32x1024xbf16, #tpu.memory_space<vmem>>, vector<32x1024xbf16>
    %cst_108 = arith.constant dense<0.000000e+00> : vector<2x1024xf32>
    %164 = tpu.matmul %162, %163, %cst_108 {dimension_numbers = #tpu.dot_dimension_numbers<[1], [0], [0], [1], [0, 0, 1, 1], [], []>} : vector<2x32xbf16>, vector<32x1024xbf16>, vector<2x1024xf32> -> vector<2x1024xf32>
    %165 = arith.truncf %159 : vector<2x32xf32> to vector<2x32xbf16>
    %c0_109 = arith.constant 0 : index
    %c0_110 = arith.constant 0 : index
    %166 = vector.load %arg28[%c0_109, %c0_110] : memref<32x1024xbf16, #tpu.memory_space<vmem>>, vector<32x1024xbf16>
    %cst_111 = arith.constant dense<0.000000e+00> : vector<2x1024xf32>
    %167 = tpu.matmul %165, %166, %cst_111 {dimension_numbers = #tpu.dot_dimension_numbers<[1], [0], [0], [1], [0, 0, 1, 1], [], []>} : vector<2x32xbf16>, vector<32x1024xbf16>, vector<2x1024xf32> -> vector<2x1024xf32>
    %168 = arith.addf %164, %167 : vector<2x1024xf32>
    %169 = arith.truncf %161 : vector<2x512xf32> to vector<2x512xbf16>
    %c0_112 = arith.constant 0 : index
    %c0_113 = arith.constant 0 : index
    %170 = vector.load %arg29[%c0_112, %c0_113] : memref<512x1024xbf16, #tpu.memory_space<vmem>>, vector<512x1024xbf16>
    %cst_114 = arith.constant dense<0.000000e+00> : vector<2x1024xf32>
    %171 = tpu.matmul %169, %170, %cst_114 {dimension_numbers = #tpu.dot_dimension_numbers<[1], [0], [0], [1], [0, 0, 1, 1], [], []>} : vector<2x512xbf16>, vector<512x1024xbf16>, vector<2x1024xf32> -> vector<2x1024xf32>
    %172 = arith.addf %168, %171 : vector<2x1024xf32>
    %c0_115 = arith.constant 0 : index
    %c0_116 = arith.constant 0 : index
    %173 = vector.load %arg30[%c0_115, %c0_116] : memref<1x1024xf32, #tpu.memory_space<vmem>>, vector<1x1024xf32>
    %174 = vector.broadcast %173 : vector<1x1024xf32> to vector<2x1024xf32>
    %175 = arith.addf %172, %174 : vector<2x1024xf32>
    %cst_117 = arith.constant 0.000000e+00 : f32
    %176 = vector.broadcast %cst_117 : f32 to vector<2x1024xf32>
    %177 = arith.maximumf %175, %176 : vector<2x1024xf32>
    %178 = arith.truncf %177 : vector<2x1024xf32> to vector<2x1024xbf16>
    %c0_118 = arith.constant 0 : index
    %c0_119 = arith.constant 0 : index
    %179 = vector.load %arg31[%c0_118, %c0_119] : memref<1024x2xbf16, #tpu.memory_space<vmem>>, vector<1024x2xbf16>
    %cst_120 = arith.constant dense<0.000000e+00> : vector<2x2xf32>
    %180 = tpu.matmul %178, %179, %cst_120 {dimension_numbers = #tpu.dot_dimension_numbers<[1], [0], [0], [1], [0, 0, 1, 1], [], []>} : vector<2x1024xbf16>, vector<1024x2xbf16>, vector<2x2xf32> -> vector<2x2xf32>
    %c0_121 = arith.constant 0 : index
    %c0_122 = arith.constant 0 : index
    %181 = vector.load %arg32[%c0_121, %c0_122] : memref<1x2xf32, #tpu.memory_space<vmem>>, vector<1x2xf32>
    %182 = vector.broadcast %181 : vector<1x2xf32> to vector<2x2xf32>
    %183 = arith.addf %180, %182 : vector<2x2xf32>
    %c0_123 = arith.constant 0 : index
    %c0_124 = arith.constant 0 : index
    %184 = vector.load %arg33[%c0_123, %c0_124] : memref<2x2xf32, #tpu.memory_space<vmem>>, vector<2x2xf32>
    tpu.vector_store %arg33[%c0_123, %c0_124], %183 {strides = array<i32>} : memref<2x2xf32, #tpu.memory_space<vmem>>, vector<2x2xf32>,
    return
  }
}

</mosaic_0001>

<bundles_post_ra>
// kernel: tpu_custom_call.1
= control target key start
LH: loop header
LB: loop body
LE: loop exit
PB: predicated region body
PF: predicated region fallthrough
CT: control target
= control target key end

     0   :  { %s15258_s6 = smov 1   ;;  %s15259_s10 = smov 2   ;;  %s17109_s0 = inlined_call_operand.smem [shape: u32[34], index: -1, kind: input, shape index: {}] }
   0x1   :  { %s15331_s5 = sld [smem:[%s17109_s0]]   ;;  %s15260_s14 = smov 3  }
   0x2   :  { %s15336_s9 = sld [smem:[%s17109_s0 + %s15258_s6]]   ;;  %s15261_s18 = smov 4  }
   0x3   :  { %s15341_s13 = sld [smem:[%s17109_s0 + %s15259_s10]]   ;;  %s15262_s22 = smov 5  }
   0x4   :  { %s15346_s17 = sld [smem:[%s17109_s0 + %s15260_s14]]   ;;  %s15263_s26 = smov 6  }
   0x5   :  { %s15351_s21 = sld [smem:[%s17109_s0 + %s15261_s18]]   ;;  %s15264_s30 = smov 7  }
   0x6   :  { %s15356_s25 = sld [smem:[%s17109_s0 + %s15262_s22]]   ;;  %s15265_s4 = smov 8  }
   0x7   :  { %17184 = sst [smem:[#allocation47_spill]] %s15331_s5  ;;  %s15266_s10 = smov 9  }
   0x8   :  { %17185 = sst [smem:[#allocation48_spill]] %s15336_s9  ;;  %s15267_s15 = smov 10  }
   0x9   :  { %17186 = sst [smem:[#allocation49_spill]] %s15341_s13  ;;  %s15268_s20 = smov 11  }
   0xa   :  { %17187 = sst [smem:[#allocation50_spill]] %s15346_s17  ;;  %s15270_s1 = smov 13  }
   0xb   :  { %s15361_s29 = sld [smem:[%s17109_s0 + %s15263_s26]]   ;;  %s15269_s26 = smov 12  }
   0xc   :  { %s15366_s3 = sld [smem:[%s17109_s0 + %s15264_s30]]   ;;  %s15271_s7 = smov 14  }
   0xd   :  { %s15371_s8 = sld [smem:[%s17109_s0 + %s15265_s4]]   ;;  %s15273_s22 = smov 16  }
   0xe   :  { %s15376_s14 = sld [smem:[%s17109_s0 + %s15266_s10]]   ;;  %s15274_s28 = smov 17  }
   0xf   :  { %s15381_s19 = sld [smem:[%s17109_s0 + %s15267_s15]]   ;;  %s15272_s15 = smov 15  }
  0x10   :  { %s15386_s24 = sld [smem:[%s17109_s0 + %s15268_s20]]  }
  0x11   :  { %s15391_s30 = sld [smem:[%s17109_s0 + %s15269_s26]]  }
  0x12   :  { %17188 = sst [smem:[#allocation51_spill]] %s15366_s3 }
  0x13   :  { %17189 = sst [smem:[#allocation52_spill]] %s15371_s8 }
  0x14   :  { %s15396_s6 = sld [smem:[%s17109_s0 + %s15270_s1]]  }
  0x15   :  { %s15401_s12 = sld [smem:[%s17109_s0 + %s15271_s7]]   ;;  %s15275_s7 = smov 18  }
  0x16   :  { %17190 = sst [smem:[#allocation53_spill]] %s15386_s24 }
  0x17   :  { %s15406_s20 = sld [smem:[%s17109_s0 + %s15272_s15]]   ;;  %s15276_s15 = smov 19  }
  0x18   :  { %s15411_s27 = sld [smem:[%s17109_s0 + %s15273_s22]]   ;;  %s15277_s22 = smov 20  }
  0x19   :  { %s15416_s4 = sld [smem:[%s17109_s0 + %s15274_s28]]   ;;  %s15278_s28 = smov 21  }
  0x1a   :  { %s15431_s24 = sld [smem:[%s17109_s0 + %s15277_s22]]   ;;  %s15281_s22 = smov 24  }
  0x1b   :  { %17191 = sst [smem:[#allocation54_spill]] %s15401_s12 }
  0x1c   :  { %s15421_s12 = sld [smem:[%s17109_s0 + %s15275_s7]]   ;;  %s15279_s7 = smov 22  }
  0x1d   :  { %17192 = sst [smem:[#allocation55_spill]] %s15406_s20 }
  0x1e   :  { %s15426_s20 = sld [smem:[%s17109_s0 + %s15276_s15]]   ;;  %s15280_s15 = smov 23  }
  0x1f   :  { %s15436_s13 = sld [smem:[%s17109_s0 + %s15278_s28]]   ;;  %s15282_s28 = smov 25  }
  0x20   :  { %17194 = sst [smem:[#allocation57_spill]] %s15431_s24 }
  0x21   :  { %s15446_s17 = sld [smem:[%s17109_s0 + %s15280_s15]]   ;;  %s15284_s15 = smov 27  }
  0x22   :  { %17193 = sst [smem:[#allocation56_spill]] %s15421_s12 }
  0x23   :  { %s15441_s12 = sld [smem:[%s17109_s0 + %s15279_s7]]   ;;  %s15283_s7 = smov 26  }
  0x24   :  { %s15451_s9 = sld [smem:[%s17109_s0 + %s15281_s22]]   ;;  %s15285_s22 = smov 28  }
  0x25   :  { %17195 = sst [smem:[#allocation58_spill]] %s15436_s13 }
  0x26   :  { %s15456_s13 = sld [smem:[%s17109_s0 + %s15282_s28]]   ;;  %s15286_s28 = smov 29  }
  0x27   :  { %s15466_s3 = sld [smem:[%s17109_s0 + %s15284_s15]]   ;;  %s15288_s15 = smov 31  }
  0x28   :  { %s15471_s8 = sld [smem:[%s17109_s0 + %s15285_s22]]   ;;  %s15289_s22 = smov 32  }
  0x29   :  { %17196 = sst [smem:[#allocation59_spill]] %s15441_s12 }
  0x2a   :  { %17197 = sst [smem:[#allocation60_spill]] %s15451_s9 }
  0x2b   :  { %s15461_s12 = sld [smem:[%s17109_s0 + %s15283_s7]]   ;;  %s15287_s7 = smov 30  }
  0x2c   :  { %s15476_s5 = sld [smem:[%s17109_s0 + %s15286_s28]]   ;;  %s15290_s28 = smov 33  }
  0x2d   :  { %s15486_s9 = sld [smem:[%s17109_s0 + %s15288_s15]]  }
  0x2e   :  { %17199 = sst [smem:[#allocation62_spill]] %s15471_s8 }
  0x2f   :  { %s15491_s8 = sld [smem:[%s17109_s0 + %s15289_s22]]  }
  0x30   :  { %s15496_s24 = sld [smem:[%s17109_s0 + %s15290_s28]]  }
  0x31   :  { %17198 = sst [smem:[#allocation61_spill]] %s15461_s12 }
  0x32   :  { %s15481_s12 = sld [smem:[%s17109_s0 + %s15287_s7]]  }
  0x33   :  { %72 = vsyncpa [#allocation3], 0 }
  0x34   :  { %73 = vsyncpa [#allocation6], 0 }
  0x35   :  { %74 = vsyncpa [#allocation9], 0 }
  0x36   :  { %75 = vsyncpa [#allocation12], 0 }
  0x37   :  { %76 = vsyncpa [#allocation15], 0 }
  0x38   :  { %77 = vsyncpa [#allocation18], 0 }
  0x39   :  { %78 = vsyncpa [#allocation21], 0 }
  0x3a   :  { %79 = vsyncpa [#allocation24], 0 }
  0x3b   :  { %80 = vsyncpa [#allocation27], 0 }
  0x3c   :  { %81 = vsyncpa [#allocation30], 0 }
  0x3d   :  { %82 = vsyncpa [#allocation33], 0 }
  0x3e   :  { %83 = vsyncpa [#allocation4], 0  ;;  %s15291_s7 = smov [#allocation5]   ;;  %s15292_s11 = smov [#allocation8]  }
  0x3f   :  { %s110_s10 = sshll.u32 %s15291_s7, 4  ;;  %s134_s0 = sshll.u32 %s15292_s11, 4  ;;  %s111_s10 = int_to_ptr.vmem [resolvable:$true] %s110_s10  ;;  %s135_s0 = int_to_ptr.vmem [resolvable:$true] %s134_s0 }
  0x40   :  { %s14772_s15 = scalar_lea.hbm %s15356_s25, 16 }
  0x41   :  { %p14773_p0 = scmp.ne.s32.totalorder %s15356_s25, %s14772_s15  ;;  %p14776_p1 = scmp.lt.u32.totalorder %s14772_s15, %s15356_s25 }
  0x43   :  { %p14778_p2 = pnand %p14776_p1, %p14773_p0 }
  0x45   :  { %14781 = shalt.err (!%p14778_p2)
}
  0x46   :  { %s14782_s16 = scalar_lea.vmem %s111_s10, 16  ;;  %s14786_s18 = scalar_lea.vmem %s111_s10, 32 }
  0x47   :  { %p14783_p3 = scmp.ne.s32.totalorder %s111_s10, %s14782_s16  ;;  %p14787_p4 = scmp.lt.s32.totalorder %s111_s10, %s111_s10 }
  0x48   :  { %p14788_p5 = scmp.lt.s32.totalorder %s14786_s18, %s14782_s16 }
  0x4a   :  { %p14789_p6 = por %p14788_p5, %p14787_p4 }
  0x4c   :  { %p14790_p7 = pnand %p14789_p6, %p14783_p3 }
  0x4e   :  { %14793 = shalt.err (!%p14790_p7)
}
  0x4f   :  { %113 = dma.hbm_to_vmem [thread:$0]  %s15356_s25, 16, %s111_s10, [#allocation6]  }
  0x50   :  { %s14794_s22 = scalar_lea.hbm %s15376_s14, 32 }
  0x51   :  { %p14795_p8 = scmp.ne.s32.totalorder %s15376_s14, %s14794_s22  ;;  %p14798_p9 = scmp.lt.u32.totalorder %s14794_s22, %s15376_s14 }
  0x53   :  { %p14800_p10 = pnand %p14798_p9, %p14795_p8 }
  0x55   :  { %14803 = shalt.err (!%p14800_p10)
}
  0x56   :  { %s14804_s23 = scalar_lea.vmem %s135_s0, 32  ;;  %p14809_p12 = scmp.lt.s32.totalorder %s135_s0, %s135_s0 }
  0x57   :  { %p14805_p11 = scmp.ne.s32.totalorder %s135_s0, %s14804_s23  ;;  %p14810_p13 = scmp.lt.s32.totalorder %s14804_s23, %s14804_s23 }
  0x59   :  { %p14811_p0 = por %p14810_p13, %p14809_p12 }
  0x5b   :  { %p14812_p1 = pnand %p14811_p0, %p14805_p11 }
  0x5d   :  { %14815 = shalt.err (!%p14812_p1)
}
  0x5e   :  { %137 = dma.hbm_to_vmem [thread:$0]  %s15376_s14, 32, %s135_s0, [#allocation9]  }
  0x5f   :  { %s15293_s26 = smov [#allocation11]   ;;  %s15294_s25 = smov [#allocation14]  }
  0x60   :  { %s156_s28 = sshll.u32 %s15293_s26, 4  ;;  %s182_s1 = sshll.u32 %s15294_s25, 4  ;;  %s157_s28 = int_to_ptr.vmem [resolvable:$true] %s156_s28  ;;  %s183_s1 = int_to_ptr.vmem [resolvable:$true] %s182_s1 }
  0x61   :  { %s14816_s2 = scalar_lea.hbm %s15391_s30, 16 }
  0x62   :  { %p14817_p2 = scmp.ne.s32.totalorder %s15391_s30, %s14816_s2  ;;  %p14820_p3 = scmp.lt.u32.totalorder %s14816_s2, %s15391_s30 }
  0x64   :  { %p14822_p4 = pnand %p14820_p3, %p14817_p2 }
  0x66   :  { %14825 = shalt.err (!%p14822_p4)
}
  0x67   :  { %s14826_s7 = scalar_lea.vmem %s157_s28, 16  ;;  %s14830_s10 = scalar_lea.vmem %s157_s28, 32 }
  0x68   :  { %p14827_p5 = scmp.ne.s32.totalorder %s157_s28, %s14826_s7  ;;  %p14831_p6 = scmp.lt.s32.totalorder %s157_s28, %s157_s28 }
  0x69   :  { %p14832_p7 = scmp.lt.s32.totalorder %s14830_s10, %s14826_s7 }
  0x6b   :  { %p14833_p8 = por %p14832_p7, %p14831_p6 }
  0x6d   :  { %p14834_p9 = pnand %p14833_p8, %p14827_p5 }
  0x6f   :  { %14837 = shalt.err (!%p14834_p9)
}
  0x70   :  { %159 = dma.hbm_to_vmem [thread:$0]  %s15391_s30, 16, %s157_s28, [#allocation12]  }
  0x71   :  { %s14838_s14 = scalar_lea.hbm %s15411_s27, 32 }
  0x72   :  { %p14839_p10 = scmp.ne.s32.totalorder %s15411_s27, %s14838_s14  ;;  %p14842_p11 = scmp.lt.u32.totalorder %s14838_s14, %s15411_s27 }
  0x74   :  { %p14844_p12 = pnand %p14842_p11, %p14839_p10 }
  0x76   :  { %14847 = shalt.err (!%p14844_p12)
}
  0x77   :  { %s14848_s11 = scalar_lea.vmem %s183_s1, 32  ;;  %p14853_p0 = scmp.lt.s32.totalorder %s183_s1, %s183_s1 }
  0x78   :  { %p14849_p13 = scmp.ne.s32.totalorder %s183_s1, %s14848_s11  ;;  %p14854_p1 = scmp.lt.s32.totalorder %s14848_s11, %s14848_s11 }
  0x7a   :  { %p14855_p2 = por %p14854_p1, %p14853_p0 }
  0x7c   :  { %p14856_p3 = pnand %p14855_p2, %p14849_p13 }
  0x7e   :  { %14859 = shalt.err (!%p14856_p3)
}
  0x7f   :  { %185 = dma.hbm_to_vmem [thread:$0]  %s15411_s27, 32, %s183_s1, [#allocation15]  }
  0x80   :  { %s15295_s0 = smov [#allocation17]   ;;  %s15296_s30 = smov [#allocation20]  }
  0x81   :  { %s204_s15 = sshll.u32 %s15295_s0, 4  ;;  %s230_s16 = sshll.u32 %s15296_s30, 4  ;;  %s205_s15 = int_to_ptr.vmem [resolvable:$true] %s204_s15  ;;  %s231_s16 = int_to_ptr.vmem [resolvable:$true] %s230_s16 }
  0x82   :  { %s14860_s18 = scalar_lea.hbm %s15426_s20, 16 }
  0x83   :  { %p14861_p4 = scmp.ne.s32.totalorder %s15426_s20, %s14860_s18  ;;  %p14864_p5 = scmp.lt.u32.totalorder %s14860_s18, %s15426_s20 }
  0x85   :  { %p14866_p6 = pnand %p14864_p5, %p14861_p4 }
  0x87   :  { %14869 = shalt.err (!%p14866_p6)
}
  0x88   :  { %s14870_s22 = scalar_lea.vmem %s205_s15, 16  ;;  %s14874_s23 = scalar_lea.vmem %s205_s15, 32 }
  0x89   :  { %p14871_p7 = scmp.ne.s32.totalorder %s205_s15, %s14870_s22  ;;  %p14875_p8 = scmp.lt.s32.totalorder %s205_s15, %s205_s15 }
  0x8a   :  { %p14876_p9 = scmp.lt.s32.totalorder %s14874_s23, %s14870_s22 }
  0x8c   :  { %p14877_p10 = por %p14876_p9, %p14875_p8 }
  0x8e   :  { %p14878_p11 = pnand %p14877_p10, %p14871_p7 }
  0x90   :  { %14881 = shalt.err (!%p14878_p11)
}
  0x91   :  { %207 = dma.hbm_to_vmem [thread:$0]  %s15426_s20, 16, %s205_s15, [#allocation18]  }
  0x92   :  { %s14882_s27 = scalar_lea.hbm %s15446_s17, 32 }
  0x93   :  { %p14883_p12 = scmp.ne.s32.totalorder %s15446_s17, %s14882_s27  ;;  %p14886_p13 = scmp.lt.u32.totalorder %s14882_s27, %s15446_s17 }
  0x95   :  { %p14888_p0 = pnand %p14886_p13, %p14883_p12 }
  0x97   :  { %14891 = shalt.err (!%p14888_p0)
}
  0x98   :  { %s14892_s26 = scalar_lea.vmem %s231_s16, 32  ;;  %p14897_p2 = scmp.lt.s32.totalorder %s231_s16, %s231_s16 }
  0x99   :  { %p14893_p1 = scmp.ne.s32.totalorder %s231_s16, %s14892_s26  ;;  %p14898_p3 = scmp.lt.s32.totalorder %s14892_s26, %s14892_s26 }
  0x9b   :  { %p14899_p4 = por %p14898_p3, %p14897_p2 }
  0x9d   :  { %p14900_p5 = pnand %p14899_p4, %p14893_p1 }
  0x9f   :  { %14903 = shalt.err (!%p14900_p5)
}
  0xa0   :  { %233 = dma.hbm_to_vmem [thread:$0]  %s15446_s17, 32, %s231_s16, [#allocation21]  }
  0xa1   :  { %s15297_s28 = smov [#allocation23]   ;;  %s14904_s20 = scalar_lea.hbm %s15456_s13, 65536 }
  0xa2   :  { %s249_s25 = sshll.u32 %s15297_s28, 4  ;;  %p14905_p6 = scmp.ne.s32.totalorder %s15456_s13, %s14904_s20  ;;  %s250_s25 = int_to_ptr.vmem [resolvable:$true] %s249_s25 }
  0xa3   :  { %p14908_p7 = scmp.lt.u32.totalorder %s14904_s20, %s15456_s13 }
  0xa5   :  { %p14910_p8 = pnand %p14908_p7, %p14905_p6 }
  0xa7   :  { %14913 = shalt.err (!%p14910_p8)
}
  0xa8   :  { %s14914_s1 = scalar_lea.vmem %s250_s25, 65536  ;;  %p14919_p10 = scmp.lt.s32.totalorder %s250_s25, %s250_s25 }
  0xa9   :  { %p14915_p9 = scmp.ne.s32.totalorder %s250_s25, %s14914_s1  ;;  %p14920_p11 = scmp.lt.s32.totalorder %s14914_s1, %s14914_s1 }
  0xab   :  { %p14921_p12 = por %p14920_p11, %p14919_p10 }
  0xad   :  { %p14922_p13 = pnand %p14921_p12, %p14915_p9 }
  0xaf   :  { %14925 = shalt.err (!%p14922_p13)
}
  0xb0   :  { %s15298_s2 = smov 256   ;;  %s15299_s17 = smov 16  }
  0xb1   :  { %255 = dma.hbm_to_vmem [thread:$0]  %s15456_s13, 65536, %s250_s25, [#allocation24], %s15298_s2, %s15298_s2, %s15299_s17  }
  0xb2   :  { %s15300_s7 = smov [#allocation26]   ;;  %s14926_s14 = scalar_lea.hbm %s15466_s3, 2048 }
  0xb3   :  { %s271_s10 = sshll.u32 %s15300_s7, 4  ;;  %p14927_p0 = scmp.ne.s32.totalorder %s15466_s3, %s14926_s14  ;;  %s272_s10 = int_to_ptr.vmem [resolvable:$true] %s271_s10 }
  0xb4   :  { %p14930_p1 = scmp.lt.u32.totalorder %s14926_s14, %s15466_s3 }
  0xb6   :  { %p14932_p2 = pnand %p14930_p1, %p14927_p0 }
  0xb8   :  { %14935 = shalt.err (!%p14932_p2)
}
  0xb9   :  { %s14936_s11 = scalar_lea.vmem %s272_s10, 2048  ;;  %p14941_p4 = scmp.lt.s32.totalorder %s272_s10, %s272_s10 }
  0xba   :  { %p14937_p3 = scmp.ne.s32.totalorder %s272_s10, %s14936_s11  ;;  %p14942_p5 = scmp.lt.s32.totalorder %s14936_s11, %s14936_s11 }
  0xbc   :  { %p14943_p6 = por %p14942_p5, %p14941_p4 }
  0xbe   :  { %p14944_p7 = pnand %p14943_p6, %p14937_p3 }
  0xc0   :  { %14947 = shalt.err (!%p14944_p7)
}
  0xc1   :  { %s15301_s0 = smov 512   ;;  %s15302_s13 = smov 32  }
  0xc2   :  { %277 = dma.hbm_to_vmem [thread:$0]  %s15466_s3, 2048, %s272_s10, [#allocation27], %s15301_s0, %s15301_s0, %s15302_s13  }
  0xc3   :  { %s15303_s15 = smov [#allocation29]   ;;  %s15304_s16 = smov [#allocation2]  }
  0xc4   :  { %s295_s30 = sshll.u32 %s15303_s15, 4  ;;  %s97_s18 = sshll.u32 %s15304_s16, 4  ;;  %s296_s30 = int_to_ptr.vmem [resolvable:$true] %s295_s30  ;;  %s15533_s18 = int_to_ptr.vmem [resolvable:$true] %s97_s18 }
  0xc5   :  { %s14948_s22 = scalar_lea.hbm %s15476_s5, 32768 }
  0xc6   :  { %p14949_p8 = scmp.ne.s32.totalorder %s15476_s5, %s14948_s22  ;;  %p14952_p9 = scmp.lt.u32.totalorder %s14948_s22, %s15476_s5 }
  0xc8   :  { %p14954_p10 = pnand %p14952_p9, %p14949_p8 }
  0xca   :  { %14957 = shalt.err (!%p14954_p10)
}
  0xcb   :  { %s14958_s23 = scalar_lea.vmem %s296_s30, 32768  ;;  %p14963_p12 = scmp.lt.s32.totalorder %s296_s30, %s296_s30 }
  0xcc   :  { %p14959_p11 = scmp.ne.s32.totalorder %s296_s30, %s14958_s23  ;;  %p14964_p13 = scmp.lt.s32.totalorder %s14958_s23, %s14958_s23 }
  0xce   :  { %p14965_p0 = por %p14964_p13, %p14963_p12 }
  0xd0   :  { %p14966_p1 = pnand %p14965_p0, %p14959_p11 }
  0xd2   :  { %14969 = shalt.err (!%p14966_p1)
}
  0xd3   :  { %301 = dma.hbm_to_vmem [thread:$0]  %s15476_s5, 32768, %s296_s30, [#allocation30], %s15301_s0, %s15301_s0, %s15302_s13  }
  0xd4   :  { %s14970_s3 = scalar_lea.hbm %s15351_s21, 128 }
  0xd5   :  { %p14971_p2 = scmp.ne.s32.totalorder %s15351_s21, %s14970_s3  ;;  %p14974_p3 = scmp.lt.u32.totalorder %s14970_s3, %s15351_s21 }
  0xd7   :  { %p14976_p4 = pnand %p14974_p3, %p14971_p2 }
  0xd9   :  { %14979 = shalt.err (!%p14976_p4)
}
  0xda   :  { %s14980_s27 = scalar_lea.vmem %s15533_s18, 128  ;;  %p14985_p6 = scmp.lt.s32.totalorder %s15533_s18, %s15533_s18 }
  0xdb   :  { %p14981_p5 = scmp.ne.s32.totalorder %s15533_s18, %s14980_s27  ;;  %p14986_p7 = scmp.lt.s32.totalorder %s14980_s27, %s14980_s27 }
  0xdd   :  { %p14987_p8 = por %p14986_p7, %p14985_p6 }
  0xdf   :  { %p14988_p9 = pnand %p14987_p8, %p14981_p5 }
  0xe1   :  { %14991 = shalt.err (!%p14988_p9)
}
  0xe2   :  { %s15305_s26 = smov 64   ;;  %s15306_s5 = smov 4  }
  0xe3   :  { %103 = dma.hbm_to_vmem [thread:$0]  %s15351_s21, 128, %s15533_s18, [#allocation3], %s15305_s26, %s15305_s26, %s15306_s5  }
  0xe4   :  { %s15307_s28 = smov [#allocation7]   ;;  %s15308_s20 = smov [#allocation10]  }
  0xe5   :  { %s120_s25 = sshll.u32 %s15307_s28, 4  ;;  %s144_s1 = sshll.u32 %s15308_s20, 4  ;;  %s121_s25 = int_to_ptr.vmem [resolvable:$true] %s120_s25  ;;  %s145_s1 = int_to_ptr.vmem [resolvable:$true] %s144_s1 }
  0xe6   :  { %s14992_s2 = scalar_lea.hbm %s15361_s29, 64 }
  0xe7   :  { %p14993_p10 = scmp.ne.s32.totalorder %s15361_s29, %s14992_s2  ;;  %p14996_p11 = scmp.lt.u32.totalorder %s14992_s2, %s15361_s29 }
  0xe9   :  { %p14998_p12 = pnand %p14996_p11, %p14993_p10 }
  0xeb   :  { %15001 = shalt.err (!%p14998_p12)
}
  0xec   :  { %s15002_s17 = scalar_lea.vmem %s121_s25, 64  ;;  %p15007_p0 = scmp.lt.s32.totalorder %s121_s25, %s121_s25 }
  0xed   :  { %p15003_p13 = scmp.ne.s32.totalorder %s121_s25, %s15002_s17  ;;  %p15008_p1 = scmp.lt.s32.totalorder %s15002_s17, %s15002_s17 }
  0xef   :  { %p15009_p2 = por %p15008_p1, %p15007_p0 }
  0xf1   :  { %p15010_p3 = pnand %p15009_p2, %p15003_p13 }
  0xf3   :  { %15013 = shalt.err (!%p15010_p3)
}
  0xf4   :  { %123 = dma.hbm_to_vmem [thread:$0]  %s15361_s29, 64, %s121_s25, [#allocation6]  }
  0xf5   :  { %s15014_s21 = scalar_lea.hbm %s15381_s19, 32 }
  0xf6   :  { %p15015_p4 = scmp.ne.s32.totalorder %s15381_s19, %s15014_s21  ;;  %p15018_p5 = scmp.lt.u32.totalorder %s15014_s21, %s15381_s19 }
  0xf8   :  { %p15020_p6 = pnand %p15018_p5, %p15015_p4 }
  0xfa   :  { %15023 = shalt.err (!%p15020_p6)
}
  0xfb   :  { %s15024_s7 = scalar_lea.vmem %s145_s1, 32  ;;  %p15029_p8 = scmp.lt.s32.totalorder %s145_s1, %s145_s1 }
  0xfc   :  { %p15025_p7 = scmp.ne.s32.totalorder %s145_s1, %s15024_s7  ;;  %p15030_p9 = scmp.lt.s32.totalorder %s15024_s7, %s15024_s7 }
  0xfe   :  { %p15031_p10 = por %p15030_p9, %p15029_p8 }
 0x100   :  { %p15032_p11 = pnand %p15031_p10, %p15025_p7 }
 0x102   :  { %15035 = shalt.err (!%p15032_p11)
}
 0x103   :  { %147 = dma.hbm_to_vmem [thread:$0]  %s15381_s19, 32, %s145_s1, [#allocation9]  }
 0x104   :  { %s15309_s10 = smov [#allocation13]   ;;  %s15310_s29 = smov [#allocation16]  }
 0x105   :  { %s165_s14 = sshll.u32 %s15309_s10, 4  ;;  %s192_s11 = sshll.u32 %s15310_s29, 4  ;;  %s166_s14 = int_to_ptr.vmem [resolvable:$true] %s165_s14  ;;  %s193_s11 = int_to_ptr.vmem [resolvable:$true] %s192_s11 }
 0x106   :  { %s15036_s15 = scalar_lea.hbm %s15396_s6, 256 }
 0x107   :  { %p15037_p12 = scmp.ne.s32.totalorder %s15396_s6, %s15036_s15  ;;  %p15040_p13 = scmp.lt.u32.totalorder %s15036_s15, %s15396_s6 }
 0x109   :  { %p15042_p0 = pnand %p15040_p13, %p15037_p12 }
 0x10b   :  { %15045 = shalt.err (!%p15042_p0)
}
 0x10c   :  { %s15046_s30 = scalar_lea.vmem %s166_s14, 256  ;;  %p15051_p2 = scmp.lt.s32.totalorder %s166_s14, %s166_s14 }
 0x10d   :  { %p15047_p1 = scmp.ne.s32.totalorder %s166_s14, %s15046_s30  ;;  %p15052_p3 = scmp.lt.s32.totalorder %s15046_s30, %s15046_s30 }
 0x10f   :  { %p15053_p4 = por %p15052_p3, %p15051_p2 }
 0x111   :  { %p15054_p5 = pnand %p15053_p4, %p15047_p1 }
 0x113   :  { %15057 = shalt.err (!%p15054_p5)
}
 0x114   :  { %171 = dma.hbm_to_vmem [thread:$0]  %s15396_s6, 256, %s166_s14, [#allocation12], %s15305_s26, %s15305_s26, %s15306_s5  }
 0x115   :  { %s15058_s19 = scalar_lea.hbm %s15416_s4, 32 }
 0x116   :  { %p15059_p6 = scmp.ne.s32.totalorder %s15416_s4, %s15058_s19  ;;  %p15062_p7 = scmp.lt.u32.totalorder %s15058_s19, %s15416_s4 }
 0x118   :  { %p15064_p8 = pnand %p15062_p7, %p15059_p6 }
 0x11a   :  { %15067 = shalt.err (!%p15064_p8)
}
 0x11b   :  { %s15068_s16 = scalar_lea.vmem %s193_s11, 32  ;;  %p15073_p10 = scmp.lt.s32.totalorder %s193_s11, %s193_s11 }
 0x11c   :  { %p15069_p9 = scmp.ne.s32.totalorder %s193_s11, %s15068_s16  ;;  %p15074_p11 = scmp.lt.s32.totalorder %s15068_s16, %s15068_s16 }
 0x11e   :  { %p15075_p12 = por %p15074_p11, %p15073_p10 }
 0x120   :  { %p15076_p13 = pnand %p15075_p12, %p15069_p9 }
 0x122   :  { %15079 = shalt.err (!%p15076_p13)
}
 0x123   :  { %s17200_s18 = sld [smem:[#allocation57_spill]]  ;;  %s15311_s22 = smov [#allocation19]  }
 0x124   :  { %195 = dma.hbm_to_vmem [thread:$0]  %s15416_s4, 32, %s193_s11, [#allocation15]  }
 0x125   :  { %s213_s23 = sshll.u32 %s15311_s22, 4  ;;  %s15312_s6 = smov [#allocation22]   ;;  %s214_s23 = int_to_ptr.vmem [resolvable:$true] %s213_s23 }
 0x126   :  { %s240_s3 = sshll.u32 %s15312_s6, 4  ;;  %s241_s3 = int_to_ptr.vmem [resolvable:$true] %s240_s3 }
 0x129   :  { %s15080_s27 = scalar_lea.hbm %s17200_s18, 4096 }
 0x12a   :  { %p15081_p0 = scmp.ne.s32.totalorder %s17200_s18, %s15080_s27  ;;  %p15084_p1 = scmp.lt.u32.totalorder %s15080_s27, %s17200_s18 }
 0x12c   :  { %p15086_p2 = pnand %p15084_p1, %p15081_p0 }
 0x12e   :  { %15089 = shalt.err (!%p15086_p2)
}
 0x12f   :  { %s15090_s5 = scalar_lea.vmem %s214_s23, 4096  ;;  %p15095_p4 = scmp.lt.s32.totalorder %s214_s23, %s214_s23 }
 0x130   :  { %p15091_p3 = scmp.ne.s32.totalorder %s214_s23, %s15090_s5  ;;  %p15096_p5 = scmp.lt.s32.totalorder %s15090_s5, %s15090_s5 }
 0x132   :  { %p15097_p6 = por %p15096_p5, %p15095_p4 }
 0x134   :  { %p15098_p7 = pnand %p15097_p6, %p15091_p3 }
 0x136   :  { %15101 = shalt.err (!%p15098_p7)
}
 0x137   :  { %s15313_s28 = smov 1024   ;;  %s17201_s4 = sld [smem:[#allocation60_spill]] }
 0x138   :  { %219 = dma.hbm_to_vmem [thread:$0]  %s17200_s18, 4096, %s214_s23, [#allocation18], %s15313_s28, %s15313_s28, %s15305_s26  }
 0x13d   :  { %s15102_s25 = scalar_lea.hbm %s17201_s4, 512 }
 0x13e   :  { %p15103_p8 = scmp.ne.s32.totalorder %s17201_s4, %s15102_s25  ;;  %p15106_p9 = scmp.lt.u32.totalorder %s15102_s25, %s17201_s4 }
 0x140   :  { %p15108_p10 = pnand %p15106_p9, %p15103_p8 }
 0x142   :  { %15111 = shalt.err (!%p15108_p10)
}
 0x143   :  { %s15112_s20 = scalar_lea.vmem %s241_s3, 512  ;;  %p15117_p12 = scmp.lt.s32.totalorder %s241_s3, %s241_s3 }
 0x144   :  { %p15113_p11 = scmp.ne.s32.totalorder %s241_s3, %s15112_s20  ;;  %p15118_p13 = scmp.lt.s32.totalorder %s15112_s20, %s15112_s20 }
 0x146   :  { %p15119_p0 = por %p15118_p13, %p15117_p12 }
 0x148   :  { %p15120_p1 = pnand %p15119_p0, %p15113_p11 }
 0x14a   :  { %15123 = shalt.err (!%p15120_p1)
}
 0x14b   :  { %s17202_s1 = sld [smem:[#allocation61_spill]]  ;;  %s15314_s2 = smov [#allocation25]  }
 0x14c   :  { %243 = dma.hbm_to_vmem [thread:$0]  %s17201_s4, 512, %s241_s3, [#allocation21]  }
 0x14d   :  { %s262_s26 = sshll.u32 %s15314_s2, 4  ;;  %s15315_s17 = smov [#allocation28]   ;;  %s263_s26 = int_to_ptr.vmem [resolvable:$true] %s262_s26 }
 0x14e   :  { %s283_s21 = sshll.u32 %s15315_s17, 4  ;;  %s284_s21 = int_to_ptr.vmem [resolvable:$true] %s283_s21 }
 0x151   :  { %s15124_s7 = scalar_lea.hbm %s17202_s1, 64 }
 0x152   :  { %p15125_p2 = scmp.ne.s32.totalorder %s17202_s1, %s15124_s7  ;;  %p15128_p3 = scmp.lt.u32.totalorder %s15124_s7, %s17202_s1 }
 0x154   :  { %p15130_p4 = pnand %p15128_p3, %p15125_p2 }
 0x156   :  { %15133 = shalt.err (!%p15130_p4)
}
 0x157   :  { %s15134_s10 = scalar_lea.vmem %s263_s26, 64  ;;  %p15139_p6 = scmp.lt.s32.totalorder %s263_s26, %s263_s26 }
 0x158   :  { %p15135_p5 = scmp.ne.s32.totalorder %s263_s26, %s15134_s10  ;;  %p15140_p7 = scmp.lt.s32.totalorder %s15134_s10, %s15134_s10 }
 0x15a   :  { %p15141_p8 = por %p15140_p7, %p15139_p6 }
 0x15c   :  { %p15142_p9 = pnand %p15141_p8, %p15135_p5 }
 0x15e   :  { %15145 = shalt.err (!%p15142_p9)
}
 0x15f   :  { %s17203_s14 = sld [smem:[#allocation62_spill]] }
 0x160   :  { %265 = dma.hbm_to_vmem [thread:$0]  %s17202_s1, 64, %s263_s26, [#allocation24]  }
 0x165   :  { %s15146_s29 = scalar_lea.hbm %s17203_s14, 2048 }
 0x166   :  { %p15147_p10 = scmp.ne.s32.totalorder %s17203_s14, %s15146_s29  ;;  %p15150_p11 = scmp.lt.u32.totalorder %s15146_s29, %s17203_s14 }
 0x168   :  { %p15152_p12 = pnand %p15150_p11, %p15147_p10 }
 0x16a   :  { %15155 = shalt.err (!%p15152_p12)
}
 0x16b   :  { %s15156_s11 = scalar_lea.vmem %s284_s21, 2048  ;;  %p15161_p0 = scmp.lt.s32.totalorder %s284_s21, %s284_s21 }
 0x16c   :  { %p15157_p13 = scmp.ne.s32.totalorder %s284_s21, %s15156_s11  ;;  %p15162_p1 = scmp.lt.s32.totalorder %s15156_s11, %s15156_s11 }
 0x16e   :  { %p15163_p2 = por %p15162_p1, %p15161_p0 }
 0x170   :  { %p15164_p3 = pnand %p15163_p2, %p15157_p13 }
 0x172   :  { %15167 = shalt.err (!%p15164_p3)
}
 0x173   :  { %289 = dma.hbm_to_vmem [thread:$0]  %s17203_s14, 2048, %s284_s21, [#allocation27], %s15301_s0, %s15301_s0, %s15302_s13  }
 0x174   :  { %s15316_s15 = smov [#allocation31]   ;;  %s15317_s19 = smov [#allocation32]  }
 0x175   :  { %s308_s30 = sshll.u32 %s15316_s15, 4  ;;  %s320_s16 = sshll.u32 %s15317_s19, 4  ;;  %s309_s30 = int_to_ptr.vmem [resolvable:$true] %s308_s30  ;;  %s321_s16 = int_to_ptr.vmem [resolvable:$true] %s320_s16 }
 0x176   :  { %s15168_s18 = scalar_lea.hbm %s15481_s12, 128 }
 0x177   :  { %p15169_p4 = scmp.ne.s32.totalorder %s15481_s12, %s15168_s18  ;;  %p15172_p5 = scmp.lt.u32.totalorder %s15168_s18, %s15481_s12 }
 0x179   :  { %p15174_p6 = pnand %p15172_p5, %p15169_p4 }
 0x17b   :  { %15177 = shalt.err (!%p15174_p6)
}
 0x17c   :  { %s15178_s22 = scalar_lea.vmem %s309_s30, 128  ;;  %p15183_p8 = scmp.lt.s32.totalorder %s309_s30, %s309_s30 }
 0x17d   :  { %p15179_p7 = scmp.ne.s32.totalorder %s309_s30, %s15178_s22  ;;  %p15184_p9 = scmp.lt.s32.totalorder %s15178_s22, %s15178_s22 }
 0x17f   :  { %p15185_p10 = por %p15184_p9, %p15183_p8 }
 0x181   :  { %p15186_p11 = pnand %p15185_p10, %p15179_p7 }
 0x183   :  { %15189 = shalt.err (!%p15186_p11)
}
 0x184   :  { %311 = dma.hbm_to_vmem [thread:$0]  %s15481_s12, 128, %s309_s30, [#allocation30]  }
 0x185   :  { %s15190_s0 = scalar_lea.hbm %s15491_s8, 16 }
 0x186   :  { %p15191_p12 = scmp.ne.s32.totalorder %s15491_s8, %s15190_s0  ;;  %p15194_p13 = scmp.lt.u32.totalorder %s15190_s0, %s15491_s8 }
 0x188   :  { %p15196_p0 = pnand %p15194_p13, %p15191_p12 }
 0x18a   :  { %15199 = shalt.err (!%p15196_p0)
}
 0x18b   :  { %s15200_s13 = scalar_lea.vmem %s321_s16, 16  ;;  %s15204_s23 = scalar_lea.vmem %s321_s16, 32 }
 0x18c   :  { %p15201_p1 = scmp.ne.s32.totalorder %s321_s16, %s15200_s13  ;;  %p15205_p2 = scmp.lt.s32.totalorder %s321_s16, %s321_s16 }
 0x18d   :  { %p15206_p3 = scmp.lt.s32.totalorder %s15204_s23, %s15200_s13 }
 0x18f   :  { %p15207_p4 = por %p15206_p3, %p15205_p2 }
 0x191   :  { %p15208_p5 = pnand %p15207_p4, %p15201_p1 }
 0x193   :  { %15211 = shalt.err (!%p15208_p5)
}
 0x194   :  { %323 = dma.hbm_to_vmem [thread:$0]  %s15491_s8, 16, %s321_s16, [#allocation33]  }
 0x195   :  { %15234 = dma.done.wait [#allocation3], 128  }
 0x196   :  { %15235 = vsyncadd [#allocation3], 4294967168 }
 0x197   :  { %15236 = dma.done.wait [#allocation6], 80  }
 0x198   :  { %15237 = vsyncadd [#allocation6], 4294967216 }
 0x199   :  { %15238 = dma.done.wait [#allocation9], 64  }
 0x19a   :  { %15239 = vsyncadd [#allocation9], 4294967232 }
 0x19b   :  { %15240 = dma.done.wait [#allocation12], 272  }
 0x19c   :  { %15241 = vsyncadd [#allocation12], 4294967024 }
 0x19d   :  { %15242 = dma.done.wait [#allocation15], 64  }
 0x19e   :  { %15243 = vsyncadd [#allocation15], 4294967232 }
 0x19f   :  { %15244 = dma.done.wait [#allocation18], 4112  }
 0x1a0   :  { %15245 = vsyncadd [#allocation18], 4294963184 }
 0x1a1   :  { %15246 = dma.done.wait [#allocation21], 544  }
 0x1a2   :  { %15247 = vsyncadd [#allocation21], 4294966752 }
 0x1a3   :  { %15248 = dma.done.wait [#allocation24], 65600  }
 0x1a4   :  { %15249 = vsyncadd [#allocation24], 4294901696 }
 0x1a5   :  { %15250 = dma.done.wait [#allocation27], 4096  }
 0x1a6   :  { %15251 = vsyncadd [#allocation27], 4294963200 }
 0x1a7   :  { %15252 = dma.done.wait [#allocation30], 32896  }
 0x1a8   :  { %15253 = vsyncadd [#allocation30], 4294934400 }
 0x1a9   :  { %15254 = dma.done.wait [#allocation33], 16  }
 0x1aa   :  { %15255 = vsyncadd [#allocation33], 4294967280  ;;  %s17204_s8 = sld [smem:[#allocation47_spill]]  ;;  %s17205_s12 = sld [smem:[#allocation52_spill]]  ;;  %v17124_v0 = vmov 0.0   ;;  %vm15319_vm0 = vmmov 0  }
 0x1ab   :  { %s17206_s6 = sld [smem:[#allocation51_spill]]  ;;  %13232 = vmatprep.subr.bf16.mxu0 %v17124_v0  ;;  %13234 = vmatprep.mubr.msk.bf16.mxu0 %vm15319_vm0, %v17124_v0  ;;  %vm413_vm1 = vcmask 1043456   ;;  %v408_v1 = vld [vmem:[#allocation7] sm:$0xf]  ;;  %vm575_vm2 = vcmask 1041408   ;;  %vm409_vm3 = vcmask 64512  }
 0x1ac   :  { %13238 = vmatprep.subr.bf16.mxu1 %v17124_v0  ;;  %13240 = vmatprep.mubr.msk.bf16.mxu1 %vm15319_vm0, %v17124_v0  ;;  %v415_v4 = vsel %vm413_vm1, %v408_v1, 0  ;;  %s17207_s3 = sld [smem:[#allocation48_spill]]  ;;  %v549_v10 = vld [vmem:[#allocation8] sm:$0x3]  ;;  %vm565_vm4 = vcmask 31744   ;;  %s17208_s27 = sld [smem:[#allocation50_spill]] }
 0x1ad   :  { %13233 = vmatpush3.bf16.msra.mxu0 %v415_v4  ;;  %v577_v11 = vsel %vm575_vm2, %v549_v10, 0  ;;  %s17209_s5 = sld [smem:[#allocation49_spill]]  ;;  %vm653_vm5 = vcmask 130048   ;;  %vm868_vm12 = vcmask 392192   ;;  %s17210_s28 = sld [smem:[#allocation53_spill]]  ;;  %vm1295_vm13 = vcmask 261120  }
 0x1ae   :  { %13244 = vmatprep.subr.bf16.mxu0 %v17124_v0  ;;  %s17211_s4 = sld [smem:[#allocation54_spill]]  ;;  %s17212_s25 = sld [smem:[#allocation55_spill]] }
 0x1af   :  { %s17214_s20 = sld [smem:[#allocation56_spill]]  ;;  %s17216_s1 = sld [smem:[#allocation59_spill]] }
 0x1b0   :  { %v405_v2 = vld [vmem:[%s17204_s8] sm:$0xff]  ;;  %v406_v3 = vld [vmem:[%s17204_s8 + $0x8] sm:$0xff]  ;;  %s17217_s2 = sld [smem:[#allocation58_spill]] }
 0x1b1   :  { %v407_v5 = vpack.c.bf16 %v406_v3, %v405_v2  ;;  %v504_v6 = vld [vmem:[%s17205_s12] sm:$0xf] }
 0x1b2   :  { %v459_v7 = vld [vmem:[%s17206_s6] sm:$0xf]  ;;  %v506_v8 = vsel %vm413_vm1, %v504_v6, 0  ;;  %v13818_v13 = vld [vmem:[%s17207_s3 + $0x8] sm:$0xff]   ;;  %v13819_v14 = vld [vmem:[%s17207_s3 + $0x10] sm:$0xff]  }
 0x1b3   :  { %v461_v9 = vsel %vm413_vm1, %v459_v7, 0  ;;  %13235 = vmatmul.mubr.msk.bf16.vlgmr.msra.gmra.mrb[0].mxu0 %vm409_vm3, %v407_v5  ;;  %v13817_v12 = vld [vmem:[%s17207_s3] sm:$0xff]   ;;  %v15652_v31 = vld [vmem:[%s17208_s27 + $0x8] sm:$0xff]   ;;  %v15660_v32 = vld [vmem:[%s17208_s27 + $0x10] sm:$0xff]  }
 0x1b4   :  { %13239 = vmatpush3.bf16.msra.mxu1 %v461_v9  ;;  %13245 = vmatpush3.bf16.msra.mxu0 %v506_v8  ;;  %v15644_v28 = vld [vmem:[%s17208_s27] sm:$0xff]   ;;  %v15674_v34 = vld [vmem:[%s17209_s5 + $0x8] sm:$0xff]   ;;  %v15681_v35 = vld [vmem:[%s17209_s5 + $0x10] sm:$0xff]  }
 0x1b5   :  { %13250 = vmatprep.subr.bf16.mxu1 %v17124_v0  ;;  %13246 = vmatprep.mubr.msk.bf16.mxu0 %vm15319_vm0, %v17124_v0  ;;  %v15667_v33 = vld [vmem:[%s17209_s5] sm:$0xff]  }
 0x1b6   :  { %13292 = vmatprep.subr.bf16.mxu0 %v17124_v0 }
 0x1b7   :  { %13241 = vmatmul.mubr.msk.bf16.vlgmr.msra.gmra.mrb[0].mxu1 %vm409_vm3, %v407_v5 }
 0x1b8   :  { %13251 = vmatpush3.bf16.msra.mxu1 %v577_v11  ;;  %13252 = vmatprep.mubr.msk.bf16.mxu1 %vm15319_vm0, %v17124_v0 }
 0x1b9   :  { %13264 = vmatprep.subr.bf16.mxu1 %v17124_v0 }
 0x1bb   :  { %13247 = vmatmul.mubr.msk.bf16.vlgmr.msra.gmra.mrb[4].mxu0 %vm409_vm3, %v407_v5 }
 0x1bc   :  { %13298 = vmatprep.mubr.msk.bf16.mxu0 %vm15319_vm0, %v17124_v0 }
 0x1bf   :  { %13253 = vmatmul.mubr.msk.bf16.vlgmr.msra.gmra.mrb[4].mxu1 %vm565_vm4, %v13817_v12 }
 0x1c0   :  { %13256 = vmatprep.mubr.msk.bf16.mxu1 %vm15319_vm0, %v17124_v0 }
 0x1c7   :  { %13257 = vmatmul.mubr.msk.bf16.gmra.mrb[8].mxu1 %vm565_vm4, %v13818_v13 }
 0x1c8   :  { %13260 = vmatprep.mubr.msk.bf16.mxu1 %vm15319_vm0, %v17124_v0 }
 0x1cf   :  { %13261 = vmatmul.mubr.msk.bf16.gmra.mrb[12].mxu1 %vm565_vm4, %v13819_v14 }
 0x1d0   :  { %13266 = vmatprep.mubr.msk.bf16.mxu1 %vm15319_vm0, %v17124_v0 }
 0x286   :  { %v15637_v15 = vpop.f32.mrb[0].mxu0 }
 0x287   :  { %v13236_v16 = vpop.f32.mrb[1].mxu0 }
 0x288   :  { %v15639_v17 = vpop.f32.mrb[2].mxu0 }
 0x289   :  { %v458_v19 = vpack.c.bf16 %v15639_v17, %v15637_v15  ;;  %v13237_v20 = vpop.f32.mrb[3].mxu0  ;;  %v1043_v15 = vld [vmem:[#allocation10] sm:$0x3] }
 0x28a   :  { %v497_v18 = vpop.f32.mrb[0].mxu1  ;;  %v1054_v17 = vsel %vm575_vm2, %v1043_v15, 0  ;;  %v13833_v15 = vld [vmem:[%s17210_s28 + $0x30] sm:$0xff]  }
 0x28b   :  { %v13242_v21 = vpop.f32.mrb[1].mxu1 }
 0x28c   :  { %v500_v22 = vpop.f32.mrb[2].mxu1 }
 0x28d   :  { %v636_v23 = vpack.c.bf16 %v500_v22, %v497_v18  ;;  %v13243_v24 = vpop.f32.mrb[3].mxu1 }
 0x28e   :  { %v542_v25 = vpop.f32.mrb[4].mxu0 }
 0x28f   :  { %v13248_v26 = vpop.f32.mrb[5].mxu0 }
 0x290   :  { %v545_v27 = vpop.f32.mrb[6].mxu0 }
 0x291   :  { %v637_v29 = vpack.c.bf16 %v545_v27, %v542_v25  ;;  %v13249_v30 = vpop.f32.mrb[7].mxu0 }
 0x293   :  { %13265 = vmatpush3.bf16.msra.mxu1 %v637_v29 }
 0x294   :  { %13278 = vmatprep.subr.bf16.mxu1 %v17124_v0 }
 0x296   :  { %13267 = vmatmul.mubr.msk.bf16.vlgmr.msra.gmra.mrb[4].mxu1 %vm653_vm5, %v15644_v28 }
 0x297   :  { %13270 = vmatprep.mubr.msk.bf16.mxu1 %vm15319_vm0, %v17124_v0  ;;  %13279 = vmatpush3.bf16.msra.mxu1 %v636_v23 }
 0x298   :  { %13344 = vmatprep.subr.bf16.mxu1 %v17124_v0 }
 0x29e   :  { %13271 = vmatmul.mubr.msk.bf16.gmra.mrb[8].mxu1 %vm653_vm5, %v15652_v31 }
 0x29f   :  { %13274 = vmatprep.mubr.msk.bf16.mxu1 %vm15319_vm0, %v17124_v0 }
 0x2a6   :  { %13275 = vmatmul.mubr.msk.bf16.gmra.mrb[12].mxu1 %vm653_vm5, %v15660_v32 }
 0x2a7   :  { %13280 = vmatprep.mubr.msk.bf16.mxu1 %vm15319_vm0, %v17124_v0 }
 0x2ae   :  { %13281 = vmatmul.mubr.msk.bf16.vlgmr.msra.gmra.mrb[4].mxu1 %vm653_vm5, %v15667_v33 }
 0x2af   :  { %13284 = vmatprep.mubr.msk.bf16.mxu1 %vm15319_vm0, %v17124_v0 }
 0x2b6   :  { %13285 = vmatmul.mubr.msk.bf16.gmra.mrb[8].mxu1 %vm653_vm5, %v15674_v34 }
 0x2b7   :  { %13288 = vmatprep.mubr.msk.bf16.mxu1 %vm15319_vm0, %v17124_v0 }
 0x2be   :  { %13289 = vmatmul.mubr.msk.bf16.gmra.mrb[12].mxu1 %vm653_vm5, %v15681_v35 }
 0x2bf   :  { %13350 = vmatprep.mubr.msk.bf16.mxu1 %vm15319_vm0, %v17124_v0 }
 0x381   :  { %v778_v36 = vpop.f32.mrb[4].mxu1 }
 0x382   :  { %v13282_v37 = vpop.f32.mrb[5].mxu1  ;;  %v813_v47 = vmul.f32 0.2, %v778_v36  ;;  %vm807_vm8 = vcmp.gt.f32.partialorder %v778_v36, 0.0 }
 0x383   :  { %v781_v38 = vpop.f32.mrb[6].mxu1 }
 0x384   :  { %v13283_v39 = vpop.f32.mrb[7].mxu1  ;;  %v814_v51 = vmul.f32 0.2, %v781_v38  ;;  %vm808_vm9 = vcmp.gt.f32.partialorder %v781_v38, 0.0  ;;  %v819_v54 = vsel %vm807_vm8, %v778_v36, %v813_v47 }
 0x385   :  { %v825_v62 = vsel %vm565_vm4, %v819_v54, -inf }
 0x386   :  { %v820_v58 = vsel %vm808_vm9, %v781_v38, %v814_v51 }
 0x387   :  { %v826_v3 = vsel %vm565_vm4, %v820_v58, -inf }
 0x389   :  { %v786_v40 = vpop.f32.mrb[8].mxu1 }
 0x38a   :  { %vm809_vm6 = vcmp.gt.f32.partialorder %v786_v40, 0.0  ;;  %v815_v41 = vmul.f32 0.2, %v786_v40  ;;  %v13286_v42 = vpop.f32.mrb[9].mxu1 }
 0x38b   :  { %v789_v43 = vpop.f32.mrb[10].mxu1 }
 0x38c   :  { %v821_v44 = vsel %vm809_vm6, %v786_v40, %v815_v41  ;;  %vm810_vm7 = vcmp.gt.f32.partialorder %v789_v43, 0.0  ;;  %v816_v45 = vmul.f32 0.2, %v789_v43  ;;  %v13287_v46 = vpop.f32.mrb[11].mxu1 }
 0x38d   :  { %v827_v49 = vsel %vm565_vm4, %v821_v44, -inf }
 0x38e   :  { %v822_v48 = vsel %vm810_vm7, %v789_v43, %v816_v45 }
 0x38f   :  { %v828_v50 = vsel %vm565_vm4, %v822_v48, -inf }
 0x390   :  { %v834_v52 = vmax.f32 %v827_v49, %v828_v50 }
 0x391   :  { %v794_v53 = vpop.f32.mrb[12].mxu1 }
 0x392   :  { %vm811_vm10 = vcmp.gt.f32.partialorder %v794_v53, 0.0  ;;  %v817_v55 = vmul.f32 0.2, %v794_v53  ;;  %v13290_v56 = vpop.f32.mrb[13].mxu1 }
 0x393   :  { %v797_v57 = vpop.f32.mrb[14].mxu1 }
 0x394   :  { %v823_v59 = vsel %vm811_vm10, %v794_v53, %v817_v55  ;;  %vm812_vm11 = vcmp.gt.f32.partialorder %v797_v57, 0.0  ;;  %v818_v60 = vmul.f32 0.2, %v797_v57  ;;  %v13291_v61 = vpop.f32.mrb[15].mxu1 }
 0x395   :  { %v829_v63 = vsel %vm565_vm4, %v823_v59, -inf }
 0x396   :  { %v830_v1 = vmax.f32 %v825_v62, %v829_v63  ;;  %v824_v2 = vsel %vm812_vm11, %v797_v57, %v818_v60 }
 0x397   :  { %v831_v4 = vsel %vm565_vm4, %v824_v2, -inf }
 0x398   :  { %v832_v5 = vmax.f32 %v826_v3, %v831_v4 }
 0x39a   :  { %v833_v6 = vmax.f32 %v830_v1, %v832_v5 }
 0x39c   :  { %v835_v7 = vmax.f32 %v833_v6, %v834_v52 }
 0x39e   :  { %v836_v8 = vrot.slane %v835_v7, 4 }
 0x3a0   :  { %v837_v9 = vmax.f32 %v835_v7, %v836_v8 }
 0x3a2   :  { %v838_v10 = vrot.slane %v837_v9, 2 }
 0x3a4   :  { %v839_v11 = vmax.f32 %v837_v9, %v838_v10 }
 0x3a6   :  { %v840_v12 = vrot.slane %v839_v11, 1 }
 0x3a8   :  { %v841_v13 = vmax.f32 %v839_v11, %v840_v12 }
 0x3aa   :  { %v847_v14 = vsub.f32 %v824_v2, %v841_v13  ;;  %v842_v16 = vsub.f32 %v819_v54, %v841_v13  ;;  %v843_v18 = vsub.f32 %v820_v58, %v841_v13  ;;  %v844_v20 = vsub.f32 %v821_v44, %v841_v13  ;;  %v15707_v44 = vld [vmem:[#allocation2] sm:$0xff]  }
 0x3ab   :  { %v845_v21 = vsub.f32 %v822_v48, %v841_v13  ;;  %v846_v22 = vsub.f32 %v823_v59, %v841_v13 }
 0x3ac   :  { %v848_v23 = vmul.f32 1.442695, %v842_v16  ;;  %v850_v24 = vmul.f32 1.442695, %v843_v18  ;;  %v852_v25 = vmul.f32 1.442695, %v844_v20 }
 0x3ad   :  { %v854_v26 = vmul.f32 1.442695, %v845_v21  ;;  %v858_v27 = vmul.f32 1.442695, %v847_v14  ;;  %v856_v29 = vmul.f32 1.442695, %v846_v22 }
 0x3ae   :  { %14689 = vpow2.f32 %v848_v23 }
 0x3af   :  { %14691 = vpow2.f32 %v850_v24 }
 0x3b0   :  { %14693 = vpow2.f32 %v852_v25 }
 0x3b1   :  { %14695 = vpow2.f32 %v854_v26 }
 0x3b2   :  { %14697 = vpow2.f32 %v858_v27 }
 0x3b3   :  { %14699 = vpow2.f32 %v856_v29 }
 0x3b8   :  { %v14690_v30 = vpop.eup %14689 }
 0x3b9   :  { %v14692_v36 = vpop.eup %14691 }
 0x3ba   :  { %v15693_v37 = vpop.eup %14693  ;;  %v860_v38 = vpack.c.bf16 %v14692_v36, %v14690_v30 }
 0x3bb   :  { %v15695_v39 = vpop.eup %14695 }
 0x3bc   :  { %13293 = vmatpush3.bf16.msra.mxu0 %v860_v38  ;;  %v15698_v40 = vpop.eup %14697  ;;  %v861_v41 = vpack.c.bf16 %v15695_v39, %v15693_v37 }
 0x3bd   :  { %13294 = vmatprep.subr.bf16.mxu0 %v17124_v0  ;;  %v15702_v42 = vpop.eup %14699 }
 0x3be   :  { %v862_v43 = vpack.c.bf16 %v15698_v40, %v15702_v42 }
 0x3c0   :  { %13295 = vmatpush3.bf16.msra.mxu0 %v861_v41 }
 0x3c1   :  { %13296 = vmatprep.subr.bf16.mxu0 %v17124_v0 }
 0x3c4   :  { %13297 = vmatpush3.bf16.msra.mxu0 %v862_v43  ;;  %v13827_v43 = vld [vmem:[%s17210_s28] sm:$0xff]  }
 0x3c5   :  { %13302 = vmatprep.subr.bf16.mxu0 %v17124_v0 }
 0x3c7   :  { %13299 = vmatmul.mubr.msk.bf16.vlgmr.msra.gmra.mrb[8].mxu0 %vm868_vm12, %v15707_v44 }
 0x3c8   :  { %13304 = vmatprep.mubr.msk.bf16.mxu0 %vm15319_vm0, %v17124_v0 }
 0x49a   :  { %v906_v45 = vpop.f32.mrb[8].mxu0 }
 0x49b   :  { %v13300_v46 = vpop.f32.mrb[9].mxu0 }
 0x49c   :  { %v909_v47 = vpop.f32.mrb[10].mxu0  ;;  %v13829_v46 = vld [vmem:[%s17210_s28 + $0x10] sm:$0xff]  }
 0x49d   :  { %v913_v48 = vpack.c.bf16 %v909_v47, %v906_v45  ;;  %v13301_v49 = vpop.f32.mrb[11].mxu0  ;;  %v13828_v45 = vld [vmem:[%s17210_s28 + $0x8] sm:$0xff]   ;;  %v13830_v47 = vld [vmem:[%s17210_s28 + $0x18] sm:$0xff]  }
 0x49e   :  { %v13832_v49 = vld [vmem:[%s17210_s28 + $0x28] sm:$0xff]  }
 0x49f   :  { %13303 = vmatpush3.bf16.msra.mxu0 %v913_v48  ;;  %v13831_v48 = vld [vmem:[%s17210_s28 + $0x20] sm:$0xff]  }
 0x4a0   :  { %13316 = vmatprep.subr.bf16.mxu0 %v17124_v0 }
 0x4a2   :  { %13305 = vmatmul.mubr.msk.bf16.vlgmr.msra.gmra.mrb[12].mxu0 %vm653_vm5, %v15644_v28 }
 0x4a3   :  { %13317 = vmatpush3.bf16.msra.mxu0 %v458_v19  ;;  %13308 = vmatprep.mubr.msk.bf16.mxu0 %vm15319_vm0, %v17124_v0 }
 0x4a4   :  { %13330 = vmatprep.subr.bf16.mxu0 %v17124_v0 }
 0x4aa   :  { %13309 = vmatmul.mubr.msk.bf16.gmra.mrb[16].mxu0 %vm653_vm5, %v15652_v31 }
 0x4ab   :  { %13312 = vmatprep.mubr.msk.bf16.mxu0 %vm15319_vm0, %v17124_v0 }
 0x4b2   :  { %13313 = vmatmul.mubr.msk.bf16.gmra.mrb[20].mxu0 %vm653_vm5, %v15660_v32 }
 0x4b3   :  { %13318 = vmatprep.mubr.msk.bf16.mxu0 %vm15319_vm0, %v17124_v0 }
 0x4ba   :  { %13319 = vmatmul.mubr.msk.bf16.vlgmr.msra.gmra.mrb[24].mxu0 %vm653_vm5, %v15667_v33 }
 0x4bb   :  { %13322 = vmatprep.mubr.msk.bf16.mxu0 %vm15319_vm0, %v17124_v0  ;;  %13331 = vmatpush3.bf16.msra.mxu0 %v1054_v17 }
 0x4bc   :  { %13354 = vmatprep.subr.bf16.mxu0 %v17124_v0 }
 0x4c2   :  { %13323 = vmatmul.mubr.msk.bf16.gmra.mrb[28].mxu0 %vm653_vm5, %v15674_v34 }
 0x4c3   :  { %13326 = vmatprep.mubr.msk.bf16.mxu0 %vm15319_vm0, %v17124_v0 }
 0x4ca   :  { %13327 = vmatmul.mubr.msk.bf16.gmra.mrb[32].mxu0 %vm653_vm5, %v15681_v35 }
 0x4cb   :  { %13332 = vmatprep.mubr.msk.bf16.mxu0 %vm15319_vm0, %v17124_v0 }
 0x575   :  { %v948_v19 = vpop.f32.mrb[12].mxu0 }
 0x576   :  { %v949_v50 = vadd.f32 1e-16, %v948_v19  ;;  %v13306_v51 = vpop.f32.mrb[13].mxu0 }
 0x577   :  { %v951_v52 = vpop.f32.mrb[14].mxu0 }
 0x578   :  { %14701 = vrcp.f32 %v949_v50  ;;  %v952_v53 = vadd.f32 1e-16, %v951_v52  ;;  %v13307_v54 = vpop.f32.mrb[15].mxu0 }
 0x57a   :  { %14703 = vrcp.f32 %v952_v53 }
 0x57d   :  { %v956_v55 = vpop.f32.mrb[16].mxu0 }
 0x57e   :  { %v957_v56 = vadd.f32 1e-16, %v956_v55  ;;  %v13310_v57 = vpop.f32.mrb[17].mxu0 }
 0x57f   :  { %v959_v58 = vpop.f32.mrb[18].mxu0 }
 0x580   :  { %14705 = vrcp.f32 %v957_v56  ;;  %v960_v59 = vadd.f32 1e-16, %v959_v58  ;;  %v13311_v60 = vpop.f32.mrb[19].mxu0 }
 0x582   :  { %v14702_v61 = vpop.eup %14701  ;;  %14707 = vrcp.f32 %v960_v59 }
 0x583   :  { %v977_v63 = vmul.f32 %v14702_v61, %v14690_v30 }
 0x584   :  { %v14704_v62 = vpop.eup %14703 }
 0x585   :  { %v978_v1 = vmul.f32 %v14704_v62, %v14692_v36  ;;  %v964_v2 = vpop.f32.mrb[20].mxu0 }
 0x586   :  { %v965_v3 = vadd.f32 1e-16, %v964_v2  ;;  %v13314_v4 = vpop.f32.mrb[21].mxu0 }
 0x587   :  { %v1040_v5 = vpack.c.bf16 %v978_v1, %v977_v63  ;;  %v967_v6 = vpop.f32.mrb[22].mxu0 }
 0x588   :  { %14709 = vrcp.f32 %v965_v3  ;;  %v968_v7 = vadd.f32 1e-16, %v967_v6  ;;  %v13315_v8 = vpop.f32.mrb[23].mxu0  ;;  %v13834_v3 = vld [vmem:[%s17210_s28 + $0x38] sm:$0xff]  }
 0x589   :  { %13333 = vmatmul.mubr.msk.bf16.vlgmr.msra.gmra.mrb[36].mxu0 %vm565_vm4, %v1040_v5 }
 0x58a   :  { %v14706_v9 = vpop.eup %14705  ;;  %14711 = vrcp.f32 %v968_v7  ;;  %13336 = vmatprep.mubr.msk.bf16.mxu0 %vm15319_vm0, %v17124_v0  ;;  %13355 = vmatpush3.bf16.msra.mxu0 %v13827_v43 }
 0x58b   :  { %v979_v11 = vmul.f32 %v14706_v9, %v15693_v37  ;;  %13356 = vmatprep.subr.bf16.mxu0 %v17124_v0  ;;  %v13835_v9 = vld [vmem:[#allocation13] sm:$0xff]  }
 0x58c   :  { %v14708_v10 = vpop.eup %14707 }
 0x58d   :  { %v980_v12 = vmul.f32 %v14708_v10, %v15695_v39  ;;  %v1017_v13 = vpop.f32.mrb[24].mxu0  ;;  %v13836_v10 = vld [vmem:[#allocation13 + $0x8] sm:$0xff]  }
 0x58e   :  { %v13320_v14 = vpop.f32.mrb[25].mxu0  ;;  %13357 = vmatpush3.bf16.msra.mxu0 %v13828_v45 }
 0x58f   :  { %v1041_v16 = vpack.c.bf16 %v980_v12, %v979_v11  ;;  %v1020_v18 = vpop.f32.mrb[26].mxu0  ;;  %13358 = vmatprep.subr.bf16.mxu0 %v17124_v0  ;;  %v11970_v11 = vld [vmem:[#allocation11] ss:$0 sm:$0xff] }
 0x590   :  { %v1116_v20 = vpack.c.bf16 %v1020_v18, %v1017_v13  ;;  %v13321_v21 = vpop.f32.mrb[27].mxu0 }
 0x591   :  { %13337 = vmatmul.mubr.msk.bf16.gmra.mrb[40].mxu0 %vm565_vm4, %v1041_v16 }
 0x592   :  { %v14710_v22 = vpop.eup %14709  ;;  %13340 = vmatprep.mubr.msk.bf16.mxu0 %vm15319_vm0, %v17124_v0  ;;  %13359 = vmatpush3.bf16.msra.mxu0 %v13829_v46 }
 0x593   :  { %v981_v24 = vmul.f32 %v14710_v22, %v15702_v42  ;;  %13360 = vmatprep.subr.bf16.mxu0 %v17124_v0 }
 0x594   :  { %v14712_v23 = vpop.eup %14711 }
 0x595   :  { %v982_v25 = vmul.f32 %v14712_v23, %v15698_v40  ;;  %v1025_v26 = vpop.f32.mrb[28].mxu0  ;;  %v13837_v23 = vld [vmem:[%s17211_s4] sm:$0xff]  }
 0x596   :  { %v13324_v27 = vpop.f32.mrb[29].mxu0  ;;  %13361 = vmatpush3.bf16.msra.mxu0 %v13830_v47 }
 0x597   :  { %v1042_v29 = vpack.c.bf16 %v982_v25, %v981_v24  ;;  %v1028_v30 = vpop.f32.mrb[30].mxu0  ;;  %13362 = vmatprep.subr.bf16.mxu0 %v17124_v0  ;;  %v13838_v25 = vld [vmem:[%s17211_s4 + $0x8] sm:$0xff]  }
 0x598   :  { %v1117_v36 = vpack.c.bf16 %v1028_v30, %v1025_v26  ;;  %v13325_v37 = vpop.f32.mrb[31].mxu0  ;;  %v13839_v26 = vld [vmem:[%s17212_s25] sm:$0xff]   ;;  %v13840_v27 = vld [vmem:[%s17212_s25 + $0x8] sm:$0xff]  }
 0x599   :  { %13341 = vmatmul.mubr.msk.bf16.gmra.mrb[44].mxu0 %vm565_vm4, %v1042_v29  ;;  %v1455_v29 = vld [vmem:[#allocation14] sm:$0x3]  ;;  %v15817_v37 = vld [vmem:[%s17207_s3 + $0x8] sm:$0xff]  }
 0x59a   :  { %13370 = vmatprep.mubr.msk.bf16.mxu0 %vm15319_vm0, %v17124_v0  ;;  %13363 = vmatpush3.bf16.msra.mxu0 %v13831_v48  ;;  %v1457_v30 = vsel %vm575_vm2, %v1455_v29, 0 }
 0x59b   :  { %13364 = vmatprep.subr.bf16.mxu0 %v17124_v0 }
 0x59d   :  { %v1033_v38 = vpop.f32.mrb[32].mxu0 }
 0x59e   :  { %v13328_v39 = vpop.f32.mrb[33].mxu0  ;;  %13365 = vmatpush3.bf16.msra.mxu0 %v13832_v49 }
 0x59f   :  { %v1036_v41 = vpop.f32.mrb[34].mxu0  ;;  %13366 = vmatprep.subr.bf16.mxu0 %v17124_v0 }
 0x5a0   :  { %v1118_v42 = vpack.c.bf16 %v1036_v41, %v1033_v38  ;;  %v13329_v40 = vpop.f32.mrb[35].mxu0  ;;  %v15824_v38 = vld [vmem:[%s17207_s3 + $0x10] sm:$0xff]  }
 0x5a2   :  { %13367 = vmatpush3.bf16.msra.mxu0 %v13833_v15 }
 0x5a3   :  { %13368 = vmatprep.subr.bf16.mxu0 %v17124_v0 }
 0x5a6   :  { %13369 = vmatpush3.bf16.msra.mxu0 %v13834_v3 }
 0x5a7   :  { %13440 = vmatprep.subr.bf16.mxu0 %v17124_v0 }
 0x65c   :  { %v1090_v17 = vpop.f32.mrb[36].mxu0 }
 0x65d   :  { %v13334_v19 = vpop.f32.mrb[37].mxu0 }
 0x65e   :  { %v1093_v50 = vpop.f32.mrb[38].mxu0 }
 0x65f   :  { %v1113_v51 = vpack.c.bf16 %v1093_v50, %v1090_v17  ;;  %v13335_v52 = vpop.f32.mrb[39].mxu0 }
 0x661   :  { %v1119_v53 = vmul.bf16 %v1116_v20, %v1113_v51 }
 0x663   :  { %13345 = vmatpush3.bf16.msra.mxu1 %v1119_v53 }
 0x664   :  { %v1098_v54 = vpop.f32.mrb[40].mxu0  ;;  %13346 = vmatprep.subr.bf16.mxu1 %v17124_v0 }
 0x665   :  { %v13338_v55 = vpop.f32.mrb[41].mxu0 }
 0x666   :  { %v1101_v56 = vpop.f32.mrb[42].mxu0 }
 0x667   :  { %v1114_v57 = vpack.c.bf16 %v1101_v56, %v1098_v54  ;;  %v13339_v58 = vpop.f32.mrb[43].mxu0 }
 0x669   :  { %v1120_v59 = vmul.bf16 %v1117_v36, %v1114_v57  ;;  %v15810_v36 = vld [vmem:[%s17207_s3] sm:$0xff]  }
 0x66b   :  { %13347 = vmatpush3.bf16.msra.mxu1 %v1120_v59 }
 0x66c   :  { %v1106_v60 = vpop.f32.mrb[44].mxu0  ;;  %13348 = vmatprep.subr.bf16.mxu1 %v17124_v0 }
 0x66d   :  { %v13342_v61 = vpop.f32.mrb[45].mxu0 }
 0x66e   :  { %v1109_v62 = vpop.f32.mrb[46].mxu0 }
 0x66f   :  { %v1115_v63 = vpack.c.bf16 %v1109_v62, %v1106_v60  ;;  %v13343_v1 = vpop.f32.mrb[47].mxu0 }
 0x671   :  { %v1121_v2 = vmul.bf16 %v1118_v42, %v1115_v63 }
 0x673   :  { %13349 = vmatpush3.bf16.msra.mxu1 %v1121_v2 }
 0x674   :  { %13374 = vmatprep.subr.bf16.mxu1 %v17124_v0 }
 0x676   :  { %13351 = vmatmul.mubr.msk.bf16.vlgmr.msra.gmra.mrb[16].mxu1 %vm868_vm12, %v15707_v44 }
 0x677   :  { %13378 = vmatprep.mubr.msk.bf16.mxu1 %vm15319_vm0, %v17124_v0  ;;  %13375 = vmatpush3.bf16.msra.mxu1 %v13835_v9 }
 0x678   :  { %13376 = vmatprep.subr.bf16.mxu1 %v17124_v0 }
 0x67b   :  { %13377 = vmatpush3.bf16.msra.mxu1 %v13836_v10 }
 0x67c   :  { %13382 = vmatprep.subr.bf16.mxu1 %v17124_v0 }
 0x749   :  { %v1156_v4 = vpop.f32.mrb[16].mxu1 }
 0x74a   :  { %v13352_v5 = vpop.f32.mrb[17].mxu1 }
 0x74b   :  { %v1159_v6 = vpop.f32.mrb[18].mxu1 }
 0x74c   :  { %v1163_v7 = vpack.c.bf16 %v1159_v6, %v1156_v4  ;;  %v13353_v8 = vpop.f32.mrb[19].mxu1 }
 0x74e   :  { %13371 = vmatmul.mubr.bf16.vlgmr.msra.gmra.mrb[48].mxu0 %v1163_v7 }
 0x74f   :  { %13446 = vmatprep.mubr.msk.bf16.mxu0 %vm15319_vm0, %v17124_v0 }
 0x821   :  { %v1269_v12 = vpop.f32.mrb[48].mxu0 }
 0x822   :  { %v1270_v13 = vadd.f32 %v11970_v11, %v1269_v12  ;;  %v13372_v14 = vpop.f32.mrb[49].mxu0 }
 0x823   :  { %v1272_v16 = vpop.f32.mrb[50].mxu0 }
 0x824   :  { %v1273_v18 = vadd.f32 %v11970_v11, %v1272_v16  ;;  %v13373_v20 = vpop.f32.mrb[51].mxu0  ;;  %v1276_v21 = vmax.f32 %v1270_v13, 0.0 }
 0x826   :  { %v1277_v22 = vmax.f32 %v1273_v18, 0.0 }
 0x828   :  { %v15786_v24 = vpack.c.bf16 %v1277_v22, %v1276_v21 }
 0x82a   :  { %17213 = vst [vmem:[#allocation63_spill] sm:$0xff] %v15786_v24  ;;  %13379 = vmatmul.mubr.msk.bf16.vlgmr.msra.gmra.mrb[20].mxu1 %vm1295_vm13, %v15786_v24 }
 0x82b   :  { %13383 = vmatpush3.bf16.msra.mxu1 %v13837_v23  ;;  %13386 = vmatprep.mubr.msk.bf16.mxu1 %vm15319_vm0, %v17124_v0 }
 0x82c   :  { %13384 = vmatprep.subr.bf16.mxu1 %v17124_v0 }
 0x82f   :  { %13385 = vmatpush3.bf16.msra.mxu1 %v13838_v25 }
 0x830   :  { %13390 = vmatprep.subr.bf16.mxu1 %v17124_v0 }
 0x832   :  { %13387 = vmatmul.mubr.msk.bf16.vlgmr.msra.gmra.mrb[24].mxu1 %vm1295_vm13, %v15786_v24 }
 0x833   :  { %13391 = vmatpush3.bf16.msra.mxu1 %v13839_v26  ;;  %13394 = vmatprep.mubr.msk.bf16.mxu1 %vm15319_vm0, %v17124_v0 }
 0x834   :  { %13392 = vmatprep.subr.bf16.mxu1 %v17124_v0 }
 0x837   :  { %13393 = vmatpush3.bf16.msra.mxu1 %v13840_v27 }
 0x838   :  { %13398 = vmatprep.subr.bf16.mxu1 %v17124_v0 }
 0x83a   :  { %13395 = vmatmul.mubr.msk.bf16.vlgmr.msra.gmra.mrb[28].mxu1 %vm1295_vm13, %v15786_v24 }
 0x83b   :  { %13399 = vmatpush3.bf16.msra.mxu1 %v1457_v30  ;;  %13400 = vmatprep.mubr.msk.bf16.mxu1 %vm15319_vm0, %v17124_v0 }
 0x83c   :  { %13412 = vmatprep.subr.bf16.mxu1 %v17124_v0 }
 0x842   :  { %13401 = vmatmul.mubr.msk.bf16.vlgmr.msra.gmra.mrb[32].mxu1 %vm565_vm4, %v15810_v36 }
 0x843   :  { %13404 = vmatprep.mubr.msk.bf16.mxu1 %vm15319_vm0, %v17124_v0 }
 0x84a   :  { %13405 = vmatmul.mubr.msk.bf16.gmra.mrb[36].mxu1 %vm565_vm4, %v15817_v37 }
 0x84b   :  { %13408 = vmatprep.mubr.msk.bf16.mxu1 %vm15319_vm0, %v17124_v0 }
 0x852   :  { %13409 = vmatmul.mubr.msk.bf16.gmra.mrb[40].mxu1 %vm565_vm4, %v15824_v38 }
 0x853   :  { %13414 = vmatprep.mubr.msk.bf16.mxu1 %vm15319_vm0, %v17124_v0 }
 0x8fd   :  { %v15830_v39 = vpop.f32.mrb[20].mxu1 }
 0x8fe   :  { %v13380_v41 = vpop.f32.mrb[21].mxu1 }
 0x8ff   :  { %v15832_v42 = vpop.f32.mrb[22].mxu1 }
 0x900   :  { %v1340_v40 = vpack.c.bf16 %v15832_v42, %v15830_v39  ;;  %v13381_v43 = vpop.f32.mrb[23].mxu1 }
 0x905   :  { %v1391_v45 = vpop.f32.mrb[24].mxu1 }
 0x906   :  { %v13388_v46 = vpop.f32.mrb[25].mxu1 }
 0x907   :  { %v1394_v47 = vpop.f32.mrb[26].mxu1 }
 0x908   :  { %v1516_v48 = vpack.c.bf16 %v1394_v47, %v1391_v45  ;;  %v13389_v49 = vpop.f32.mrb[27].mxu1 }
 0x90d   :  { %v1448_v15 = vpop.f32.mrb[28].mxu1 }
 0x90e   :  { %v13396_v17 = vpop.f32.mrb[29].mxu1 }
 0x90f   :  { %v1451_v19 = vpop.f32.mrb[30].mxu1 }
 0x910   :  { %v1517_v50 = vpack.c.bf16 %v1451_v19, %v1448_v15  ;;  %v13397_v51 = vpop.f32.mrb[31].mxu1 }
 0x912   :  { %13413 = vmatpush3.bf16.msra.mxu1 %v1517_v50 }
 0x913   :  { %13426 = vmatprep.subr.bf16.mxu1 %v17124_v0 }
 0x915   :  { %13415 = vmatmul.mubr.msk.bf16.vlgmr.msra.gmra.mrb[32].mxu1 %vm653_vm5, %v15644_v28 }
 0x916   :  { %13427 = vmatpush3.bf16.msra.mxu1 %v1516_v48  ;;  %13418 = vmatprep.mubr.msk.bf16.mxu1 %vm15319_vm0, %v17124_v0 }
 0x917   :  { %13492 = vmatprep.subr.bf16.mxu1 %v17124_v0 }
 0x91d   :  { %13419 = vmatmul.mubr.msk.bf16.gmra.mrb[36].mxu1 %vm653_vm5, %v15652_v31 }
 0x91e   :  { %13422 = vmatprep.mubr.msk.bf16.mxu1 %vm15319_vm0, %v17124_v0 }
 0x925   :  { %13423 = vmatmul.mubr.msk.bf16.gmra.mrb[40].mxu1 %vm653_vm5, %v15660_v32 }
 0x926   :  { %13428 = vmatprep.mubr.msk.bf16.mxu1 %vm15319_vm0, %v17124_v0 }
 0x92d   :  { %13429 = vmatmul.mubr.msk.bf16.vlgmr.msra.gmra.mrb[32].mxu1 %vm653_vm5, %v15667_v33 }
 0x92e   :  { %13432 = vmatprep.mubr.msk.bf16.mxu1 %vm15319_vm0, %v17124_v0 }
 0x935   :  { %13433 = vmatmul.mubr.msk.bf16.gmra.mrb[36].mxu1 %vm653_vm5, %v15674_v34 }
 0x936   :  { %13436 = vmatprep.mubr.msk.bf16.mxu1 %vm15319_vm0, %v17124_v0 }
 0x93d   :  { %13437 = vmatmul.mubr.msk.bf16.gmra.mrb[40].mxu1 %vm653_vm5, %v15681_v35 }
 0x93e   :  { %13498 = vmatprep.mubr.msk.bf16.mxu1 %vm15319_vm0, %v17124_v0 }
 0xa00   :  { %v1609_v52 = vpop.f32.mrb[32].mxu1 }
 0xa01   :  { %v13430_v53 = vpop.f32.mrb[33].mxu1  ;;  %v1644_v63 = vmul.f32 0.2, %v1609_v52  ;;  %vm1638_vm1 = vcmp.gt.f32.partialorder %v1609_v52, 0.0 }
 0xa02   :  { %v1612_v54 = vpop.f32.mrb[34].mxu1 }
 0xa03   :  { %v13431_v55 = vpop.f32.mrb[35].mxu1  ;;  %v1645_v4 = vmul.f32 0.2, %v1612_v54  ;;  %vm1639_vm3 = vcmp.gt.f32.partialorder %v1612_v54, 0.0  ;;  %v1650_v7 = vsel %vm1638_vm1, %v1609_v52, %v1644_v63 }
 0xa04   :  { %v1656_v16 = vsel %vm565_vm4, %v1650_v7, -inf }
 0xa05   :  { %v1651_v11 = vsel %vm1639_vm3, %v1612_v54, %v1645_v4 }
 0xa06   :  { %v1657_v22 = vsel %vm565_vm4, %v1651_v11, -inf }
 0xa08   :  { %v1617_v56 = vpop.f32.mrb[36].mxu1 }
 0xa09   :  { %vm1640_vm14 = vcmp.gt.f32.partialorder %v1617_v56, 0.0  ;;  %v1646_v57 = vmul.f32 0.2, %v1617_v56  ;;  %v13434_v58 = vpop.f32.mrb[37].mxu1 }
 0xa0a   :  { %v1620_v59 = vpop.f32.mrb[38].mxu1 }
 0xa0b   :  { %v1652_v60 = vsel %vm1640_vm14, %v1617_v56, %v1646_v57  ;;  %vm1641_vm15 = vcmp.gt.f32.partialorder %v1620_v59, 0.0  ;;  %v1647_v61 = vmul.f32 0.2, %v1620_v59  ;;  %v13435_v62 = vpop.f32.mrb[39].mxu1 }
 0xa0c   :  { %v1658_v2 = vsel %vm565_vm4, %v1652_v60, -inf }
 0xa0d   :  { %v1653_v1 = vsel %vm1641_vm15, %v1620_v59, %v1647_v61 }
 0xa0e   :  { %v1659_v3 = vsel %vm565_vm4, %v1653_v1, -inf }
 0xa0f   :  { %v1665_v5 = vmax.f32 %v1658_v2, %v1659_v3 }
 0xa10   :  { %v1625_v6 = vpop.f32.mrb[40].mxu1 }
 0xa11   :  { %vm1642_vm6 = vcmp.gt.f32.partialorder %v1625_v6, 0.0  ;;  %v1648_v8 = vmul.f32 0.2, %v1625_v6  ;;  %v13438_v9 = vpop.f32.mrb[41].mxu1 }
 0xa12   :  { %v1628_v10 = vpop.f32.mrb[42].mxu1 }
 0xa13   :  { %v1654_v12 = vsel %vm1642_vm6, %v1625_v6, %v1648_v8  ;;  %vm1643_vm7 = vcmp.gt.f32.partialorder %v1628_v10, 0.0  ;;  %v1649_v13 = vmul.f32 0.2, %v1628_v10  ;;  %v13439_v14 = vpop.f32.mrb[43].mxu1 }
 0xa14   :  { %v1660_v18 = vsel %vm565_vm4, %v1654_v12, -inf }
 0xa15   :  { %v1661_v20 = vmax.f32 %v1656_v16, %v1660_v18  ;;  %v1655_v21 = vsel %vm1643_vm7, %v1628_v10, %v1649_v13 }
 0xa16   :  { %v1662_v23 = vsel %vm565_vm4, %v1655_v21, -inf }
 0xa17   :  { %v1663_v25 = vmax.f32 %v1657_v22, %v1662_v23 }
 0xa19   :  { %v1664_v26 = vmax.f32 %v1661_v20, %v1663_v25 }
 0xa1b   :  { %v1666_v27 = vmax.f32 %v1664_v26, %v1665_v5 }
 0xa1d   :  { %v1667_v29 = vrot.slane %v1666_v27, 4 }
 0xa1f   :  { %v1668_v30 = vmax.f32 %v1666_v27, %v1667_v29 }
 0xa21   :  { %v1669_v41 = vrot.slane %v1668_v30, 2 }
 0xa23   :  { %v1670_v43 = vmax.f32 %v1668_v30, %v1669_v41 }
 0xa25   :  { %v1671_v45 = vrot.slane %v1670_v43, 1 }
 0xa27   :  { %v1672_v46 = vmax.f32 %v1670_v43, %v1671_v45 }
 0xa29   :  { %v1678_v47 = vsub.f32 %v1655_v21, %v1672_v46  ;;  %v1673_v48 = vsub.f32 %v1650_v7, %v1672_v46  ;;  %v1674_v49 = vsub.f32 %v1651_v11, %v1672_v46  ;;  %v1675_v15 = vsub.f32 %v1652_v60, %v1672_v46 }
 0xa2a   :  { %v1676_v17 = vsub.f32 %v1653_v1, %v1672_v46  ;;  %v1677_v19 = vsub.f32 %v1654_v12, %v1672_v46 }
 0xa2b   :  { %v1679_v50 = vmul.f32 1.442695, %v1673_v48  ;;  %v1681_v51 = vmul.f32 1.442695, %v1674_v49  ;;  %v1683_v52 = vmul.f32 1.442695, %v1675_v15 }
 0xa2c   :  { %v1685_v53 = vmul.f32 1.442695, %v1676_v17  ;;  %v1689_v54 = vmul.f32 1.442695, %v1678_v47  ;;  %v1687_v55 = vmul.f32 1.442695, %v1677_v19 }
 0xa2d   :  { %14713 = vpow2.f32 %v1679_v50 }
 0xa2e   :  { %14715 = vpow2.f32 %v1681_v51 }
 0xa2f   :  { %14717 = vpow2.f32 %v1683_v52 }
 0xa30   :  { %14719 = vpow2.f32 %v1685_v53 }
 0xa31   :  { %14721 = vpow2.f32 %v1689_v54 }
 0xa32   :  { %14723 = vpow2.f32 %v1687_v55 }
 0xa37   :  { %v14714_v56 = vpop.eup %14713 }
 0xa38   :  { %v14716_v57 = vpop.eup %14715 }
 0xa39   :  { %v15868_v58 = vpop.eup %14717  ;;  %v1691_v59 = vpack.c.bf16 %v14716_v57, %v14714_v56 }
 0xa3a   :  { %v15870_v60 = vpop.eup %14719 }
 0xa3b   :  { %13441 = vmatpush3.bf16.msra.mxu0 %v1691_v59  ;;  %v15873_v61 = vpop.eup %14721  ;;  %v1692_v62 = vpack.c.bf16 %v15870_v60, %v15868_v58 }
 0xa3c   :  { %13442 = vmatprep.subr.bf16.mxu0 %v17124_v0  ;;  %v15877_v63 = vpop.eup %14723 }
 0xa3d   :  { %v1693_v1 = vpack.c.bf16 %v15873_v61, %v15877_v63 }
 0xa3f   :  { %13443 = vmatpush3.bf16.msra.mxu0 %v1692_v62  ;;  %v13841_v62 = vld [vmem:[%s17214_s20] sm:$0xff]  }
 0xa40   :  { %13444 = vmatprep.subr.bf16.mxu0 %v17124_v0 }
 0xa43   :  { %13445 = vmatpush3.bf16.msra.mxu0 %v1693_v1  ;;  %v13843_v1 = vld [vmem:[%s17214_s20 + $0x10] sm:$0xff]  }
 0xa44   :  { %13450 = vmatprep.subr.bf16.mxu0 %v17124_v0 }
 0xa46   :  { %13447 = vmatmul.mubr.msk.bf16.vlgmr.msra.gmra.mrb[52].mxu0 %vm868_vm12, %v15707_v44 }
 0xa47   :  { %13452 = vmatprep.mubr.msk.bf16.mxu0 %vm15319_vm0, %v17124_v0 }
 0xb19   :  { %v1728_v2 = vpop.f32.mrb[52].mxu0 }
 0xb1a   :  { %v13448_v3 = vpop.f32.mrb[53].mxu0 }
 0xb1b   :  { %v1731_v4 = vpop.f32.mrb[54].mxu0  ;;  %v13845_v3 = vld [vmem:[%s17214_s20 + $0x20] sm:$0xff]  }
 0xb1c   :  { %v1735_v5 = vpack.c.bf16 %v1731_v4, %v1728_v2  ;;  %v13449_v6 = vpop.f32.mrb[55].mxu0  ;;  %v13844_v2 = vld [vmem:[%s17214_s20 + $0x18] sm:$0xff]   ;;  %v13846_v4 = vld [vmem:[%s17214_s20 + $0x28] sm:$0xff]  }
 0xb1e   :  { %13451 = vmatpush3.bf16.msra.mxu0 %v1735_v5  ;;  %v13847_v5 = vld [vmem:[%s17214_s20 + $0x30] sm:$0xff]  }
 0xb1f   :  { %13464 = vmatprep.subr.bf16.mxu0 %v17124_v0 }
 0xb21   :  { %13453 = vmatmul.mubr.msk.bf16.vlgmr.msra.gmra.mrb[56].mxu0 %vm653_vm5, %v15644_v28  ;;  %v1865_v28 = vld [vmem:[#allocation16] sm:$0x3] }
 0xb22   :  { %13465 = vmatpush3.bf16.msra.mxu0 %v1340_v40  ;;  %13456 = vmatprep.mubr.msk.bf16.mxu0 %vm15319_vm0, %v17124_v0 }
 0xb23   :  { %13478 = vmatprep.subr.bf16.mxu0 %v17124_v0 }
 0xb29   :  { %13457 = vmatmul.mubr.msk.bf16.gmra.mrb[60].mxu0 %vm653_vm5, %v15652_v31  ;;  %v1876_v31 = vsel %vm575_vm2, %v1865_v28, 0 }
 0xb2a   :  { %13460 = vmatprep.mubr.msk.bf16.mxu0 %vm15319_vm0, %v17124_v0 }
 0xb31   :  { %13461 = vmatmul.mubr.msk.bf16.gmra.mrb[64].mxu0 %vm653_vm5, %v15660_v32 }
 0xb32   :  { %13466 = vmatprep.mubr.msk.bf16.mxu0 %vm15319_vm0, %v17124_v0 }
 0xb39   :  { %13467 = vmatmul.mubr.msk.bf16.vlgmr.msra.gmra.mrb[68].mxu0 %vm653_vm5, %v15667_v33 }
 0xb3a   :  { %13470 = vmatprep.mubr.msk.bf16.mxu0 %vm15319_vm0, %v17124_v0  ;;  %13479 = vmatpush3.bf16.msra.mxu0 %v1876_v31 }
 0xb3b   :  { %13502 = vmatprep.subr.bf16.mxu0 %v17124_v0 }
 0xb41   :  { %13471 = vmatmul.mubr.msk.bf16.gmra.mrb[72].mxu0 %vm653_vm5, %v15674_v34 }
 0xb42   :  { %13474 = vmatprep.mubr.msk.bf16.mxu0 %vm15319_vm0, %v17124_v0 }
 0xb49   :  { %13475 = vmatmul.mubr.msk.bf16.gmra.mrb[76].mxu0 %vm653_vm5, %v15681_v35 }
 0xb4a   :  { %13480 = vmatprep.mubr.msk.bf16.mxu0 %vm15319_vm0, %v17124_v0 }
 0xbf4   :  { %v1770_v32 = vpop.f32.mrb[56].mxu0 }
 0xbf5   :  { %v1771_v33 = vadd.f32 1e-16, %v1770_v32  ;;  %v13454_v39 = vpop.f32.mrb[57].mxu0 }
 0xbf6   :  { %v1773_v42 = vpop.f32.mrb[58].mxu0 }
 0xbf7   :  { %14725 = vrcp.f32 %v1771_v33  ;;  %v1774_v34 = vadd.f32 1e-16, %v1773_v42  ;;  %v13455_v40 = vpop.f32.mrb[59].mxu0 }
 0xbf9   :  { %14727 = vrcp.f32 %v1774_v34 }
 0xbfc   :  { %v1778_v7 = vpop.f32.mrb[60].mxu0 }
 0xbfd   :  { %v1779_v8 = vadd.f32 1e-16, %v1778_v7  ;;  %v13458_v35 = vpop.f32.mrb[61].mxu0 }
 0xbfe   :  { %v1781_v9 = vpop.f32.mrb[62].mxu0 }
 0xbff   :  { %14729 = vrcp.f32 %v1779_v8  ;;  %v1782_v10 = vadd.f32 1e-16, %v1781_v9  ;;  %v13459_v11 = vpop.f32.mrb[63].mxu0 }
 0xc01   :  { %v14726_v12 = vpop.eup %14725  ;;  %14731 = vrcp.f32 %v1782_v10 }
 0xc02   :  { %v1799_v14 = vmul.f32 %v14726_v12, %v14714_v56 }
 0xc03   :  { %v14728_v13 = vpop.eup %14727 }
 0xc04   :  { %v1800_v16 = vmul.f32 %v14728_v13, %v14716_v57  ;;  %v1786_v18 = vpop.f32.mrb[64].mxu0 }
 0xc05   :  { %v1787_v20 = vadd.f32 1e-16, %v1786_v18  ;;  %v13462_v21 = vpop.f32.mrb[65].mxu0 }
 0xc06   :  { %v1862_v22 = vpack.c.bf16 %v1800_v16, %v1799_v14  ;;  %v1789_v23 = vpop.f32.mrb[66].mxu0  ;;  %v13848_v16 = vld [vmem:[%s17214_s20 + $0x38] sm:$0xff]  }
 0xc07   :  { %14733 = vrcp.f32 %v1787_v20  ;;  %v1790_v25 = vadd.f32 1e-16, %v1789_v23  ;;  %v13463_v26 = vpop.f32.mrb[67].mxu0 }
 0xc08   :  { %13481 = vmatmul.mubr.msk.bf16.vlgmr.msra.gmra.mrb[80].mxu0 %vm565_vm4, %v1862_v22  ;;  %v2109_v26 = vld [vmem:[#allocation19 + $0x40] sm:$0xff] }
 0xc09   :  { %v14730_v27 = vpop.eup %14729  ;;  %14735 = vrcp.f32 %v1790_v25  ;;  %13484 = vmatprep.mubr.msk.bf16.mxu0 %vm15319_vm0, %v17124_v0  ;;  %13503 = vmatpush3.bf16.msra.mxu0 %v13841_v62  ;;  %v2101_v25 = vld [vmem:[#allocation19] sm:$0xff] }
 0xc0a   :  { %v1801_v30 = vmul.f32 %v14730_v27, %v15868_v58  ;;  %13504 = vmatprep.subr.bf16.mxu0 %v17124_v0  ;;  %v2104_v27 = vld [vmem:[#allocation19 + $0x18] sm:$0xff] }
 0xc0b   :  { %v14732_v29 = vpop.eup %14731 }
 0xc0c   :  { %v1802_v41 = vmul.f32 %v14732_v29, %v15870_v60  ;;  %v1839_v43 = vpop.f32.mrb[68].mxu0  ;;  %v12018_v29 = vcombine.high %v2101_v25, %v2109_v26 }
 0xc0d   :  { %v13468_v45 = vpop.f32.mrb[69].mxu0 }
 0xc0e   :  { %v1863_v46 = vpack.c.bf16 %v1802_v41, %v1801_v30  ;;  %v1842_v47 = vpop.f32.mrb[70].mxu0  ;;  %v2112_v30 = vld [vmem:[#allocation19 + $0x58] sm:$0xff]  ;;  %v12017_v41 = vcombine.low %v2101_v25, %v2109_v26 }
 0xc0f   :  { %v1938_v48 = vpack.c.bf16 %v1842_v47, %v1839_v43  ;;  %v13469_v49 = vpop.f32.mrb[71].mxu0  ;;  %v12023_v43 = vcombine.low %v2104_v27, %v2112_v30  ;;  %v12024_v45 = vcombine.high %v2104_v27, %v2112_v30  ;;  %v2120_v47 = vld [vmem:[#allocation19 + $0x98] sm:$0xff]  ;;  %v2129_v30 = vld [vmem:[#allocation19 + $0xe0] sm:$0xff] }
 0xc10   :  { %13485 = vmatmul.mubr.msk.bf16.gmra.mrb[84].mxu0 %vm565_vm4, %v1863_v46  ;;  %v2125_v46 = vld [vmem:[#allocation19 + $0xc0] sm:$0xff]  ;;  %v2128_v49 = vld [vmem:[#allocation19 + $0xd8] sm:$0xff] }
 0xc11   :  { %v14734_v15 = vpop.eup %14733  ;;  %13488 = vmatprep.mubr.msk.bf16.mxu0 %vm15319_vm0, %v17124_v0 }
 0xc12   :  { %v1803_v19 = vmul.f32 %v14734_v15, %v15877_v63  ;;  %v13842_v63 = vld [vmem:[%s17214_s20 + $0x8] sm:$0xff]  }
 0xc13   :  { %v14736_v17 = vpop.eup %14735  ;;  %13505 = vmatpush3.bf16.msra.mxu0 %v13842_v63 }
 0xc14   :  { %v1804_v50 = vmul.f32 %v14736_v17, %v15873_v61  ;;  %v1847_v51 = vpop.f32.mrb[72].mxu0  ;;  %13506 = vmatprep.subr.bf16.mxu0 %v17124_v0  ;;  %v12039_v17 = vcombine.low %v2120_v47, %v2128_v49 }
 0xc15   :  { %v13472_v52 = vpop.f32.mrb[73].mxu0 }
 0xc16   :  { %v1864_v53 = vpack.c.bf16 %v1804_v50, %v1803_v19  ;;  %v1850_v54 = vpop.f32.mrb[74].mxu0  ;;  %v12040_v19 = vcombine.high %v2120_v47, %v2128_v49  ;;  %v17126_v50 = vmov 0   ;;  %v2110_v52 = vld [vmem:[#allocation19 + $0x48] sm:$0xff] }
 0xc17   :  { %v1939_v55 = vpack.c.bf16 %v1850_v54, %v1847_v51  ;;  %v13473_v56 = vpop.f32.mrb[75].mxu0  ;;  %13507 = vmatpush3.bf16.msra.mxu0 %v13843_v1  ;;  %v2102_v51 = vld [vmem:[#allocation19 + $0x8] sm:$0xff] }
 0xc18   :  { %13489 = vmatmul.mubr.msk.bf16.gmra.mrb[88].mxu0 %vm565_vm4, %v1864_v53  ;;  %13508 = vmatprep.subr.bf16.mxu0 %v17124_v0  ;;  %v2106_v53 = vld [vmem:[#allocation19 + $0x28] sm:$0xff]  ;;  %v12019_v54 = vcombine.low %v2102_v51, %v2110_v52 }
 0xc19   :  { %13518 = vmatprep.mubr.msk.bf16.mxu0 %vm15319_vm0, %v17124_v0  ;;  %v2114_v56 = vld [vmem:[#allocation19 + $0x68] sm:$0xff] }
 0xc1b   :  { %13509 = vmatpush3.bf16.msra.mxu0 %v13844_v2 }
 0xc1c   :  { %v1855_v57 = vpop.f32.mrb[76].mxu0  ;;  %13510 = vmatprep.subr.bf16.mxu0 %v17124_v0 }
 0xc1d   :  { %v13476_v58 = vpop.f32.mrb[77].mxu0 }
 0xc1e   :  { %v1858_v59 = vpop.f32.mrb[78].mxu0  ;;  %v12028_v58 = vcombine.high %v2106_v53, %v2114_v56 }
 0xc1f   :  { %v1940_v60 = vpack.c.bf16 %v1858_v59, %v1855_v57  ;;  %v13477_v61 = vpop.f32.mrb[79].mxu0  ;;  %13511 = vmatpush3.bf16.msra.mxu0 %v13845_v3  ;;  %v12027_v57 = vcombine.low %v2106_v53, %v2114_v56  ;;  %v12008_v59 = vld [vmem:[#allocation17] ss:$0 sm:$0xff]  ;;  %v2118_v3 = vld [vmem:[#allocation19 + $0x88] sm:$0xff]  ;;  %v13851_v53 = vld [vmem:[%s17217_s2] sm:$0xff]  }
 0xc20   :  { %13512 = vmatprep.subr.bf16.mxu0 %v17124_v0 }
 0xc23   :  { %13513 = vmatpush3.bf16.msra.mxu0 %v13846_v4  ;;  %v2126_v4 = vld [vmem:[#allocation19 + $0xc8] sm:$0xff] }
 0xc24   :  { %13514 = vmatprep.subr.bf16.mxu0 %v17124_v0 }
 0xc27   :  { %13515 = vmatpush3.bf16.msra.mxu0 %v13847_v5  ;;  %v2122_v5 = vld [vmem:[#allocation19 + $0xa8] sm:$0xff] }
 0xc28   :  { %13516 = vmatprep.subr.bf16.mxu0 %v17124_v0 }
 0xc2b   :  { %13517 = vmatpush3.bf16.msra.mxu0 %v13848_v16 }
 0xc2c   :  { %2425 = vmatprep.subr.bf16.mxu0 %v12024_v45 }
 0xcdb   :  { %v1912_v6 = vpop.f32.mrb[80].mxu0 }
 0xcdc   :  { %v13482_v28 = vpop.f32.mrb[81].mxu0 }
 0xcdd   :  { %v1915_v31 = vpop.f32.mrb[82].mxu0 }
 0xcde   :  { %v1935_v32 = vpack.c.bf16 %v1915_v31, %v1912_v6  ;;  %v13483_v33 = vpop.f32.mrb[83].mxu0  ;;  %v2130_v6 = vld [vmem:[#allocation19 + $0xe8] sm:$0xff] }
 0xcdf   :  { %v12036_v33 = vcombine.high %v2118_v3, %v2126_v4 }
 0xce0   :  { %v1941_v39 = vmul.bf16 %v1938_v48, %v1935_v32 }
 0xce2   :  { %13493 = vmatpush3.bf16.msra.mxu1 %v1941_v39  ;;  %v12044_v39 = vcombine.high %v2122_v5, %v2130_v6 }
 0xce3   :  { %v1920_v42 = vpop.f32.mrb[84].mxu0  ;;  %13494 = vmatprep.subr.bf16.mxu1 %v17124_v0 }
 0xce4   :  { %v13486_v34 = vpop.f32.mrb[85].mxu0 }
 0xce5   :  { %v1923_v40 = vpop.f32.mrb[86].mxu0  ;;  %v2111_v34 = vld [vmem:[#allocation19 + $0x50] sm:$0xff] }
 0xce6   :  { %v1936_v7 = vpack.c.bf16 %v1923_v40, %v1920_v42  ;;  %v13487_v8 = vpop.f32.mrb[87].mxu0  ;;  %v2103_v42 = vld [vmem:[#allocation19 + $0x10] sm:$0xff]  ;;  %v2108_v40 = vld [vmem:[#allocation19 + $0x38] sm:$0xff] }
 0xce7   :  { %v12035_v8 = vcombine.low %v2118_v3, %v2126_v4  ;;  %v12021_v16 = vcombine.low %v2103_v42, %v2111_v34 }
 0xce8   :  { %v1942_v35 = vmul.bf16 %v1939_v55, %v1936_v7  ;;  %v12020_v55 = vcombine.high %v2102_v51, %v2110_v52  ;;  %v2116_v7 = vld [vmem:[#allocation19 + $0x78] sm:$0xff] }
 0xcea   :  { %13495 = vmatpush3.bf16.msra.mxu1 %v1942_v35  ;;  %v12043_v35 = vcombine.low %v2122_v5, %v2130_v6 }
 0xceb   :  { %v1928_v9 = vpop.f32.mrb[88].mxu0  ;;  %13496 = vmatprep.subr.bf16.mxu1 %v17124_v0 }
 0xcec   :  { %v13490_v10 = vpop.f32.mrb[89].mxu0 }
 0xced   :  { %v1931_v11 = vpop.f32.mrb[90].mxu0  ;;  %v12032_v10 = vcombine.high %v2108_v40, %v2116_v7 }
 0xcee   :  { %v1937_v12 = vpack.c.bf16 %v1931_v11, %v1928_v9  ;;  %v13491_v13 = vpop.f32.mrb[91].mxu0  ;;  %v12022_v9 = vcombine.high %v2103_v42, %v2111_v34  ;;  %v2119_v11 = vld [vmem:[#allocation19 + $0x90] sm:$0xff] }
 0xcef   :  { %v2124_v13 = vld [vmem:[#allocation19 + $0xb8] sm:$0xff] }
 0xcf0   :  { %v1943_v14 = vmul.bf16 %v1940_v60, %v1937_v12  ;;  %v2127_v12 = vld [vmem:[#allocation19 + $0xd0] sm:$0xff] }
 0xcf1   :  { %v12037_v25 = vcombine.low %v2119_v11, %v2127_v12 }
 0xcf2   :  { %13497 = vmatpush3.bf16.msra.mxu1 %v1943_v14  ;;  %v2132_v14 = vld [vmem:[#allocation19 + $0xf8] sm:$0xff] }
 0xcf3   :  { %2296 = vmatprep.subr.bf16.mxu1 %v12018_v29  ;;  %v12047_v26 = vcombine.low %v2124_v13, %v2132_v14  ;;  %v2121_v29 = vld [vmem:[#allocation19 + $0xa0] sm:$0xff] }
 0xcf4   :  { %v12042_v45 = vcombine.high %v2121_v29, %v2129_v30  ;;  %v12041_v47 = vcombine.low %v2121_v29, %v2129_v30 }
 0xcf5   :  { %13499 = vmatmul.mubr.msk.bf16.vlgmr.msra.gmra.mrb[44].mxu1 %vm868_vm12, %v15707_v44  ;;  %v2117_v44 = vld [vmem:[#allocation19 + $0x80] sm:$0xff] }
 0xcf6   :  { %2297 = vmatpush1.bf16.msra.mxu1 %v12017_v41  ;;  %v12034_v48 = vcombine.high %v2117_v44, %v2125_v46  ;;  %v12033_v15 = vcombine.low %v2117_v44, %v2125_v46  ;;  %2328 = vmatprep.mubr.bf16.mxu1 %v17126_v50  ;;  %v2107_v44 = vld [vmem:[#allocation19 + $0x30] sm:$0xff] }
 0xcf7   :  { %v2115_v46 = vld [vmem:[#allocation19 + $0x70] sm:$0xff] }
 0xcf8   :  { %2298 = vmatprep.subr.bf16.mxu1 %v12034_v48  ;;  %v13850_v48 = vld [vmem:[%s17216_s1 + $0x8] sm:$0xff]   ;;  %v12030_v49 = vcombine.high %v2107_v44, %v2115_v46 }
 0xcfa   :  { %2299 = vmatpush1.bf16.msra.mxu1 %v12033_v15  ;;  %v2123_v15 = vld [vmem:[#allocation19 + $0xb0] sm:$0xff] }
 0xcfb   :  { %2339 = vmatprep.subr.bf16.mxu1 %v12020_v55  ;;  %v2770_v55 = vld [vmem:[#allocation20] sm:$0x3] }
 0xcfc   :  { %v2772_v56 = vsel %vm575_vm2, %v2770_v55, 0 }
 0xdc8   :  { %v1978_v18 = vpop.f32.mrb[44].mxu1 }
 0xdc9   :  { %v13500_v20 = vpop.f32.mrb[45].mxu1 }
 0xdca   :  { %v1981_v21 = vpop.f32.mrb[46].mxu1  ;;  %v12038_v20 = vcombine.high %v2119_v11, %v2127_v12 }
 0xdcb   :  { %v1985_v22 = vpack.c.bf16 %v1981_v21, %v1978_v18  ;;  %v13501_v23 = vpop.f32.mrb[47].mxu1  ;;  %v12031_v18 = vcombine.low %v2108_v40, %v2116_v7  ;;  %v12048_v21 = vcombine.high %v2124_v13, %v2132_v14 }
 0xdcc   :  { %v2113_v23 = vld [vmem:[#allocation19 + $0x60] sm:$0xff] }
 0xdcd   :  { %13519 = vmatmul.mubr.bf16.vlgmr.msra.gmra.mrb[92].mxu0 %v1985_v22  ;;  %v2105_v22 = vld [vmem:[#allocation19 + $0x20] sm:$0xff] }
 0xdce   :  { %2426 = vmatpush1.bf16.msra.mxu0 %v12023_v43  ;;  %2457 = vmatprep.mubr.bf16.mxu0 %v17126_v50  ;;  %v12026_v27 = vcombine.high %v2105_v22, %v2113_v23  ;;  %v12025_v41 = vcombine.low %v2105_v22, %v2113_v23  ;;  %v13849_v43 = vld [vmem:[%s17216_s1] sm:$0xff]  }
 0xdcf   :  { %2427 = vmatprep.subr.bf16.mxu0 %v12040_v19  ;;  %v12029_v19 = vcombine.low %v2107_v44, %v2115_v46 }
 0xdd2   :  { %2428 = vmatpush1.bf16.msra.mxu0 %v12039_v17  ;;  %v2131_v17 = vld [vmem:[#allocation19 + $0xf0] sm:$0xff] }
 0xdd3   :  { %2511 = vmatprep.subr.bf16.mxu0 %v12028_v58  ;;  %v12046_v51 = vcombine.high %v2123_v15, %v2131_v17  ;;  %v12045_v52 = vcombine.low %v2123_v15, %v2131_v17 }
 0xea0   :  { %v2091_v60 = vpop.f32.mrb[92].mxu0 }
 0xea1   :  { %v2092_v61 = vadd.f32 %v12008_v59, %v2091_v60  ;;  %v13520_v62 = vpop.f32.mrb[93].mxu0 }
 0xea2   :  { %v2094_v63 = vpop.f32.mrb[94].mxu0 }
 0xea3   :  { %v2095_v1 = vadd.f32 %v12008_v59, %v2094_v63  ;;  %v13521_v2 = vpop.f32.mrb[95].mxu0  ;;  %v2098_v28 = vmax.f32 %v2092_v61, 0.0 }
 0xea5   :  { %v2099_v31 = vmax.f32 %v2095_v1, 0.0 }
 0xea7   :  { %v15952_v32 = vpack.c.bf16 %v2099_v31, %v2098_v28 }
 0xea9   :  { %17215 = vst [vmem:[#allocation64_spill] sm:$0xff] %v15952_v32  ;;  %12049 = vmatmul.mubr.msk.bf16.vlgmr.msra.gmra.mrb[48].mxu1 %vm1295_vm13, %v15952_v32  ;;  %12052 = vmatmul.mubr.msk.bf16.vlgmr.msra.gmra.mrb[96].mxu0 %vm1295_vm13, %v15952_v32 }
 0xeaa   :  { %2340 = vmatpush1.bf16.msra.mxu1 %v12019_v54  ;;  %2512 = vmatpush1.bf16.msra.mxu0 %v12027_v57  ;;  %v13852_v54 = vld [vmem:[%s17217_s2 + $0x8] sm:$0xff]  }
 0xeab   :  { %2341 = vmatprep.subr.bf16.mxu1 %v12036_v33  ;;  %2513 = vmatprep.subr.bf16.mxu0 %v12044_v39 }
 0xeac   :  { %2371 = vmatprep.mubr.bf16.mxu1 %v17126_v50  ;;  %2543 = vmatprep.mubr.bf16.mxu0 %v17126_v50 }
 0xeae   :  { %2342 = vmatpush1.bf16.msra.mxu1 %v12035_v8  ;;  %2514 = vmatpush1.bf16.msra.mxu0 %v12043_v35 }
 0xeaf   :  { %2382 = vmatprep.subr.bf16.mxu1 %v12022_v9  ;;  %2597 = vmatprep.subr.bf16.mxu0 %v12032_v10 }
 0xeb1   :  { %12050 = vmatmul.mubr.msk.bf16.vlgmr.msra.gmra.mrb[52].mxu1 %vm1295_vm13, %v15952_v32  ;;  %12054 = vmatmul.mubr.msk.bf16.vlgmr.msra.gmra.mrb[100].mxu0 %vm1295_vm13, %v15952_v32 }
 0xeb2   :  { %2383 = vmatpush1.bf16.msra.mxu1 %v12021_v16  ;;  %2598 = vmatpush1.bf16.msra.mxu0 %v12031_v18 }
 0xeb3   :  { %2384 = vmatprep.subr.bf16.mxu1 %v12038_v20  ;;  %2599 = vmatprep.subr.bf16.mxu0 %v12048_v21 }
 0xeb4   :  { %2414 = vmatprep.mubr.bf16.mxu1 %v17126_v50  ;;  %2629 = vmatprep.mubr.bf16.mxu0 %v17126_v50 }
 0xeb6   :  { %2385 = vmatpush1.bf16.msra.mxu1 %v12037_v25  ;;  %2600 = vmatpush1.bf16.msra.mxu0 %v12047_v26 }
 0xeb7   :  { %2468 = vmatprep.subr.bf16.mxu1 %v12026_v27  ;;  %13530 = vmatprep.subr.bf16.mxu0 %v17124_v0 }
 0xeb9   :  { %12051 = vmatmul.mubr.msk.bf16.vlgmr.msra.gmra.mrb[56].mxu1 %vm1295_vm13, %v15952_v32  ;;  %12056 = vmatmul.mubr.msk.bf16.vlgmr.msra.gmra.mrb[104].mxu0 %vm1295_vm13, %v15952_v32 }
 0xeba   :  { %2469 = vmatpush1.bf16.msra.mxu1 %v12025_v41  ;;  %13531 = vmatpush3.bf16.msra.mxu0 %v13849_v43 }
 0xebb   :  { %2470 = vmatprep.subr.bf16.mxu1 %v12042_v45  ;;  %13532 = vmatprep.subr.bf16.mxu0 %v17124_v0 }
 0xebc   :  { %2500 = vmatprep.mubr.bf16.mxu1 %v17126_v50  ;;  %13534 = vmatprep.mubr.msk.bf16.mxu0 %vm15319_vm0, %v17124_v0 }
 0xebe   :  { %2471 = vmatpush1.bf16.msra.mxu1 %v12041_v47  ;;  %13533 = vmatpush3.bf16.msra.mxu0 %v13850_v48  ;;  %v16074_v47 = vld [vmem:[%s17208_s27] sm:$0xff]  }
 0xebf   :  { %2554 = vmatprep.subr.bf16.mxu1 %v12030_v49  ;;  %13580 = vmatprep.subr.bf16.mxu0 %v17124_v0 }
 0xec1   :  { %12053 = vmatmul.mubr.msk.bf16.vlgmr.msra.gmra.mrb[60].mxu1 %vm1295_vm13, %v15952_v32  ;;  %13535 = vmatmul.mubr.msk.bf16.vlgmr.msra.gmra.mrb[108].mxu0 %vm1295_vm13, %v15952_v32 }
 0xec2   :  { %2555 = vmatpush1.bf16.msra.mxu1 %v12029_v19  ;;  %2586 = vmatprep.mubr.bf16.mxu1 %v17126_v50 }
 0xec3   :  { %2556 = vmatprep.subr.bf16.mxu1 %v12046_v51  ;;  %13586 = vmatprep.mubr.msk.bf16.mxu0 %vm15319_vm0, %v17124_v0 }
 0xec6   :  { %2557 = vmatpush1.bf16.msra.mxu1 %v12045_v52  ;;  %v16081_v52 = vld [vmem:[%s17208_s27 + $0x8] sm:$0xff]  }
 0xec7   :  { %13522 = vmatprep.subr.bf16.mxu1 %v17124_v0 }
 0xec9   :  { %12055 = vmatmul.mubr.msk.bf16.vlgmr.msra.gmra.mrb[64].mxu1 %vm1295_vm13, %v15952_v32 }
 0xeca   :  { %13523 = vmatpush3.bf16.msra.mxu1 %v13851_v53  ;;  %13526 = vmatprep.mubr.msk.bf16.mxu1 %vm15319_vm0, %v17124_v0 }
 0xecb   :  { %13524 = vmatprep.subr.bf16.mxu1 %v17124_v0 }
 0xece   :  { %13525 = vmatpush3.bf16.msra.mxu1 %v13852_v54 }
 0xecf   :  { %13538 = vmatprep.subr.bf16.mxu1 %v17124_v0 }
 0xed1   :  { %13527 = vmatmul.mubr.msk.bf16.vlgmr.msra.gmra.mrb[68].mxu1 %vm1295_vm13, %v15952_v32 }
 0xed2   :  { %13540 = vmatprep.mubr.msk.bf16.mxu1 %vm15319_vm0, %v17124_v0  ;;  %13539 = vmatpush3.bf16.msra.mxu1 %v2772_v56 }
 0xed3   :  { %13552 = vmatprep.subr.bf16.mxu1 %v17124_v0 }
 0xed9   :  { %13541 = vmatmul.mubr.msk.bf16.vlgmr.msra.gmra.mrb[72].mxu1 %vm565_vm4, %v15810_v36 }
 0xeda   :  { %13544 = vmatprep.mubr.msk.bf16.mxu1 %vm15319_vm0, %v17124_v0 }
 0xee1   :  { %13545 = vmatmul.mubr.msk.bf16.gmra.mrb[76].mxu1 %vm565_vm4, %v15817_v37 }
 0xee2   :  { %13548 = vmatprep.mubr.msk.bf16.mxu1 %vm15319_vm0, %v17124_v0 }
 0xee9   :  { %13549 = vmatmul.mubr.msk.bf16.gmra.mrb[80].mxu1 %vm565_vm4, %v15824_v38 }
 0xeea   :  { %13554 = vmatprep.mubr.msk.bf16.mxu1 %vm15319_vm0, %v17124_v0 }
 0xf7c   :  { %v16012_v57 = vpop.f32.mrb[48].mxu1  ;;  %v16014_v58 = vpop.f32.mrb[96].mxu0 }
 0xf7d   :  { %v16016_v36 = vpop.f32.mrb[49].mxu1  ;;  %v16018_v59 = vpop.f32.mrb[97].mxu0 }
 0xf7e   :  { %v16020_v60 = vpop.f32.mrb[50].mxu1  ;;  %v16022_v37 = vpop.f32.mrb[98].mxu0 }
 0xf7f   :  { %v2640_v61 = vpack.c.bf16 %v16020_v60, %v16012_v57  ;;  %v16028_v62 = vpop.f32.mrb[51].mxu1  ;;  %v16030_v63 = vpop.f32.mrb[99].mxu0  ;;  %v17218_v57 = vpack.c.bf16 %v16022_v37, %v16014_v58  ;;  %v15321_v60 = vmov 1983009808  }
 0xf80   :  { %v2641_v1 = vpack.c.bf16 %v16028_v62, %v16016_v36  ;;  %v2647_v2 = vpack.c.bf16 %v16030_v63, %v16018_v59  ;;  %v3637_v37 = vunpack.c.l.s4 %v15321_v60 }
 0xf82   :  { %v3638_v62 = vunpack.c.0.s8 %v3637_v37 }
 0xf84   :  { %v16036_v3 = vpop.f32.mrb[52].mxu1  ;;  %v16038_v4 = vpop.f32.mrb[100].mxu0 }
 0xf85   :  { %v16040_v5 = vpop.f32.mrb[53].mxu1  ;;  %v16042_v6 = vpop.f32.mrb[101].mxu0 }
 0xf86   :  { %v16044_v28 = vpop.f32.mrb[54].mxu1  ;;  %v16046_v31 = vpop.f32.mrb[102].mxu0 }
 0xf87   :  { %v2642_v33 = vpack.c.bf16 %v16044_v28, %v16036_v3  ;;  %v16052_v42 = vpop.f32.mrb[55].mxu1  ;;  %v16054_v34 = vpop.f32.mrb[103].mxu0  ;;  %v17220_v58 = vpack.c.bf16 %v16046_v31, %v16038_v4 }
 0xf88   :  { %v2643_v40 = vpack.c.bf16 %v16052_v42, %v16040_v5  ;;  %v17219_v36 = vpack.c.bf16 %v16054_v34, %v16042_v6  ;;  %v3628_v34 = vld [vmem:[#allocation22 + $0x8] sm:$0xff] }
 0xf8c   :  { %v2416_v8 = vpop.f32.mrb[56].mxu1  ;;  %v16060_v35 = vpop.f32.mrb[104].mxu0 }
 0xf8d   :  { %v2418_v9 = vpop.f32.mrb[57].mxu1  ;;  %v16062_v10 = vpop.f32.mrb[105].mxu0 }
 0xf8e   :  { %v2420_v11 = vpop.f32.mrb[58].mxu1  ;;  %v16064_v12 = vpop.f32.mrb[106].mxu0 }
 0xf8f   :  { %v2644_v13 = vpack.c.bf16 %v2420_v11, %v2416_v8  ;;  %v2422_v16 = vpop.f32.mrb[59].mxu1  ;;  %v16068_v18 = vpop.f32.mrb[107].mxu0  ;;  %v16088_v8 = vld [vmem:[%s17208_s27 + $0x10] sm:$0xff]   ;;  %v16102_v11 = vld [vmem:[%s17209_s5 + $0x8] sm:$0xff]   ;;  %v17223_v4 = vpack.c.bf16 %v16064_v12, %v16060_v35  ;;  %v3652_v35 = vcombine.high %v3628_v34, %v3628_v34 }
 0xf90   :  { %v2645_v20 = vpack.c.bf16 %v2422_v16, %v2418_v9  ;;  %v16095_v9 = vld [vmem:[%s17209_s5] sm:$0xff]   ;;  %v16109_v16 = vld [vmem:[%s17209_s5 + $0x10] sm:$0xff]   ;;  %v17221_v59 = vpack.c.bf16 %v16068_v18, %v16062_v10 }
 0xf94   :  { %v2502_v22 = vpop.f32.mrb[60].mxu1  ;;  %v2763_v23 = vpop.f32.mrb[108].mxu0 }
 0xf95   :  { %v2504_v25 = vpop.f32.mrb[61].mxu1  ;;  %v13536_v26 = vpop.f32.mrb[109].mxu0 }
 0xf96   :  { %v2506_v27 = vpop.f32.mrb[62].mxu1  ;;  %v2766_v29 = vpop.f32.mrb[110].mxu0 }
 0xf97   :  { %v2648_v30 = vpack.c.bf16 %v2506_v27, %v2502_v22  ;;  %v2832_v41 = vpack.c.bf16 %v2766_v29, %v2763_v23  ;;  %v2508_v43 = vpop.f32.mrb[63].mxu1  ;;  %v13537_v45 = vpop.f32.mrb[111].mxu0 }
 0xf98   :  { %v2649_v44 = vpack.c.bf16 %v2508_v43, %v2504_v25 }
 0xf99   :  { %13553 = vmatpush3.bf16.msra.mxu1 %v2832_v41 }
 0xf9a   :  { %13566 = vmatprep.subr.bf16.mxu1 %v17124_v0 }
 0xf9c   :  { %v2588_v46 = vpop.f32.mrb[64].mxu1  ;;  %13555 = vmatmul.mubr.msk.bf16.vlgmr.msra.gmra.mrb[72].mxu1 %vm653_vm5, %v16074_v47 }
 0xf9d   :  { %v2590_v48 = vpop.f32.mrb[65].mxu1  ;;  %13558 = vmatprep.mubr.msk.bf16.mxu1 %vm15319_vm0, %v17124_v0 }
 0xf9e   :  { %v2592_v49 = vpop.f32.mrb[66].mxu1 }
 0xf9f   :  { %v2652_v15 = vpack.c.bf16 %v2592_v49, %v2588_v46  ;;  %v2594_v17 = vpop.f32.mrb[67].mxu1 }
 0xfa0   :  { %v2653_v19 = vpack.c.bf16 %v2594_v17, %v2590_v48 }
 0xfa4   :  { %v2706_v51 = vpop.f32.mrb[68].mxu1  ;;  %13559 = vmatmul.mubr.msk.bf16.gmra.mrb[76].mxu1 %vm653_vm5, %v16081_v52 }
 0xfa5   :  { %v13528_v53 = vpop.f32.mrb[69].mxu1  ;;  %13562 = vmatprep.mubr.msk.bf16.mxu1 %vm15319_vm0, %v17124_v0 }
 0xfa6   :  { %v2709_v54 = vpop.f32.mrb[70].mxu1 }
 0xfa7   :  { %v2831_v55 = vpack.c.bf16 %v2709_v54, %v2706_v51  ;;  %v13529_v56 = vpop.f32.mrb[71].mxu1 }
 0xfa9   :  { %13567 = vmatpush3.bf16.msra.mxu1 %v2831_v55 }
 0xfaa   :  { %3246 = vmatprep.subr.bf16.mxu1 %v2645_v20 }
 0xfac   :  { %13563 = vmatmul.mubr.msk.bf16.gmra.mrb[80].mxu1 %vm653_vm5, %v16088_v8 }
 0xfad   :  { %13568 = vmatprep.mubr.msk.bf16.mxu1 %vm15319_vm0, %v17124_v0 }
 0xfb4   :  { %13569 = vmatmul.mubr.msk.bf16.vlgmr.msra.gmra.mrb[72].mxu1 %vm653_vm5, %v16095_v9 }
 0xfb5   :  { %3247 = vmatpush1.bf16.msra.mxu1 %v2644_v13  ;;  %13572 = vmatprep.mubr.msk.bf16.mxu1 %vm15319_vm0, %v17124_v0 }
 0xfb6   :  { %3372 = vmatprep.subr.bf16.mxu1 %v2649_v44 }
 0xfbc   :  { %13573 = vmatmul.mubr.msk.bf16.gmra.mrb[76].mxu1 %vm653_vm5, %v16102_v11 }
 0xfbd   :  { %13576 = vmatprep.mubr.msk.bf16.mxu1 %vm15319_vm0, %v17124_v0 }
 0xfc4   :  { %13577 = vmatmul.mubr.msk.bf16.gmra.mrb[80].mxu1 %vm653_vm5, %v16109_v16 }
 0xfc5   :  { %3278 = vmatprep.mubr.bf16.mxu1 %v17126_v50 }
 0xfcc   :  { %12082 = vmatmul.mubr.msk.bf16.vlgmr.msra.gmra.mrb[84].mxu1 %vm653_vm5, %v16095_v9 }
 0xfcd   :  { %3373 = vmatpush1.bf16.msra.mxu1 %v2648_v30  ;;  %3288 = vmatprep.mubr.bf16.mxu1 %v17126_v50 }
 0xfce   :  { %3498 = vmatprep.subr.bf16.mxu1 %v2653_v19 }
 0xfd4   :  { %12083 = vmatmul.mubr.msk.bf16.gmra.mrb[88].mxu1 %vm653_vm5, %v16102_v11 }
 0xfd5   :  { %3298 = vmatprep.mubr.bf16.mxu1 %v17126_v50 }
 0xfdc   :  { %12084 = vmatmul.mubr.msk.bf16.gmra.mrb[92].mxu1 %vm653_vm5, %v16109_v16 }
 0xfdd   :  { %3404 = vmatprep.mubr.bf16.mxu1 %v17126_v50 }
 0xfe4   :  { %12088 = vmatmul.mubr.msk.bf16.vlgmr.msra.gmra.mrb[96].mxu1 %vm653_vm5, %v16095_v9 }
 0xfe5   :  { %3499 = vmatpush1.bf16.msra.mxu1 %v2652_v15  ;;  %3414 = vmatprep.mubr.bf16.mxu1 %v17126_v50 }
 0xfec   :  { %12089 = vmatmul.mubr.msk.bf16.gmra.mrb[100].mxu1 %vm653_vm5, %v16102_v11 }
 0xfed   :  { %3424 = vmatprep.mubr.bf16.mxu1 %v17126_v50 }
 0xff4   :  { %12090 = vmatmul.mubr.msk.bf16.gmra.mrb[104].mxu1 %vm653_vm5, %v16109_v16 }
 0xff5   :  { %3530 = vmatprep.mubr.bf16.mxu1 %v17126_v50 }
 0xffc   :  { %12094 = vmatmul.mubr.msk.bf16.vlgmr.msra.gmra.mrb[108].mxu1 %vm653_vm5, %v16095_v9 }
 0xffd   :  { %3540 = vmatprep.mubr.bf16.mxu1 %v17126_v50 }
0x1004   :  { %12095 = vmatmul.mubr.msk.bf16.gmra.mrb[112].mxu1 %vm653_vm5, %v16102_v11 }
0x1005   :  { %3550 = vmatprep.mubr.bf16.mxu1 %v17126_v50 }
0x100c   :  { %12096 = vmatmul.mubr.msk.bf16.gmra.mrb[116].mxu1 %vm653_vm5, %v16109_v16 }
0x100d   :  { %3792 = vmatprep.mubr.bf16.mxu1 %v17126_v50 }
0x1087   :  { %v2924_v13 = vpop.f32.mrb[72].mxu1 }
0x1088   :  { %v13570_v20 = vpop.f32.mrb[73].mxu1  ;;  %v2959_v45 = vmul.f32 0.2, %v2924_v13  ;;  %vm2953_vm10 = vcmp.gt.f32.partialorder %v2924_v13, 0.0 }
0x1089   :  { %v2927_v22 = vpop.f32.mrb[74].mxu1 }
0x108a   :  { %v13571_v23 = vpop.f32.mrb[75].mxu1  ;;  %v2960_v49 = vmul.f32 0.2, %v2927_v22  ;;  %vm2954_vm11 = vcmp.gt.f32.partialorder %v2927_v22, 0.0  ;;  %v2965_v19 = vsel %vm2953_vm10, %v2924_v13, %v2959_v45 }
0x108c   :  { %v2966_v55 = vsel %vm2954_vm11, %v2927_v22, %v2960_v49 }
0x108f   :  { %v2932_v25 = vpop.f32.mrb[76].mxu1 }
0x1090   :  { %vm2955_vm8 = vcmp.gt.f32.partialorder %v2932_v25, 0.0  ;;  %v2961_v26 = vmul.f32 0.2, %v2932_v25  ;;  %v13574_v27 = vpop.f32.mrb[77].mxu1 }
0x1091   :  { %v2935_v29 = vpop.f32.mrb[78].mxu1 }
0x1092   :  { %v2967_v30 = vsel %vm2955_vm8, %v2932_v25, %v2961_v26  ;;  %vm2956_vm9 = vcmp.gt.f32.partialorder %v2935_v29, 0.0  ;;  %v2962_v41 = vmul.f32 0.2, %v2935_v29  ;;  %v13575_v43 = vpop.f32.mrb[79].mxu1  ;;  %v2971_v25 = vsel %vm565_vm4, %v2965_v19, -inf }
0x1093   :  { %v2973_v46 = vsel %vm565_vm4, %v2967_v30, -inf }
0x1094   :  { %v2968_v44 = vsel %vm2956_vm9, %v2935_v29, %v2962_v41  ;;  %v2972_v41 = vsel %vm565_vm4, %v2966_v55, -inf }
0x1095   :  { %v2974_v48 = vsel %vm565_vm4, %v2968_v44, -inf }
0x1096   :  { %v2980_v15 = vmax.f32 %v2973_v46, %v2974_v48 }
0x1097   :  { %v2940_v17 = vpop.f32.mrb[80].mxu1 }
0x1098   :  { %vm2957_vm14 = vcmp.gt.f32.partialorder %v2940_v17, 0.0  ;;  %v2963_v51 = vmul.f32 0.2, %v2940_v17  ;;  %v13578_v53 = vpop.f32.mrb[81].mxu1 }
0x1099   :  { %v2943_v54 = vpop.f32.mrb[82].mxu1 }
0x109a   :  { %v2969_v56 = vsel %vm2957_vm14, %v2940_v17, %v2963_v51  ;;  %vm2958_vm15 = vcmp.gt.f32.partialorder %v2943_v54, 0.0  ;;  %v2964_v20 = vmul.f32 0.2, %v2943_v54  ;;  %v13579_v23 = vpop.f32.mrb[83].mxu1 }
0x109b   :  { %v2975_v26 = vsel %vm565_vm4, %v2969_v56, -inf }
0x109c   :  { %v2976_v27 = vmax.f32 %v2971_v25, %v2975_v26  ;;  %v2970_v29 = vsel %vm2958_vm15, %v2943_v54, %v2964_v20 }
0x109d   :  { %v2977_v43 = vsel %vm565_vm4, %v2970_v29, -inf }
0x109e   :  { %v2978_v13 = vmax.f32 %v2972_v41, %v2977_v43 }
0x10a0   :  { %v2979_v45 = vmax.f32 %v2976_v27, %v2978_v13 }
0x10a2   :  { %v2981_v46 = vmax.f32 %v2979_v45, %v2980_v15 }
0x10a4   :  { %v2982_v48 = vrot.slane %v2981_v46, 4 }
0x10a6   :  { %v2983_v53 = vmax.f32 %v2981_v46, %v2982_v48 }
0x10a8   :  { %v2984_v22 = vrot.slane %v2983_v53, 2 }
0x10aa   :  { %v2985_v49 = vmax.f32 %v2983_v53, %v2984_v22 }
0x10ac   :  { %v2986_v17 = vrot.slane %v2985_v49, 1 }
0x10ae   :  { %v2987_v51 = vmax.f32 %v2985_v49, %v2986_v17 }
0x10b0   :  { %v2993_v23 = vsub.f32 %v2970_v29, %v2987_v51  ;;  %v2988_v14 = vsub.f32 %v2965_v19, %v2987_v51  ;;  %v2989_v21 = vsub.f32 %v2966_v55, %v2987_v51  ;;  %v2990_v39 = vsub.f32 %v2967_v30, %v2987_v51 }
0x10b1   :  { %v2991_v7 = vsub.f32 %v2968_v44, %v2987_v51  ;;  %v2992_v25 = vsub.f32 %v2969_v56, %v2987_v51  ;;  %v16168_v44 = vld [vmem:[#allocation2] sm:$0xff]  }
0x10b2   :  { %v2994_v54 = vmul.f32 1.442695, %v2988_v14  ;;  %v2996_v20 = vmul.f32 1.442695, %v2989_v21  ;;  %v2998_v26 = vmul.f32 1.442695, %v2990_v39 }
0x10b3   :  { %v3000_v38 = vmul.f32 1.442695, %v2991_v7  ;;  %v3004_v27 = vmul.f32 1.442695, %v2993_v23  ;;  %v3002_v15 = vmul.f32 1.442695, %v2992_v25 }
0x10b4   :  { %14737 = vpow2.f32 %v2994_v54 }
0x10b5   :  { %14739 = vpow2.f32 %v2996_v20 }
0x10b6   :  { %14741 = vpow2.f32 %v2998_v26 }
0x10b7   :  { %14743 = vpow2.f32 %v3000_v38 }
0x10b8   :  { %14745 = vpow2.f32 %v3004_v27 }
0x10b9   :  { %14747 = vpow2.f32 %v3002_v15 }
0x10be   :  { %v16147_v41 = vpop.eup %14737 }
0x10bf   :  { %v16149_v29 = vpop.eup %14739 }
0x10c0   :  { %v16151_v19 = vpop.eup %14741  ;;  %v3006_v14 = vpack.c.bf16 %v16149_v29, %v16147_v41 }
0x10c1   :  { %v16155_v21 = vpop.eup %14743 }
0x10c2   :  { %13581 = vmatpush3.bf16.msra.mxu0 %v3006_v14  ;;  %v16158_v39 = vpop.eup %14745  ;;  %v3007_v38 = vpack.c.bf16 %v16155_v21, %v16151_v19 }
0x10c3   :  { %13582 = vmatprep.subr.bf16.mxu0 %v17124_v0  ;;  %v16162_v7 = vpop.eup %14747 }
0x10c4   :  { %v3008_v30 = vpack.c.bf16 %v16158_v39, %v16162_v7 }
0x10c6   :  { %13583 = vmatpush3.bf16.msra.mxu0 %v3007_v38 }
0x10c7   :  { %13584 = vmatprep.subr.bf16.mxu0 %v17124_v0 }
0x10ca   :  { %13585 = vmatpush3.bf16.msra.mxu0 %v3008_v30 }
0x10cb   :  { %13590 = vmatprep.subr.bf16.mxu0 %v17124_v0 }
0x10cd   :  { %13587 = vmatmul.mubr.msk.bf16.vlgmr.msra.gmra.mrb[112].mxu0 %vm868_vm12, %v16168_v44 }
0x10ce   :  { %13592 = vmatprep.mubr.msk.bf16.mxu0 %vm15319_vm0, %v17124_v0 }
0x11a0   :  { %v3043_v55 = vpop.f32.mrb[112].mxu0 }
0x11a1   :  { %v13588_v56 = vpop.f32.mrb[113].mxu0 }
0x11a2   :  { %v3046_v43 = vpop.f32.mrb[114].mxu0 }
0x11a3   :  { %v3050_v13 = vpack.c.bf16 %v3046_v43, %v3043_v55  ;;  %v13589_v45 = vpop.f32.mrb[115].mxu0 }
0x11a5   :  { %13591 = vmatpush3.bf16.msra.mxu0 %v3050_v13 }
0x11a6   :  { %3120 = vmatprep.subr.bf16.mxu0 %v2641_v1  ;;  %v3627_v1 = vld [vmem:[#allocation22] sm:$0xff] }
0x11a7   :  { %v3635_v3 = vcombine.high %v3627_v1, %v3627_v1 }
0x11a8   :  { %13593 = vmatmul.mubr.msk.bf16.vlgmr.msra.gmra.mrb[116].mxu0 %vm653_vm5, %v16074_v47  ;;  %v16283_v47 = vpop.f32.mrb[84].mxu1 }
0x11a9   :  { %3121 = vmatpush1.bf16.msra.mxu0 %v2640_v61  ;;  %13596 = vmatprep.mubr.msk.bf16.mxu0 %vm15319_vm0, %v17124_v0  ;;  %v3639_v61 = vlaneseq }
0x11aa   :  { %3183 = vmatprep.subr.bf16.mxu0 %v2643_v40 }
0x11ab   :  { %v16239_v63 = vshrl.u32 %v3639_v61, 7 }
0x11ad   :  { %17222 = vst [vmem:[#allocation65_spill] sm:$0xff] %v16239_v63 }
0x11b0   :  { %13597 = vmatmul.mubr.msk.bf16.gmra.mrb[120].mxu0 %vm653_vm5, %v16081_v52  ;;  %v16285_v52 = vpop.f32.mrb[85].mxu1 }
0x11b1   :  { %13600 = vmatprep.mubr.msk.bf16.mxu0 %vm15319_vm0, %v17124_v0 }
0x11b8   :  { %13601 = vmatmul.mubr.msk.bf16.gmra.mrb[124].mxu0 %vm653_vm5, %v16088_v8  ;;  %v16287_v8 = vpop.f32.mrb[86].mxu1 }
0x11b9   :  { %3152 = vmatprep.mubr.bf16.mxu0 %v17126_v50  ;;  %v16291_v46 = vpop.f32.mrb[87].mxu1 }
0x11ba   :  { %v16295_v48 = vpop.f32.mrb[88].mxu1 }
0x11bb   :  { %v16297_v53 = vpop.f32.mrb[89].mxu1 }
0x11c0   :  { %12076 = vmatmul.mubr.msk.bf16.vlgmr.msra.gmra.mrb[128].mxu0 %vm653_vm5, %v16095_v9 }
0x11c1   :  { %3184 = vmatpush1.bf16.msra.mxu0 %v2642_v33  ;;  %3162 = vmatprep.mubr.bf16.mxu0 %v17126_v50 }
0x11c2   :  { %3309 = vmatprep.subr.bf16.mxu0 %v2647_v2  ;;  %v16244_v2 = vsub.s32 %v3638_v62, %v16239_v63 }
0x11c4   :  { %v3642_v5 = vrot.slane %v3627_v1, %v16244_v2  ;;  %v3649_v6 = vrot.slane %v3635_v3, %v16244_v2  ;;  %v16265_v40 = vrot.slane %v3628_v34, %v16244_v2  ;;  %v16271_v12 = vrot.slane %v3652_v35, %v16244_v2 }
0x11c6   :  { %v3650_v28 = vcombine.high %v3642_v5, %v3642_v5  ;;  %v3651_v31 = vcombine.high %v3649_v6, %v3649_v6  ;;  %v3713_v33 = vsel %vm575_vm2, %v3642_v5, 0  ;;  %v3719_v42 = vsel %vm575_vm2, %v3649_v6, 0 }
0x11c7   :  { %v3667_v10 = vcombine.high %v16265_v40, %v16265_v40  ;;  %v3668_v18 = vcombine.high %v16271_v12, %v16271_v12 }
0x11c8   :  { %12077 = vmatmul.mubr.msk.bf16.gmra.mrb[132].mxu0 %vm653_vm5, %v16102_v11  ;;  %12100 = vmatprep.subr.msk.bf16.mxu1 %vm575_vm2, %v3650_v28 }
0x11c9   :  { %3172 = vmatprep.mubr.bf16.mxu0 %v17126_v50  ;;  %3761 = vmatpush1.bf16.msra.mxu1 %v3713_v33 }
0x11ca   :  { %12108 = vmatprep.subr.msk.bf16.mxu1 %vm575_vm2, %v3667_v10 }
0x11d0   :  { %12078 = vmatmul.mubr.msk.bf16.gmra.mrb[136].mxu0 %vm653_vm5, %v16109_v16 }
0x11d1   :  { %3215 = vmatprep.mubr.bf16.mxu0 %v17126_v50 }
0x11d8   :  { %12079 = vmatmul.mubr.msk.bf16.vlgmr.msra.gmra.mrb[140].mxu0 %vm653_vm5, %v16095_v9 }
0x11d9   :  { %3310 = vmatpush1.bf16.msra.mxu0 %v17218_v57  ;;  %3225 = vmatprep.mubr.bf16.mxu0 %v17126_v50 }
0x11da   :  { %3435 = vmatprep.subr.bf16.mxu0 %v17219_v36 }
0x11e0   :  { %12080 = vmatmul.mubr.msk.bf16.gmra.mrb[144].mxu0 %vm653_vm5, %v16102_v11 }
0x11e1   :  { %3235 = vmatprep.mubr.bf16.mxu0 %v17126_v50 }
0x11e8   :  { %12081 = vmatmul.mubr.msk.bf16.gmra.mrb[148].mxu0 %vm653_vm5, %v16109_v16 }
0x11e9   :  { %3341 = vmatprep.mubr.bf16.mxu0 %v17126_v50 }
0x11f0   :  { %12085 = vmatmul.mubr.msk.bf16.vlgmr.msra.gmra.mrb[152].mxu0 %vm653_vm5, %v16095_v9 }
0x11f1   :  { %3436 = vmatpush1.bf16.msra.mxu0 %v17220_v58  ;;  %3351 = vmatprep.mubr.bf16.mxu0 %v17126_v50  ;;  %v3731_v58 = vsel %vm575_vm2, %v16271_v12, 0 }
0x11f2   :  { %3561 = vmatprep.subr.bf16.mxu0 %v17221_v59 }
0x11f8   :  { %12086 = vmatmul.mubr.msk.bf16.gmra.mrb[156].mxu0 %vm653_vm5, %v16102_v11 }
0x11f9   :  { %3361 = vmatprep.mubr.bf16.mxu0 %v17126_v50 }
0x1200   :  { %12087 = vmatmul.mubr.msk.bf16.gmra.mrb[160].mxu0 %vm653_vm5, %v16109_v16 }
0x1201   :  { %3467 = vmatprep.mubr.bf16.mxu0 %v17126_v50 }
0x1208   :  { %12091 = vmatmul.mubr.msk.bf16.vlgmr.msra.gmra.mrb[164].mxu0 %vm653_vm5, %v16095_v9 }
0x1209   :  { %3562 = vmatpush1.bf16.msra.mxu0 %v17223_v4  ;;  %3477 = vmatprep.mubr.bf16.mxu0 %v17126_v50 }
0x120a   :  { %12104 = vmatprep.subr.msk.bf16.mxu0 %vm575_vm2, %v3651_v31 }
0x1210   :  { %12092 = vmatmul.mubr.msk.bf16.gmra.mrb[168].mxu0 %vm653_vm5, %v16102_v11 }
0x1211   :  { %3487 = vmatprep.mubr.bf16.mxu0 %v17126_v50 }
0x1218   :  { %12093 = vmatmul.mubr.msk.bf16.gmra.mrb[172].mxu0 %vm653_vm5, %v16109_v16 }
0x1219   :  { %3593 = vmatprep.mubr.bf16.mxu0 %v17126_v50 }
0x1220   :  { %12097 = vmatmul.mubr.msk.bf16.vlgmr.msra.gmra.mrb[176].mxu0 %vm653_vm5, %v16095_v9 }
0x1221   :  { %3603 = vmatprep.mubr.bf16.mxu0 %v17126_v50  ;;  %3824 = vmatpush1.bf16.msra.mxu0 %v3719_v42 }
0x1222   :  { %12112 = vmatprep.subr.msk.bf16.mxu0 %vm575_vm2, %v3668_v18  ;;  %v3629_v18 = vld [vmem:[#allocation22 + $0x10] sm:$0xff] }
0x1223   :  { %v3669_v34 = vcombine.high %v3629_v18, %v3629_v18 }
0x1228   :  { %12098 = vmatmul.mubr.msk.bf16.gmra.mrb[180].mxu0 %vm653_vm5, %v16102_v11 }
0x1229   :  { %3613 = vmatprep.mubr.bf16.mxu0 %v17126_v50 }
0x1230   :  { %12099 = vmatmul.mubr.msk.bf16.gmra.mrb[184].mxu0 %vm653_vm5, %v16109_v16  ;;  %v16299_v16 = vpop.f32.mrb[90].mxu1 }
0x1231   :  { %3855 = vmatprep.mubr.bf16.mxu0 %v17126_v50  ;;  %v16303_v49 = vpop.f32.mrb[91].mxu1 }
0x1232   :  { %v16307_v51 = vpop.f32.mrb[92].mxu1 }
0x1233   :  { %v16309_v23 = vpop.f32.mrb[93].mxu1 }
0x1234   :  { %17224 = vst [vmem:[#allocation66_spill] sm:$0xff] %v16309_v23  ;;  %v16311_v25 = vpop.f32.mrb[94].mxu1 }
0x1235   :  { %v16315_v20 = vpop.f32.mrb[95].mxu1 }
0x1236   :  { %17225 = vst [vmem:[#allocation67_spill] sm:$0xff] %v16315_v20  ;;  %v16319_v27 = vpop.f32.mrb[96].mxu1 }
0x1237   :  { %17226 = vst [vmem:[#allocation68_spill] sm:$0xff] %v16319_v27  ;;  %v16321_v15 = vpop.f32.mrb[97].mxu1 }
0x1238   :  { %17227 = vst [vmem:[#allocation69_spill] sm:$0xff] %v16321_v15  ;;  %v16323_v14 = vpop.f32.mrb[98].mxu1 }
0x1239   :  { %17228 = vst [vmem:[#allocation70_spill] sm:$0xff] %v16323_v14  ;;  %v16327_v30 = vpop.f32.mrb[99].mxu1 }
0x123a   :  { %17229 = vst [vmem:[#allocation71_spill] sm:$0xff] %v16327_v30  ;;  %v16331_v56 = vpop.f32.mrb[100].mxu1 }
0x123b   :  { %17230 = vst [vmem:[#allocation72_spill] sm:$0xff] %v16331_v56  ;;  %v16333_v43 = vpop.f32.mrb[101].mxu1 }
0x123c   :  { %17231 = vst [vmem:[#allocation73_spill] sm:$0xff] %v16333_v43  ;;  %v16335_v13 = vpop.f32.mrb[102].mxu1 }
0x123d   :  { %17232 = vst [vmem:[#allocation74_spill] sm:$0xff] %v16335_v13  ;;  %v16339_v57 = vpop.f32.mrb[103].mxu1 }
0x123e   :  { %17233 = vst [vmem:[#allocation75_spill] sm:$0xff] %v16339_v57  ;;  %v16343_v59 = vpop.f32.mrb[104].mxu1 }
0x123f   :  { %17234 = vst [vmem:[#allocation76_spill] sm:$0xff] %v16343_v59  ;;  %v16345_v61 = vpop.f32.mrb[105].mxu1 }
0x1240   :  { %17235 = vst [vmem:[#allocation77_spill] sm:$0xff] %v16345_v61  ;;  %v16347_v1 = vpop.f32.mrb[106].mxu1 }
0x1241   :  { %17236 = vst [vmem:[#allocation78_spill] sm:$0xff] %v16347_v1  ;;  %v16351_v6 = vpop.f32.mrb[107].mxu1 }
0x1242   :  { %17237 = vst [vmem:[#allocation79_spill] sm:$0xff] %v16351_v6  ;;  %v16355_v31 = vpop.f32.mrb[108].mxu1 }
0x1243   :  { %17238 = vst [vmem:[#allocation80_spill] sm:$0xff] %v16355_v31  ;;  %v16357_v33 = vpop.f32.mrb[109].mxu1 }
0x1244   :  { %17239 = vst [vmem:[#allocation81_spill] sm:$0xff] %v16357_v33  ;;  %v16359_v42 = vpop.f32.mrb[110].mxu1 }
0x1245   :  { %17240 = vst [vmem:[#allocation82_spill] sm:$0xff] %v16359_v42  ;;  %v16363_v35 = vpop.f32.mrb[111].mxu1 }
0x1246   :  { %17241 = vst [vmem:[#allocation83_spill] sm:$0xff] %v16363_v35 }
0x127b   :  { %v3085_v36 = vpop.f32.mrb[116].mxu0 }
0x127c   :  { %v3086_v60 = vadd.f32 1e-16, %v3085_v36  ;;  %v13594_v37 = vpop.f32.mrb[117].mxu0 }
0x127d   :  { %v3088_v62 = vpop.f32.mrb[118].mxu0 }
0x127e   :  { %14749 = vrcp.f32 %v3086_v60  ;;  %v3089_v3 = vadd.f32 1e-16, %v3088_v62  ;;  %v13595_v4 = vpop.f32.mrb[119].mxu0  ;;  %v16367_v60 = vpop.f32.mrb[112].mxu1 }
0x127f   :  { %17242 = vst [vmem:[#allocation84_spill] sm:$0xff] %v16367_v60  ;;  %v16369_v4 = vpop.f32.mrb[113].mxu1 }
0x1280   :  { %14751 = vrcp.f32 %v3089_v3  ;;  %17243 = vst [vmem:[#allocation85_spill] sm:$0xff] %v16369_v4  ;;  %v16371_v0 = vpop.f32.mrb[114].mxu1 }
0x1281   :  { %17244 = vst [vmem:[#allocation86_spill] sm:$0xff] %v16371_v0  ;;  %v16375_v45 = vpop.f32.mrb[115].mxu1 }
0x1282   :  { %17245 = vst [vmem:[#allocation87_spill] sm:$0xff] %v16375_v45  ;;  %v16379_v55 = vpop.f32.mrb[116].mxu1 }
0x1283   :  { %v3093_v10 = vpop.f32.mrb[120].mxu0  ;;  %17246 = vst [vmem:[#allocation88_spill] sm:$0xff] %v16379_v55 }
0x1284   :  { %v3094_v37 = vadd.f32 1e-16, %v3093_v10  ;;  %v13598_v62 = vpop.f32.mrb[121].mxu0 }
0x1285   :  { %v3096_v3 = vpop.f32.mrb[122].mxu0  ;;  %v16381_v62 = vpop.f32.mrb[117].mxu1 }
0x1286   :  { %14753 = vrcp.f32 %v3094_v37  ;;  %v3097_v28 = vadd.f32 1e-16, %v3096_v3  ;;  %v13599_v5 = vpop.f32.mrb[123].mxu0  ;;  %17247 = vst [vmem:[#allocation89_spill] sm:$0xff] %v16381_v62  ;;  %v16383_v38 = vpop.f32.mrb[118].mxu1  ;;  %v16389_v3 = vrot.slane %v3669_v34, %v16244_v2  ;;  %v3725_v34 = vsel %vm575_vm2, %v16265_v40, 0 }
0x1287   :  { %17248 = vst [vmem:[#allocation90_spill] sm:$0xff] %v16383_v38  ;;  %v16386_v5 = vrot.slane %v3629_v18, %v16244_v2  ;;  %v16393_v26 = vpop.f32.mrb[119].mxu1  ;;  %v17250_v40 = vmov 0  }
0x1288   :  { %v14750_v10 = vpop.eup %14749  ;;  %14755 = vrcp.f32 %v3097_v28  ;;  %17249 = vst [vmem:[#allocation91_spill] sm:$0xff] %v16393_v26 }
0x1289   :  { %v3114_v36 = vmul.f32 %v14750_v10, %v16147_v41  ;;  %v3685_v10 = vcombine.high %v16389_v3, %v16389_v3 }
0x128a   :  { %v14752_v37 = vpop.eup %14751 }
0x128b   :  { %v3115_v28 = vmul.f32 %v14752_v37, %v16149_v29  ;;  %v3101_v54 = vpop.f32.mrb[124].mxu0  ;;  %v3684_v29 = vcombine.high %v16386_v5, %v16386_v5 }
0x128c   :  { %v3102_v22 = vadd.f32 1e-16, %v3101_v54  ;;  %v13602_v11 = vpop.f32.mrb[125].mxu0 }
0x128d   :  { %v16399_v18 = vpack.c.bf16 %v3115_v28, %v3114_v36  ;;  %v3104_v9 = vpop.f32.mrb[126].mxu0 }
0x128e   :  { %14757 = vrcp.f32 %v3102_v22  ;;  %v3105_v50 = vadd.f32 1e-16, %v3104_v9  ;;  %v13603_v41 = vpop.f32.mrb[127].mxu0 }
0x128f   :  { %12101 = vmatmul.mubr.msk.bf16.vlgmr.msra.gmra.mrb[120].mxu1 %vm565_vm4, %v16399_v18  ;;  %12105 = vmatmul.mubr.msk.bf16.vlgmr.msra.gmra.mrb[188].mxu0 %vm565_vm4, %v16399_v18 }
0x1290   :  { %v14754_v11 = vpop.eup %14753  ;;  %14759 = vrcp.f32 %v3105_v50  ;;  %3802 = vmatprep.mubr.bf16.mxu1 %v17250_v40  ;;  %3865 = vmatprep.mubr.bf16.mxu0 %v17250_v40 }
0x1291   :  { %3887 = vmatpush1.bf16.msra.mxu1 %v3725_v34  ;;  %3950 = vmatpush1.bf16.msra.mxu0 %v3731_v58  ;;  %v3116_v9 = vmul.f32 %v14754_v11, %v16151_v19 }
0x1292   :  { %v14756_v12 = vpop.eup %14755  ;;  %12116 = vmatprep.subr.msk.bf16.mxu1 %vm575_vm2, %v3684_v29  ;;  %12120 = vmatprep.subr.msk.bf16.mxu0 %vm575_vm2, %v3685_v10  ;;  %v3630_v10 = vld [vmem:[#allocation22 + $0x18] sm:$0xff] }
0x1293   :  { %v3117_v22 = vmul.f32 %v14756_v12, %v16155_v21  ;;  %v16419_v54 = vpop.f32.mrb[128].mxu0  ;;  %v3686_v17 = vcombine.high %v3630_v10, %v3630_v10 }
0x1294   :  { %v16421_v36 = vpop.f32.mrb[129].mxu0 }
0x1295   :  { %v16423_v50 = vpack.c.bf16 %v3117_v22, %v3116_v9  ;;  %v16425_v37 = vpop.f32.mrb[130].mxu0 }
0x1296   :  { %v16429_v28 = vpop.f32.mrb[131].mxu0 }
0x1297   :  { %12102 = vmatmul.mubr.msk.bf16.gmra.mrb[124].mxu1 %vm565_vm4, %v16423_v50  ;;  %12106 = vmatmul.mubr.msk.bf16.gmra.mrb[192].mxu0 %vm565_vm4, %v16423_v50 }
0x1298   :  { %v14758_v21 = vpop.eup %14757  ;;  %3812 = vmatprep.mubr.bf16.mxu1 %v17250_v40  ;;  %3875 = vmatprep.mubr.bf16.mxu0 %v17250_v40 }
0x1299   :  { %v3118_v41 = vmul.f32 %v14758_v21, %v16162_v7  ;;  %v3693_v7 = vrot.slane %v3630_v10, %v16244_v2  ;;  %v3700_v21 = vrot.slane %v3686_v17, %v16244_v2 }
0x129a   :  { %v14760_v34 = vpop.eup %14759 }
0x129b   :  { %v3119_v29 = vmul.f32 %v14760_v34, %v16158_v39  ;;  %v16441_v11 = vpop.f32.mrb[132].mxu0  ;;  %v3743_v39 = vsel %vm575_vm2, %v16389_v3, 0  ;;  %v3701_v63 = vcombine.high %v3693_v7, %v3693_v7  ;;  %v3702_v32 = vcombine.high %v3700_v21, %v3700_v21 }
0x129c   :  { %v16443_v12 = vpop.f32.mrb[133].mxu0  ;;  %v3749_v38 = vsel %vm575_vm2, %v3693_v7, 0  ;;  %v3755_v4 = vsel %vm575_vm2, %v3700_v21, 0 }
0x129d   :  { %v16445_v9 = vpack.c.bf16 %v3119_v29, %v3118_v41  ;;  %v16447_v22 = vpop.f32.mrb[134].mxu0  ;;  %v3737_v29 = vsel %vm575_vm2, %v16386_v5, 0 }
0x129e   :  { %v16451_v58 = vpop.f32.mrb[135].mxu0 }
0x129f   :  { %12103 = vmatmul.mubr.msk.bf16.gmra.mrb[128].mxu1 %vm565_vm4, %v16445_v9  ;;  %12107 = vmatmul.mubr.msk.bf16.gmra.mrb[196].mxu0 %vm565_vm4, %v16445_v9 }
0x12a0   :  { %3918 = vmatprep.mubr.bf16.mxu1 %v17250_v40  ;;  %3981 = vmatprep.mubr.bf16.mxu0 %v17250_v40 }
0x12a3   :  { %v16463_v34 = vpop.f32.mrb[136].mxu0 }
0x12a4   :  { %v16465_v41 = vpop.f32.mrb[137].mxu0 }
0x12a5   :  { %v16469_v19 = vpop.f32.mrb[138].mxu0 }
0x12a6   :  { %v16475_v10 = vpop.f32.mrb[139].mxu0 }
0x12a7   :  { %12109 = vmatmul.mubr.msk.bf16.vlgmr.msra.gmra.mrb[132].mxu1 %vm565_vm4, %v16399_v18  ;;  %12113 = vmatmul.mubr.msk.bf16.vlgmr.msra.gmra.mrb[200].mxu0 %vm565_vm4, %v16399_v18 }
0x12a8   :  { %3928 = vmatprep.mubr.bf16.mxu1 %v17250_v40  ;;  %3991 = vmatprep.mubr.bf16.mxu0 %v17250_v40 }
0x12a9   :  { %4013 = vmatpush1.bf16.msra.mxu1 %v3737_v29  ;;  %4076 = vmatpush1.bf16.msra.mxu0 %v3743_v39 }
0x12aa   :  { %12124 = vmatprep.subr.msk.bf16.mxu1 %vm575_vm2, %v3701_v63  ;;  %12128 = vmatprep.subr.msk.bf16.mxu0 %vm575_vm2, %v3702_v32 }
0x12ab   :  { %v16487_v17 = vpop.f32.mrb[140].mxu0 }
0x12ac   :  { %v16489_v5 = vpop.f32.mrb[141].mxu0 }
0x12ad   :  { %v16491_v3 = vpop.f32.mrb[142].mxu0 }
0x12ae   :  { %v16495_v2 = vpop.f32.mrb[143].mxu0 }
0x12af   :  { %12110 = vmatmul.mubr.msk.bf16.gmra.mrb[136].mxu1 %vm565_vm4, %v16423_v50  ;;  %12114 = vmatmul.mubr.msk.bf16.gmra.mrb[204].mxu0 %vm565_vm4, %v16423_v50 }
0x12b0   :  { %3938 = vmatprep.mubr.bf16.mxu1 %v17250_v40  ;;  %4001 = vmatprep.mubr.bf16.mxu0 %v17250_v40 }
0x12b3   :  { %v16505_v63 = vpop.f32.mrb[144].mxu0 }
0x12b4   :  { %v16507_v39 = vpop.f32.mrb[145].mxu0 }
0x12b5   :  { %v16509_v29 = vpop.f32.mrb[146].mxu0 }
0x12b6   :  { %v16513_v62 = vpop.f32.mrb[147].mxu0 }
0x12b7   :  { %12111 = vmatmul.mubr.msk.bf16.gmra.mrb[140].mxu1 %vm565_vm4, %v16445_v9  ;;  %12115 = vmatmul.mubr.msk.bf16.gmra.mrb[208].mxu0 %vm565_vm4, %v16445_v9 }
0x12b8   :  { %4044 = vmatprep.mubr.bf16.mxu1 %v17250_v40  ;;  %4107 = vmatprep.mubr.bf16.mxu0 %v17250_v40 }
0x12bb   :  { %v16523_v26 = vpop.f32.mrb[148].mxu0 }
0x12bc   :  { %v16525_v55 = vpop.f32.mrb[149].mxu0 }
0x12bd   :  { %v16527_v24 = vpop.f32.mrb[150].mxu0 }
0x12be   :  { %v16533_v60 = vpop.f32.mrb[151].mxu0 }
0x12bf   :  { %12117 = vmatmul.mubr.msk.bf16.vlgmr.msra.gmra.mrb[144].mxu1 %vm565_vm4, %v16399_v18  ;;  %12121 = vmatmul.mubr.msk.bf16.vlgmr.msra.gmra.mrb[212].mxu0 %vm565_vm4, %v16399_v18 }
0x12c0   :  { %4054 = vmatprep.mubr.bf16.mxu1 %v17250_v40  ;;  %4117 = vmatprep.mubr.bf16.mxu0 %v17250_v40 }
0x12c1   :  { %4139 = vmatpush1.bf16.msra.mxu1 %v3749_v38  ;;  %4202 = vmatpush1.bf16.msra.mxu0 %v3755_v4 }
0x12c3   :  { %v16543_v7 = vpop.f32.mrb[152].mxu0 }
0x12c4   :  { %v16545_v21 = vpop.f32.mrb[153].mxu0 }
0x12c5   :  { %v16547_v45 = vpop.f32.mrb[154].mxu0 }
0x12c6   :  { %v16551_v33 = vpop.f32.mrb[155].mxu0 }
0x12c7   :  { %12118 = vmatmul.mubr.msk.bf16.gmra.mrb[148].mxu1 %vm565_vm4, %v16423_v50  ;;  %12122 = vmatmul.mubr.msk.bf16.gmra.mrb[216].mxu0 %vm565_vm4, %v16423_v50 }
0x12c8   :  { %4064 = vmatprep.mubr.bf16.mxu1 %v17250_v40  ;;  %4127 = vmatprep.mubr.bf16.mxu0 %v17250_v40 }
0x12cb   :  { %v16561_v4 = vpop.f32.mrb[156].mxu0 }
0x12cc   :  { %v16563_v32 = vpop.f32.mrb[157].mxu0 }
0x12cd   :  { %v16565_v0 = vpop.f32.mrb[158].mxu0 }
0x12ce   :  { %v16569_v31 = vpop.f32.mrb[159].mxu0 }
0x12cf   :  { %12119 = vmatmul.mubr.msk.bf16.gmra.mrb[152].mxu1 %vm565_vm4, %v16445_v9  ;;  %12123 = vmatmul.mubr.msk.bf16.gmra.mrb[220].mxu0 %vm565_vm4, %v16445_v9 }
0x12d0   :  { %4170 = vmatprep.mubr.bf16.mxu1 %v17250_v40  ;;  %4233 = vmatprep.mubr.bf16.mxu0 %v17250_v40 }
0x12d3   :  { %v16579_v42 = vpop.f32.mrb[160].mxu0 }
0x12d4   :  { %v16581_v61 = vpop.f32.mrb[161].mxu0 }
0x12d5   :  { %17251 = vst [vmem:[#allocation92_spill] sm:$0xff] %v16581_v61  ;;  %v16583_v35 = vpop.f32.mrb[162].mxu0 }
0x12d6   :  { %v16587_v59 = vpop.f32.mrb[163].mxu0 }
0x12d7   :  { %17252 = vst [vmem:[#allocation93_spill] sm:$0xff] %v16587_v59  ;;  %12125 = vmatmul.mubr.msk.bf16.vlgmr.msra.gmra.mrb[156].mxu1 %vm565_vm4, %v16399_v18  ;;  %12129 = vmatmul.mubr.msk.bf16.vlgmr.msra.gmra.mrb[224].mxu0 %vm565_vm4, %v16399_v18 }
0x12d8   :  { %4180 = vmatprep.mubr.bf16.mxu1 %v17250_v40  ;;  %4243 = vmatprep.mubr.bf16.mxu0 %v17250_v40 }
0x12db   :  { %v16597_v1 = vpop.f32.mrb[164].mxu0 }
0x12dc   :  { %17253 = vst [vmem:[#allocation94_spill] sm:$0xff] %v16597_v1  ;;  %v16599_v43 = vpop.f32.mrb[165].mxu0 }
0x12dd   :  { %17254 = vst [vmem:[#allocation95_spill] sm:$0xff] %v16599_v43  ;;  %v16601_v6 = vpop.f32.mrb[166].mxu0 }
0x12de   :  { %17255 = vst [vmem:[#allocation96_spill] sm:$0xff] %v16601_v6  ;;  %v16605_v56 = vpop.f32.mrb[167].mxu0  ;;  %v17277_v6 = vpack.c.bf16 %v16425_v37, %v16419_v54 }
0x12df   :  { %17256 = vst [vmem:[#allocation97_spill] sm:$0xff] %v16605_v56  ;;  %12126 = vmatmul.mubr.msk.bf16.gmra.mrb[160].mxu1 %vm565_vm4, %v16423_v50  ;;  %12130 = vmatmul.mubr.msk.bf16.gmra.mrb[228].mxu0 %vm565_vm4, %v16423_v50 }
0x12e0   :  { %4190 = vmatprep.mubr.bf16.mxu1 %v17250_v40  ;;  %4253 = vmatprep.mubr.bf16.mxu0 %v17250_v40 }
0x12e3   :  { %v16615_v38 = vpop.f32.mrb[168].mxu0 }
0x12e4   :  { %17257 = vst [vmem:[#allocation98_spill] sm:$0xff] %v16615_v38  ;;  %v16617_v13 = vpop.f32.mrb[169].mxu0 }
0x12e5   :  { %17258 = vst [vmem:[#allocation99_spill] sm:$0xff] %v16617_v13  ;;  %v16619_v57 = vpop.f32.mrb[170].mxu0 }
0x12e6   :  { %17259 = vst [vmem:[#allocation100_spill] sm:$0xff] %v16619_v57  ;;  %v16623_v30 = vpop.f32.mrb[171].mxu0 }
0x12e7   :  { %17260 = vst [vmem:[#allocation101_spill] sm:$0xff] %v16623_v30  ;;  %12127 = vmatmul.mubr.msk.bf16.gmra.mrb[164].mxu1 %vm565_vm4, %v16445_v9  ;;  %12131 = vmatmul.mubr.msk.bf16.gmra.mrb[232].mxu0 %vm565_vm4, %v16445_v9 }
0x12e8   :  { %4440 = vmatprep.mubr.bf16.mxu1 %v17250_v40  ;;  %4526 = vmatprep.mubr.bf16.mxu0 %v17250_v40 }
0x12eb   :  { %v16633_v18 = vpop.f32.mrb[172].mxu0 }
0x12ec   :  { %17261 = vst [vmem:[#allocation102_spill] sm:$0xff] %v16633_v18  ;;  %v16635_v43 = vpop.f32.mrb[173].mxu0 }
0x12ed   :  { %17262 = vst [vmem:[#allocation103_spill] sm:$0xff] %v16635_v43  ;;  %v16637_v15 = vpop.f32.mrb[174].mxu0 }
0x12ee   :  { %17263 = vst [vmem:[#allocation104_spill] sm:$0xff] %v16637_v15  ;;  %v16641_v57 = vpop.f32.mrb[175].mxu0 }
0x12ef   :  { %17264 = vst [vmem:[#allocation105_spill] sm:$0xff] %v16641_v57 }
0x12f3   :  { %v16645_v56 = vpop.f32.mrb[176].mxu0 }
0x12f4   :  { %17265 = vst [vmem:[#allocation106_spill] sm:$0xff] %v16645_v56  ;;  %v16647_v50 = vpop.f32.mrb[177].mxu0 }
0x12f5   :  { %17266 = vst [vmem:[#allocation107_spill] sm:$0xff] %v16647_v50  ;;  %v16649_v13 = vpop.f32.mrb[178].mxu0 }
0x12f6   :  { %17267 = vst [vmem:[#allocation108_spill] sm:$0xff] %v16649_v13  ;;  %v16653_v1 = vpop.f32.mrb[179].mxu0 }
0x12f7   :  { %17268 = vst [vmem:[#allocation109_spill] sm:$0xff] %v16653_v1 }
0x12fb   :  { %v16657_v38 = vpop.f32.mrb[180].mxu0 }
0x12fc   :  { %17269 = vst [vmem:[#allocation110_spill] sm:$0xff] %v16657_v38  ;;  %v16659_v18 = vpop.f32.mrb[181].mxu0 }
0x12fd   :  { %17270 = vst [vmem:[#allocation111_spill] sm:$0xff] %v16659_v18  ;;  %v16661_v15 = vpop.f32.mrb[182].mxu0 }
0x12fe   :  { %17271 = vst [vmem:[#allocation112_spill] sm:$0xff] %v16661_v15  ;;  %v16665_v43 = vpop.f32.mrb[183].mxu0 }
0x12ff   :  { %17272 = vst [vmem:[#allocation113_spill] sm:$0xff] %v16665_v43 }
0x1303   :  { %v16669_v30 = vpop.f32.mrb[184].mxu0 }
0x1304   :  { %17273 = vst [vmem:[#allocation114_spill] sm:$0xff] %v16669_v30  ;;  %v16671_v56 = vpop.f32.mrb[185].mxu0 }
0x1305   :  { %17274 = vst [vmem:[#allocation115_spill] sm:$0xff] %v16671_v56  ;;  %v16673_v13 = vpop.f32.mrb[186].mxu0  ;;  %v17279_v56 = vpack.c.bf16 %v16429_v28, %v16421_v36  ;;  %v17283_v28 = vpack.c.bf16 %v16451_v58, %v16443_v12  ;;  %v17285_v58 = vpack.c.bf16 %v16469_v19, %v16463_v34 }
0x1306   :  { %17275 = vst [vmem:[#allocation116_spill] sm:$0xff] %v16673_v13  ;;  %v16677_v50 = vpop.f32.mrb[187].mxu0  ;;  %v17278_v13 = vpack.c.bf16 %v16491_v3, %v16487_v17 }
0x1307   :  { %17276 = vst [vmem:[#allocation117_spill] sm:$0xff] %v16677_v50 }
0x1362   :  { %v3794_v9 = vpop.f32.mrb[120].mxu1  ;;  %v3857_v38 = vpop.f32.mrb[188].mxu0 }
0x1363   :  { %v3796_v15 = vpop.f32.mrb[121].mxu1  ;;  %v3859_v27 = vpop.f32.mrb[189].mxu0 }
0x1364   :  { %v3798_v14 = vpop.f32.mrb[122].mxu1  ;;  %v3861_v57 = vpop.f32.mrb[190].mxu0 }
0x1365   :  { %v4264_v18 = vpack.c.bf16 %v3798_v14, %v3794_v9  ;;  %v4266_v43 = vpack.c.bf16 %v3861_v57, %v3857_v38  ;;  %v3800_v61 = vpop.f32.mrb[123].mxu1  ;;  %v3863_v59 = vpop.f32.mrb[191].mxu0  ;;  %v17280_v14 = vpack.c.bf16 %v16495_v2, %v16489_v5  ;;  %v17284_v2 = vpack.c.bf16 %v16513_v62, %v16507_v39 }
0x1366   :  { %v4265_v23 = vpack.c.bf16 %v3800_v61, %v3796_v15  ;;  %v4267_v20 = vpack.c.bf16 %v3863_v59, %v3859_v27  ;;  %v17286_v62 = vpack.c.bf16 %v16527_v24, %v16523_v26 }
0x1367   :  { %v4360_v30 = vmul.bf16 %v17277_v6, %v4264_v18  ;;  %v4362_v1 = vmul.bf16 %v17278_v13, %v4266_v43 }
0x1368   :  { %v4361_v50 = vmul.bf16 %v17279_v56, %v4265_v23  ;;  %v4363_v57 = vmul.bf16 %v17280_v14, %v4267_v20  ;;  %v17281_v23 = vpack.c.bf16 %v16447_v22, %v16441_v11  ;;  %v17282_v20 = vpack.c.bf16 %v16509_v29, %v16505_v63 }
0x136a   :  { %v3804_v38 = vpop.f32.mrb[124].mxu1  ;;  %v3867_v9 = vpop.f32.mrb[192].mxu0  ;;  %4408 = vmatprep.subr.bf16.mxu1 %v4361_v50 }
0x136b   :  { %v3806_v27 = vpop.f32.mrb[125].mxu1  ;;  %v3869_v15 = vpop.f32.mrb[193].mxu0  ;;  %4409 = vmatpush1.bf16.msra.mxu1 %v4360_v30 }
0x136c   :  { %v3808_v59 = vpop.f32.mrb[126].mxu1  ;;  %v3871_v61 = vpop.f32.mrb[194].mxu0 }
0x136d   :  { %v4280_v6 = vpack.c.bf16 %v3808_v59, %v3804_v38  ;;  %v4282_v54 = vpack.c.bf16 %v3871_v61, %v3867_v9  ;;  %v3810_v37 = vpop.f32.mrb[127].mxu1  ;;  %v3873_v43 = vpop.f32.mrb[195].mxu0  ;;  %v17287_v59 = vpack.c.bf16 %v16475_v10, %v16465_v41  ;;  %v17290_v10 = vpack.c.bf16 %v16547_v45, %v16543_v7 }
0x136e   :  { %v4281_v13 = vpack.c.bf16 %v3810_v37, %v3806_v27  ;;  %v4283_v17 = vpack.c.bf16 %v3873_v43, %v3869_v15 }
0x136f   :  { %v4376_v56 = vmul.bf16 %v17281_v23, %v4280_v6  ;;  %v4378_v36 = vmul.bf16 %v17282_v20, %v4282_v54  ;;  %v17288_v6 = vpack.c.bf16 %v16533_v60, %v16525_v55  ;;  %v17289_v55 = vpack.c.bf16 %v16287_v8, %v16283_v47 }
0x1370   :  { %v4377_v30 = vmul.bf16 %v17283_v28, %v4281_v13  ;;  %v4379_v5 = vmul.bf16 %v17284_v2, %v4283_v17  ;;  %v17292_v2 = vpack.c.bf16 %v16551_v33, %v16545_v21  ;;  %v17293_v33 = vpack.c.bf16 %v16299_v16, %v16295_v48 }
0x1372   :  { %v3814_v3 = vpop.f32.mrb[128].mxu1  ;;  %v3877_v18 = vpop.f32.mrb[196].mxu0  ;;  %4410 = vmatprep.subr.bf16.mxu1 %v4377_v30 }
0x1373   :  { %v3816_v50 = vpop.f32.mrb[129].mxu1  ;;  %v3879_v14 = vpop.f32.mrb[197].mxu0  ;;  %4411 = vmatpush1.bf16.msra.mxu1 %v4376_v56 }
0x1374   :  { %v3818_v11 = vpop.f32.mrb[130].mxu1  ;;  %v3881_v22 = vpop.f32.mrb[198].mxu0 }
0x1375   :  { %v4296_v38 = vpack.c.bf16 %v3818_v11, %v3814_v3  ;;  %v4298_v9 = vpack.c.bf16 %v3881_v22, %v3877_v18  ;;  %v3820_v63 = vpop.f32.mrb[131].mxu1  ;;  %v3883_v29 = vpop.f32.mrb[199].mxu0 }
0x1376   :  { %v4297_v27 = vpack.c.bf16 %v3820_v63, %v3816_v50  ;;  %v4299_v15 = vpack.c.bf16 %v3883_v29, %v3879_v14  ;;  %v17296_v63 = vpack.c.bf16 %v16569_v31, %v16563_v32 }
0x1377   :  { %v4392_v12 = vmul.bf16 %v17285_v58, %v4296_v38  ;;  %v4394_v39 = vmul.bf16 %v17286_v62, %v4298_v9  ;;  %v17297_v62 = vpack.c.bf16 %v16311_v25, %v16307_v51 }
0x1378   :  { %v4393_v61 = vmul.bf16 %v17287_v59, %v4297_v27  ;;  %v4395_v54 = vmul.bf16 %v17288_v6, %v4299_v15  ;;  %v17298_v59 = vpack.c.bf16 %v16583_v35, %v16579_v42  ;;  %v17299_v6 = vld [vmem:[#allocation67_spill] sm:$0xff] }
0x137a   :  { %v3920_v37 = vpop.f32.mrb[132].mxu1  ;;  %v3983_v43 = vpop.f32.mrb[200].mxu0  ;;  %4412 = vmatprep.subr.bf16.mxu1 %v4393_v61 }
0x137b   :  { %v3922_v13 = vpop.f32.mrb[133].mxu1  ;;  %v3985_v17 = vpop.f32.mrb[201].mxu0  ;;  %4413 = vmatpush1.bf16.msra.mxu1 %v4392_v12 }
0x137c   :  { %v3924_v19 = vpop.f32.mrb[134].mxu1  ;;  %v3987_v34 = vpop.f32.mrb[202].mxu0  ;;  %4451 = vmatprep.subr.bf16.mxu1 %v4363_v57  ;;  %v17291_v57 = vpack.c.bf16 %v16291_v46, %v16285_v52 }
0x137d   :  { %v4268_v23 = vpack.c.bf16 %v3924_v19, %v3920_v37  ;;  %v4270_v24 = vpack.c.bf16 %v3987_v34, %v3983_v43  ;;  %v3926_v26 = vpop.f32.mrb[135].mxu1  ;;  %v3989_v56 = vpop.f32.mrb[203].mxu0 }
0x137e   :  { %v4269_v20 = vpack.c.bf16 %v3926_v26, %v3922_v13  ;;  %v4271_v41 = vpack.c.bf16 %v3989_v56, %v3985_v17  ;;  %12132 = vmatmul.mubr.msk.bf16.vlgmr.msra.gmra.mrb[168].mxu1 %vm868_vm12, %v16168_v44  ;;  %v17302_v13 = vld [vmem:[#allocation93_spill] sm:$0xff]  ;;  %v17303_v17 = vld [vmem:[#allocation92_spill] sm:$0xff] }
0x137f   :  { %v4364_v60 = vmul.bf16 %v17289_v55, %v4268_v23  ;;  %v4366_v28 = vmul.bf16 %v17290_v10, %v4270_v24  ;;  %4452 = vmatpush1.bf16.msra.mxu1 %v4362_v1  ;;  %4483 = vmatprep.mubr.bf16.mxu1 %v17250_v40  ;;  %v17304_v19 = vpack.c.bf16 %v17302_v13, %v17303_v17  ;;  %v17305_v10 = vld [vmem:[#allocation70_spill] sm:$0xff] }
0x1380   :  { %v4365_v30 = vmul.bf16 %v17291_v57, %v4269_v20  ;;  %v4367_v3 = vmul.bf16 %v17292_v2, %v4271_v41  ;;  %4453 = vmatprep.subr.bf16.mxu1 %v4379_v5  ;;  %v17294_v5 = vpack.c.bf16 %v16565_v0, %v16561_v4  ;;  %v17308_v2 = vld [vmem:[#allocation96_spill] sm:$0xff] }
0x1382   :  { %v3930_v18 = vpop.f32.mrb[136].mxu1  ;;  %v3993_v50 = vpop.f32.mrb[204].mxu0  ;;  %4494 = vmatprep.subr.bf16.mxu0 %v4365_v30 }
0x1383   :  { %v3932_v47 = vpop.f32.mrb[137].mxu1  ;;  %v3995_v8 = vpop.f32.mrb[205].mxu0  ;;  %4454 = vmatpush1.bf16.msra.mxu1 %v4378_v36  ;;  %4495 = vmatpush1.bf16.msra.mxu0 %v4364_v60  ;;  %v17295_v36 = vpack.c.bf16 %v16303_v49, %v16297_v53 }
0x1384   :  { %v3934_v45 = vpop.f32.mrb[138].mxu1  ;;  %v3997_v1 = vpop.f32.mrb[206].mxu0  ;;  %4455 = vmatprep.subr.bf16.mxu1 %v4395_v54  ;;  %v17300_v54 = vld [vmem:[#allocation66_spill] sm:$0xff] }
0x1385   :  { %v4284_v7 = vpack.c.bf16 %v3934_v45, %v3930_v18  ;;  %v4286_v14 = vpack.c.bf16 %v3997_v1, %v3993_v50  ;;  %v3936_v11 = vpop.f32.mrb[139].mxu1  ;;  %v3999_v52 = vpop.f32.mrb[207].mxu0  ;;  %v17301_v37 = vpack.c.bf16 %v17299_v6, %v17300_v54 }
0x1386   :  { %v4285_v46 = vpack.c.bf16 %v3936_v11, %v3932_v47  ;;  %v4287_v22 = vpack.c.bf16 %v3999_v52, %v3995_v8  ;;  %v17311_v47 = vld [vmem:[#allocation71_spill] sm:$0xff]  ;;  %v17312_v8 = vld [vmem:[#allocation69_spill] sm:$0xff] }
0x1387   :  { %v4380_v21 = vmul.bf16 %v17293_v33, %v4284_v7  ;;  %v4382_v38 = vmul.bf16 %v17294_v5, %v4286_v14  ;;  %4456 = vmatpush1.bf16.msra.mxu1 %v4394_v39  ;;  %v17313_v45 = vpack.c.bf16 %v17311_v47, %v17312_v8  ;;  %v17314_v7 = vld [vmem:[#allocation97_spill] sm:$0xff]  ;;  %v17315_v14 = vld [vmem:[#allocation95_spill] sm:$0xff] }
0x1388   :  { %v4381_v9 = vmul.bf16 %v17295_v36, %v4285_v46  ;;  %v4383_v29 = vmul.bf16 %v17296_v63, %v4287_v22  ;;  %4537 = vmatprep.subr.bf16.mxu1 %v4367_v3  ;;  %v17309_v3 = vld [vmem:[#allocation94_spill] sm:$0xff]  ;;  %v17316_v11 = vpack.c.bf16 %v17314_v7, %v17315_v14 }
0x1389   :  { %v17310_v18 = vpack.c.bf16 %v17308_v2, %v17309_v3  ;;  %v17338_v3 = vld [vmem:[#allocation105_spill] sm:$0xff] }
0x138a   :  { %v3940_v27 = vpop.f32.mrb[140].mxu1  ;;  %v4003_v15 = vpop.f32.mrb[208].mxu0  ;;  %4496 = vmatprep.subr.bf16.mxu0 %v4381_v9  ;;  %12133 = vmatmul.mubr.msk.bf16.vlgmr.msra.gmra.mrb[172].mxu1 %vm868_vm12, %v16168_v44 }
0x138b   :  { %v3942_v48 = vpop.f32.mrb[141].mxu1  ;;  %v4005_v16 = vpop.f32.mrb[209].mxu0  ;;  %4497 = vmatpush1.bf16.msra.mxu0 %v4380_v21  ;;  %4538 = vmatpush1.bf16.msra.mxu1 %v4366_v28  ;;  %v17306_v28 = vld [vmem:[#allocation68_spill] sm:$0xff] }
0x138c   :  { %v3944_v0 = vpop.f32.mrb[142].mxu1  ;;  %v4007_v4 = vpop.f32.mrb[210].mxu0  ;;  %4539 = vmatprep.subr.bf16.mxu1 %v4383_v29  ;;  %4569 = vmatprep.mubr.bf16.mxu1 %v17250_v40  ;;  %v17307_v57 = vpack.c.bf16 %v17305_v10, %v17306_v28  ;;  %v17335_v28 = vld [vmem:[#allocation79_spill] sm:$0xff] }
0x138d   :  { %v4300_v53 = vpack.c.bf16 %v3944_v0, %v3940_v27  ;;  %v4302_v49 = vpack.c.bf16 %v4007_v4, %v4003_v15  ;;  %v3946_v31 = vpop.f32.mrb[143].mxu1  ;;  %v4009_v32 = vpop.f32.mrb[211].mxu0  ;;  %v17317_v15 = vld [vmem:[#allocation74_spill] sm:$0xff]  ;;  %v17320_v4 = vld [vmem:[#allocation100_spill] sm:$0xff] }
0x138e   :  { %v4301_v58 = vpack.c.bf16 %v3946_v31, %v3942_v48  ;;  %v4303_v12 = vpack.c.bf16 %v4009_v32, %v4005_v16  ;;  %v17318_v48 = vld [vmem:[#allocation72_spill] sm:$0xff]  ;;  %v17323_v32 = vld [vmem:[#allocation75_spill] sm:$0xff] }
0x138f   :  { %v4396_v39 = vmul.bf16 %v17297_v62, %v4300_v53  ;;  %v4398_v61 = vmul.bf16 %v17298_v59, %v4302_v49  ;;  %4540 = vmatpush1.bf16.msra.mxu1 %v4382_v38  ;;  %v17319_v16 = vpack.c.bf16 %v17317_v15, %v17318_v48  ;;  %v17321_v53 = vld [vmem:[#allocation98_spill] sm:$0xff]  ;;  %v17327_v59 = vld [vmem:[#allocation99_spill] sm:$0xff] }
0x1390   :  { %v4397_v43 = vmul.bf16 %v17301_v37, %v4301_v58  ;;  %v4399_v34 = vmul.bf16 %v17304_v19, %v4303_v12  ;;  %v17322_v49 = vpack.c.bf16 %v17320_v4, %v17321_v53  ;;  %v17324_v58 = vld [vmem:[#allocation73_spill] sm:$0xff] }
0x1391   :  { %v17325_v12 = vpack.c.bf16 %v17323_v32, %v17324_v58 }
0x1392   :  { %v4046_v23 = vpop.f32.mrb[144].mxu1  ;;  %v4109_v24 = vpop.f32.mrb[212].mxu0  ;;  %4498 = vmatprep.subr.bf16.mxu0 %v4397_v43  ;;  %4541 = vmatprep.subr.bf16.mxu1 %v4399_v34 }
0x1393   :  { %v4048_v26 = vpop.f32.mrb[145].mxu1  ;;  %v4111_v51 = vpop.f32.mrb[213].mxu0  ;;  %4499 = vmatpush1.bf16.msra.mxu0 %v4396_v39  ;;  %4542 = vmatpush1.bf16.msra.mxu1 %v4398_v61  ;;  %v17326_v39 = vld [vmem:[#allocation101_spill] sm:$0xff] }
0x1394   :  { %v4050_v25 = vpop.f32.mrb[146].mxu1  ;;  %v4113_v42 = vpop.f32.mrb[214].mxu0  ;;  %v17328_v61 = vpack.c.bf16 %v17326_v39, %v17327_v59 }
0x1395   :  { %v4272_v35 = vpack.c.bf16 %v4050_v25, %v4046_v23  ;;  %v4274_v56 = vpack.c.bf16 %v4113_v42, %v4109_v24  ;;  %v4052_v20 = vpop.f32.mrb[147].mxu1  ;;  %v4115_v41 = vpop.f32.mrb[215].mxu0  ;;  %v17329_v42 = vld [vmem:[#allocation78_spill] sm:$0xff] }
0x1396   :  { %v4273_v55 = vpack.c.bf16 %v4052_v20, %v4048_v26  ;;  %v4275_v60 = vpack.c.bf16 %v4115_v41, %v4111_v51  ;;  %12134 = vmatmul.mubr.msk.bf16.vlgmr.msra.gmra.mrb[236].mxu0 %vm868_vm12, %v16168_v44  ;;  %12135 = vmatmul.mubr.msk.bf16.vlgmr.msra.gmra.mrb[176].mxu1 %vm868_vm12, %v16168_v44  ;;  %v17332_v41 = vld [vmem:[#allocation104_spill] sm:$0xff] }
0x1397   :  { %v4368_v30 = vmul.bf16 %v17307_v57, %v4272_v35  ;;  %v4370_v50 = vmul.bf16 %v17310_v18, %v4274_v56  ;;  %4612 = vmatprep.mubr.bf16.mxu0 %v17250_v40  ;;  %4655 = vmatprep.mubr.bf16.mxu1 %v17250_v40  ;;  %v17330_v35 = vld [vmem:[#allocation76_spill] sm:$0xff]  ;;  %v17336_v57 = vld [vmem:[#allocation77_spill] sm:$0xff]  ;;  %v17339_v18 = vld [vmem:[#allocation103_spill] sm:$0xff] }
0x1398   :  { %v4369_v1 = vmul.bf16 %v17313_v45, %v4273_v55  ;;  %v4371_v44 = vmul.bf16 %v17316_v11, %v4275_v60  ;;  %v17331_v56 = vpack.c.bf16 %v17329_v42, %v17330_v35  ;;  %v17333_v55 = vld [vmem:[#allocation102_spill] sm:$0xff] }
0x1399   :  { %v17334_v60 = vpack.c.bf16 %v17332_v41, %v17333_v55 }
0x139a   :  { %v4056_v52 = vpop.f32.mrb[148].mxu1  ;;  %v4119_v46 = vpop.f32.mrb[216].mxu0  ;;  %4580 = vmatprep.subr.bf16.mxu0 %v4369_v1  ;;  %4623 = vmatprep.subr.bf16.mxu1 %v4371_v44 }
0x139b   :  { %v4058_v22 = vpop.f32.mrb[149].mxu1  ;;  %v4121_v33 = vpop.f32.mrb[217].mxu0  ;;  %4581 = vmatpush1.bf16.msra.mxu0 %v4368_v30  ;;  %4624 = vmatpush1.bf16.msra.mxu1 %v4370_v50  ;;  %v17337_v30 = vpack.c.bf16 %v17335_v28, %v17336_v57  ;;  %v17340_v50 = vpack.c.bf16 %v17338_v3, %v17339_v18 }
0x139c   :  { %v4060_v21 = vpop.f32.mrb[150].mxu1  ;;  %v4123_v5 = vpop.f32.mrb[218].mxu0 }
0x139d   :  { %v4288_v38 = vpack.c.bf16 %v4060_v21, %v4056_v52  ;;  %v4290_v36 = vpack.c.bf16 %v4123_v5, %v4119_v46  ;;  %v4062_v9 = vpop.f32.mrb[151].mxu1  ;;  %v4125_v63 = vpop.f32.mrb[219].mxu0  ;;  %v14771_v5 = vld [vmem:[#allocation2] sm:$0xff]  }
0x139e   :  { %v4289_v29 = vpack.c.bf16 %v4062_v9, %v4058_v22  ;;  %v4291_v27 = vpack.c.bf16 %v4125_v63, %v4121_v33 }
0x139f   :  { %v4384_v0 = vmul.bf16 %v17319_v16, %v4288_v38  ;;  %v4386_v31 = vmul.bf16 %v17322_v49, %v4290_v36  ;;  %v17341_v38 = vld [vmem:[#allocation82_spill] sm:$0xff]  ;;  %v17342_v36 = vld [vmem:[#allocation80_spill] sm:$0xff]  ;;  %v17347_v16 = vld [vmem:[#allocation83_spill] sm:$0xff] }
0x13a0   :  { %v4385_v62 = vmul.bf16 %v17325_v12, %v4289_v29  ;;  %v4387_v6 = vmul.bf16 %v17328_v61, %v4291_v27  ;;  %v17343_v9 = vpack.c.bf16 %v17341_v38, %v17342_v36  ;;  %v17344_v29 = vld [vmem:[#allocation108_spill] sm:$0xff]  ;;  %v17345_v27 = vld [vmem:[#allocation106_spill] sm:$0xff]  ;;  %v17350_v49 = vld [vmem:[#allocation109_spill] sm:$0xff] }
0x13a1   :  { %v17346_v15 = vpack.c.bf16 %v17344_v29, %v17345_v27 }
0x13a2   :  { %v4066_v54 = vpop.f32.mrb[152].mxu1  ;;  %v4129_v37 = vpop.f32.mrb[220].mxu0  ;;  %4582 = vmatprep.subr.bf16.mxu0 %v4385_v62  ;;  %4625 = vmatprep.subr.bf16.mxu1 %v4387_v6 }
0x13a3   :  { %v4068_v43 = vpop.f32.mrb[153].mxu1  ;;  %v4131_v13 = vpop.f32.mrb[221].mxu0  ;;  %4583 = vmatpush1.bf16.msra.mxu0 %v4384_v0  ;;  %4626 = vmatpush1.bf16.msra.mxu1 %v4386_v31  ;;  %v17348_v0 = vld [vmem:[#allocation81_spill] sm:$0xff]  ;;  %v17351_v31 = vld [vmem:[#allocation107_spill] sm:$0xff] }
0x13a4   :  { %v4070_v17 = vpop.f32.mrb[154].mxu1  ;;  %v4133_v19 = vpop.f32.mrb[222].mxu0  ;;  %v17349_v4 = vpack.c.bf16 %v17347_v16, %v17348_v0  ;;  %v17352_v32 = vpack.c.bf16 %v17350_v49, %v17351_v31  ;;  %v13857_v49 = vld [vmem:[#allocation23] ss:$16 sps:$4 sm:$0xff]   ;;  %v13860_v31 = vld [vmem:[#allocation23 + $0x8] ss:$16 sps:$4 sm:$0xff]  }
0x13a5   :  { %v4304_v34 = vpack.c.bf16 %v4070_v17, %v4066_v54  ;;  %v4306_v23 = vpack.c.bf16 %v4133_v19, %v4129_v37  ;;  %v4072_v24 = vpop.f32.mrb[155].mxu1  ;;  %v4135_v26 = vpop.f32.mrb[223].mxu0 }
0x13a6   :  { %v4305_v51 = vpack.c.bf16 %v4072_v24, %v4068_v43  ;;  %v4307_v25 = vpack.c.bf16 %v4135_v26, %v4131_v13 }
0x13a7   :  { %v4400_v20 = vmul.bf16 %v17331_v56, %v4304_v34  ;;  %v4402_v10 = vmul.bf16 %v17334_v60, %v4306_v23  ;;  %v17353_v34 = vld [vmem:[#allocation86_spill] sm:$0xff]  ;;  %v17354_v23 = vld [vmem:[#allocation84_spill] sm:$0xff]  ;;  %v17359_v56 = vld [vmem:[#allocation87_spill] sm:$0xff] }
0x13a8   :  { %v4401_v2 = vmul.bf16 %v17337_v30, %v4305_v51  ;;  %v4403_v47 = vmul.bf16 %v17340_v50, %v4307_v25  ;;  %v17355_v24 = vpack.c.bf16 %v17353_v34, %v17354_v23  ;;  %v17356_v51 = vld [vmem:[#allocation112_spill] sm:$0xff]  ;;  %v17357_v25 = vld [vmem:[#allocation110_spill] sm:$0xff]  ;;  %v17362_v60 = vld [vmem:[#allocation113_spill] sm:$0xff] }
0x13a9   :  { %v17358_v42 = vpack.c.bf16 %v17356_v51, %v17357_v25  ;;  %v13884_v34 = vld [vmem:[#allocation23 + $0x88] ss:$16 sps:$4 sm:$0xff]   ;;  %v13889_v23 = vld [vmem:[#allocation23 + $0xa4] ss:$16 sps:$4 sm:$0xff]  }
0x13aa   :  { %v4172_v8 = vpop.f32.mrb[156].mxu1  ;;  %v4235_v45 = vpop.f32.mrb[224].mxu0  ;;  %4584 = vmatprep.subr.bf16.mxu0 %v4401_v2  ;;  %4627 = vmatprep.subr.bf16.mxu1 %v4403_v47  ;;  %v13890_v51 = vld [vmem:[#allocation23 + $0xa8] ss:$16 sps:$4 sm:$0xff]   ;;  %v13895_v25 = vld [vmem:[#allocation23 + $0xc4] ss:$16 sps:$4 sm:$0xff]  }
0x13ab   :  { %v4174_v1 = vpop.f32.mrb[157].mxu1  ;;  %v4237_v7 = vpop.f32.mrb[225].mxu0  ;;  %4585 = vmatpush1.bf16.msra.mxu0 %v4400_v20  ;;  %4628 = vmatpush1.bf16.msra.mxu1 %v4402_v10  ;;  %v17360_v20 = vld [vmem:[#allocation85_spill] sm:$0xff]  ;;  %v17363_v10 = vld [vmem:[#allocation111_spill] sm:$0xff] }
0x13ac   :  { %v4176_v14 = vpop.f32.mrb[158].mxu1  ;;  %v4239_v11 = vpop.f32.mrb[226].mxu0  ;;  %v17361_v41 = vpack.c.bf16 %v17359_v56, %v17360_v20  ;;  %v17364_v28 = vpack.c.bf16 %v17362_v60, %v17363_v10  ;;  %v13896_v56 = vld [vmem:[#allocation23 + $0xc8] ss:$16 sps:$4 sm:$0xff]   ;;  %v13901_v20 = vld [vmem:[#allocation23 + $0xe4] ss:$16 sps:$4 sm:$0xff]  }
0x13ad   :  { %v4276_v44 = vpack.c.bf16 %v4176_v14, %v4172_v8  ;;  %v4278_v52 = vpack.c.bf16 %v4239_v11, %v4235_v45  ;;  %v4178_v46 = vpop.f32.mrb[159].mxu1  ;;  %v4241_v22 = vpop.f32.mrb[227].mxu0  ;;  %v13902_v60 = vld [vmem:[#allocation23 + $0xe8] ss:$16 sps:$4 sm:$0xff]   ;;  %v13907_v10 = vld [vmem:[#allocation23 + $0x104] ss:$16 sps:$4 sm:$0xff]  }
0x13ae   :  { %v4277_v33 = vpack.c.bf16 %v4178_v46, %v4174_v1  ;;  %v4279_v21 = vpack.c.bf16 %v4241_v22, %v4237_v7  ;;  %12136 = vmatmul.mubr.msk.bf16.vlgmr.msra.gmra.mrb[240].mxu0 %vm868_vm12, %v14771_v5  ;;  %12137 = vmatmul.mubr.msk.bf16.vlgmr.msra.gmra.mrb[180].mxu1 %vm868_vm12, %v14771_v5 }
0x13af   :  { %v4372_v63 = vmul.bf16 %v17343_v9, %v4276_v44  ;;  %v4374_v48 = vmul.bf16 %v17346_v15, %v4278_v52  ;;  %4698 = vmatprep.mubr.bf16.mxu0 %v17250_v40  ;;  %4741 = vmatprep.mubr.bf16.mxu1 %v17250_v40  ;;  %v17365_v44 = vld [vmem:[#allocation90_spill] sm:$0xff]  ;;  %v17366_v52 = vld [vmem:[#allocation88_spill] sm:$0xff]  ;;  %v17371_v9 = vld [vmem:[#allocation91_spill] sm:$0xff] }
0x13b0   :  { %v4373_v53 = vmul.bf16 %v17349_v4, %v4277_v33  ;;  %v4375_v58 = vmul.bf16 %v17352_v32, %v4279_v21  ;;  %v17367_v46 = vpack.c.bf16 %v17365_v44, %v17366_v52  ;;  %v17368_v33 = vld [vmem:[#allocation116_spill] sm:$0xff]  ;;  %v17369_v21 = vld [vmem:[#allocation114_spill] sm:$0xff]  ;;  %v17374_v15 = vld [vmem:[#allocation117_spill] sm:$0xff] }
0x13b1   :  { %v17370_v38 = vpack.c.bf16 %v17368_v33, %v17369_v21  ;;  %v13859_v4 = vld [vmem:[#allocation23 + $0x4] ss:$16 sps:$4 sm:$0xff]   ;;  %v13926_v44 = vld [vmem:[#allocation23 + $0x168] ss:$16 sps:$4 sm:$0xff]  }
0x13b2   :  { %v4182_v12 = vpop.f32.mrb[160].mxu1  ;;  %v4245_v62 = vpop.f32.mrb[228].mxu0  ;;  %4666 = vmatprep.subr.bf16.mxu0 %v4373_v53  ;;  %4709 = vmatprep.subr.bf16.mxu1 %v4375_v58  ;;  %v13862_v53 = vld [vmem:[#allocation23 + $0xc] ss:$16 sps:$4 sm:$0xff]   ;;  %v13865_v32 = vld [vmem:[#allocation23 + $0x24] ss:$16 sps:$4 sm:$0xff]  }
0x13b3   :  { %v4184_v39 = vpop.f32.mrb[161].mxu1  ;;  %v4247_v59 = vpop.f32.mrb[229].mxu0  ;;  %4667 = vmatpush1.bf16.msra.mxu0 %v4372_v63  ;;  %4710 = vmatpush1.bf16.msra.mxu1 %v4374_v48  ;;  %v17372_v63 = vld [vmem:[#allocation89_spill] sm:$0xff]  ;;  %v17375_v48 = vld [vmem:[#allocation115_spill] sm:$0xff]  ;;  %v13868_v58 = vld [vmem:[#allocation23 + $0x2c] ss:$16 sps:$4 sm:$0xff]  }
0x13b4   :  { %v4186_v61 = vpop.f32.mrb[162].mxu1  ;;  %v4249_v6 = vpop.f32.mrb[230].mxu0  ;;  %v17373_v29 = vpack.c.bf16 %v17371_v9, %v17372_v63  ;;  %v17376_v16 = vpack.c.bf16 %v17374_v15, %v17375_v48  ;;  %v13931_v52 = vld [vmem:[#allocation23 + $0x184] ss:$16 sps:$4 sm:$0xff]   ;;  %v13932_v33 = vld [vmem:[#allocation23 + $0x188] ss:$16 sps:$4 sm:$0xff]  }
0x13b5   :  { %v4292_v54 = vpack.c.bf16 %v4186_v61, %v4182_v12  ;;  %v4294_v37 = vpack.c.bf16 %v4249_v6, %v4245_v62  ;;  %v4188_v43 = vpop.f32.mrb[163].mxu1  ;;  %v4251_v13 = vpop.f32.mrb[231].mxu0  ;;  %v13863_v12 = vld [vmem:[#allocation23 + $0x20] ss:$16 sps:$4 sm:$0xff]   ;;  %v13866_v62 = vld [vmem:[#allocation23 + $0x28] ss:$16 sps:$4 sm:$0xff]  }
0x13b6   :  { %v4293_v17 = vpack.c.bf16 %v4188_v43, %v4184_v39  ;;  %v4295_v19 = vpack.c.bf16 %v4251_v13, %v4247_v59  ;;  %v13871_v39 = vld [vmem:[#allocation23 + $0x44] ss:$16 sps:$4 sm:$0xff]   ;;  %v13874_v59 = vld [vmem:[#allocation23 + $0x4c] ss:$16 sps:$4 sm:$0xff]   ;;  %v13869_v61 = vld [vmem:[#allocation23 + $0x40] ss:$16 sps:$4 sm:$0xff]  }
0x13b7   :  { %v4388_v26 = vmul.bf16 %v17355_v24, %v4292_v54  ;;  %v4390_v35 = vmul.bf16 %v17358_v42, %v4294_v37  ;;  %v13872_v6 = vld [vmem:[#allocation23 + $0x48] ss:$16 sps:$4 sm:$0xff]   ;;  %v13877_v54 = vld [vmem:[#allocation23 + $0x64] ss:$16 sps:$4 sm:$0xff]   ;;  %v13880_v37 = vld [vmem:[#allocation23 + $0x6c] ss:$16 sps:$4 sm:$0xff]  }
0x13b8   :  { %v4389_v55 = vmul.bf16 %v17361_v41, %v4293_v17  ;;  %v4391_v57 = vmul.bf16 %v17364_v28, %v4295_v19  ;;  %v13875_v43 = vld [vmem:[#allocation23 + $0x60] ss:$16 sps:$4 sm:$0xff]   ;;  %v13883_v13 = vld [vmem:[#allocation23 + $0x84] ss:$16 sps:$4 sm:$0xff]   ;;  %v13886_v17 = vld [vmem:[#allocation23 + $0x8c] ss:$16 sps:$4 sm:$0xff]  }
0x13b9   :  { %v13881_v19 = vld [vmem:[#allocation23 + $0x80] ss:$16 sps:$4 sm:$0xff]   ;;  %v13892_v24 = vld [vmem:[#allocation23 + $0xac] ss:$16 sps:$4 sm:$0xff]   ;;  %v13937_v21 = vld [vmem:[#allocation23 + $0x1a4] ss:$16 sps:$4 sm:$0xff]  }
0x13ba   :  { %v4192_v30 = vpop.f32.mrb[164].mxu1  ;;  %v4255_v2 = vpop.f32.mrb[232].mxu0  ;;  %4668 = vmatprep.subr.bf16.mxu0 %v4389_v55  ;;  %4711 = vmatprep.subr.bf16.mxu1 %v4391_v57  ;;  %v13898_v42 = vld [vmem:[#allocation23 + $0xcc] ss:$16 sps:$4 sm:$0xff]   ;;  %v13899_v55 = vld [vmem:[#allocation23 + $0xe0] ss:$16 sps:$4 sm:$0xff]  }
0x13bb   :  { %v4194_v3 = vpop.f32.mrb[165].mxu1  ;;  %v4257_v18 = vpop.f32.mrb[233].mxu0  ;;  %4669 = vmatpush1.bf16.msra.mxu0 %v4388_v26  ;;  %4712 = vmatpush1.bf16.msra.mxu1 %v4390_v35  ;;  %v13887_v26 = vld [vmem:[#allocation23 + $0xa0] ss:$16 sps:$4 sm:$0xff]   ;;  %v13904_v41 = vld [vmem:[#allocation23 + $0xec] ss:$16 sps:$4 sm:$0xff]  }
0x13bc   :  { %v4196_v50 = vpop.f32.mrb[166].mxu1  ;;  %v4259_v47 = vpop.f32.mrb[234].mxu0  ;;  %v13893_v35 = vld [vmem:[#allocation23 + $0xc0] ss:$16 sps:$4 sm:$0xff]   ;;  %v13910_v28 = vld [vmem:[#allocation23 + $0x10c] ss:$16 sps:$4 sm:$0xff]  }
0x13bd   :  { %v4308_v8 = vpack.c.bf16 %v4196_v50, %v4192_v30  ;;  %v4310_v45 = vpack.c.bf16 %v4259_v47, %v4255_v2  ;;  %v4198_v1 = vpop.f32.mrb[167].mxu1  ;;  %v4261_v7 = vpop.f32.mrb[235].mxu0  ;;  %v13905_v57 = vld [vmem:[#allocation23 + $0x100] ss:$16 sps:$4 sm:$0xff]   ;;  %v13908_v30 = vld [vmem:[#allocation23 + $0x108] ss:$16 sps:$4 sm:$0xff]  }
0x13be   :  { %v4309_v14 = vpack.c.bf16 %v4198_v1, %v4194_v3  ;;  %v4311_v11 = vpack.c.bf16 %v4261_v7, %v4257_v18  ;;  %v13913_v2 = vld [vmem:[#allocation23 + $0x124] ss:$16 sps:$4 sm:$0xff]   ;;  %v13916_v3 = vld [vmem:[#allocation23 + $0x12c] ss:$16 sps:$4 sm:$0xff]   ;;  %v13911_v18 = vld [vmem:[#allocation23 + $0x120] ss:$16 sps:$4 sm:$0xff]  }
0x13bf   :  { %v4404_v22 = vmul.bf16 %v17367_v46, %v4308_v8  ;;  %v4406_v36 = vmul.bf16 %v17370_v38, %v4310_v45  ;;  %v13914_v50 = vld [vmem:[#allocation23 + $0x128] ss:$16 sps:$4 sm:$0xff]   ;;  %v13919_v47 = vld [vmem:[#allocation23 + $0x144] ss:$16 sps:$4 sm:$0xff]   ;;  %v13922_v8 = vld [vmem:[#allocation23 + $0x14c] ss:$16 sps:$4 sm:$0xff]  }
0x13c0   :  { %v4405_v27 = vmul.bf16 %v17373_v29, %v4309_v14  ;;  %v4407_v0 = vmul.bf16 %v17376_v16, %v4311_v11  ;;  %v13917_v45 = vld [vmem:[#allocation23 + $0x140] ss:$16 sps:$4 sm:$0xff]   ;;  %v13920_v1 = vld [vmem:[#allocation23 + $0x148] ss:$16 sps:$4 sm:$0xff]   ;;  %v13925_v7 = vld [vmem:[#allocation23 + $0x164] ss:$16 sps:$4 sm:$0xff]  }
0x13c1   :  { %v13928_v14 = vld [vmem:[#allocation23 + $0x16c] ss:$16 sps:$4 sm:$0xff]   ;;  %v13923_v11 = vld [vmem:[#allocation23 + $0x160] ss:$16 sps:$4 sm:$0xff]   ;;  %v13938_v9 = vld [vmem:[#allocation23 + $0x1a8] ss:$16 sps:$4 sm:$0xff]  }
0x13c2   :  { %4670 = vmatprep.subr.bf16.mxu0 %v4405_v27  ;;  %4713 = vmatprep.subr.bf16.mxu1 %v4407_v0  ;;  %v13934_v46 = vld [vmem:[#allocation23 + $0x18c] ss:$16 sps:$4 sm:$0xff]   ;;  %v13943_v63 = vld [vmem:[#allocation23 + $0x1c4] ss:$16 sps:$4 sm:$0xff]   ;;  %v13941_v27 = vld [vmem:[#allocation23 + $0x1c0] ss:$16 sps:$4 sm:$0xff]  }
0x13c3   :  { %4671 = vmatpush1.bf16.msra.mxu0 %v4404_v22  ;;  %4714 = vmatpush1.bf16.msra.mxu1 %v4406_v36  ;;  %v13929_v22 = vld [vmem:[#allocation23 + $0x180] ss:$16 sps:$4 sm:$0xff]   ;;  %v13940_v38 = vld [vmem:[#allocation23 + $0x1ac] ss:$16 sps:$4 sm:$0xff]   ;;  %v13944_v15 = vld [vmem:[#allocation23 + $0x1c8] ss:$16 sps:$4 sm:$0xff]  }
0x13c4   :  { %7862 = vmatprep.subr.bf16.mxu0 %v13859_v4  ;;  %8206 = vmatprep.subr.bf16.mxu1 %v13862_v53  ;;  %v13935_v36 = vld [vmem:[#allocation23 + $0x1a0] ss:$16 sps:$4 sm:$0xff]   ;;  %v13946_v29 = vld [vmem:[#allocation23 + $0x1cc] ss:$16 sps:$4 sm:$0xff]   ;;  %v13949_v48 = vld [vmem:[#allocation23 + $0x1e4] ss:$16 sps:$4 sm:$0xff]  }
0x13c5   :  { %v13952_v16 = vld [vmem:[#allocation23 + $0x1ec] ss:$16 sps:$4 sm:$0xff]   ;;  %v13947_v0 = vld [vmem:[#allocation23 + $0x1e0] ss:$16 sps:$4 sm:$0xff]   ;;  %v13950_v4 = vld [vmem:[#allocation23 + $0x1e8] ss:$16 sps:$4 sm:$0xff]  }
0x13c6   :  { %12138 = vmatmul.mubr.msk.bf16.vlgmr.msra.gmra.mrb[244].mxu0 %vm868_vm12, %v14771_v5  ;;  %12139 = vmatmul.mubr.msk.bf16.vlgmr.msra.gmra.mrb[184].mxu1 %vm868_vm12, %v14771_v5  ;;  %v13878_v5 = vld [vmem:[#allocation23 + $0x68] ss:$16 sps:$4 sm:$0xff]   ;;  %v13955_v53 = vld [vmem:[#allocation23 + $0x204] ss:$16 sps:$4 sm:$0xff]  }
0x13c7   :  { %7863 = vmatpush1.bf16.msra.mxu0 %v13857_v49  ;;  %8207 = vmatpush1.bf16.msra.mxu1 %v13860_v31  ;;  %v13958_v49 = vld [vmem:[#allocation23 + $0x20c] ss:$16 sps:$4 sm:$0xff]  }
0x13c8   :  { %7864 = vmatprep.subr.bf16.mxu0 %v13865_v32  ;;  %8208 = vmatprep.subr.bf16.mxu1 %v13868_v58 }
0x13cb   :  { %7865 = vmatpush1.bf16.msra.mxu0 %v13863_v12  ;;  %8209 = vmatpush1.bf16.msra.mxu1 %v13866_v62 }
0x13cc   :  { %7866 = vmatprep.subr.bf16.mxu0 %v13871_v39  ;;  %8210 = vmatprep.subr.bf16.mxu1 %v13874_v59  ;;  %v13953_v59 = vld [vmem:[#allocation23 + $0x200] ss:$16 sps:$4 sm:$0xff]  }
0x13cf   :  { %7867 = vmatpush1.bf16.msra.mxu0 %v13869_v61  ;;  %8211 = vmatpush1.bf16.msra.mxu1 %v13872_v6  ;;  %v13956_v61 = vld [vmem:[#allocation23 + $0x208] ss:$16 sps:$4 sm:$0xff]   ;;  %v13961_v6 = vld [vmem:[#allocation23 + $0x224] ss:$16 sps:$4 sm:$0xff]  }
0x13d0   :  { %7868 = vmatprep.subr.bf16.mxu0 %v13877_v54  ;;  %8212 = vmatprep.subr.bf16.mxu1 %v13880_v37  ;;  %v13964_v54 = vld [vmem:[#allocation23 + $0x22c] ss:$16 sps:$4 sm:$0xff]   ;;  %v13959_v37 = vld [vmem:[#allocation23 + $0x220] ss:$16 sps:$4 sm:$0xff]  }
0x13d3   :  { %7869 = vmatpush1.bf16.msra.mxu0 %v13875_v43  ;;  %8213 = vmatpush1.bf16.msra.mxu1 %v13878_v5  ;;  %v13962_v43 = vld [vmem:[#allocation23 + $0x228] ss:$16 sps:$4 sm:$0xff]   ;;  %v13967_v5 = vld [vmem:[#allocation23 + $0x244] ss:$16 sps:$4 sm:$0xff]  }
0x13d4   :  { %7870 = vmatprep.subr.bf16.mxu0 %v13883_v13  ;;  %8214 = vmatprep.subr.bf16.mxu1 %v13886_v17  ;;  %v13970_v13 = vld [vmem:[#allocation23 + $0x24c] ss:$16 sps:$4 sm:$0xff]   ;;  %v13965_v17 = vld [vmem:[#allocation23 + $0x240] ss:$16 sps:$4 sm:$0xff]  }
0x13d7   :  { %7871 = vmatpush1.bf16.msra.mxu0 %v13881_v19  ;;  %8215 = vmatpush1.bf16.msra.mxu1 %v13884_v34  ;;  %v13968_v19 = vld [vmem:[#allocation23 + $0x248] ss:$16 sps:$4 sm:$0xff]  }
0x13d8   :  { %7872 = vmatprep.subr.bf16.mxu0 %v13889_v23  ;;  %8216 = vmatprep.subr.bf16.mxu1 %v13892_v24  ;;  %v13973_v23 = vld [vmem:[#allocation23 + $0x264] ss:$16 sps:$4 sm:$0xff]   ;;  %v13976_v24 = vld [vmem:[#allocation23 + $0x26c] ss:$16 sps:$4 sm:$0xff]  }
0x13db   :  { %7873 = vmatpush1.bf16.msra.mxu0 %v13887_v26  ;;  %8217 = vmatpush1.bf16.msra.mxu1 %v13890_v51 }
0x13dc   :  { %7874 = vmatprep.subr.bf16.mxu0 %v13895_v25  ;;  %8218 = vmatprep.subr.bf16.mxu1 %v13898_v42 }
0x13df   :  { %7875 = vmatpush1.bf16.msra.mxu0 %v13893_v35  ;;  %8219 = vmatpush1.bf16.msra.mxu1 %v13896_v56  ;;  %v13971_v35 = vld [vmem:[#allocation23 + $0x260] ss:$16 sps:$4 sm:$0xff]   ;;  %v13974_v56 = vld [vmem:[#allocation23 + $0x268] ss:$16 sps:$4 sm:$0xff]  }
0x13e0   :  { %7876 = vmatprep.subr.bf16.mxu0 %v13901_v20  ;;  %8220 = vmatprep.subr.bf16.mxu1 %v13904_v41  ;;  %v13979_v41 = vld [vmem:[#allocation23 + $0x284] ss:$16 sps:$4 sm:$0xff]  }
0x13e3   :  { %7877 = vmatpush1.bf16.msra.mxu0 %v13899_v55  ;;  %8221 = vmatpush1.bf16.msra.mxu1 %v13902_v60  ;;  %v13982_v55 = vld [vmem:[#allocation23 + $0x28c] ss:$16 sps:$4 sm:$0xff]   ;;  %v13977_v60 = vld [vmem:[#allocation23 + $0x280] ss:$16 sps:$4 sm:$0xff]  }
0x13e4   :  { %7878 = vmatprep.subr.bf16.mxu0 %v13907_v10  ;;  %8222 = vmatprep.subr.bf16.mxu1 %v13910_v28  ;;  %v13980_v10 = vld [vmem:[#allocation23 + $0x288] ss:$16 sps:$4 sm:$0xff]   ;;  %v13985_v28 = vld [vmem:[#allocation23 + $0x2a4] ss:$16 sps:$4 sm:$0xff]  }
0x13e7   :  { %7879 = vmatpush1.bf16.msra.mxu0 %v13905_v57  ;;  %8223 = vmatpush1.bf16.msra.mxu1 %v13908_v30  ;;  %v13988_v57 = vld [vmem:[#allocation23 + $0x2ac] ss:$16 sps:$4 sm:$0xff]   ;;  %v13983_v30 = vld [vmem:[#allocation23 + $0x2a0] ss:$16 sps:$4 sm:$0xff]  }
0x13e8   :  { %7880 = vmatprep.subr.bf16.mxu0 %v13913_v2  ;;  %8224 = vmatprep.subr.bf16.mxu1 %v13916_v3  ;;  %v13986_v2 = vld [vmem:[#allocation23 + $0x2a8] ss:$16 sps:$4 sm:$0xff]  }
0x13eb   :  { %7881 = vmatpush1.bf16.msra.mxu0 %v13911_v18  ;;  %8225 = vmatpush1.bf16.msra.mxu1 %v13914_v50  ;;  %v13991_v50 = vld [vmem:[#allocation23 + $0x2c4] ss:$16 sps:$4 sm:$0xff]  }
0x13ec   :  { %7882 = vmatprep.subr.bf16.mxu0 %v13919_v47  ;;  %8226 = vmatprep.subr.bf16.mxu1 %v13922_v8  ;;  %v13994_v47 = vld [vmem:[#allocation23 + $0x2cc] ss:$16 sps:$4 sm:$0xff]  }
0x13ef   :  { %7883 = vmatpush1.bf16.msra.mxu0 %v13917_v45  ;;  %8227 = vmatpush1.bf16.msra.mxu1 %v13920_v1 }
0x13f0   :  { %7884 = vmatprep.subr.bf16.mxu0 %v13925_v7  ;;  %8228 = vmatprep.subr.bf16.mxu1 %v13928_v14 }
0x13f3   :  { %7885 = vmatpush1.bf16.msra.mxu0 %v13923_v11  ;;  %8229 = vmatpush1.bf16.msra.mxu1 %v13926_v44 }
0x13f4   :  { %7886 = vmatprep.subr.bf16.mxu0 %v13931_v52  ;;  %8230 = vmatprep.subr.bf16.mxu1 %v13934_v46  ;;  %v13989_v46 = vld [vmem:[#allocation23 + $0x2c0] ss:$16 sps:$4 sm:$0xff]  }
0x13f7   :  { %7887 = vmatpush1.bf16.msra.mxu0 %v13929_v22  ;;  %8231 = vmatpush1.bf16.msra.mxu1 %v13932_v33  ;;  %v13992_v22 = vld [vmem:[#allocation23 + $0x2c8] ss:$16 sps:$4 sm:$0xff]  }
0x13f8   :  { %7888 = vmatprep.subr.bf16.mxu0 %v13937_v21  ;;  %8232 = vmatprep.subr.bf16.mxu1 %v13940_v38  ;;  %v13997_v38 = vld [vmem:[#allocation23 + $0x2e4] ss:$16 sps:$4 sm:$0xff]  }
0x13fb   :  { %7889 = vmatpush1.bf16.msra.mxu0 %v13935_v36  ;;  %8233 = vmatpush1.bf16.msra.mxu1 %v13938_v9  ;;  %v14000_v36 = vld [vmem:[#allocation23 + $0x2ec] ss:$16 sps:$4 sm:$0xff]   ;;  %v13995_v9 = vld [vmem:[#allocation23 + $0x2e0] ss:$16 sps:$4 sm:$0xff]  }
0x13fc   :  { %7890 = vmatprep.subr.bf16.mxu0 %v13943_v63  ;;  %8234 = vmatprep.subr.bf16.mxu1 %v13946_v29  ;;  %v13998_v63 = vld [vmem:[#allocation23 + $0x2e8] ss:$16 sps:$4 sm:$0xff]   ;;  %v14003_v29 = vld [vmem:[#allocation23 + $0x304] ss:$16 sps:$4 sm:$0xff]  }
0x13ff   :  { %7891 = vmatpush1.bf16.msra.mxu0 %v13941_v27  ;;  %8235 = vmatpush1.bf16.msra.mxu1 %v13944_v15  ;;  %v14006_v27 = vld [vmem:[#allocation23 + $0x30c] ss:$16 sps:$4 sm:$0xff]   ;;  %v14001_v15 = vld [vmem:[#allocation23 + $0x300] ss:$16 sps:$4 sm:$0xff]  }
0x1400   :  { %7892 = vmatprep.subr.bf16.mxu0 %v13949_v48  ;;  %8236 = vmatprep.subr.bf16.mxu1 %v13952_v16  ;;  %v14004_v48 = vld [vmem:[#allocation23 + $0x308] ss:$16 sps:$4 sm:$0xff]   ;;  %v14009_v16 = vld [vmem:[#allocation23 + $0x324] ss:$16 sps:$4 sm:$0xff]  }
0x1403   :  { %7893 = vmatpush1.bf16.msra.mxu0 %v13947_v0  ;;  %8237 = vmatpush1.bf16.msra.mxu1 %v13950_v4  ;;  %v14012_v0 = vld [vmem:[#allocation23 + $0x32c] ss:$16 sps:$4 sm:$0xff]   ;;  %v14007_v4 = vld [vmem:[#allocation23 + $0x320] ss:$16 sps:$4 sm:$0xff]  }
0x1404   :  { %7905 = vmatprep.subr.bf16.mxu0 %v13955_v53  ;;  %8249 = vmatprep.subr.bf16.mxu1 %v13958_v49  ;;  %v14010_v53 = vld [vmem:[#allocation23 + $0x328] ss:$16 sps:$4 sm:$0xff]   ;;  %v14015_v49 = vld [vmem:[#allocation23 + $0x344] ss:$16 sps:$4 sm:$0xff]  }
0x1451   :  { %v4442_v31 = vpop.f32.mrb[168].mxu1 }
0x1452   :  { %v4444_v32 = vpop.f32.mrb[169].mxu1 }
0x1453   :  { %v4446_v58 = vpop.f32.mrb[170].mxu1 }
0x1454   :  { %v4752_v12 = vpack.c.bf16 %v4446_v58, %v4442_v31  ;;  %v4448_v62 = vpop.f32.mrb[171].mxu1  ;;  %v14018_v31 = vld [vmem:[#allocation23 + $0x34c] ss:$16 sps:$4 sm:$0xff]   ;;  %v14016_v58 = vld [vmem:[#allocation23 + $0x348] ss:$16 sps:$4 sm:$0xff]  }
0x1455   :  { %v4753_v39 = vpack.c.bf16 %v4448_v62, %v4444_v32  ;;  %v14013_v32 = vld [vmem:[#allocation23 + $0x340] ss:$16 sps:$4 sm:$0xff]   ;;  %v14024_v62 = vld [vmem:[#allocation23 + $0x36c] ss:$16 sps:$4 sm:$0xff]  }
0x1457   :  { %7894 = vmatprep.mubr.bf16.mxu0 %v4753_v39  ;;  %8238 = vmatprep.mubr.bf16.mxu1 %v4753_v39  ;;  %v14019_v39 = vld [vmem:[#allocation23 + $0x360] ss:$16 sps:$4 sm:$0xff]  }
0x1458   :  { %7895 = vmatmul.mubr.bf16.vlgmr.msra.gmra.mrb[248].mxu0 %v4752_v12  ;;  %8239 = vmatmul.mubr.bf16.vlgmr.msra.gmra.mrb[188].mxu1 %v4752_v12  ;;  %v14021_v12 = vld [vmem:[#allocation23 + $0x364] ss:$16 sps:$4 sm:$0xff]  }
0x1459   :  { %7906 = vmatpush1.bf16.msra.mxu0 %v13953_v59  ;;  %8250 = vmatpush1.bf16.msra.mxu1 %v13956_v61  ;;  %v14022_v59 = vld [vmem:[#allocation23 + $0x368] ss:$16 sps:$4 sm:$0xff]  }
0x145a   :  { %7907 = vmatprep.subr.bf16.mxu0 %v13961_v6  ;;  %8251 = vmatprep.subr.bf16.mxu1 %v13964_v54  ;;  %v14027_v54 = vld [vmem:[#allocation23 + $0x384] ss:$16 sps:$4 sm:$0xff]  }
0x145d   :  { %7908 = vmatpush1.bf16.msra.mxu0 %v13959_v37  ;;  %8252 = vmatpush1.bf16.msra.mxu1 %v13962_v43  ;;  %v4485_v34 = vpop.f32.mrb[172].mxu1  ;;  %v14030_v37 = vld [vmem:[#allocation23 + $0x38c] ss:$16 sps:$4 sm:$0xff]  }
0x145e   :  { %7909 = vmatprep.subr.bf16.mxu0 %v13967_v5  ;;  %8253 = vmatprep.subr.bf16.mxu1 %v13970_v13  ;;  %v4487_v26 = vpop.f32.mrb[173].mxu1 }
0x145f   :  { %v4489_v51 = vpop.f32.mrb[174].mxu1 }
0x1460   :  { %v16843_v25 = vpack.c.bf16 %v4489_v51, %v4485_v34  ;;  %v4491_v42 = vpop.f32.mrb[175].mxu1  ;;  %v14028_v51 = vld [vmem:[#allocation23 + $0x388] ss:$16 sps:$4 sm:$0xff]  }
0x1461   :  { %7910 = vmatpush1.bf16.msra.mxu0 %v13965_v17  ;;  %8254 = vmatpush1.bf16.msra.mxu1 %v13968_v19  ;;  %v4755_v20 = vpack.c.bf16 %v4491_v42, %v4487_v26  ;;  %v14025_v26 = vld [vmem:[#allocation23 + $0x380] ss:$16 sps:$4 sm:$0xff]  }
0x1462   :  { %7911 = vmatprep.subr.bf16.mxu0 %v13973_v23  ;;  %8255 = vmatprep.subr.bf16.mxu1 %v13976_v24 }
0x1463   :  { %7937 = vmatprep.mubr.bf16.mxu0 %v4755_v20  ;;  %8281 = vmatprep.mubr.bf16.mxu1 %v4755_v20  ;;  %v14036_v20 = vld [vmem:[#allocation23 + $0x3ac] ss:$16 sps:$4 sm:$0xff]  }
0x1465   :  { %7912 = vmatpush1.bf16.msra.mxu0 %v13971_v35  ;;  %8256 = vmatpush1.bf16.msra.mxu1 %v13974_v56  ;;  %v14033_v56 = vld [vmem:[#allocation23 + $0x3a4] ss:$16 sps:$4 sm:$0xff]  }
0x1466   :  { %7913 = vmatprep.subr.bf16.mxu0 %v13979_v41  ;;  %8257 = vmatprep.subr.bf16.mxu1 %v13982_v55  ;;  %v14031_v41 = vld [vmem:[#allocation23 + $0x3a0] ss:$16 sps:$4 sm:$0xff]   ;;  %v14034_v55 = vld [vmem:[#allocation23 + $0x3a8] ss:$16 sps:$4 sm:$0xff]  }
0x1469   :  { %7914 = vmatpush1.bf16.msra.mxu0 %v13977_v60  ;;  %8258 = vmatpush1.bf16.msra.mxu1 %v13980_v10  ;;  %v4528_v3 = vpop.f32.mrb[236].mxu0  ;;  %v4571_v18 = vpop.f32.mrb[176].mxu1  ;;  %v14039_v60 = vld [vmem:[#allocation23 + $0x3c4] ss:$16 sps:$4 sm:$0xff]   ;;  %v14042_v10 = vld [vmem:[#allocation23 + $0x3cc] ss:$16 sps:$4 sm:$0xff]  }
0x146a   :  { %7915 = vmatprep.subr.bf16.mxu0 %v13985_v28  ;;  %8259 = vmatprep.subr.bf16.mxu1 %v13988_v57  ;;  %v4530_v8 = vpop.f32.mrb[237].mxu0  ;;  %v4573_v45 = vpop.f32.mrb[177].mxu1  ;;  %v14037_v28 = vld [vmem:[#allocation23 + $0x3c0] ss:$16 sps:$4 sm:$0xff]   ;;  %v14040_v57 = vld [vmem:[#allocation23 + $0x3c8] ss:$16 sps:$4 sm:$0xff]  }
0x146b   :  { %v4532_v1 = vpop.f32.mrb[238].mxu0  ;;  %v4575_v7 = vpop.f32.mrb[178].mxu1 }
0x146c   :  { %v16845_v14 = vpack.c.bf16 %v4532_v1, %v4528_v3  ;;  %v4534_v11 = vpop.f32.mrb[239].mxu0  ;;  %v16847_v44 = vpack.c.bf16 %v4575_v7, %v4571_v18  ;;  %v4577_v52 = vpop.f32.mrb[179].mxu1  ;;  %v14043_v3 = vld [vmem:[#allocation23 + $0x3e0] ss:$16 sps:$4 sm:$0xff]   ;;  %v14046_v18 = vld [vmem:[#allocation23 + $0x3e8] ss:$16 sps:$4 sm:$0xff]  }
0x146d   :  { %7916 = vmatpush1.bf16.msra.mxu0 %v13983_v30  ;;  %8260 = vmatpush1.bf16.msra.mxu1 %v13986_v2  ;;  %v16849_v33 = vpack.c.bf16 %v4534_v11, %v4530_v8  ;;  %v16851_v21 = vpack.c.bf16 %v4577_v52, %v4573_v45  ;;  %v14045_v30 = vld [vmem:[#allocation23 + $0x3e4] ss:$16 sps:$4 sm:$0xff]   ;;  %v14048_v2 = vld [vmem:[#allocation23 + $0x3ec] ss:$16 sps:$4 sm:$0xff]   ;;  %v14049_v8 = vld [vmem:[#allocation23 + $0x400] ss:$16 sps:$4 sm:$0xff]  }
0x146e   :  { %7917 = vmatprep.subr.bf16.mxu0 %v13991_v50  ;;  %8261 = vmatprep.subr.bf16.mxu1 %v13994_v47  ;;  %v14051_v50 = vld [vmem:[#allocation23 + $0x404] ss:$16 sps:$4 sm:$0xff]   ;;  %v14054_v47 = vld [vmem:[#allocation23 + $0x40c] ss:$16 sps:$4 sm:$0xff]   ;;  %v14052_v45 = vld [vmem:[#allocation23 + $0x408] ss:$16 sps:$4 sm:$0xff]  }
0x146f   :  { %v14057_v1 = vld [vmem:[#allocation23 + $0x424] ss:$16 sps:$4 sm:$0xff]   ;;  %v14060_v7 = vld [vmem:[#allocation23 + $0x42c] ss:$16 sps:$4 sm:$0xff]   ;;  %v14055_v11 = vld [vmem:[#allocation23 + $0x420] ss:$16 sps:$4 sm:$0xff]  }
0x1470   :  { %v14058_v52 = vld [vmem:[#allocation23 + $0x428] ss:$16 sps:$4 sm:$0xff]  }
0x1471   :  { %7918 = vmatpush1.bf16.msra.mxu0 %v13989_v46  ;;  %8262 = vmatpush1.bf16.msra.mxu1 %v13992_v22 }
0x1472   :  { %7919 = vmatprep.subr.bf16.mxu0 %v13997_v38  ;;  %8263 = vmatprep.subr.bf16.mxu1 %v14000_v36  ;;  %v14063_v38 = vld [vmem:[#allocation23 + $0x444] ss:$16 sps:$4 sm:$0xff]   ;;  %v14066_v36 = vld [vmem:[#allocation23 + $0x44c] ss:$16 sps:$4 sm:$0xff]  }
0x1475   :  { %7920 = vmatpush1.bf16.msra.mxu0 %v13995_v9  ;;  %8264 = vmatpush1.bf16.msra.mxu1 %v13998_v63 }
0x1476   :  { %7921 = vmatprep.subr.bf16.mxu0 %v14003_v29  ;;  %8265 = vmatprep.subr.bf16.mxu1 %v14006_v27 }
0x1479   :  { %7922 = vmatpush1.bf16.msra.mxu0 %v14001_v15  ;;  %8266 = vmatpush1.bf16.msra.mxu1 %v14004_v48 }
0x147a   :  { %7923 = vmatprep.subr.bf16.mxu0 %v14009_v16  ;;  %8267 = vmatprep.subr.bf16.mxu1 %v14012_v0  ;;  %v14061_v0 = vld [vmem:[#allocation23 + $0x440] ss:$16 sps:$4 sm:$0xff]  }
0x147d   :  { %7924 = vmatpush1.bf16.msra.mxu0 %v14007_v4  ;;  %8268 = vmatpush1.bf16.msra.mxu1 %v14010_v53  ;;  %v14064_v4 = vld [vmem:[#allocation23 + $0x448] ss:$16 sps:$4 sm:$0xff]  }
0x147e   :  { %7925 = vmatprep.subr.bf16.mxu0 %v14015_v49  ;;  %8269 = vmatprep.subr.bf16.mxu1 %v14018_v31  ;;  %v14069_v31 = vld [vmem:[#allocation23 + $0x464] ss:$16 sps:$4 sm:$0xff]  }
0x1481   :  { %7926 = vmatpush1.bf16.msra.mxu0 %v14013_v32  ;;  %8270 = vmatpush1.bf16.msra.mxu1 %v14016_v58  ;;  %v4614_v61 = vpop.f32.mrb[240].mxu0  ;;  %v4657_v6 = vpop.f32.mrb[180].mxu1  ;;  %v14067_v32 = vld [vmem:[#allocation23 + $0x460] ss:$16 sps:$4 sm:$0xff]   ;;  %v14070_v58 = vld [vmem:[#allocation23 + $0x468] ss:$16 sps:$4 sm:$0xff]  }
0x1482   :  { %7927 = vmatprep.subr.bf16.mxu0 %v14021_v12  ;;  %8271 = vmatprep.subr.bf16.mxu1 %v14024_v62  ;;  %v4616_v43 = vpop.f32.mrb[241].mxu0  ;;  %v4659_v5 = vpop.f32.mrb[181].mxu1  ;;  %v14075_v12 = vld [vmem:[#allocation23 + $0x484] ss:$16 sps:$4 sm:$0xff]   ;;  %v14078_v62 = vld [vmem:[#allocation23 + $0x48c] ss:$16 sps:$4 sm:$0xff]  }
0x1483   :  { %v4618_v13 = vpop.f32.mrb[242].mxu0  ;;  %v4661_v17 = vpop.f32.mrb[182].mxu1 }
0x1484   :  { %v16853_v19 = vpack.c.bf16 %v4618_v13, %v4614_v61  ;;  %v16855_v34 = vpack.c.bf16 %v4661_v17, %v4657_v6  ;;  %v4620_v23 = vpop.f32.mrb[243].mxu0  ;;  %v4663_v24 = vpop.f32.mrb[183].mxu1  ;;  %v14081_v61 = vld [vmem:[#allocation23 + $0x4a4] ss:$16 sps:$4 sm:$0xff]   ;;  %v14084_v6 = vld [vmem:[#allocation23 + $0x4ac] ss:$16 sps:$4 sm:$0xff]  }
0x1485   :  { %7928 = vmatpush1.bf16.msra.mxu0 %v14019_v39  ;;  %8272 = vmatpush1.bf16.msra.mxu1 %v14022_v59  ;;  %v16857_v42 = vpack.c.bf16 %v4620_v23, %v4616_v43  ;;  %v16859_v35 = vpack.c.bf16 %v4663_v24, %v4659_v5  ;;  %v14073_v39 = vld [vmem:[#allocation23 + $0x480] ss:$16 sps:$4 sm:$0xff]   ;;  %v14076_v59 = vld [vmem:[#allocation23 + $0x488] ss:$16 sps:$4 sm:$0xff]   ;;  %v14087_v43 = vld [vmem:[#allocation23 + $0x4c4] ss:$16 sps:$4 sm:$0xff]  }
0x1486   :  { %7929 = vmatprep.subr.bf16.mxu0 %v14027_v54  ;;  %8273 = vmatprep.subr.bf16.mxu1 %v14030_v37  ;;  %v14079_v54 = vld [vmem:[#allocation23 + $0x4a0] ss:$16 sps:$4 sm:$0xff]   ;;  %v14082_v37 = vld [vmem:[#allocation23 + $0x4a8] ss:$16 sps:$4 sm:$0xff]   ;;  %v14090_v5 = vld [vmem:[#allocation23 + $0x4cc] ss:$16 sps:$4 sm:$0xff]  }
0x1487   :  { %v14085_v13 = vld [vmem:[#allocation23 + $0x4c0] ss:$16 sps:$4 sm:$0xff]   ;;  %v14088_v17 = vld [vmem:[#allocation23 + $0x4c8] ss:$16 sps:$4 sm:$0xff]   ;;  %v14093_v23 = vld [vmem:[#allocation23 + $0x4e4] ss:$16 sps:$4 sm:$0xff]  }
0x1488   :  { %v14096_v24 = vld [vmem:[#allocation23 + $0x4ec] ss:$16 sps:$4 sm:$0xff]  }
0x1489   :  { %7930 = vmatpush1.bf16.msra.mxu0 %v14025_v26  ;;  %8274 = vmatpush1.bf16.msra.mxu1 %v14028_v51  ;;  %v14091_v26 = vld [vmem:[#allocation23 + $0x4e0] ss:$16 sps:$4 sm:$0xff]   ;;  %v14094_v51 = vld [vmem:[#allocation23 + $0x4e8] ss:$16 sps:$4 sm:$0xff]  }
0x148a   :  { %7931 = vmatprep.subr.bf16.mxu0 %v14033_v56  ;;  %8275 = vmatprep.subr.bf16.mxu1 %v14036_v20  ;;  %v14099_v56 = vld [vmem:[#allocation23 + $0x504] ss:$16 sps:$4 sm:$0xff]   ;;  %v14102_v20 = vld [vmem:[#allocation23 + $0x50c] ss:$16 sps:$4 sm:$0xff]  }
0x148d   :  { %7932 = vmatpush1.bf16.msra.mxu0 %v14031_v41  ;;  %8276 = vmatpush1.bf16.msra.mxu1 %v14034_v55  ;;  %v14097_v41 = vld [vmem:[#allocation23 + $0x500] ss:$16 sps:$4 sm:$0xff]   ;;  %v14100_v55 = vld [vmem:[#allocation23 + $0x508] ss:$16 sps:$4 sm:$0xff]  }
0x148e   :  { %7933 = vmatprep.subr.bf16.mxu0 %v14039_v60  ;;  %8277 = vmatprep.subr.bf16.mxu1 %v14042_v10  ;;  %v14105_v60 = vld [vmem:[#allocation23 + $0x524] ss:$16 sps:$4 sm:$0xff]   ;;  %v14108_v10 = vld [vmem:[#allocation23 + $0x52c] ss:$16 sps:$4 sm:$0xff]  }
0x1491   :  { %7934 = vmatpush1.bf16.msra.mxu0 %v14037_v28  ;;  %8278 = vmatpush1.bf16.msra.mxu1 %v14040_v57  ;;  %v14103_v28 = vld [vmem:[#allocation23 + $0x520] ss:$16 sps:$4 sm:$0xff]   ;;  %v14106_v57 = vld [vmem:[#allocation23 + $0x528] ss:$16 sps:$4 sm:$0xff]  }
0x1492   :  { %7935 = vmatprep.subr.bf16.mxu0 %v14045_v30  ;;  %8279 = vmatprep.subr.bf16.mxu1 %v14048_v2  ;;  %v14111_v30 = vld [vmem:[#allocation23 + $0x544] ss:$16 sps:$4 sm:$0xff]   ;;  %v14114_v2 = vld [vmem:[#allocation23 + $0x54c] ss:$16 sps:$4 sm:$0xff]  }
0x1495   :  { %7936 = vmatpush1.bf16.msra.mxu0 %v14043_v3  ;;  %8280 = vmatpush1.bf16.msra.mxu1 %v14046_v18  ;;  %v14109_v3 = vld [vmem:[#allocation23 + $0x540] ss:$16 sps:$4 sm:$0xff]   ;;  %v14112_v18 = vld [vmem:[#allocation23 + $0x548] ss:$16 sps:$4 sm:$0xff]  }
0x1496   :  { %7948 = vmatprep.subr.bf16.mxu0 %v14051_v50  ;;  %8292 = vmatprep.subr.bf16.mxu1 %v14054_v47  ;;  %v14117_v50 = vld [vmem:[#allocation23 + $0x564] ss:$16 sps:$4 sm:$0xff]   ;;  %v14120_v47 = vld [vmem:[#allocation23 + $0x56c] ss:$16 sps:$4 sm:$0xff]  }
0x1498   :  { %7938 = vmatmul.mubr.bf16.vlgmr.msra.gmra.mrb[248].mxu0 %v16843_v25  ;;  %8282 = vmatmul.mubr.bf16.vlgmr.msra.gmra.mrb[188].mxu1 %v16843_v25 }
0x1499   :  { %7949 = vmatpush1.bf16.msra.mxu0 %v14049_v8  ;;  %8293 = vmatpush1.bf16.msra.mxu1 %v14052_v45  ;;  %v4700_v46 = vpop.f32.mrb[244].mxu0  ;;  %v4743_v22 = vpop.f32.mrb[184].mxu1  ;;  %v14115_v8 = vld [vmem:[#allocation23 + $0x560] ss:$16 sps:$4 sm:$0xff]   ;;  %v14118_v45 = vld [vmem:[#allocation23 + $0x568] ss:$16 sps:$4 sm:$0xff]  }
0x149a   :  { %7950 = vmatprep.subr.bf16.mxu0 %v14057_v1  ;;  %8294 = vmatprep.subr.bf16.mxu1 %v14060_v7  ;;  %v4702_v9 = vpop.f32.mrb[245].mxu0  ;;  %v4745_v63 = vpop.f32.mrb[185].mxu1  ;;  %v14123_v1 = vld [vmem:[#allocation23 + $0x584] ss:$16 sps:$4 sm:$0xff]   ;;  %v14126_v7 = vld [vmem:[#allocation23 + $0x58c] ss:$16 sps:$4 sm:$0xff]  }
0x149b   :  { %7980 = vmatprep.mubr.bf16.mxu0 %v16849_v33  ;;  %8324 = vmatprep.mubr.bf16.mxu1 %v16849_v33  ;;  %v4704_v29 = vpop.f32.mrb[246].mxu0  ;;  %v4747_v27 = vpop.f32.mrb[186].mxu1  ;;  %v14072_v33 = vld [vmem:[#allocation23 + $0x46c] ss:$16 sps:$4 sm:$0xff]  }
0x149c   :  { %v16865_v15 = vpack.c.bf16 %v4704_v29, %v4700_v46  ;;  %v16867_v25 = vpack.c.bf16 %v4747_v27, %v4743_v22  ;;  %v4706_v48 = vpop.f32.mrb[247].mxu0  ;;  %v4749_v16 = vpop.f32.mrb[187].mxu1  ;;  %v14129_v46 = vld [vmem:[#allocation23 + $0x5a4] ss:$16 sps:$4 sm:$0xff]   ;;  %v14132_v22 = vld [vmem:[#allocation23 + $0x5ac] ss:$16 sps:$4 sm:$0xff]  }
0x149d   :  { %7951 = vmatpush1.bf16.msra.mxu0 %v14055_v11  ;;  %8295 = vmatpush1.bf16.msra.mxu1 %v14058_v52  ;;  %v16869_v53 = vpack.c.bf16 %v4706_v48, %v4702_v9  ;;  %v16871_v49 = vpack.c.bf16 %v4749_v16, %v4745_v63  ;;  %v14121_v11 = vld [vmem:[#allocation23 + $0x580] ss:$16 sps:$4 sm:$0xff]   ;;  %v14124_v52 = vld [vmem:[#allocation23 + $0x588] ss:$16 sps:$4 sm:$0xff]   ;;  %v14135_v9 = vld [vmem:[#allocation23 + $0x5c4] ss:$16 sps:$4 sm:$0xff]  }
0x149e   :  { %7952 = vmatprep.subr.bf16.mxu0 %v14063_v38  ;;  %8296 = vmatprep.subr.bf16.mxu1 %v14066_v36  ;;  %v14127_v38 = vld [vmem:[#allocation23 + $0x5a0] ss:$16 sps:$4 sm:$0xff]   ;;  %v14130_v36 = vld [vmem:[#allocation23 + $0x5a8] ss:$16 sps:$4 sm:$0xff]   ;;  %v14138_v63 = vld [vmem:[#allocation23 + $0x5cc] ss:$16 sps:$4 sm:$0xff]  }
0x149f   :  { %v14133_v29 = vld [vmem:[#allocation23 + $0x5c0] ss:$16 sps:$4 sm:$0xff]   ;;  %v14136_v27 = vld [vmem:[#allocation23 + $0x5c8] ss:$16 sps:$4 sm:$0xff]   ;;  %v14141_v48 = vld [vmem:[#allocation23 + $0x5e4] ss:$16 sps:$4 sm:$0xff]  }
0x14a0   :  { %v14144_v16 = vld [vmem:[#allocation23 + $0x5ec] ss:$16 sps:$4 sm:$0xff]  }
0x14a1   :  { %7953 = vmatpush1.bf16.msra.mxu0 %v14061_v0  ;;  %8297 = vmatpush1.bf16.msra.mxu1 %v14064_v4  ;;  %v14139_v0 = vld [vmem:[#allocation23 + $0x5e0] ss:$16 sps:$4 sm:$0xff]   ;;  %v14142_v4 = vld [vmem:[#allocation23 + $0x5e8] ss:$16 sps:$4 sm:$0xff]  }
0x14a2   :  { %7954 = vmatprep.subr.bf16.mxu0 %v14069_v31  ;;  %8298 = vmatprep.subr.bf16.mxu1 %v14072_v33  ;;  %v14147_v31 = vld [vmem:[#allocation23 + $0x604] ss:$16 sps:$4 sm:$0xff]   ;;  %v14150_v33 = vld [vmem:[#allocation23 + $0x60c] ss:$16 sps:$4 sm:$0xff]  }
0x14a5   :  { %7955 = vmatpush1.bf16.msra.mxu0 %v14067_v32  ;;  %8299 = vmatpush1.bf16.msra.mxu1 %v14070_v58  ;;  %v14145_v32 = vld [vmem:[#allocation23 + $0x600] ss:$16 sps:$4 sm:$0xff]   ;;  %v14148_v58 = vld [vmem:[#allocation23 + $0x608] ss:$16 sps:$4 sm:$0xff]  }
0x14a6   :  { %7956 = vmatprep.subr.bf16.mxu0 %v14075_v12  ;;  %8300 = vmatprep.subr.bf16.mxu1 %v14078_v62  ;;  %v14153_v12 = vld [vmem:[#allocation23 + $0x624] ss:$16 sps:$4 sm:$0xff]   ;;  %v14156_v62 = vld [vmem:[#allocation23 + $0x62c] ss:$16 sps:$4 sm:$0xff]  }
0x14a9   :  { %7957 = vmatpush1.bf16.msra.mxu0 %v14073_v39  ;;  %8301 = vmatpush1.bf16.msra.mxu1 %v14076_v59  ;;  %v14151_v39 = vld [vmem:[#allocation23 + $0x620] ss:$16 sps:$4 sm:$0xff]   ;;  %v14154_v59 = vld [vmem:[#allocation23 + $0x628] ss:$16 sps:$4 sm:$0xff]  }
0x14aa   :  { %7958 = vmatprep.subr.bf16.mxu0 %v14081_v61  ;;  %8302 = vmatprep.subr.bf16.mxu1 %v14084_v6  ;;  %v14159_v61 = vld [vmem:[#allocation23 + $0x644] ss:$16 sps:$4 sm:$0xff]   ;;  %v14162_v6 = vld [vmem:[#allocation23 + $0x64c] ss:$16 sps:$4 sm:$0xff]  }
0x14ad   :  { %7959 = vmatpush1.bf16.msra.mxu0 %v14079_v54  ;;  %8303 = vmatpush1.bf16.msra.mxu1 %v14082_v37  ;;  %v14157_v54 = vld [vmem:[#allocation23 + $0x640] ss:$16 sps:$4 sm:$0xff]   ;;  %v14160_v37 = vld [vmem:[#allocation23 + $0x648] ss:$16 sps:$4 sm:$0xff]  }
0x14ae   :  { %7960 = vmatprep.subr.bf16.mxu0 %v14087_v43  ;;  %8304 = vmatprep.subr.bf16.mxu1 %v14090_v5  ;;  %v14165_v43 = vld [vmem:[#allocation23 + $0x664] ss:$16 sps:$4 sm:$0xff]   ;;  %v14163_v5 = vld [vmem:[#allocation23 + $0x660] ss:$16 sps:$4 sm:$0xff]  }
0x14b1   :  { %7961 = vmatpush1.bf16.msra.mxu0 %v14085_v13  ;;  %8305 = vmatpush1.bf16.msra.mxu1 %v14088_v17  ;;  %v14166_v13 = vld [vmem:[#allocation23 + $0x668] ss:$16 sps:$4 sm:$0xff]   ;;  %v14171_v17 = vld [vmem:[#allocation23 + $0x684] ss:$16 sps:$4 sm:$0xff]  }
0x14b2   :  { %7962 = vmatprep.subr.bf16.mxu0 %v14093_v23  ;;  %8306 = vmatprep.subr.bf16.mxu1 %v14096_v24  ;;  %v14174_v23 = vld [vmem:[#allocation23 + $0x68c] ss:$16 sps:$4 sm:$0xff]   ;;  %v14169_v24 = vld [vmem:[#allocation23 + $0x680] ss:$16 sps:$4 sm:$0xff]  }
0x14b5   :  { %7963 = vmatpush1.bf16.msra.mxu0 %v14091_v26  ;;  %8307 = vmatpush1.bf16.msra.mxu1 %v14094_v51  ;;  %v14177_v26 = vld [vmem:[#allocation23 + $0x6a4] ss:$16 sps:$4 sm:$0xff]   ;;  %v14180_v51 = vld [vmem:[#allocation23 + $0x6ac] ss:$16 sps:$4 sm:$0xff]  }
0x14b6   :  { %7964 = vmatprep.subr.bf16.mxu0 %v14099_v56  ;;  %8308 = vmatprep.subr.bf16.mxu1 %v14102_v20  ;;  %v14175_v56 = vld [vmem:[#allocation23 + $0x6a0] ss:$16 sps:$4 sm:$0xff]   ;;  %v14178_v20 = vld [vmem:[#allocation23 + $0x6a8] ss:$16 sps:$4 sm:$0xff]  }
0x14b9   :  { %7965 = vmatpush1.bf16.msra.mxu0 %v14097_v41  ;;  %8309 = vmatpush1.bf16.msra.mxu1 %v14100_v55  ;;  %v14183_v41 = vld [vmem:[#allocation23 + $0x6c4] ss:$16 sps:$4 sm:$0xff]   ;;  %v14186_v55 = vld [vmem:[#allocation23 + $0x6cc] ss:$16 sps:$4 sm:$0xff]  }
0x14ba   :  { %7966 = vmatprep.subr.bf16.mxu0 %v14105_v60  ;;  %8310 = vmatprep.subr.bf16.mxu1 %v14108_v10  ;;  %v14181_v60 = vld [vmem:[#allocation23 + $0x6c0] ss:$16 sps:$4 sm:$0xff]   ;;  %v14184_v10 = vld [vmem:[#allocation23 + $0x6c8] ss:$16 sps:$4 sm:$0xff]  }
0x14bd   :  { %7967 = vmatpush1.bf16.msra.mxu0 %v14103_v28  ;;  %8311 = vmatpush1.bf16.msra.mxu1 %v14106_v57  ;;  %v14189_v28 = vld [vmem:[#allocation23 + $0x6e4] ss:$16 sps:$4 sm:$0xff]   ;;  %v14192_v57 = vld [vmem:[#allocation23 + $0x6ec] ss:$16 sps:$4 sm:$0xff]  }
0x14be   :  { %7968 = vmatprep.subr.bf16.mxu0 %v14111_v30  ;;  %8312 = vmatprep.subr.bf16.mxu1 %v14114_v2  ;;  %v14187_v30 = vld [vmem:[#allocation23 + $0x6e0] ss:$16 sps:$4 sm:$0xff]   ;;  %v14190_v2 = vld [vmem:[#allocation23 + $0x6e8] ss:$16 sps:$4 sm:$0xff]  }
0x14c1   :  { %7969 = vmatpush1.bf16.msra.mxu0 %v14109_v3  ;;  %8313 = vmatpush1.bf16.msra.mxu1 %v14112_v18  ;;  %v14195_v3 = vld [vmem:[#allocation23 + $0x704] ss:$16 sps:$4 sm:$0xff]   ;;  %v14198_v18 = vld [vmem:[#allocation23 + $0x70c] ss:$16 sps:$4 sm:$0xff]  }
0x14c2   :  { %7970 = vmatprep.subr.bf16.mxu0 %v14117_v50  ;;  %8314 = vmatprep.subr.bf16.mxu1 %v14120_v47  ;;  %v14193_v50 = vld [vmem:[#allocation23 + $0x700] ss:$16 sps:$4 sm:$0xff]   ;;  %v14196_v47 = vld [vmem:[#allocation23 + $0x708] ss:$16 sps:$4 sm:$0xff]  }
0x14c5   :  { %7971 = vmatpush1.bf16.msra.mxu0 %v14115_v8  ;;  %8315 = vmatpush1.bf16.msra.mxu1 %v14118_v45  ;;  %v14201_v8 = vld [vmem:[#allocation23 + $0x724] ss:$16 sps:$4 sm:$0xff]   ;;  %v14204_v45 = vld [vmem:[#allocation23 + $0x72c] ss:$16 sps:$4 sm:$0xff]  }
0x14c6   :  { %7972 = vmatprep.subr.bf16.mxu0 %v14123_v1  ;;  %8316 = vmatprep.subr.bf16.mxu1 %v14126_v7  ;;  %v14199_v1 = vld [vmem:[#allocation23 + $0x720] ss:$16 sps:$4 sm:$0xff]   ;;  %v14202_v7 = vld [vmem:[#allocation23 + $0x728] ss:$16 sps:$4 sm:$0xff]  }
0x14c9   :  { %7973 = vmatpush1.bf16.msra.mxu0 %v14121_v11  ;;  %8317 = vmatpush1.bf16.msra.mxu1 %v14124_v52  ;;  %v14207_v11 = vld [vmem:[#allocation23 + $0x744] ss:$16 sps:$4 sm:$0xff]   ;;  %v14210_v52 = vld [vmem:[#allocation23 + $0x74c] ss:$16 sps:$4 sm:$0xff]  }
0x14ca   :  { %7974 = vmatprep.subr.bf16.mxu0 %v14129_v46  ;;  %8318 = vmatprep.subr.bf16.mxu1 %v14132_v22  ;;  %v14205_v46 = vld [vmem:[#allocation23 + $0x740] ss:$16 sps:$4 sm:$0xff]   ;;  %v14208_v22 = vld [vmem:[#allocation23 + $0x748] ss:$16 sps:$4 sm:$0xff]  }
0x14cd   :  { %7975 = vmatpush1.bf16.msra.mxu0 %v14127_v38  ;;  %8319 = vmatpush1.bf16.msra.mxu1 %v14130_v36  ;;  %v14213_v38 = vld [vmem:[#allocation23 + $0x764] ss:$16 sps:$4 sm:$0xff]   ;;  %v14216_v36 = vld [vmem:[#allocation23 + $0x76c] ss:$16 sps:$4 sm:$0xff]  }
0x14ce   :  { %7976 = vmatprep.subr.bf16.mxu0 %v14135_v9  ;;  %8320 = vmatprep.subr.bf16.mxu1 %v14138_v63  ;;  %v14211_v9 = vld [vmem:[#allocation23 + $0x760] ss:$16 sps:$4 sm:$0xff]   ;;  %v14214_v63 = vld [vmem:[#allocation23 + $0x768] ss:$16 sps:$4 sm:$0xff]  }
0x14d1   :  { %7977 = vmatpush1.bf16.msra.mxu0 %v14133_v29  ;;  %8321 = vmatpush1.bf16.msra.mxu1 %v14136_v27  ;;  %v14219_v29 = vld [vmem:[#allocation23 + $0x784] ss:$16 sps:$4 sm:$0xff]   ;;  %v14222_v27 = vld [vmem:[#allocation23 + $0x78c] ss:$16 sps:$4 sm:$0xff]  }
0x14d2   :  { %7978 = vmatprep.subr.bf16.mxu0 %v14141_v48  ;;  %8322 = vmatprep.subr.bf16.mxu1 %v14144_v16  ;;  %v14217_v48 = vld [vmem:[#allocation23 + $0x780] ss:$16 sps:$4 sm:$0xff]   ;;  %v14220_v16 = vld [vmem:[#allocation23 + $0x788] ss:$16 sps:$4 sm:$0xff]  }
0x14d5   :  { %7979 = vmatpush1.bf16.msra.mxu0 %v14139_v0  ;;  %8323 = vmatpush1.bf16.msra.mxu1 %v14142_v4  ;;  %v14225_v0 = vld [vmem:[#allocation23 + $0x7a4] ss:$16 sps:$4 sm:$0xff]   ;;  %v14228_v4 = vld [vmem:[#allocation23 + $0x7ac] ss:$16 sps:$4 sm:$0xff]  }
0x14d6   :  { %7991 = vmatprep.subr.bf16.mxu0 %v14147_v31  ;;  %8335 = vmatprep.subr.bf16.mxu1 %v14150_v33  ;;  %v14223_v31 = vld [vmem:[#allocation23 + $0x7a0] ss:$16 sps:$4 sm:$0xff]   ;;  %v14226_v33 = vld [vmem:[#allocation23 + $0x7a8] ss:$16 sps:$4 sm:$0xff]  }
0x14d8   :  { %7981 = vmatmul.mubr.bf16.vlgmr.msra.gmra.mrb[248].mxu0 %v16845_v14  ;;  %8325 = vmatmul.mubr.bf16.vlgmr.msra.gmra.mrb[188].mxu1 %v16845_v14  ;;  %v14168_v14 = vld [vmem:[#allocation23 + $0x66c] ss:$16 sps:$4 sm:$0xff]  }
0x14d9   :  { %7992 = vmatpush1.bf16.msra.mxu0 %v14145_v32  ;;  %8336 = vmatpush1.bf16.msra.mxu1 %v14148_v58  ;;  %v14231_v32 = vld [vmem:[#allocation23 + $0x7c4] ss:$16 sps:$4 sm:$0xff]   ;;  %v14234_v58 = vld [vmem:[#allocation23 + $0x7cc] ss:$16 sps:$4 sm:$0xff]  }
0x14da   :  { %7993 = vmatprep.subr.bf16.mxu0 %v14153_v12  ;;  %8337 = vmatprep.subr.bf16.mxu1 %v14156_v62  ;;  %v14229_v12 = vld [vmem:[#allocation23 + $0x7c0] ss:$16 sps:$4 sm:$0xff]   ;;  %v14232_v62 = vld [vmem:[#allocation23 + $0x7c8] ss:$16 sps:$4 sm:$0xff]  }
0x14db   :  { %8023 = vmatprep.mubr.bf16.mxu0 %v16851_v21  ;;  %8367 = vmatprep.mubr.bf16.mxu1 %v16851_v21  ;;  %v14172_v21 = vld [vmem:[#allocation23 + $0x688] ss:$16 sps:$4 sm:$0xff]  }
0x14dd   :  { %7994 = vmatpush1.bf16.msra.mxu0 %v14151_v39  ;;  %8338 = vmatpush1.bf16.msra.mxu1 %v14154_v59  ;;  %v14237_v39 = vld [vmem:[#allocation23 + $0x7e4] ss:$16 sps:$4 sm:$0xff]   ;;  %v14240_v59 = vld [vmem:[#allocation23 + $0x7ec] ss:$16 sps:$4 sm:$0xff]  }
0x14de   :  { %7995 = vmatprep.subr.bf16.mxu0 %v14159_v61  ;;  %8339 = vmatprep.subr.bf16.mxu1 %v14162_v6  ;;  %v14235_v61 = vld [vmem:[#allocation23 + $0x7e0] ss:$16 sps:$4 sm:$0xff]   ;;  %v14238_v6 = vld [vmem:[#allocation23 + $0x7e8] ss:$16 sps:$4 sm:$0xff]  }
0x14e1   :  { %7996 = vmatpush1.bf16.msra.mxu0 %v14157_v54  ;;  %8340 = vmatpush1.bf16.msra.mxu1 %v14160_v37  ;;  %v14243_v54 = vld [vmem:[#allocation23 + $0x804] ss:$16 sps:$4 sm:$0xff]   ;;  %v14246_v37 = vld [vmem:[#allocation23 + $0x80c] ss:$16 sps:$4 sm:$0xff]  }
0x14e2   :  { %7997 = vmatprep.subr.bf16.mxu0 %v14165_v43  ;;  %8341 = vmatprep.subr.bf16.mxu1 %v14168_v14  ;;  %v14241_v43 = vld [vmem:[#allocation23 + $0x800] ss:$16 sps:$4 sm:$0xff]   ;;  %v14244_v14 = vld [vmem:[#allocation23 + $0x808] ss:$16 sps:$4 sm:$0xff]  }
0x14e5   :  { %7998 = vmatpush1.bf16.msra.mxu0 %v14163_v5  ;;  %8342 = vmatpush1.bf16.msra.mxu1 %v14166_v13  ;;  %v14249_v5 = vld [vmem:[#allocation23 + $0x824] ss:$16 sps:$4 sm:$0xff]   ;;  %v14252_v13 = vld [vmem:[#allocation23 + $0x82c] ss:$16 sps:$4 sm:$0xff]  }
0x14e6   :  { %7999 = vmatprep.subr.bf16.mxu0 %v14171_v17  ;;  %8343 = vmatprep.subr.bf16.mxu1 %v14174_v23  ;;  %v14247_v17 = vld [vmem:[#allocation23 + $0x820] ss:$16 sps:$4 sm:$0xff]   ;;  %v14250_v23 = vld [vmem:[#allocation23 + $0x828] ss:$16 sps:$4 sm:$0xff]  }
0x14e9   :  { %8000 = vmatpush1.bf16.msra.mxu0 %v14169_v24  ;;  %8344 = vmatpush1.bf16.msra.mxu1 %v14172_v21  ;;  %v14255_v24 = vld [vmem:[#allocation23 + $0x844] ss:$16 sps:$4 sm:$0xff]   ;;  %v14258_v21 = vld [vmem:[#allocation23 + $0x84c] ss:$16 sps:$4 sm:$0xff]  }
0x14ea   :  { %8001 = vmatprep.subr.bf16.mxu0 %v14177_v26  ;;  %8345 = vmatprep.subr.bf16.mxu1 %v14180_v51  ;;  %v14253_v26 = vld [vmem:[#allocation23 + $0x840] ss:$16 sps:$4 sm:$0xff]   ;;  %v14256_v51 = vld [vmem:[#allocation23 + $0x848] ss:$16 sps:$4 sm:$0xff]  }
0x14ed   :  { %8002 = vmatpush1.bf16.msra.mxu0 %v14175_v56  ;;  %8346 = vmatpush1.bf16.msra.mxu1 %v14178_v20  ;;  %v14261_v56 = vld [vmem:[#allocation23 + $0x864] ss:$16 sps:$4 sm:$0xff]   ;;  %v14259_v20 = vld [vmem:[#allocation23 + $0x860] ss:$16 sps:$4 sm:$0xff]  }
0x14ee   :  { %8003 = vmatprep.subr.bf16.mxu0 %v14183_v41  ;;  %8347 = vmatprep.subr.bf16.mxu1 %v14186_v55  ;;  %v14262_v41 = vld [vmem:[#allocation23 + $0x868] ss:$16 sps:$4 sm:$0xff]   ;;  %v14267_v55 = vld [vmem:[#allocation23 + $0x884] ss:$16 sps:$4 sm:$0xff]  }
0x14f1   :  { %8004 = vmatpush1.bf16.msra.mxu0 %v14181_v60  ;;  %8348 = vmatpush1.bf16.msra.mxu1 %v14184_v10  ;;  %v14265_v60 = vld [vmem:[#allocation23 + $0x880] ss:$16 sps:$4 sm:$0xff]   ;;  %v14268_v10 = vld [vmem:[#allocation23 + $0x888] ss:$16 sps:$4 sm:$0xff]  }
0x14f2   :  { %8005 = vmatprep.subr.bf16.mxu0 %v14189_v28  ;;  %8349 = vmatprep.subr.bf16.mxu1 %v14192_v57  ;;  %v14273_v28 = vld [vmem:[#allocation23 + $0x8a4] ss:$16 sps:$4 sm:$0xff]   ;;  %v14276_v57 = vld [vmem:[#allocation23 + $0x8ac] ss:$16 sps:$4 sm:$0xff]  }
0x14f5   :  { %8006 = vmatpush1.bf16.msra.mxu0 %v14187_v30  ;;  %8350 = vmatpush1.bf16.msra.mxu1 %v14190_v2  ;;  %v14271_v30 = vld [vmem:[#allocation23 + $0x8a0] ss:$16 sps:$4 sm:$0xff]   ;;  %v14274_v2 = vld [vmem:[#allocation23 + $0x8a8] ss:$16 sps:$4 sm:$0xff]  }
0x14f6   :  { %8007 = vmatprep.subr.bf16.mxu0 %v14195_v3  ;;  %8351 = vmatprep.subr.bf16.mxu1 %v14198_v18  ;;  %v14279_v3 = vld [vmem:[#allocation23 + $0x8c4] ss:$16 sps:$4 sm:$0xff]   ;;  %v14282_v18 = vld [vmem:[#allocation23 + $0x8cc] ss:$16 sps:$4 sm:$0xff]  }
0x14f9   :  { %8008 = vmatpush1.bf16.msra.mxu0 %v14193_v50  ;;  %8352 = vmatpush1.bf16.msra.mxu1 %v14196_v47  ;;  %v14277_v50 = vld [vmem:[#allocation23 + $0x8c0] ss:$16 sps:$4 sm:$0xff]   ;;  %v14280_v47 = vld [vmem:[#allocation23 + $0x8c8] ss:$16 sps:$4 sm:$0xff]  }
0x14fa   :  { %8009 = vmatprep.subr.bf16.mxu0 %v14201_v8  ;;  %8353 = vmatprep.subr.bf16.mxu1 %v14204_v45  ;;  %v14285_v8 = vld [vmem:[#allocation23 + $0x8e4] ss:$16 sps:$4 sm:$0xff]   ;;  %v14288_v45 = vld [vmem:[#allocation23 + $0x8ec] ss:$16 sps:$4 sm:$0xff]  }
0x14fd   :  { %8010 = vmatpush1.bf16.msra.mxu0 %v14199_v1  ;;  %8354 = vmatpush1.bf16.msra.mxu1 %v14202_v7  ;;  %v14283_v1 = vld [vmem:[#allocation23 + $0x8e0] ss:$16 sps:$4 sm:$0xff]   ;;  %v14286_v7 = vld [vmem:[#allocation23 + $0x8e8] ss:$16 sps:$4 sm:$0xff]  }
0x14fe   :  { %8011 = vmatprep.subr.bf16.mxu0 %v14207_v11  ;;  %8355 = vmatprep.subr.bf16.mxu1 %v14210_v52  ;;  %v14291_v11 = vld [vmem:[#allocation23 + $0x904] ss:$16 sps:$4 sm:$0xff]   ;;  %v14294_v52 = vld [vmem:[#allocation23 + $0x90c] ss:$16 sps:$4 sm:$0xff]  }
0x1501   :  { %8012 = vmatpush1.bf16.msra.mxu0 %v14205_v46  ;;  %8356 = vmatpush1.bf16.msra.mxu1 %v14208_v22  ;;  %v14289_v46 = vld [vmem:[#allocation23 + $0x900] ss:$16 sps:$4 sm:$0xff]   ;;  %v14292_v22 = vld [vmem:[#allocation23 + $0x908] ss:$16 sps:$4 sm:$0xff]  }
0x1502   :  { %8013 = vmatprep.subr.bf16.mxu0 %v14213_v38  ;;  %8357 = vmatprep.subr.bf16.mxu1 %v14216_v36  ;;  %v14297_v38 = vld [vmem:[#allocation23 + $0x924] ss:$16 sps:$4 sm:$0xff]   ;;  %v14300_v36 = vld [vmem:[#allocation23 + $0x92c] ss:$16 sps:$4 sm:$0xff]  }
0x1505   :  { %8014 = vmatpush1.bf16.msra.mxu0 %v14211_v9  ;;  %8358 = vmatpush1.bf16.msra.mxu1 %v14214_v63  ;;  %v14295_v9 = vld [vmem:[#allocation23 + $0x920] ss:$16 sps:$4 sm:$0xff]   ;;  %v14298_v63 = vld [vmem:[#allocation23 + $0x928] ss:$16 sps:$4 sm:$0xff]  }
0x1506   :  { %8015 = vmatprep.subr.bf16.mxu0 %v14219_v29  ;;  %8359 = vmatprep.subr.bf16.mxu1 %v14222_v27  ;;  %v14303_v29 = vld [vmem:[#allocation23 + $0x944] ss:$16 sps:$4 sm:$0xff]   ;;  %v14306_v27 = vld [vmem:[#allocation23 + $0x94c] ss:$16 sps:$4 sm:$0xff]  }
0x1509   :  { %8016 = vmatpush1.bf16.msra.mxu0 %v14217_v48  ;;  %8360 = vmatpush1.bf16.msra.mxu1 %v14220_v16  ;;  %v14301_v48 = vld [vmem:[#allocation23 + $0x940] ss:$16 sps:$4 sm:$0xff]   ;;  %v14304_v16 = vld [vmem:[#allocation23 + $0x948] ss:$16 sps:$4 sm:$0xff]  }
0x150a   :  { %8017 = vmatprep.subr.bf16.mxu0 %v14225_v0  ;;  %8361 = vmatprep.subr.bf16.mxu1 %v14228_v4  ;;  %v14309_v0 = vld [vmem:[#allocation23 + $0x964] ss:$16 sps:$4 sm:$0xff]   ;;  %v14312_v4 = vld [vmem:[#allocation23 + $0x96c] ss:$16 sps:$4 sm:$0xff]  }
0x150d   :  { %8018 = vmatpush1.bf16.msra.mxu0 %v14223_v31  ;;  %8362 = vmatpush1.bf16.msra.mxu1 %v14226_v33  ;;  %v14307_v31 = vld [vmem:[#allocation23 + $0x960] ss:$16 sps:$4 sm:$0xff]   ;;  %v14310_v33 = vld [vmem:[#allocation23 + $0x968] ss:$16 sps:$4 sm:$0xff]  }
0x150e   :  { %8019 = vmatprep.subr.bf16.mxu0 %v14231_v32  ;;  %8363 = vmatprep.subr.bf16.mxu1 %v14234_v58  ;;  %v14315_v32 = vld [vmem:[#allocation23 + $0x984] ss:$16 sps:$4 sm:$0xff]   ;;  %v14318_v58 = vld [vmem:[#allocation23 + $0x98c] ss:$16 sps:$4 sm:$0xff]  }
0x1511   :  { %8020 = vmatpush1.bf16.msra.mxu0 %v14229_v12  ;;  %8364 = vmatpush1.bf16.msra.mxu1 %v14232_v62  ;;  %v14313_v12 = vld [vmem:[#allocation23 + $0x980] ss:$16 sps:$4 sm:$0xff]   ;;  %v14316_v62 = vld [vmem:[#allocation23 + $0x988] ss:$16 sps:$4 sm:$0xff]  }
0x1512   :  { %8021 = vmatprep.subr.bf16.mxu0 %v14237_v39  ;;  %8365 = vmatprep.subr.bf16.mxu1 %v14240_v59  ;;  %v14321_v39 = vld [vmem:[#allocation23 + $0x9a4] ss:$16 sps:$4 sm:$0xff]   ;;  %v14324_v59 = vld [vmem:[#allocation23 + $0x9ac] ss:$16 sps:$4 sm:$0xff]  }
0x1515   :  { %8022 = vmatpush1.bf16.msra.mxu0 %v14235_v61  ;;  %8366 = vmatpush1.bf16.msra.mxu1 %v14238_v6  ;;  %v14319_v61 = vld [vmem:[#allocation23 + $0x9a0] ss:$16 sps:$4 sm:$0xff]   ;;  %v14322_v6 = vld [vmem:[#allocation23 + $0x9a8] ss:$16 sps:$4 sm:$0xff]  }
0x1516   :  { %8034 = vmatprep.subr.bf16.mxu0 %v14243_v54  ;;  %8378 = vmatprep.subr.bf16.mxu1 %v14246_v37  ;;  %v14327_v54 = vld [vmem:[#allocation23 + $0x9c4] ss:$16 sps:$4 sm:$0xff]   ;;  %v14330_v37 = vld [vmem:[#allocation23 + $0x9cc] ss:$16 sps:$4 sm:$0xff]  }
0x1518   :  { %8024 = vmatmul.mubr.bf16.vlgmr.msra.gmra.mrb[248].mxu0 %v16847_v44  ;;  %8368 = vmatmul.mubr.bf16.vlgmr.msra.gmra.mrb[188].mxu1 %v16847_v44  ;;  %v14264_v44 = vld [vmem:[#allocation23 + $0x86c] ss:$16 sps:$4 sm:$0xff]  }
0x1519   :  { %8035 = vmatpush1.bf16.msra.mxu0 %v14241_v43  ;;  %8066 = vmatprep.mubr.bf16.mxu0 %v16857_v42  ;;  %v14325_v43 = vld [vmem:[#allocation23 + $0x9c0] ss:$16 sps:$4 sm:$0xff]  }
0x151a   :  { %8379 = vmatpush1.bf16.msra.mxu1 %v14244_v14  ;;  %8410 = vmatprep.mubr.bf16.mxu1 %v16857_v42  ;;  %v14270_v42 = vld [vmem:[#allocation23 + $0x88c] ss:$16 sps:$4 sm:$0xff]   ;;  %v14328_v14 = vld [vmem:[#allocation23 + $0x9c8] ss:$16 sps:$4 sm:$0xff]  }
0x151b   :  { %8036 = vmatprep.subr.bf16.mxu0 %v14249_v5  ;;  %8380 = vmatprep.subr.bf16.mxu1 %v14252_v13  ;;  %v14333_v5 = vld [vmem:[#allocation23 + $0x9e4] ss:$16 sps:$4 sm:$0xff]   ;;  %v14336_v13 = vld [vmem:[#allocation23 + $0x9ec] ss:$16 sps:$4 sm:$0xff]  }
0x151d   :  { %8037 = vmatpush1.bf16.msra.mxu0 %v14247_v17  ;;  %v14331_v17 = vld [vmem:[#allocation23 + $0x9e0] ss:$16 sps:$4 sm:$0xff]  }
0x151e   :  { %8381 = vmatpush1.bf16.msra.mxu1 %v14250_v23  ;;  %8038 = vmatprep.subr.bf16.mxu0 %v14255_v24  ;;  %v14334_v23 = vld [vmem:[#allocation23 + $0x9e8] ss:$16 sps:$4 sm:$0xff]   ;;  %v14339_v24 = vld [vmem:[#allocation23 + $0xa04] ss:$16 sps:$4 sm:$0xff]  }
0x151f   :  { %8382 = vmatprep.subr.bf16.mxu1 %v14258_v21  ;;  %v14342_v21 = vld [vmem:[#allocation23 + $0xa0c] ss:$16 sps:$4 sm:$0xff]  }
0x1521   :  { %8039 = vmatpush1.bf16.msra.mxu0 %v14253_v26  ;;  %v14337_v26 = vld [vmem:[#allocation23 + $0xa00] ss:$16 sps:$4 sm:$0xff]  }
0x1522   :  { %8383 = vmatpush1.bf16.msra.mxu1 %v14256_v51  ;;  %8040 = vmatprep.subr.bf16.mxu0 %v14261_v56  ;;  %v14340_v51 = vld [vmem:[#allocation23 + $0xa08] ss:$16 sps:$4 sm:$0xff]   ;;  %v14345_v56 = vld [vmem:[#allocation23 + $0xa24] ss:$16 sps:$4 sm:$0xff]  }
0x1523   :  { %8384 = vmatprep.subr.bf16.mxu1 %v14264_v44  ;;  %v14348_v44 = vld [vmem:[#allocation23 + $0xa2c] ss:$16 sps:$4 sm:$0xff]  }
0x1525   :  { %8041 = vmatpush1.bf16.msra.mxu0 %v14259_v20  ;;  %v14343_v20 = vld [vmem:[#allocation23 + $0xa20] ss:$16 sps:$4 sm:$0xff]  }
0x1526   :  { %8385 = vmatpush1.bf16.msra.mxu1 %v14262_v41  ;;  %8042 = vmatprep.subr.bf16.mxu0 %v14267_v55  ;;  %v14346_v41 = vld [vmem:[#allocation23 + $0xa28] ss:$16 sps:$4 sm:$0xff]   ;;  %v14351_v55 = vld [vmem:[#allocation23 + $0xa44] ss:$16 sps:$4 sm:$0xff]  }
0x1527   :  { %8386 = vmatprep.subr.bf16.mxu1 %v14270_v42  ;;  %v14354_v42 = vld [vmem:[#allocation23 + $0xa4c] ss:$16 sps:$4 sm:$0xff]  }
0x1529   :  { %8043 = vmatpush1.bf16.msra.mxu0 %v14265_v60  ;;  %v14349_v60 = vld [vmem:[#allocation23 + $0xa40] ss:$16 sps:$4 sm:$0xff]  }
0x152a   :  { %8387 = vmatpush1.bf16.msra.mxu1 %v14268_v10  ;;  %8044 = vmatprep.subr.bf16.mxu0 %v14273_v28  ;;  %v14352_v10 = vld [vmem:[#allocation23 + $0xa48] ss:$16 sps:$4 sm:$0xff]   ;;  %v14357_v28 = vld [vmem:[#allocation23 + $0xa64] ss:$16 sps:$4 sm:$0xff]  }
0x152b   :  { %8388 = vmatprep.subr.bf16.mxu1 %v14276_v57  ;;  %v14355_v57 = vld [vmem:[#allocation23 + $0xa60] ss:$16 sps:$4 sm:$0xff]  }
0x152d   :  { %8045 = vmatpush1.bf16.msra.mxu0 %v14271_v30  ;;  %v14358_v30 = vld [vmem:[#allocation23 + $0xa68] ss:$16 sps:$4 sm:$0xff]  }
0x152e   :  { %8389 = vmatpush1.bf16.msra.mxu1 %v14274_v2  ;;  %8046 = vmatprep.subr.bf16.mxu0 %v14279_v3  ;;  %v14363_v2 = vld [vmem:[#allocation23 + $0xa84] ss:$16 sps:$4 sm:$0xff]   ;;  %v14366_v3 = vld [vmem:[#allocation23 + $0xa8c] ss:$16 sps:$4 sm:$0xff]  }
0x152f   :  { %8390 = vmatprep.subr.bf16.mxu1 %v14282_v18  ;;  %v14364_v18 = vld [vmem:[#allocation23 + $0xa88] ss:$16 sps:$4 sm:$0xff]  }
0x1531   :  { %8047 = vmatpush1.bf16.msra.mxu0 %v14277_v50  ;;  %v14369_v50 = vld [vmem:[#allocation23 + $0xaa4] ss:$16 sps:$4 sm:$0xff]  }
0x1532   :  { %8391 = vmatpush1.bf16.msra.mxu1 %v14280_v47  ;;  %8048 = vmatprep.subr.bf16.mxu0 %v14285_v8  ;;  %v14372_v47 = vld [vmem:[#allocation23 + $0xaac] ss:$16 sps:$4 sm:$0xff]   ;;  %v14367_v8 = vld [vmem:[#allocation23 + $0xaa0] ss:$16 sps:$4 sm:$0xff]  }
0x1533   :  { %8392 = vmatprep.subr.bf16.mxu1 %v14288_v45  ;;  %v14370_v45 = vld [vmem:[#allocation23 + $0xaa8] ss:$16 sps:$4 sm:$0xff]  }
0x1535   :  { %8049 = vmatpush1.bf16.msra.mxu0 %v14283_v1  ;;  %v14375_v1 = vld [vmem:[#allocation23 + $0xac4] ss:$16 sps:$4 sm:$0xff]  }
0x1536   :  { %8393 = vmatpush1.bf16.msra.mxu1 %v14286_v7  ;;  %8050 = vmatprep.subr.bf16.mxu0 %v14291_v11  ;;  %v14378_v7 = vld [vmem:[#allocation23 + $0xacc] ss:$16 sps:$4 sm:$0xff]   ;;  %v14373_v11 = vld [vmem:[#allocation23 + $0xac0] ss:$16 sps:$4 sm:$0xff]  }
0x1537   :  { %8394 = vmatprep.subr.bf16.mxu1 %v14294_v52  ;;  %v14376_v52 = vld [vmem:[#allocation23 + $0xac8] ss:$16 sps:$4 sm:$0xff]  }
0x1539   :  { %8051 = vmatpush1.bf16.msra.mxu0 %v14289_v46  ;;  %v14381_v46 = vld [vmem:[#allocation23 + $0xae4] ss:$16 sps:$4 sm:$0xff]  }
0x153a   :  { %8395 = vmatpush1.bf16.msra.mxu1 %v14292_v22  ;;  %8052 = vmatprep.subr.bf16.mxu0 %v14297_v38  ;;  %v14384_v22 = vld [vmem:[#allocation23 + $0xaec] ss:$16 sps:$4 sm:$0xff]   ;;  %v14379_v38 = vld [vmem:[#allocation23 + $0xae0] ss:$16 sps:$4 sm:$0xff]  }
0x153b   :  { %8396 = vmatprep.subr.bf16.mxu1 %v14300_v36  ;;  %v14382_v36 = vld [vmem:[#allocation23 + $0xae8] ss:$16 sps:$4 sm:$0xff]  }
0x153d   :  { %8053 = vmatpush1.bf16.msra.mxu0 %v14295_v9  ;;  %v14387_v9 = vld [vmem:[#allocation23 + $0xb04] ss:$16 sps:$4 sm:$0xff]  }
0x153e   :  { %8397 = vmatpush1.bf16.msra.mxu1 %v14298_v63  ;;  %8054 = vmatprep.subr.bf16.mxu0 %v14303_v29  ;;  %v14390_v63 = vld [vmem:[#allocation23 + $0xb0c] ss:$16 sps:$4 sm:$0xff]   ;;  %v14385_v29 = vld [vmem:[#allocation23 + $0xb00] ss:$16 sps:$4 sm:$0xff]  }
0x153f   :  { %8398 = vmatprep.subr.bf16.mxu1 %v14306_v27  ;;  %v14388_v27 = vld [vmem:[#allocation23 + $0xb08] ss:$16 sps:$4 sm:$0xff]  }
0x1541   :  { %8055 = vmatpush1.bf16.msra.mxu0 %v14301_v48  ;;  %v14393_v48 = vld [vmem:[#allocation23 + $0xb24] ss:$16 sps:$4 sm:$0xff]  }
0x1542   :  { %8399 = vmatpush1.bf16.msra.mxu1 %v14304_v16  ;;  %8056 = vmatprep.subr.bf16.mxu0 %v14309_v0  ;;  %v14396_v16 = vld [vmem:[#allocation23 + $0xb2c] ss:$16 sps:$4 sm:$0xff]   ;;  %v14391_v0 = vld [vmem:[#allocation23 + $0xb20] ss:$16 sps:$4 sm:$0xff]  }
0x1543   :  { %8400 = vmatprep.subr.bf16.mxu1 %v14312_v4  ;;  %v14394_v4 = vld [vmem:[#allocation23 + $0xb28] ss:$16 sps:$4 sm:$0xff]  }
0x1545   :  { %8057 = vmatpush1.bf16.msra.mxu0 %v14307_v31  ;;  %v14399_v31 = vld [vmem:[#allocation23 + $0xb44] ss:$16 sps:$4 sm:$0xff]  }
0x1546   :  { %8401 = vmatpush1.bf16.msra.mxu1 %v14310_v33  ;;  %8058 = vmatprep.subr.bf16.mxu0 %v14315_v32  ;;  %v14402_v33 = vld [vmem:[#allocation23 + $0xb4c] ss:$16 sps:$4 sm:$0xff]   ;;  %v14397_v32 = vld [vmem:[#allocation23 + $0xb40] ss:$16 sps:$4 sm:$0xff]  }
0x1547   :  { %8402 = vmatprep.subr.bf16.mxu1 %v14318_v58  ;;  %v14400_v58 = vld [vmem:[#allocation23 + $0xb48] ss:$16 sps:$4 sm:$0xff]  }
0x1549   :  { %8059 = vmatpush1.bf16.msra.mxu0 %v14313_v12  ;;  %v14405_v12 = vld [vmem:[#allocation23 + $0xb64] ss:$16 sps:$4 sm:$0xff]  }
0x154a   :  { %8403 = vmatpush1.bf16.msra.mxu1 %v14316_v62  ;;  %8060 = vmatprep.subr.bf16.mxu0 %v14321_v39  ;;  %v14408_v62 = vld [vmem:[#allocation23 + $0xb6c] ss:$16 sps:$4 sm:$0xff]   ;;  %v14403_v39 = vld [vmem:[#allocation23 + $0xb60] ss:$16 sps:$4 sm:$0xff]  }
0x154b   :  { %8404 = vmatprep.subr.bf16.mxu1 %v14324_v59  ;;  %v14406_v59 = vld [vmem:[#allocation23 + $0xb68] ss:$16 sps:$4 sm:$0xff]  }
0x154d   :  { %8061 = vmatpush1.bf16.msra.mxu0 %v14319_v61  ;;  %v14411_v61 = vld [vmem:[#allocation23 + $0xb84] ss:$16 sps:$4 sm:$0xff]  }
0x154e   :  { %8405 = vmatpush1.bf16.msra.mxu1 %v14322_v6  ;;  %8062 = vmatprep.subr.bf16.mxu0 %v14327_v54  ;;  %v14414_v6 = vld [vmem:[#allocation23 + $0xb8c] ss:$16 sps:$4 sm:$0xff]   ;;  %v14409_v54 = vld [vmem:[#allocation23 + $0xb80] ss:$16 sps:$4 sm:$0xff]  }
0x154f   :  { %8406 = vmatprep.subr.bf16.mxu1 %v14330_v37  ;;  %v14412_v37 = vld [vmem:[#allocation23 + $0xb88] ss:$16 sps:$4 sm:$0xff]  }
0x1551   :  { %8063 = vmatpush1.bf16.msra.mxu0 %v14325_v43  ;;  %v14417_v43 = vld [vmem:[#allocation23 + $0xba4] ss:$16 sps:$4 sm:$0xff]  }
0x1552   :  { %8407 = vmatpush1.bf16.msra.mxu1 %v14328_v14  ;;  %8064 = vmatprep.subr.bf16.mxu0 %v14333_v5  ;;  %v14420_v14 = vld [vmem:[#allocation23 + $0xbac] ss:$16 sps:$4 sm:$0xff]   ;;  %v14415_v5 = vld [vmem:[#allocation23 + $0xba0] ss:$16 sps:$4 sm:$0xff]  }
0x1553   :  { %8408 = vmatprep.subr.bf16.mxu1 %v14336_v13  ;;  %v14418_v13 = vld [vmem:[#allocation23 + $0xba8] ss:$16 sps:$4 sm:$0xff]  }
0x1555   :  { %8065 = vmatpush1.bf16.msra.mxu0 %v14331_v17  ;;  %v14423_v17 = vld [vmem:[#allocation23 + $0xbc4] ss:$16 sps:$4 sm:$0xff]  }
0x1556   :  { %8409 = vmatpush1.bf16.msra.mxu1 %v14334_v23  ;;  %8077 = vmatprep.subr.bf16.mxu0 %v14339_v24  ;;  %v14426_v23 = vld [vmem:[#allocation23 + $0xbcc] ss:$16 sps:$4 sm:$0xff]   ;;  %v14421_v24 = vld [vmem:[#allocation23 + $0xbc0] ss:$16 sps:$4 sm:$0xff]  }
0x1557   :  { %8421 = vmatprep.subr.bf16.mxu1 %v14342_v21  ;;  %v14424_v21 = vld [vmem:[#allocation23 + $0xbc8] ss:$16 sps:$4 sm:$0xff]  }
0x1558   :  { %8067 = vmatmul.mubr.bf16.vlgmr.msra.gmra.mrb[248].mxu0 %v16853_v19 }
0x1559   :  { %8411 = vmatmul.mubr.bf16.vlgmr.msra.gmra.mrb[188].mxu1 %v16853_v19  ;;  %8078 = vmatpush1.bf16.msra.mxu0 %v14337_v26  ;;  %v14360_v19 = vld [vmem:[#allocation23 + $0xa6c] ss:$16 sps:$4 sm:$0xff]   ;;  %v14429_v26 = vld [vmem:[#allocation23 + $0xbe4] ss:$16 sps:$4 sm:$0xff]  }
0x155a   :  { %8109 = vmatprep.mubr.bf16.mxu0 %v16859_v35  ;;  %8422 = vmatpush1.bf16.msra.mxu1 %v14340_v51  ;;  %v14432_v51 = vld [vmem:[#allocation23 + $0xbec] ss:$16 sps:$4 sm:$0xff]  }
0x155b   :  { %8453 = vmatprep.mubr.bf16.mxu1 %v16859_v35  ;;  %8079 = vmatprep.subr.bf16.mxu0 %v14345_v56  ;;  %v14361_v35 = vld [vmem:[#allocation23 + $0xa80] ss:$16 sps:$4 sm:$0xff]  }
0x155c   :  { %8423 = vmatprep.subr.bf16.mxu1 %v14348_v44  ;;  %v14427_v56 = vld [vmem:[#allocation23 + $0xbe0] ss:$16 sps:$4 sm:$0xff]   ;;  %v14430_v44 = vld [vmem:[#allocation23 + $0xbe8] ss:$16 sps:$4 sm:$0xff]  }
0x155d   :  { %8080 = vmatpush1.bf16.msra.mxu0 %v14343_v20  ;;  %v14435_v20 = vld [vmem:[#allocation23 + $0xc04] ss:$16 sps:$4 sm:$0xff]  }
0x155e   :  { %8424 = vmatpush1.bf16.msra.mxu1 %v14346_v41  ;;  %8081 = vmatprep.subr.bf16.mxu0 %v14351_v55  ;;  %v14438_v41 = vld [vmem:[#allocation23 + $0xc0c] ss:$16 sps:$4 sm:$0xff]   ;;  %v14433_v55 = vld [vmem:[#allocation23 + $0xc00] ss:$16 sps:$4 sm:$0xff]  }
0x155f   :  { %8425 = vmatprep.subr.bf16.mxu1 %v14354_v42  ;;  %v14436_v42 = vld [vmem:[#allocation23 + $0xc08] ss:$16 sps:$4 sm:$0xff]  }
0x1561   :  { %8082 = vmatpush1.bf16.msra.mxu0 %v14349_v60  ;;  %v14441_v60 = vld [vmem:[#allocation23 + $0xc24] ss:$16 sps:$4 sm:$0xff]  }
0x1562   :  { %8426 = vmatpush1.bf16.msra.mxu1 %v14352_v10  ;;  %8083 = vmatprep.subr.bf16.mxu0 %v14357_v28  ;;  %v14444_v10 = vld [vmem:[#allocation23 + $0xc2c] ss:$16 sps:$4 sm:$0xff]   ;;  %v14439_v28 = vld [vmem:[#allocation23 + $0xc20] ss:$16 sps:$4 sm:$0xff]  }
0x1563   :  { %8427 = vmatprep.subr.bf16.mxu1 %v14360_v19  ;;  %v14442_v19 = vld [vmem:[#allocation23 + $0xc28] ss:$16 sps:$4 sm:$0xff]  }
0x1565   :  { %8084 = vmatpush1.bf16.msra.mxu0 %v14355_v57  ;;  %v14447_v57 = vld [vmem:[#allocation23 + $0xc44] ss:$16 sps:$4 sm:$0xff]  }
0x1566   :  { %8428 = vmatpush1.bf16.msra.mxu1 %v14358_v30  ;;  %8085 = vmatprep.subr.bf16.mxu0 %v14363_v2  ;;  %v14450_v30 = vld [vmem:[#allocation23 + $0xc4c] ss:$16 sps:$4 sm:$0xff]   ;;  %v14445_v2 = vld [vmem:[#allocation23 + $0xc40] ss:$16 sps:$4 sm:$0xff]  }
0x1567   :  { %8429 = vmatprep.subr.bf16.mxu1 %v14366_v3  ;;  %v14448_v3 = vld [vmem:[#allocation23 + $0xc48] ss:$16 sps:$4 sm:$0xff]  }
0x1569   :  { %8086 = vmatpush1.bf16.msra.mxu0 %v14361_v35  ;;  %v14453_v35 = vld [vmem:[#allocation23 + $0xc64] ss:$16 sps:$4 sm:$0xff]  }
0x156a   :  { %8430 = vmatpush1.bf16.msra.mxu1 %v14364_v18  ;;  %8087 = vmatprep.subr.bf16.mxu0 %v14369_v50  ;;  %v14451_v18 = vld [vmem:[#allocation23 + $0xc60] ss:$16 sps:$4 sm:$0xff]   ;;  %v14454_v50 = vld [vmem:[#allocation23 + $0xc68] ss:$16 sps:$4 sm:$0xff]  }
0x156b   :  { %8431 = vmatprep.subr.bf16.mxu1 %v14372_v47  ;;  %v14459_v47 = vld [vmem:[#allocation23 + $0xc84] ss:$16 sps:$4 sm:$0xff]  }
0x156d   :  { %8088 = vmatpush1.bf16.msra.mxu0 %v14367_v8  ;;  %v14462_v8 = vld [vmem:[#allocation23 + $0xc8c] ss:$16 sps:$4 sm:$0xff]  }
0x156e   :  { %8432 = vmatpush1.bf16.msra.mxu1 %v14370_v45  ;;  %8089 = vmatprep.subr.bf16.mxu0 %v14375_v1  ;;  %v14460_v45 = vld [vmem:[#allocation23 + $0xc88] ss:$16 sps:$4 sm:$0xff]   ;;  %v14465_v1 = vld [vmem:[#allocation23 + $0xca4] ss:$16 sps:$4 sm:$0xff]  }
0x156f   :  { %8433 = vmatprep.subr.bf16.mxu1 %v14378_v7  ;;  %v14468_v7 = vld [vmem:[#allocation23 + $0xcac] ss:$16 sps:$4 sm:$0xff]  }
0x1571   :  { %8090 = vmatpush1.bf16.msra.mxu0 %v14373_v11  ;;  %v14463_v11 = vld [vmem:[#allocation23 + $0xca0] ss:$16 sps:$4 sm:$0xff]  }
0x1572   :  { %8434 = vmatpush1.bf16.msra.mxu1 %v14376_v52  ;;  %8091 = vmatprep.subr.bf16.mxu0 %v14381_v46  ;;  %v14466_v52 = vld [vmem:[#allocation23 + $0xca8] ss:$16 sps:$4 sm:$0xff]   ;;  %v14471_v46 = vld [vmem:[#allocation23 + $0xcc4] ss:$16 sps:$4 sm:$0xff]  }
0x1573   :  { %8435 = vmatprep.subr.bf16.mxu1 %v14384_v22  ;;  %v14474_v22 = vld [vmem:[#allocation23 + $0xccc] ss:$16 sps:$4 sm:$0xff]  }
0x1575   :  { %8092 = vmatpush1.bf16.msra.mxu0 %v14379_v38  ;;  %v14469_v38 = vld [vmem:[#allocation23 + $0xcc0] ss:$16 sps:$4 sm:$0xff]  }
0x1576   :  { %8436 = vmatpush1.bf16.msra.mxu1 %v14382_v36  ;;  %8093 = vmatprep.subr.bf16.mxu0 %v14387_v9  ;;  %v14472_v36 = vld [vmem:[#allocation23 + $0xcc8] ss:$16 sps:$4 sm:$0xff]   ;;  %v14477_v9 = vld [vmem:[#allocation23 + $0xce4] ss:$16 sps:$4 sm:$0xff]  }
0x1577   :  { %8437 = vmatprep.subr.bf16.mxu1 %v14390_v63  ;;  %v14480_v63 = vld [vmem:[#allocation23 + $0xcec] ss:$16 sps:$4 sm:$0xff]  }
0x1579   :  { %8094 = vmatpush1.bf16.msra.mxu0 %v14385_v29  ;;  %v14475_v29 = vld [vmem:[#allocation23 + $0xce0] ss:$16 sps:$4 sm:$0xff]  }
0x157a   :  { %8438 = vmatpush1.bf16.msra.mxu1 %v14388_v27  ;;  %8095 = vmatprep.subr.bf16.mxu0 %v14393_v48  ;;  %v14478_v27 = vld [vmem:[#allocation23 + $0xce8] ss:$16 sps:$4 sm:$0xff]   ;;  %v14483_v48 = vld [vmem:[#allocation23 + $0xd04] ss:$16 sps:$4 sm:$0xff]  }
0x157b   :  { %8439 = vmatprep.subr.bf16.mxu1 %v14396_v16  ;;  %v14486_v16 = vld [vmem:[#allocation23 + $0xd0c] ss:$16 sps:$4 sm:$0xff]  }
0x157d   :  { %8096 = vmatpush1.bf16.msra.mxu0 %v14391_v0  ;;  %v14481_v0 = vld [vmem:[#allocation23 + $0xd00] ss:$16 sps:$4 sm:$0xff]  }
0x157e   :  { %8440 = vmatpush1.bf16.msra.mxu1 %v14394_v4  ;;  %8097 = vmatprep.subr.bf16.mxu0 %v14399_v31  ;;  %v14484_v4 = vld [vmem:[#allocation23 + $0xd08] ss:$16 sps:$4 sm:$0xff]   ;;  %v14489_v31 = vld [vmem:[#allocation23 + $0xd24] ss:$16 sps:$4 sm:$0xff]  }
0x157f   :  { %8441 = vmatprep.subr.bf16.mxu1 %v14402_v33  ;;  %v14492_v33 = vld [vmem:[#allocation23 + $0xd2c] ss:$16 sps:$4 sm:$0xff]  }
0x1581   :  { %8098 = vmatpush1.bf16.msra.mxu0 %v14397_v32  ;;  %v14487_v32 = vld [vmem:[#allocation23 + $0xd20] ss:$16 sps:$4 sm:$0xff]  }
0x1582   :  { %8442 = vmatpush1.bf16.msra.mxu1 %v14400_v58  ;;  %8099 = vmatprep.subr.bf16.mxu0 %v14405_v12  ;;  %v14490_v58 = vld [vmem:[#allocation23 + $0xd28] ss:$16 sps:$4 sm:$0xff]   ;;  %v14495_v12 = vld [vmem:[#allocation23 + $0xd44] ss:$16 sps:$4 sm:$0xff]  }
0x1583   :  { %8443 = vmatprep.subr.bf16.mxu1 %v14408_v62  ;;  %v14498_v62 = vld [vmem:[#allocation23 + $0xd4c] ss:$16 sps:$4 sm:$0xff]  }
0x1585   :  { %8100 = vmatpush1.bf16.msra.mxu0 %v14403_v39  ;;  %v14493_v39 = vld [vmem:[#allocation23 + $0xd40] ss:$16 sps:$4 sm:$0xff]  }
0x1586   :  { %8444 = vmatpush1.bf16.msra.mxu1 %v14406_v59  ;;  %8101 = vmatprep.subr.bf16.mxu0 %v14411_v61  ;;  %v14496_v59 = vld [vmem:[#allocation23 + $0xd48] ss:$16 sps:$4 sm:$0xff]   ;;  %v14501_v61 = vld [vmem:[#allocation23 + $0xd64] ss:$16 sps:$4 sm:$0xff]  }
0x1587   :  { %8445 = vmatprep.subr.bf16.mxu1 %v14414_v6  ;;  %v14504_v6 = vld [vmem:[#allocation23 + $0xd6c] ss:$16 sps:$4 sm:$0xff]  }
0x1589   :  { %8102 = vmatpush1.bf16.msra.mxu0 %v14409_v54  ;;  %v14499_v54 = vld [vmem:[#allocation23 + $0xd60] ss:$16 sps:$4 sm:$0xff]  }
0x158a   :  { %8446 = vmatpush1.bf16.msra.mxu1 %v14412_v37  ;;  %8103 = vmatprep.subr.bf16.mxu0 %v14417_v43  ;;  %v14502_v37 = vld [vmem:[#allocation23 + $0xd68] ss:$16 sps:$4 sm:$0xff]   ;;  %v14507_v43 = vld [vmem:[#allocation23 + $0xd84] ss:$16 sps:$4 sm:$0xff]  }
0x158b   :  { %8447 = vmatprep.subr.bf16.mxu1 %v14420_v14  ;;  %v14510_v14 = vld [vmem:[#allocation23 + $0xd8c] ss:$16 sps:$4 sm:$0xff]  }
0x158d   :  { %8104 = vmatpush1.bf16.msra.mxu0 %v14415_v5  ;;  %v14505_v5 = vld [vmem:[#allocation23 + $0xd80] ss:$16 sps:$4 sm:$0xff]  }
0x158e   :  { %8448 = vmatpush1.bf16.msra.mxu1 %v14418_v13  ;;  %8105 = vmatprep.subr.bf16.mxu0 %v14423_v17  ;;  %v14508_v13 = vld [vmem:[#allocation23 + $0xd88] ss:$16 sps:$4 sm:$0xff]   ;;  %v14513_v17 = vld [vmem:[#allocation23 + $0xda4] ss:$16 sps:$4 sm:$0xff]  }
0x158f   :  { %8449 = vmatprep.subr.bf16.mxu1 %v14426_v23  ;;  %v14516_v23 = vld [vmem:[#allocation23 + $0xdac] ss:$16 sps:$4 sm:$0xff]  }
0x1591   :  { %8106 = vmatpush1.bf16.msra.mxu0 %v14421_v24  ;;  %v14511_v24 = vld [vmem:[#allocation23 + $0xda0] ss:$16 sps:$4 sm:$0xff]  }
0x1592   :  { %8450 = vmatpush1.bf16.msra.mxu1 %v14424_v21  ;;  %8107 = vmatprep.subr.bf16.mxu0 %v14429_v26  ;;  %v14514_v21 = vld [vmem:[#allocation23 + $0xda8] ss:$16 sps:$4 sm:$0xff]   ;;  %v14519_v26 = vld [vmem:[#allocation23 + $0xdc4] ss:$16 sps:$4 sm:$0xff]  }
0x1593   :  { %8451 = vmatprep.subr.bf16.mxu1 %v14432_v51  ;;  %v14522_v51 = vld [vmem:[#allocation23 + $0xdcc] ss:$16 sps:$4 sm:$0xff]  }
0x1595   :  { %8108 = vmatpush1.bf16.msra.mxu0 %v14427_v56  ;;  %v14517_v56 = vld [vmem:[#allocation23 + $0xdc0] ss:$16 sps:$4 sm:$0xff]  }
0x1596   :  { %8452 = vmatpush1.bf16.msra.mxu1 %v14430_v44  ;;  %8120 = vmatprep.subr.bf16.mxu0 %v14435_v20  ;;  %v14520_v44 = vld [vmem:[#allocation23 + $0xdc8] ss:$16 sps:$4 sm:$0xff]   ;;  %v14525_v20 = vld [vmem:[#allocation23 + $0xde4] ss:$16 sps:$4 sm:$0xff]  }
0x1597   :  { %8464 = vmatprep.subr.bf16.mxu1 %v14438_v41  ;;  %v14528_v41 = vld [vmem:[#allocation23 + $0xdec] ss:$16 sps:$4 sm:$0xff]  }
0x1598   :  { %8110 = vmatmul.mubr.bf16.vlgmr.msra.gmra.mrb[248].mxu0 %v16855_v34 }
0x1599   :  { %8454 = vmatmul.mubr.bf16.vlgmr.msra.gmra.mrb[188].mxu1 %v16855_v34  ;;  %8121 = vmatpush1.bf16.msra.mxu0 %v14433_v55  ;;  %v14456_v34 = vld [vmem:[#allocation23 + $0xc6c] ss:$16 sps:$4 sm:$0xff]   ;;  %v14523_v55 = vld [vmem:[#allocation23 + $0xde0] ss:$16 sps:$4 sm:$0xff]  }
0x159a   :  { %8152 = vmatprep.mubr.bf16.mxu0 %v16869_v53  ;;  %8465 = vmatpush1.bf16.msra.mxu1 %v14436_v42  ;;  %v14526_v42 = vld [vmem:[#allocation23 + $0xde8] ss:$16 sps:$4 sm:$0xff]  }
0x159b   :  { %8496 = vmatprep.mubr.bf16.mxu1 %v16869_v53  ;;  %8122 = vmatprep.subr.bf16.mxu0 %v14441_v60  ;;  %v14457_v53 = vld [vmem:[#allocation23 + $0xc80] ss:$16 sps:$4 sm:$0xff]   ;;  %v14531_v60 = vld [vmem:[#allocation23 + $0xe04] ss:$16 sps:$4 sm:$0xff]  }
0x159c   :  { %8466 = vmatprep.subr.bf16.mxu1 %v14444_v10  ;;  %v14534_v10 = vld [vmem:[#allocation23 + $0xe0c] ss:$16 sps:$4 sm:$0xff]  }
0x159d   :  { %8123 = vmatpush1.bf16.msra.mxu0 %v14439_v28  ;;  %v14529_v28 = vld [vmem:[#allocation23 + $0xe00] ss:$16 sps:$4 sm:$0xff]  }
0x159e   :  { %8467 = vmatpush1.bf16.msra.mxu1 %v14442_v19  ;;  %8124 = vmatprep.subr.bf16.mxu0 %v14447_v57  ;;  %v14532_v19 = vld [vmem:[#allocation23 + $0xe08] ss:$16 sps:$4 sm:$0xff]   ;;  %v14537_v57 = vld [vmem:[#allocation23 + $0xe24] ss:$16 sps:$4 sm:$0xff]  }
0x159f   :  { %8468 = vmatprep.subr.bf16.mxu1 %v14450_v30  ;;  %v14540_v30 = vld [vmem:[#allocation23 + $0xe2c] ss:$16 sps:$4 sm:$0xff]  }
0x15a1   :  { %8125 = vmatpush1.bf16.msra.mxu0 %v14445_v2  ;;  %v14535_v2 = vld [vmem:[#allocation23 + $0xe20] ss:$16 sps:$4 sm:$0xff]  }
0x15a2   :  { %8469 = vmatpush1.bf16.msra.mxu1 %v14448_v3  ;;  %8126 = vmatprep.subr.bf16.mxu0 %v14453_v35  ;;  %v14538_v3 = vld [vmem:[#allocation23 + $0xe28] ss:$16 sps:$4 sm:$0xff]   ;;  %v14543_v35 = vld [vmem:[#allocation23 + $0xe44] ss:$16 sps:$4 sm:$0xff]  }
0x15a3   :  { %8470 = vmatprep.subr.bf16.mxu1 %v14456_v34  ;;  %v14546_v34 = vld [vmem:[#allocation23 + $0xe4c] ss:$16 sps:$4 sm:$0xff]  }
0x15a5   :  { %8127 = vmatpush1.bf16.msra.mxu0 %v14451_v18  ;;  %v14541_v18 = vld [vmem:[#allocation23 + $0xe40] ss:$16 sps:$4 sm:$0xff]  }
0x15a6   :  { %8471 = vmatpush1.bf16.msra.mxu1 %v14454_v50  ;;  %8128 = vmatprep.subr.bf16.mxu0 %v14459_v47  ;;  %v14544_v50 = vld [vmem:[#allocation23 + $0xe48] ss:$16 sps:$4 sm:$0xff]   ;;  %v14549_v47 = vld [vmem:[#allocation23 + $0xe64] ss:$16 sps:$4 sm:$0xff]  }
0x15a7   :  { %8472 = vmatprep.subr.bf16.mxu1 %v14462_v8  ;;  %v14547_v8 = vld [vmem:[#allocation23 + $0xe60] ss:$16 sps:$4 sm:$0xff]  }
0x15a9   :  { %8129 = vmatpush1.bf16.msra.mxu0 %v14457_v53  ;;  %v14550_v53 = vld [vmem:[#allocation23 + $0xe68] ss:$16 sps:$4 sm:$0xff]  }
0x15aa   :  { %8473 = vmatpush1.bf16.msra.mxu1 %v14460_v45  ;;  %8130 = vmatprep.subr.bf16.mxu0 %v14465_v1  ;;  %v14555_v45 = vld [vmem:[#allocation23 + $0xe84] ss:$16 sps:$4 sm:$0xff]   ;;  %v14558_v1 = vld [vmem:[#allocation23 + $0xe8c] ss:$16 sps:$4 sm:$0xff]  }
0x15ab   :  { %8474 = vmatprep.subr.bf16.mxu1 %v14468_v7  ;;  %v14556_v7 = vld [vmem:[#allocation23 + $0xe88] ss:$16 sps:$4 sm:$0xff]  }
0x15ad   :  { %8131 = vmatpush1.bf16.msra.mxu0 %v14463_v11  ;;  %v14561_v11 = vld [vmem:[#allocation23 + $0xea4] ss:$16 sps:$4 sm:$0xff]  }
0x15ae   :  { %8475 = vmatpush1.bf16.msra.mxu1 %v14466_v52  ;;  %8132 = vmatprep.subr.bf16.mxu0 %v14471_v46  ;;  %v14564_v52 = vld [vmem:[#allocation23 + $0xeac] ss:$16 sps:$4 sm:$0xff]   ;;  %v14559_v46 = vld [vmem:[#allocation23 + $0xea0] ss:$16 sps:$4 sm:$0xff]  }
0x15af   :  { %8476 = vmatprep.subr.bf16.mxu1 %v14474_v22  ;;  %v14562_v22 = vld [vmem:[#allocation23 + $0xea8] ss:$16 sps:$4 sm:$0xff]  }
0x15b1   :  { %8133 = vmatpush1.bf16.msra.mxu0 %v14469_v38  ;;  %v14567_v38 = vld [vmem:[#allocation23 + $0xec4] ss:$16 sps:$4 sm:$0xff]  }
0x15b2   :  { %8477 = vmatpush1.bf16.msra.mxu1 %v14472_v36  ;;  %8134 = vmatprep.subr.bf16.mxu0 %v14477_v9  ;;  %v14570_v36 = vld [vmem:[#allocation23 + $0xecc] ss:$16 sps:$4 sm:$0xff]   ;;  %v14565_v9 = vld [vmem:[#allocation23 + $0xec0] ss:$16 sps:$4 sm:$0xff]  }
0x15b3   :  { %8478 = vmatprep.subr.bf16.mxu1 %v14480_v63  ;;  %v14568_v63 = vld [vmem:[#allocation23 + $0xec8] ss:$16 sps:$4 sm:$0xff]  }
0x15b5   :  { %8135 = vmatpush1.bf16.msra.mxu0 %v14475_v29  ;;  %v14573_v29 = vld [vmem:[#allocation23 + $0xee4] ss:$16 sps:$4 sm:$0xff]  }
0x15b6   :  { %8479 = vmatpush1.bf16.msra.mxu1 %v14478_v27  ;;  %8136 = vmatprep.subr.bf16.mxu0 %v14483_v48  ;;  %v14576_v27 = vld [vmem:[#allocation23 + $0xeec] ss:$16 sps:$4 sm:$0xff]   ;;  %v14571_v48 = vld [vmem:[#allocation23 + $0xee0] ss:$16 sps:$4 sm:$0xff]  }
0x15b7   :  { %8480 = vmatprep.subr.bf16.mxu1 %v14486_v16  ;;  %v14574_v16 = vld [vmem:[#allocation23 + $0xee8] ss:$16 sps:$4 sm:$0xff]  }
0x15b9   :  { %8137 = vmatpush1.bf16.msra.mxu0 %v14481_v0  ;;  %v14579_v0 = vld [vmem:[#allocation23 + $0xf04] ss:$16 sps:$4 sm:$0xff]  }
0x15ba   :  { %8481 = vmatpush1.bf16.msra.mxu1 %v14484_v4  ;;  %8138 = vmatprep.subr.bf16.mxu0 %v14489_v31  ;;  %v14582_v4 = vld [vmem:[#allocation23 + $0xf0c] ss:$16 sps:$4 sm:$0xff]   ;;  %v14577_v31 = vld [vmem:[#allocation23 + $0xf00] ss:$16 sps:$4 sm:$0xff]  }
0x15bb   :  { %8482 = vmatprep.subr.bf16.mxu1 %v14492_v33  ;;  %v14580_v33 = vld [vmem:[#allocation23 + $0xf08] ss:$16 sps:$4 sm:$0xff]  }
0x15bd   :  { %8139 = vmatpush1.bf16.msra.mxu0 %v14487_v32  ;;  %v14585_v32 = vld [vmem:[#allocation23 + $0xf24] ss:$16 sps:$4 sm:$0xff]  }
0x15be   :  { %8483 = vmatpush1.bf16.msra.mxu1 %v14490_v58  ;;  %8140 = vmatprep.subr.bf16.mxu0 %v14495_v12  ;;  %v14588_v58 = vld [vmem:[#allocation23 + $0xf2c] ss:$16 sps:$4 sm:$0xff]   ;;  %v14583_v12 = vld [vmem:[#allocation23 + $0xf20] ss:$16 sps:$4 sm:$0xff]  }
0x15bf   :  { %8484 = vmatprep.subr.bf16.mxu1 %v14498_v62  ;;  %v14586_v62 = vld [vmem:[#allocation23 + $0xf28] ss:$16 sps:$4 sm:$0xff]  }
0x15c1   :  { %8141 = vmatpush1.bf16.msra.mxu0 %v14493_v39  ;;  %v14591_v39 = vld [vmem:[#allocation23 + $0xf44] ss:$16 sps:$4 sm:$0xff]  }
0x15c2   :  { %8485 = vmatpush1.bf16.msra.mxu1 %v14496_v59  ;;  %8142 = vmatprep.subr.bf16.mxu0 %v14501_v61  ;;  %v14594_v59 = vld [vmem:[#allocation23 + $0xf4c] ss:$16 sps:$4 sm:$0xff]   ;;  %v14589_v61 = vld [vmem:[#allocation23 + $0xf40] ss:$16 sps:$4 sm:$0xff]  }
0x15c3   :  { %8486 = vmatprep.subr.bf16.mxu1 %v14504_v6  ;;  %v14592_v6 = vld [vmem:[#allocation23 + $0xf48] ss:$16 sps:$4 sm:$0xff]  }
0x15c5   :  { %8143 = vmatpush1.bf16.msra.mxu0 %v14499_v54  ;;  %v14597_v54 = vld [vmem:[#allocation23 + $0xf64] ss:$16 sps:$4 sm:$0xff]  }
0x15c6   :  { %8487 = vmatpush1.bf16.msra.mxu1 %v14502_v37  ;;  %8144 = vmatprep.subr.bf16.mxu0 %v14507_v43  ;;  %v14600_v37 = vld [vmem:[#allocation23 + $0xf6c] ss:$16 sps:$4 sm:$0xff]   ;;  %v14595_v43 = vld [vmem:[#allocation23 + $0xf60] ss:$16 sps:$4 sm:$0xff]  }
0x15c7   :  { %8488 = vmatprep.subr.bf16.mxu1 %v14510_v14  ;;  %v14598_v14 = vld [vmem:[#allocation23 + $0xf68] ss:$16 sps:$4 sm:$0xff]  }
0x15c9   :  { %8145 = vmatpush1.bf16.msra.mxu0 %v14505_v5  ;;  %v14603_v5 = vld [vmem:[#allocation23 + $0xf84] ss:$16 sps:$4 sm:$0xff]  }
0x15ca   :  { %8489 = vmatpush1.bf16.msra.mxu1 %v14508_v13  ;;  %8146 = vmatprep.subr.bf16.mxu0 %v14513_v17  ;;  %v14606_v13 = vld [vmem:[#allocation23 + $0xf8c] ss:$16 sps:$4 sm:$0xff]   ;;  %v14601_v17 = vld [vmem:[#allocation23 + $0xf80] ss:$16 sps:$4 sm:$0xff]  }
0x15cb   :  { %8490 = vmatprep.subr.bf16.mxu1 %v14516_v23  ;;  %v14604_v23 = vld [vmem:[#allocation23 + $0xf88] ss:$16 sps:$4 sm:$0xff]  }
0x15cd   :  { %8147 = vmatpush1.bf16.msra.mxu0 %v14511_v24  ;;  %v14609_v24 = vld [vmem:[#allocation23 + $0xfa4] ss:$16 sps:$4 sm:$0xff]  }
0x15ce   :  { %8491 = vmatpush1.bf16.msra.mxu1 %v14514_v21  ;;  %8148 = vmatprep.subr.bf16.mxu0 %v14519_v26  ;;  %v14612_v21 = vld [vmem:[#allocation23 + $0xfac] ss:$16 sps:$4 sm:$0xff]   ;;  %v14607_v26 = vld [vmem:[#allocation23 + $0xfa0] ss:$16 sps:$4 sm:$0xff]  }
0x15cf   :  { %8492 = vmatprep.subr.bf16.mxu1 %v14522_v51  ;;  %v14610_v51 = vld [vmem:[#allocation23 + $0xfa8] ss:$16 sps:$4 sm:$0xff]  }
0x15d1   :  { %8149 = vmatpush1.bf16.msra.mxu0 %v14517_v56  ;;  %v14615_v56 = vld [vmem:[#allocation23 + $0xfc4] ss:$16 sps:$4 sm:$0xff]  }
0x15d2   :  { %8493 = vmatpush1.bf16.msra.mxu1 %v14520_v44  ;;  %8150 = vmatprep.subr.bf16.mxu0 %v14525_v20  ;;  %v14618_v44 = vld [vmem:[#allocation23 + $0xfcc] ss:$16 sps:$4 sm:$0xff]   ;;  %v14613_v20 = vld [vmem:[#allocation23 + $0xfc0] ss:$16 sps:$4 sm:$0xff]  }
0x15d3   :  { %8494 = vmatprep.subr.bf16.mxu1 %v14528_v41  ;;  %v14616_v41 = vld [vmem:[#allocation23 + $0xfc8] ss:$16 sps:$4 sm:$0xff]  }
0x15d5   :  { %8151 = vmatpush1.bf16.msra.mxu0 %v14523_v55  ;;  %v14621_v55 = vld [vmem:[#allocation23 + $0xfe4] ss:$16 sps:$4 sm:$0xff]  }
0x15d6   :  { %8495 = vmatpush1.bf16.msra.mxu1 %v14526_v42  ;;  %8163 = vmatprep.subr.bf16.mxu0 %v14531_v60  ;;  %v14624_v42 = vld [vmem:[#allocation23 + $0xfec] ss:$16 sps:$4 sm:$0xff]   ;;  %v14619_v60 = vld [vmem:[#allocation23 + $0xfe0] ss:$16 sps:$4 sm:$0xff]  }
0x15d7   :  { %8507 = vmatprep.subr.bf16.mxu1 %v14534_v10  ;;  %v14622_v10 = vld [vmem:[#allocation23 + $0xfe8] ss:$16 sps:$4 sm:$0xff]  }
0x15d8   :  { %8153 = vmatmul.mubr.bf16.vlgmr.msra.gmra.mrb[248].mxu0 %v16865_v15 }
0x15d9   :  { %8497 = vmatmul.mubr.bf16.vlgmr.msra.gmra.mrb[188].mxu1 %v16865_v15  ;;  %8164 = vmatpush1.bf16.msra.mxu0 %v14529_v28  ;;  %v14552_v15 = vld [vmem:[#allocation23 + $0xe6c] ss:$16 sps:$4 sm:$0xff]   ;;  %v17377_v28 = vmov 0.0  }
0x15da   :  { %8195 = vmatprep.mubr.bf16.mxu0 %v16871_v49  ;;  %8508 = vmatpush1.bf16.msra.mxu1 %v14532_v19  ;;  %v17378_v19 = vld [vmem:[#allocation63_spill] sm:$0xff] }
0x15db   :  { %8539 = vmatprep.mubr.bf16.mxu1 %v16871_v49  ;;  %8165 = vmatprep.subr.bf16.mxu0 %v14537_v57  ;;  %v14553_v49 = vld [vmem:[#allocation23 + $0xe80] ss:$16 sps:$4 sm:$0xff]   ;;  %v17379_v57 = vld [vmem:[#allocation64_spill] sm:$0xff] }
0x15dc   :  { %8509 = vmatprep.subr.bf16.mxu1 %v14540_v30  ;;  %v16903_v30 = vld [vmem:[#allocation5] sm:$0x1] }
0x15dd   :  { %8166 = vmatpush1.bf16.msra.mxu0 %v14535_v2 }
0x15de   :  { %8510 = vmatpush1.bf16.msra.mxu1 %v14538_v3  ;;  %8167 = vmatprep.subr.bf16.mxu0 %v14543_v35  ;;  %v5280_v3 = vld [vmem:[#allocation25] sm:$0xf] }
0x15df   :  { %8511 = vmatprep.subr.bf16.mxu1 %v14546_v34 }
0x15e1   :  { %8168 = vmatpush1.bf16.msra.mxu0 %v14541_v18 }
0x15e2   :  { %8512 = vmatpush1.bf16.msra.mxu1 %v14544_v50  ;;  %8169 = vmatprep.subr.bf16.mxu0 %v14549_v47 }
0x15e3   :  { %8513 = vmatprep.subr.bf16.mxu1 %v14552_v15 }
0x15e5   :  { %8170 = vmatpush1.bf16.msra.mxu0 %v14547_v8 }
0x15e6   :  { %8514 = vmatpush1.bf16.msra.mxu1 %v14550_v53  ;;  %8171 = vmatprep.subr.bf16.mxu0 %v14555_v45 }
0x15e7   :  { %8515 = vmatprep.subr.bf16.mxu1 %v14558_v1 }
0x15e9   :  { %8172 = vmatpush1.bf16.msra.mxu0 %v14553_v49 }
0x15ea   :  { %8516 = vmatpush1.bf16.msra.mxu1 %v14556_v7  ;;  %8173 = vmatprep.subr.bf16.mxu0 %v14561_v11 }
0x15eb   :  { %8517 = vmatprep.subr.bf16.mxu1 %v14564_v52 }
0x15ed   :  { %8174 = vmatpush1.bf16.msra.mxu0 %v14559_v46 }
0x15ee   :  { %8518 = vmatpush1.bf16.msra.mxu1 %v14562_v22  ;;  %8175 = vmatprep.subr.bf16.mxu0 %v14567_v38 }
0x15ef   :  { %8519 = vmatprep.subr.bf16.mxu1 %v14570_v36 }
0x15f1   :  { %8176 = vmatpush1.bf16.msra.mxu0 %v14565_v9 }
0x15f2   :  { %8520 = vmatpush1.bf16.msra.mxu1 %v14568_v63  ;;  %8177 = vmatprep.subr.bf16.mxu0 %v14573_v29 }
0x15f3   :  { %8521 = vmatprep.subr.bf16.mxu1 %v14576_v27 }
0x15f5   :  { %8178 = vmatpush1.bf16.msra.mxu0 %v14571_v48 }
0x15f6   :  { %8522 = vmatpush1.bf16.msra.mxu1 %v14574_v16  ;;  %8179 = vmatprep.subr.bf16.mxu0 %v14579_v0 }
0x15f7   :  { %8523 = vmatprep.subr.bf16.mxu1 %v14582_v4  ;;  %v8746_v4 = vld [vmem:[#allocation28] sm:$0xff] }
0x15f9   :  { %8180 = vmatpush1.bf16.msra.mxu0 %v14577_v31  ;;  %v8750_v31 = vld [vmem:[#allocation28 + $0x20] sm:$0xff] }
0x15fa   :  { %8524 = vmatpush1.bf16.msra.mxu1 %v14580_v33  ;;  %8181 = vmatprep.subr.bf16.mxu0 %v14585_v32 }
0x15fb   :  { %8525 = vmatprep.subr.bf16.mxu1 %v14588_v58 }
0x15fd   :  { %8182 = vmatpush1.bf16.msra.mxu0 %v14583_v12 }
0x15fe   :  { %8526 = vmatpush1.bf16.msra.mxu1 %v14586_v62  ;;  %8183 = vmatprep.subr.bf16.mxu0 %v14591_v39  ;;  %v8747_v62 = vld [vmem:[#allocation28 + $0x8] sm:$0xff] }
0x15ff   :  { %8527 = vmatprep.subr.bf16.mxu1 %v14594_v59  ;;  %v8751_v39 = vld [vmem:[#allocation28 + $0x28] sm:$0xff] }
0x1601   :  { %8184 = vmatpush1.bf16.msra.mxu0 %v14589_v61 }
0x1602   :  { %8528 = vmatpush1.bf16.msra.mxu1 %v14592_v6  ;;  %8185 = vmatprep.subr.bf16.mxu0 %v14597_v54 }
0x1603   :  { %8529 = vmatprep.subr.bf16.mxu1 %v14600_v37 }
0x1605   :  { %8186 = vmatpush1.bf16.msra.mxu0 %v14595_v43  ;;  %v12657_v43 = vcombine.high %v8746_v4, %v8750_v31 }
0x1606   :  { %8530 = vmatpush1.bf16.msra.mxu1 %v14598_v14  ;;  %8187 = vmatprep.subr.bf16.mxu0 %v14603_v5 }
0x1607   :  { %8531 = vmatprep.subr.bf16.mxu1 %v14606_v13  ;;  %v12659_v13 = vcombine.high %v8747_v62, %v8751_v39 }
0x1609   :  { %8188 = vmatpush1.bf16.msra.mxu0 %v14601_v17  ;;  %v8754_v17 = vld [vmem:[#allocation28 + $0x40] sm:$0xff] }
0x160a   :  { %8532 = vmatpush1.bf16.msra.mxu1 %v14604_v23  ;;  %8189 = vmatprep.subr.bf16.mxu0 %v14609_v24  ;;  %v8758_v23 = vld [vmem:[#allocation28 + $0x60] sm:$0xff] }
0x160b   :  { %8533 = vmatprep.subr.bf16.mxu1 %v14612_v21 }
0x160d   :  { %8190 = vmatpush1.bf16.msra.mxu0 %v14607_v26  ;;  %v8755_v26 = vld [vmem:[#allocation28 + $0x48] sm:$0xff] }
0x160e   :  { %8534 = vmatpush1.bf16.msra.mxu1 %v14610_v51  ;;  %8191 = vmatprep.subr.bf16.mxu0 %v14615_v56  ;;  %v8759_v51 = vld [vmem:[#allocation28 + $0x68] sm:$0xff] }
0x160f   :  { %8535 = vmatprep.subr.bf16.mxu1 %v14618_v44 }
0x1611   :  { %8192 = vmatpush1.bf16.msra.mxu0 %v14613_v20  ;;  %v12656_v20 = vcombine.low %v8746_v4, %v8750_v31  ;;  %v8741_v4 = vld [vmem:[#allocation26 + $0x60] sm:$0xff]  ;;  %v8738_v31 = vld [vmem:[#allocation26 + $0x48] sm:$0xff] }
0x1612   :  { %8536 = vmatpush1.bf16.msra.mxu1 %v14616_v41  ;;  %8193 = vmatprep.subr.bf16.mxu0 %v14621_v55 }
0x1613   :  { %8537 = vmatprep.subr.bf16.mxu1 %v14624_v42  ;;  %v12658_v42 = vcombine.low %v8747_v62, %v8751_v39  ;;  %v8731_v39 = vld [vmem:[#allocation26 + $0x10] sm:$0xff] }
0x1615   :  { %8194 = vmatpush1.bf16.msra.mxu0 %v14619_v60  ;;  %v12665_v60 = vcombine.high %v8754_v17, %v8758_v23 }
0x1616   :  { %8538 = vmatpush1.bf16.msra.mxu1 %v14622_v10  ;;  %13604 = vmatprep.subr.bf16.mxu0 %v17377_v28 }
0x1617   :  { %13610 = vmatprep.subr.bf16.mxu1 %v17377_v28 }
0x1618   :  { %8196 = vmatmul.mubr.bf16.vlgmr.msra.gmra.mrb[248].mxu0 %v16867_v25 }
0x1619   :  { %8540 = vmatmul.mubr.bf16.vlgmr.msra.gmra.mrb[188].mxu1 %v16867_v25  ;;  %13605 = vmatpush3.bf16.msra.mxu0 %v17378_v19  ;;  %v17380_v25 = vld [vmem:[#allocation65_spill] sm:$0xff]  ;;  %v8748_v19 = vld [vmem:[#allocation28 + $0x10] sm:$0xff] }
0x161a   :  { %13611 = vmatpush3.bf16.msra.mxu1 %v17379_v57  ;;  %13612 = vmatprep.mubr.msk.bf16.mxu1 %vm15319_vm0, %v17377_v28  ;;  %v5284_v2 = vsub.s32 0, %v17380_v25  ;;  %v5292_v35 = vsub.s32 2, %v17380_v25  ;;  %v5288_v34 = vsub.s32 1, %v17380_v25  ;;  %v5296_v18 = vsub.s32 3, %v17380_v25  ;;  %v8752_v57 = vld [vmem:[#allocation28 + $0x30] sm:$0xff] }
0x161b   :  { %13606 = vmatprep.mubr.msk.bf16.mxu0 %vm15319_vm0, %v17377_v28  ;;  %v12667_v28 = vcombine.high %v8755_v26, %v8759_v51  ;;  %vm11877_vm0 = vcmask 9216  }
0x161c   :  { %v5285_v50 = vrot.slane %v5280_v3, %v5284_v2  ;;  %v5293_v47 = vrot.slane %v5280_v3, %v5292_v35  ;;  %v5289_v15 = vrot.slane %v5280_v3, %v5288_v34  ;;  %v5297_v8 = vrot.slane %v5280_v3, %v5296_v18  ;;  %v8749_v3 = vld [vmem:[#allocation28 + $0x18] sm:$0xff] }
0x1620   :  { %13607 = vmatmul.mubr.msk.bf16.vlgmr.msra.gmra.mrb[252].mxu0 %vm653_vm5, %v16903_v30 }
0x1621   :  { %13613 = vmatmul.mubr.msk.bf16.vlgmr.msra.gmra.mrb[192].mxu1 %vm653_vm5, %v16903_v30  ;;  %8678 = vmatprep.mubr.bf16.mxu0 %v17250_v40 }
0x1622   :  { %8719 = vmatprep.mubr.bf16.mxu1 %v17250_v40 }
0x16eb   :  { %v8197_v53 = vpop.f32.mrb[248].mxu0 }
0x16ec   :  { %v13616_v45 = vadd.f32 %v8197_v53, %v5285_v50  ;;  %v8541_v1 = vpop.f32.mrb[188].mxu1  ;;  %v8199_v49 = vpop.f32.mrb[249].mxu0 }
0x16ed   :  { %v13620_v7 = vadd.f32 %v8541_v1, %v5293_v47  ;;  %v13617_v11 = vadd.f32 %v8199_v49, %v5289_v15  ;;  %v8543_v52 = vpop.f32.mrb[189].mxu1  ;;  %v8201_v46 = vpop.f32.mrb[250].mxu0  ;;  %v8760_v1 = vld [vmem:[#allocation28 + $0x70] sm:$0xff] }
0x16ee   :  { %v13621_v22 = vadd.f32 %v8543_v52, %v5297_v8  ;;  %v13618_v38 = vadd.f32 %v8201_v46, %v5285_v50  ;;  %v8545_v36 = vpop.f32.mrb[190].mxu1  ;;  %v8203_v9 = vpop.f32.mrb[251].mxu0  ;;  %v8550_v48 = vmax.f32 %v13616_v45, 0.0  ;;  %v8753_v50 = vld [vmem:[#allocation28 + $0x38] sm:$0xff]  ;;  %v8756_v45 = vld [vmem:[#allocation28 + $0x50] sm:$0xff]  ;;  %v12660_v52 = vcombine.low %v8748_v19, %v8752_v57 }
0x16ef   :  { %v13622_v63 = vadd.f32 %v8545_v36, %v5293_v47  ;;  %v13619_v29 = vadd.f32 %v8203_v9, %v5289_v15  ;;  %v8547_v27 = vpop.f32.mrb[191].mxu1  ;;  %v8552_v33 = vmax.f32 %v13620_v7, 0.0  ;;  %v8551_v32 = vmax.f32 %v13617_v11, 0.0  ;;  %v8757_v7 = vld [vmem:[#allocation28 + $0x58] sm:$0xff]  ;;  %v8733_v36 = vld [vmem:[#allocation26 + $0x20] sm:$0xff]  ;;  %v8730_v9 = vld [vmem:[#allocation26 + $0x8] sm:$0xff] }
0x16f0   :  { %v8554_v16 = vmax.f32 %v13618_v38, 0.0  ;;  %v13623_v0 = vadd.f32 %v8547_v27, %v5297_v8  ;;  %v8553_v59 = vmax.f32 %v13621_v22, 0.0  ;;  %v12664_v47 = vcombine.low %v8754_v17, %v8758_v23  ;;  %v8761_v11 = vld [vmem:[#allocation28 + $0x78] sm:$0xff]  ;;  %v8729_v38 = vld [vmem:[#allocation26] sm:$0xff]  ;;  %v8743_v17 = vld [vmem:[#allocation26 + $0x70] sm:$0xff] }
0x16f1   :  { %v8556_v58 = vmax.f32 %v13622_v63, 0.0  ;;  %v8555_v12 = vmax.f32 %v13619_v29, 0.0  ;;  %v12666_v15 = vcombine.low %v8755_v26, %v8759_v51  ;;  %v12661_v8 = vcombine.high %v8748_v19, %v8752_v57  ;;  %v8734_v63 = vld [vmem:[#allocation26 + $0x28] sm:$0xff]  ;;  %v9268_v19 = vld [vmem:[#allocation29 + $0x40] sm:$0xff] }
0x16f2   :  { %v8642_v61 = vpack.c.bf16 %v8554_v16, %v8550_v48  ;;  %v8557_v6 = vmax.f32 %v13623_v0, 0.0  ;;  %v12663_v53 = vcombine.high %v8749_v3, %v8753_v50  ;;  %v12669_v46 = vcombine.high %v8756_v45, %v8760_v1  ;;  %v8737_v0 = vld [vmem:[#allocation26 + $0x40] sm:$0xff] }
0x16f3   :  { %v8644_v54 = vpack.c.bf16 %v8556_v58, %v8552_v33  ;;  %v8643_v37 = vpack.c.bf16 %v8555_v12, %v8551_v32  ;;  %v16923_v14 = vpop.f32.mrb[252].mxu0  ;;  %v12671_v22 = vcombine.high %v8757_v7, %v8761_v11  ;;  %v12668_v29 = vcombine.low %v8756_v45, %v8760_v1  ;;  %v8742_v33 = vld [vmem:[#allocation26 + $0x68] sm:$0xff]  ;;  %v9272_v57 = vld [vmem:[#allocation29 + $0x60] sm:$0xff] }
0x16f4   :  { %v8645_v5 = vpack.c.bf16 %v8557_v6, %v8553_v59  ;;  %v8636_v24 = vpop.f32.mrb[192].mxu1  ;;  %v13608_v21 = vpop.f32.mrb[253].mxu0  ;;  %v12670_v27 = vcombine.low %v8757_v7, %v8761_v11  ;;  %v12677_v48 = vcombine.high %v8729_v38, %v8733_v36  ;;  %v12679_v16 = vcombine.high %v8730_v9, %v8734_v63  ;;  %v8735_v59 = vld [vmem:[#allocation26 + $0x30] sm:$0xff]  ;;  %v8736_v6 = vld [vmem:[#allocation26 + $0x38] sm:$0xff]  ;;  %v9276_v45 = vld [vmem:[#allocation29 + $0x80] sm:$0xff] }
0x16f5   :  { %8646 = vmatprep.subr.bf16.mxu0 %v8643_v37  ;;  %v13614_v56 = vpop.f32.mrb[193].mxu1  ;;  %v8599_v44 = vpop.f32.mrb[254].mxu0  ;;  %v8745_v49 = vpack.c.bf16 %v8636_v24, %v8636_v24  ;;  %v12676_v32 = vcombine.low %v8729_v38, %v8733_v36  ;;  %v12678_v58 = vcombine.low %v8730_v9, %v8734_v63  ;;  %v12685_v12 = vcombine.high %v8737_v0, %v8741_v4  ;;  %v8740_v24 = vld [vmem:[#allocation26 + $0x58] sm:$0xff]  ;;  %v9280_v1 = vld [vmem:[#allocation29 + $0xa0] sm:$0xff] }
0x16f6   :  { %8687 = vmatprep.subr.bf16.mxu1 %v8645_v5  ;;  %8647 = vmatpush1.bf16.msra.mxu0 %v8642_v61  ;;  %v8639_v41 = vpop.f32.mrb[194].mxu1  ;;  %v13609_v55 = vpop.f32.mrb[255].mxu0  ;;  %v12687_v62 = vcombine.high %v8738_v31, %v8742_v33  ;;  %v8732_v61 = vld [vmem:[#allocation26 + $0x18] sm:$0xff]  ;;  %v12686_v37 = vcombine.low %v8738_v31, %v8742_v33  ;;  %v8728_v23 = vpack.c.bf16 %v16923_v14, %v16923_v14  ;;  %v9408_v7 = vld [vmem:[#allocation29 + $0x4a0] sm:$0xff] }
0x16f7   :  { %8688 = vmatpush1.bf16.msra.mxu1 %v8644_v54  ;;  %8845 = vmatprep.subr.bf16.mxu0 %v12657_v43  ;;  %v13615_v10 = vpop.f32.mrb[195].mxu1  ;;  %v12684_v54 = vcombine.low %v8737_v0, %v8741_v4  ;;  %v12681_v43 = vcombine.high %v8731_v39, %v8735_v59  ;;  %v12683_v5 = vcombine.high %v8732_v61, %v8736_v6  ;;  %v8744_v21 = vld [vmem:[#allocation26 + $0x78] sm:$0xff]  ;;  %v9264_v41 = vld [vmem:[#allocation29 + $0x20] sm:$0xff] }
0x16f8   :  { %8886 = vmatprep.subr.bf16.mxu1 %v12659_v13  ;;  %v8739_v13 = vld [vmem:[#allocation26 + $0x50] sm:$0xff]  ;;  %v12680_v26 = vcombine.low %v8731_v39, %v8735_v59  ;;  %v12682_v51 = vcombine.low %v8732_v61, %v8736_v6  ;;  %v12691_v44 = vcombine.high %v8740_v24, %v8744_v21  ;;  %v9388_v55 = vld [vmem:[#allocation29 + $0x400] sm:$0xff]  ;;  %v12712_v9 = vcombine.low %v9276_v45, %v9280_v1 }
0x16f9   :  { %12654 = vmatmul.mubr.msk.bf16.vlgmr.msra.gmra.mrb[0].mxu0 %vm653_vm5, %v16903_v30  ;;  %v12689_v56 = vcombine.high %v8739_v13, %v8743_v17  ;;  %v12688_v14 = vcombine.low %v8739_v13, %v8743_v17  ;;  %v9412_v38 = vld [vmem:[#allocation29 + $0x4c0] sm:$0xff] }
0x16fa   :  { %12655 = vmatmul.mubr.msk.bf16.vlgmr.msra.gmra.mrb[196].mxu1 %vm653_vm5, %v16903_v30  ;;  %8846 = vmatpush1.bf16.msra.mxu0 %v12656_v20  ;;  %v12662_v30 = vcombine.low %v8749_v3, %v8753_v50  ;;  %v9260_v20 = vld [vmem:[#allocation29] sm:$0xff] }
0x16fb   :  { %8887 = vmatpush1.bf16.msra.mxu1 %v12658_v42  ;;  %8847 = vmatprep.subr.bf16.mxu0 %v12665_v60  ;;  %v9392_v42 = vld [vmem:[#allocation29 + $0x420] sm:$0xff]  ;;  %v12690_v60 = vcombine.low %v8740_v24, %v8744_v21  ;;  %v12697_v10 = vcombine.high %v9260_v20, %v9264_v41 }
0x16fc   :  { %8888 = vmatprep.subr.bf16.mxu1 %v12667_v28  ;;  %8877 = vmatprep.mubr.bf16.mxu0 %v17250_v40  ;;  %v12825_v28 = vcombine.high %v9388_v55, %v9392_v42  ;;  %v9396_v3 = vld [vmem:[#allocation29 + $0x440] sm:$0xff] }
0x16fd   :  { %8918 = vmatprep.mubr.bf16.mxu1 %v17250_v40  ;;  %v9400_v50 = vld [vmem:[#allocation29 + $0x460] sm:$0xff] }
0x16fe   :  { %8848 = vmatpush1.bf16.msra.mxu0 %v12664_v47  ;;  %v12696_v47 = vcombine.low %v9260_v20, %v9264_v41  ;;  %v12832_v11 = vcombine.low %v9396_v3, %v9400_v50  ;;  %v9416_v36 = vld [vmem:[#allocation29 + $0x4e0] sm:$0xff] }
0x16ff   :  { %8889 = vmatpush1.bf16.msra.mxu1 %v12666_v15  ;;  %8927 = vmatprep.subr.bf16.mxu0 %v12661_v8  ;;  %v12824_v15 = vcombine.low %v9388_v55, %v9392_v42  ;;  %v12705_v8 = vcombine.high %v9268_v19, %v9272_v57  ;;  %v9420_v0 = vld [vmem:[#allocation29 + $0x500] sm:$0xff]  ;;  %v12848_v33 = vcombine.low %v9412_v38, %v9416_v36 }
0x1700   :  { %8968 = vmatprep.subr.bf16.mxu1 %v12663_v53  ;;  %v12833_v53 = vcombine.high %v9396_v3, %v9400_v50  ;;  %v9424_v4 = vld [vmem:[#allocation29 + $0x520] sm:$0xff] }
0x1701   :  { %12672 = vmatmul.mubr.msk.bf16.vlgmr.msra.gmra.mrb[4].mxu0 %vm1295_vm13, %v8745_v49  ;;  %v9428_v39 = vld [vmem:[#allocation29 + $0x540] sm:$0xff]  ;;  %v12856_v6 = vcombine.low %v9420_v0, %v9424_v4 }
0x1702   :  { %12673 = vmatmul.mubr.msk.bf16.vlgmr.msra.gmra.mrb[200].mxu1 %vm1295_vm13, %v8745_v49  ;;  %8928 = vmatpush1.bf16.msra.mxu0 %v12660_v52  ;;  %v12713_v52 = vcombine.high %v9276_v45, %v9280_v1  ;;  %v9432_v59 = vld [vmem:[#allocation29 + $0x560] sm:$0xff] }
0x1703   :  { %8969 = vmatpush1.bf16.msra.mxu1 %v12662_v30  ;;  %8929 = vmatprep.subr.bf16.mxu0 %v12669_v46  ;;  %v9284_v46 = vld [vmem:[#allocation29 + $0xc0] sm:$0xff]  ;;  %v12864_v24 = vcombine.low %v9428_v39, %v9432_v59 }
0x1704   :  { %8970 = vmatprep.subr.bf16.mxu1 %v12671_v22  ;;  %8959 = vmatprep.mubr.bf16.mxu0 %v17250_v40  ;;  %v9288_v22 = vld [vmem:[#allocation29 + $0xe0] sm:$0xff] }
0x1705   :  { %9000 = vmatprep.mubr.bf16.mxu1 %v17250_v40  ;;  %v12720_v31 = vcombine.low %v9284_v46, %v9288_v22  ;;  %v9436_v13 = vld [vmem:[#allocation29 + $0x580] sm:$0xff] }
0x1706   :  { %8930 = vmatpush1.bf16.msra.mxu0 %v12668_v29  ;;  %v12721_v29 = vcombine.high %v9284_v46, %v9288_v22  ;;  %v9440_v17 = vld [vmem:[#allocation29 + $0x5a0] sm:$0xff] }
0x1707   :  { %8971 = vmatpush1.bf16.msra.mxu1 %v12670_v27  ;;  %9092 = vmatprep.subr.bf16.mxu0 %v12677_v48  ;;  %v12849_v27 = vcombine.high %v9412_v38, %v9416_v36  ;;  %v9292_v48 = vld [vmem:[#allocation29 + $0x100] sm:$0xff]  ;;  %v12872_v55 = vcombine.low %v9436_v13, %v9440_v17 }
0x1708   :  { %9133 = vmatprep.subr.bf16.mxu1 %v12679_v16  ;;  %v9296_v16 = vld [vmem:[#allocation29 + $0x120] sm:$0xff] }
0x1709   :  { %12674 = vmatmul.mubr.msk.bf16.vlgmr.msra.gmra.mrb[8].mxu0 %vm1295_vm13, %v8745_v49  ;;  %v12728_v61 = vcombine.low %v9292_v48, %v9296_v16  ;;  %v9448_v20 = vld [vmem:[#allocation29 + $0x5e0] sm:$0xff] }
0x170a   :  { %12675 = vmatmul.mubr.msk.bf16.vlgmr.msra.gmra.mrb[204].mxu1 %vm1295_vm13, %v8745_v49  ;;  %9093 = vmatpush1.bf16.msra.mxu0 %v12676_v32  ;;  %v9404_v49 = vld [vmem:[#allocation29 + $0x480] sm:$0xff]  ;;  %v12729_v32 = vcombine.high %v9292_v48, %v9296_v16 }
0x170b   :  { %9134 = vmatpush1.bf16.msra.mxu1 %v12678_v58  ;;  %9094 = vmatprep.subr.bf16.mxu0 %v12685_v12  ;;  %v12841_v30 = vcombine.high %v9404_v49, %v9408_v7  ;;  %v12840_v63 = vcombine.low %v9404_v49, %v9408_v7  ;;  %v12857_v58 = vcombine.high %v9420_v0, %v9424_v4  ;;  %v9300_v12 = vld [vmem:[#allocation29 + $0x140] sm:$0xff] }
0x170c   :  { %9135 = vmatprep.subr.bf16.mxu1 %v12687_v62  ;;  %9124 = vmatprep.mubr.bf16.mxu0 %v17250_v40  ;;  %v9304_v62 = vld [vmem:[#allocation29 + $0x160] sm:$0xff] }
0x170d   :  { %9165 = vmatprep.mubr.bf16.mxu1 %v17250_v40  ;;  %v9464_v45 = vld [vmem:[#allocation29 + $0x660] sm:$0xff] }
0x170e   :  { %9095 = vmatpush1.bf16.msra.mxu0 %v12684_v54  ;;  %v12737_v54 = vcombine.high %v9300_v12, %v9304_v62  ;;  %v9472_v46 = vld [vmem:[#allocation29 + $0x6a0] sm:$0xff] }
0x170f   :  { %9136 = vmatpush1.bf16.msra.mxu1 %v12686_v37  ;;  %9174 = vmatprep.subr.bf16.mxu0 %v12681_v43  ;;  %v12865_v37 = vcombine.high %v9428_v39, %v9432_v59  ;;  %v9308_v43 = vld [vmem:[#allocation29 + $0x180] sm:$0xff] }
0x1710   :  { %9215 = vmatprep.subr.bf16.mxu1 %v12683_v5  ;;  %v9312_v5 = vld [vmem:[#allocation29 + $0x1a0] sm:$0xff] }
0x1711   :  { %12692 = vmatmul.mubr.msk.bf16.vlgmr.msra.gmra.mrb[12].mxu0 %vm1295_vm13, %v8728_v23  ;;  %v12745_v21 = vcombine.high %v9308_v43, %v9312_v5  ;;  %v12744_v41 = vcombine.low %v9308_v43, %v9312_v5  ;;  %v9480_v48 = vld [vmem:[#allocation29 + $0x6e0] sm:$0xff] }
0x1712   :  { %12693 = vmatmul.mubr.msk.bf16.vlgmr.msra.gmra.mrb[208].mxu1 %vm1295_vm13, %v8728_v23  ;;  %9175 = vmatpush1.bf16.msra.mxu0 %v12680_v26  ;;  %v12873_v26 = vcombine.high %v9436_v13, %v9440_v17  ;;  %v9496_v43 = vld [vmem:[#allocation29 + $0x760] sm:$0xff] }
0x1713   :  { %9216 = vmatpush1.bf16.msra.mxu1 %v12682_v51  ;;  %9176 = vmatprep.subr.bf16.mxu0 %v12689_v56  ;;  %v9316_v51 = vld [vmem:[#allocation29 + $0x1c0] sm:$0xff] }
0x1714   :  { %9217 = vmatprep.subr.bf16.mxu1 %v12691_v44  ;;  %9206 = vmatprep.mubr.bf16.mxu0 %v17250_v40  ;;  %v9320_v56 = vld [vmem:[#allocation29 + $0x1e0] sm:$0xff] }
0x1715   :  { %9247 = vmatprep.mubr.bf16.mxu1 %v17250_v40  ;;  %v12704_v40 = vcombine.low %v9268_v19, %v9272_v57  ;;  %v9444_v44 = vld [vmem:[#allocation29 + $0x5c0] sm:$0xff]  ;;  %v12753_v42 = vcombine.high %v9316_v51, %v9320_v56  ;;  %v12752_v57 = vcombine.low %v9316_v51, %v9320_v56 }
0x1716   :  { %9177 = vmatpush1.bf16.msra.mxu0 %v12688_v14  ;;  %v12881_v14 = vcombine.high %v9444_v44, %v9448_v20  ;;  %v9456_v19 = vld [vmem:[#allocation29 + $0x620] sm:$0xff]  ;;  %v12880_v3 = vcombine.low %v9444_v44, %v9448_v20 }
0x1717   :  { %9218 = vmatpush1.bf16.msra.mxu1 %v12690_v60  ;;  %10796 = vmatprep.subr.bf16.mxu0 %v12697_v10  ;;  %v9324_v60 = vld [vmem:[#allocation29 + $0x200] sm:$0xff] }
0x1718   :  { %10837 = vmatprep.subr.bf16.mxu1 %v12825_v28  ;;  %v9328_v10 = vld [vmem:[#allocation29 + $0x220] sm:$0xff] }
0x1719   :  { %12694 = vmatmul.mubr.msk.bf16.vlgmr.msra.gmra.mrb[16].mxu0 %vm1295_vm13, %v8728_v23  ;;  %v9452_v28 = vld [vmem:[#allocation29 + $0x600] sm:$0xff]  ;;  %v12761_v50 = vcombine.high %v9324_v60, %v9328_v10  ;;  %v12760_v1 = vcombine.low %v9324_v60, %v9328_v10 }
0x171a   :  { %12695 = vmatmul.mubr.msk.bf16.vlgmr.msra.gmra.mrb[212].mxu1 %vm1295_vm13, %v8728_v23  ;;  %10797 = vmatpush1.bf16.msra.mxu0 %v12696_v47  ;;  %v12736_v23 = vcombine.low %v9300_v12, %v9304_v62  ;;  %v12889_v47 = vcombine.high %v9452_v28, %v9456_v19  ;;  %v12888_v49 = vcombine.low %v9452_v28, %v9456_v19  ;;  %v9488_v12 = vld [vmem:[#allocation29 + $0x720] sm:$0xff] }
0x171b   :  { %10838 = vmatpush1.bf16.msra.mxu1 %v12824_v15  ;;  %10798 = vmatprep.subr.bf16.mxu0 %v12705_v8  ;;  %v9332_v15 = vld [vmem:[#allocation29 + $0x240] sm:$0xff] }
0x171c   :  { %10839 = vmatprep.subr.bf16.mxu1 %v12833_v53  ;;  %v9336_v8 = vld [vmem:[#allocation29 + $0x260] sm:$0xff] }
0x171d   :  { %v9460_v53 = vld [vmem:[#allocation29 + $0x640] sm:$0xff]  ;;  %v12769_v7 = vcombine.high %v9332_v15, %v9336_v8  ;;  %v12768_v22 = vcombine.low %v9332_v15, %v9336_v8  ;;  %v9393_v15 = vld [vmem:[#allocation29 + $0x428] sm:$0xff] }
0x171e   :  { %10799 = vmatpush1.bf16.msra.mxu0 %v12704_v40  ;;  %v12897_v40 = vcombine.high %v9460_v53, %v9464_v45  ;;  %v12896_v38 = vcombine.low %v9460_v53, %v9464_v45  ;;  %v9504_v51 = vld [vmem:[#allocation29 + $0x7a0] sm:$0xff] }
0x171f   :  { %10840 = vmatpush1.bf16.msra.mxu1 %v12832_v11  ;;  %10800 = vmatprep.subr.bf16.mxu0 %v12713_v52  ;;  %v9340_v11 = vld [vmem:[#allocation29 + $0x280] sm:$0xff] }
0x1720   :  { %10841 = vmatprep.subr.bf16.mxu1 %v12841_v30  ;;  %v9344_v52 = vld [vmem:[#allocation29 + $0x2a0] sm:$0xff] }
0x1721   :  { %v9468_v30 = vld [vmem:[#allocation29 + $0x680] sm:$0xff]  ;;  %v12777_v36 = vcombine.high %v9340_v11, %v9344_v52  ;;  %v12776_v16 = vcombine.low %v9340_v11, %v9344_v52  ;;  %v9269_v11 = vld [vmem:[#allocation29 + $0x48] sm:$0xff] }
0x1722   :  { %10801 = vmatpush1.bf16.msra.mxu0 %v12712_v9  ;;  %v12905_v9 = vcombine.high %v9468_v30, %v9472_v46  ;;  %v12904_v0 = vcombine.low %v9468_v30, %v9472_v46  ;;  %v9512_v60 = vld [vmem:[#allocation29 + $0x7e0] sm:$0xff]  ;;  %v9273_v52 = vld [vmem:[#allocation29 + $0x68] sm:$0xff] }
0x1723   :  { %10842 = vmatpush1.bf16.msra.mxu1 %v12840_v63  ;;  %10802 = vmatprep.subr.bf16.mxu0 %v12721_v29  ;;  %v9348_v63 = vld [vmem:[#allocation29 + $0x2c0] sm:$0xff] }
0x1724   :  { %10843 = vmatprep.subr.bf16.mxu1 %v12849_v27  ;;  %v9352_v29 = vld [vmem:[#allocation29 + $0x2e0] sm:$0xff] }
0x1725   :  { %v9476_v27 = vld [vmem:[#allocation29 + $0x6c0] sm:$0xff]  ;;  %v12785_v4 = vcombine.high %v9348_v63, %v9352_v29  ;;  %v12784_v62 = vcombine.low %v9348_v63, %v9352_v29 }
0x1726   :  { %10803 = vmatpush1.bf16.msra.mxu0 %v12720_v31  ;;  %v12913_v31 = vcombine.high %v9476_v27, %v9480_v48  ;;  %v12912_v39 = vcombine.low %v9476_v27, %v9480_v48  ;;  %v12707_v48 = vcombine.high %v9269_v11, %v9273_v52 }
0x1727   :  { %10844 = vmatpush1.bf16.msra.mxu1 %v12848_v33  ;;  %10804 = vmatprep.subr.bf16.mxu0 %v12729_v32  ;;  %v9356_v33 = vld [vmem:[#allocation29 + $0x300] sm:$0xff] }
0x1728   :  { %10845 = vmatprep.subr.bf16.mxu1 %v12857_v58  ;;  %v9360_v32 = vld [vmem:[#allocation29 + $0x320] sm:$0xff] }
0x1729   :  { %v9484_v58 = vld [vmem:[#allocation29 + $0x700] sm:$0xff]  ;;  %v12793_v59 = vcombine.high %v9356_v33, %v9360_v32  ;;  %v12792_v5 = vcombine.low %v9356_v33, %v9360_v32  ;;  %v9277_v33 = vld [vmem:[#allocation29 + $0x88] sm:$0xff] }
0x172a   :  { %10805 = vmatpush1.bf16.msra.mxu0 %v12728_v61  ;;  %v12921_v61 = vcombine.high %v9484_v58, %v9488_v12  ;;  %v12920_v13 = vcombine.low %v9484_v58, %v9488_v12  ;;  %v9281_v32 = vld [vmem:[#allocation29 + $0xa8] sm:$0xff] }
0x172b   :  { %10846 = vmatpush1.bf16.msra.mxu1 %v12856_v6  ;;  %10806 = vmatprep.subr.bf16.mxu0 %v12737_v54  ;;  %v9364_v6 = vld [vmem:[#allocation29 + $0x340] sm:$0xff]  ;;  %v9405_v12 = vld [vmem:[#allocation29 + $0x488] sm:$0xff] }
0x172c   :  { %10847 = vmatprep.subr.bf16.mxu1 %v12865_v37  ;;  %v9368_v54 = vld [vmem:[#allocation29 + $0x360] sm:$0xff] }
0x172d   :  { %v9492_v37 = vld [vmem:[#allocation29 + $0x740] sm:$0xff]  ;;  %v12801_v17 = vcombine.high %v9364_v6, %v9368_v54  ;;  %v12800_v56 = vcombine.low %v9364_v6, %v9368_v54  ;;  %v9285_v54 = vld [vmem:[#allocation29 + $0xc8] sm:$0xff] }
0x172e   :  { %10807 = vmatpush1.bf16.msra.mxu0 %v12736_v23  ;;  %v12929_v23 = vcombine.high %v9492_v37, %v9496_v43  ;;  %v12928_v44 = vcombine.low %v9492_v37, %v9496_v43  ;;  %v9289_v37 = vld [vmem:[#allocation29 + $0xe8] sm:$0xff] }
0x172f   :  { %10848 = vmatpush1.bf16.msra.mxu1 %v12864_v24  ;;  %10808 = vmatprep.subr.bf16.mxu0 %v12745_v21  ;;  %v9372_v24 = vld [vmem:[#allocation29 + $0x380] sm:$0xff] }
0x1730   :  { %10849 = vmatprep.subr.bf16.mxu1 %v12873_v26  ;;  %v9376_v21 = vld [vmem:[#allocation29 + $0x3a0] sm:$0xff] }
0x1731   :  { %v9500_v26 = vld [vmem:[#allocation29 + $0x780] sm:$0xff]  ;;  %v12809_v20 = vcombine.high %v9372_v24, %v9376_v21  ;;  %v12808_v10 = vcombine.low %v9372_v24, %v9376_v21  ;;  %v12714_v24 = vcombine.low %v9277_v33, %v9281_v32 }
0x1732   :  { %10809 = vmatpush1.bf16.msra.mxu0 %v12744_v41  ;;  %v12937_v41 = vcombine.high %v9500_v26, %v9504_v51  ;;  %v12936_v28 = vcombine.low %v9500_v26, %v9504_v51 }
0x1733   :  { %10850 = vmatpush1.bf16.msra.mxu1 %v12872_v55  ;;  %10810 = vmatprep.subr.bf16.mxu0 %v12753_v42  ;;  %v9380_v55 = vld [vmem:[#allocation29 + $0x3c0] sm:$0xff] }
0x1734   :  { %10851 = vmatprep.subr.bf16.mxu1 %v12881_v14  ;;  %v9384_v42 = vld [vmem:[#allocation29 + $0x3e0] sm:$0xff] }
0x1735   :  { %v9508_v14 = vld [vmem:[#allocation29 + $0x7c0] sm:$0xff]  ;;  %v12817_v19 = vcombine.high %v9380_v55, %v9384_v42  ;;  %v12816_v45 = vcombine.low %v9380_v55, %v9384_v42  ;;  %v9293_v55 = vld [vmem:[#allocation29 + $0x108] sm:$0xff] }
0x1736   :  { %10811 = vmatpush1.bf16.msra.mxu0 %v12752_v57  ;;  %v9261_v57 = vld [vmem:[#allocation29 + $0x8] sm:$0xff] }
0x1737   :  { %10852 = vmatpush1.bf16.msra.mxu1 %v12880_v3  ;;  %10812 = vmatprep.subr.bf16.mxu0 %v12761_v50  ;;  %v9265_v3 = vld [vmem:[#allocation29 + $0x28] sm:$0xff] }
0x1738   :  { %10853 = vmatprep.subr.bf16.mxu1 %v12889_v47  ;;  %v9389_v50 = vld [vmem:[#allocation29 + $0x408] sm:$0xff]  ;;  %v12945_v47 = vcombine.high %v9508_v14, %v9512_v60  ;;  %v12698_v8 = vcombine.low %v9261_v57, %v9265_v3 }
0x1739   :  { %v12826_v53 = vcombine.low %v9389_v50, %v9393_v15  ;;  %v9297_v42 = vld [vmem:[#allocation29 + $0x128] sm:$0xff] }
0x173a   :  { %10813 = vmatpush1.bf16.msra.mxu0 %v12760_v1  ;;  %v12944_v1 = vcombine.low %v9508_v14, %v9512_v60  ;;  %v9421_v60 = vld [vmem:[#allocation29 + $0x508] sm:$0xff] }
0x173b   :  { %10854 = vmatpush1.bf16.msra.mxu1 %v12888_v49  ;;  %10814 = vmatprep.subr.bf16.mxu0 %v12769_v7  ;;  %v12699_v49 = vcombine.high %v9261_v57, %v9265_v3  ;;  %v12827_v7 = vcombine.high %v9389_v50, %v9393_v15  ;;  %v12731_v57 = vcombine.high %v9293_v55, %v9297_v42  ;;  %v9301_v50 = vld [vmem:[#allocation29 + $0x148] sm:$0xff] }
0x173c   :  { %10855 = vmatprep.subr.bf16.mxu1 %v12897_v40 }
0x173e   :  { %10815 = vmatpush1.bf16.msra.mxu0 %v12768_v22  ;;  %v9397_v22 = vld [vmem:[#allocation29 + $0x448] sm:$0xff] }
0x173f   :  { %10856 = vmatpush1.bf16.msra.mxu1 %v12896_v38  ;;  %10816 = vmatprep.subr.bf16.mxu0 %v12777_v36  ;;  %v9401_v38 = vld [vmem:[#allocation29 + $0x468] sm:$0xff] }
0x1740   :  { %10857 = vmatprep.subr.bf16.mxu1 %v12905_v9 }
0x1742   :  { %10817 = vmatpush1.bf16.msra.mxu0 %v12776_v16 }
0x1743   :  { %10858 = vmatpush1.bf16.msra.mxu1 %v12904_v0  ;;  %10818 = vmatprep.subr.bf16.mxu0 %v12785_v4 }
0x1744   :  { %10859 = vmatprep.subr.bf16.mxu1 %v12913_v31  ;;  %v12835_v31 = vcombine.high %v9397_v22, %v9401_v38 }
0x1746   :  { %10819 = vmatpush1.bf16.msra.mxu0 %v12784_v62  ;;  %v9409_v62 = vld [vmem:[#allocation29 + $0x4a8] sm:$0xff] }
0x1747   :  { %10860 = vmatpush1.bf16.msra.mxu1 %v12912_v39  ;;  %10820 = vmatprep.subr.bf16.mxu0 %v12793_v59  ;;  %v12706_v39 = vcombine.low %v9269_v11, %v9273_v52  ;;  %v12834_v59 = vcombine.low %v9397_v22, %v9401_v38  ;;  %v12843_v6 = vcombine.high %v9405_v12, %v9409_v62  ;;  %v9309_v38 = vld [vmem:[#allocation29 + $0x188] sm:$0xff] }
0x1748   :  { %10861 = vmatprep.subr.bf16.mxu1 %v12921_v61  ;;  %v12715_v61 = vcombine.high %v9277_v33, %v9281_v32  ;;  %v12842_v51 = vcombine.low %v9405_v12, %v9409_v62  ;;  %v9321_v12 = vld [vmem:[#allocation29 + $0x1e8] sm:$0xff] }
0x174a   :  { %10821 = vmatpush1.bf16.msra.mxu0 %v12792_v5  ;;  %v9413_v5 = vld [vmem:[#allocation29 + $0x4c8] sm:$0xff] }
0x174b   :  { %10862 = vmatpush1.bf16.msra.mxu1 %v12920_v13  ;;  %10822 = vmatprep.subr.bf16.mxu0 %v12801_v17  ;;  %v9417_v13 = vld [vmem:[#allocation29 + $0x4e8] sm:$0xff] }
0x174c   :  { %10863 = vmatprep.subr.bf16.mxu1 %v12929_v23 }
0x174e   :  { %10823 = vmatpush1.bf16.msra.mxu0 %v12800_v56  ;;  %v12723_v56 = vcombine.high %v9285_v54, %v9289_v37 }
0x174f   :  { %10864 = vmatpush1.bf16.msra.mxu1 %v12928_v44  ;;  %10824 = vmatprep.subr.bf16.mxu0 %v12809_v20 }
0x1750   :  { %10865 = vmatprep.subr.bf16.mxu1 %v12937_v41  ;;  %v12851_v41 = vcombine.high %v9413_v5, %v9417_v13 }
0x1752   :  { %10825 = vmatpush1.bf16.msra.mxu0 %v12808_v10  ;;  %v9425_v10 = vld [vmem:[#allocation29 + $0x528] sm:$0xff] }
0x1753   :  { %10866 = vmatpush1.bf16.msra.mxu1 %v12936_v28  ;;  %10826 = vmatprep.subr.bf16.mxu0 %v12817_v19  ;;  %v12722_v28 = vcombine.low %v9285_v54, %v9289_v37  ;;  %v12850_v19 = vcombine.low %v9413_v5, %v9417_v13  ;;  %v12859_v3 = vcombine.high %v9421_v60, %v9425_v10 }
0x1754   :  { %10867 = vmatprep.subr.bf16.mxu1 %v12945_v47  ;;  %v9305_v47 = vld [vmem:[#allocation29 + $0x168] sm:$0xff]  ;;  %v12858_v11 = vcombine.low %v9421_v60, %v9425_v10 }
0x1755   :  { %v12739_v52 = vcombine.high %v9301_v50, %v9305_v47  ;;  %v9457_v60 = vld [vmem:[#allocation29 + $0x628] sm:$0xff] }
0x1756   :  { %10827 = vmatpush1.bf16.msra.mxu0 %v12816_v45 }
0x1757   :  { %10868 = vmatpush1.bf16.msra.mxu1 %v12944_v1  ;;  %10878 = vmatprep.subr.bf16.mxu0 %v12699_v49  ;;  %v12730_v49 = vcombine.low %v9293_v55, %v9297_v42  ;;  %v9325_v55 = vld [vmem:[#allocation29 + $0x208] sm:$0xff] }
0x1758   :  { %10919 = vmatprep.subr.bf16.mxu1 %v12827_v7  ;;  %v9329_v42 = vld [vmem:[#allocation29 + $0x228] sm:$0xff] }
0x17cc   :  { %v8680_v40 = vpop.f32.mrb[0].mxu0 }
0x17cd   :  { %v8721_v30 = vpop.f32.mrb[196].mxu1  ;;  %v8682_v46 = vpop.f32.mrb[1].mxu0  ;;  %v16949_v29 = vpack.c.bf16 %v8680_v40, %v8680_v40 }
0x17ce   :  { %v16947_v36 = vpack.c.bf16 %v8682_v46, %v8682_v46  ;;  %v8723_v9 = vpop.f32.mrb[197].mxu1  ;;  %v8684_v63 = vpop.f32.mrb[2].mxu0  ;;  %v16953_v4 = vpack.c.bf16 %v8721_v30, %v8721_v30 }
0x17cf   :  { %v16951_v27 = vpack.c.bf16 %v8723_v9, %v8723_v9  ;;  %v8725_v16 = vpop.f32.mrb[198].mxu1  ;;  %v8685_v0 = vpop.f32.mrb[3].mxu0  ;;  %v9313_v9 = vld [vmem:[#allocation29 + $0x1a8] sm:$0xff] }
0x17d0   :  { %10828 = vmatprep.mubr.bf16.mxu0 %v16947_v36  ;;  %v8726_v58 = vpop.f32.mrb[199].mxu1  ;;  %v9441_v16 = vld [vmem:[#allocation29 + $0x5a8] sm:$0xff]  ;;  %v12738_v0 = vcombine.low %v9301_v50, %v9305_v47  ;;  %v12747_v33 = vcombine.high %v9309_v38, %v9313_v9  ;;  %v12746_v37 = vcombine.low %v9309_v38, %v9313_v9 }
0x17d1   :  { %10869 = vmatprep.mubr.bf16.mxu1 %v16951_v27  ;;  %10829 = vmatmul.mubr.bf16.vlgmr.msra.gmra.mrb[20].mxu0 %v16949_v29  ;;  %v9317_v58 = vld [vmem:[#allocation29 + $0x1c8] sm:$0xff] }
0x17d2   :  { %10870 = vmatmul.mubr.bf16.vlgmr.msra.gmra.mrb[216].mxu1 %v16953_v4  ;;  %10879 = vmatpush1.bf16.msra.mxu0 %v12698_v8  ;;  %v9429_v8 = vld [vmem:[#allocation29 + $0x548] sm:$0xff] }
0x17d3   :  { %10920 = vmatpush1.bf16.msra.mxu1 %v12826_v53  ;;  %10880 = vmatprep.subr.bf16.mxu0 %v12707_v48  ;;  %v9433_v53 = vld [vmem:[#allocation29 + $0x568] sm:$0xff] }
0x17d4   :  { %10921 = vmatprep.subr.bf16.mxu1 %v12835_v31  ;;  %10910 = vmatprep.mubr.bf16.mxu0 %v16947_v36  ;;  %v16960_v43 = vpop.f32.mrb[4].mxu0  ;;  %v12867_v22 = vcombine.high %v9429_v8, %v9433_v53  ;;  %v9437_v48 = vld [vmem:[#allocation29 + $0x588] sm:$0xff]  ;;  %v12866_v31 = vcombine.low %v9429_v8, %v9433_v53 }
0x17d5   :  { %10951 = vmatprep.mubr.bf16.mxu1 %v16951_v27  ;;  %v16963_v17 = vpop.f32.mrb[200].mxu1  ;;  %v16965_v23 = vpop.f32.mrb[5].mxu0  ;;  %v12875_v32 = vcombine.high %v9437_v48, %v9441_v16  ;;  %v9461_v50 = vld [vmem:[#allocation29 + $0x648] sm:$0xff] }
0x17d6   :  { %10881 = vmatpush1.bf16.msra.mxu0 %v12706_v39  ;;  %v16967_v21 = vpop.f32.mrb[201].mxu1  ;;  %v8883_v26 = vpop.f32.mrb[6].mxu0  ;;  %v9445_v39 = vld [vmem:[#allocation29 + $0x5c8] sm:$0xff] }
0x17d7   :  { %10922 = vmatpush1.bf16.msra.mxu1 %v12834_v59  ;;  %10882 = vmatprep.subr.bf16.mxu0 %v12715_v61  ;;  %v8924_v44 = vpop.f32.mrb[202].mxu1  ;;  %v8884_v20 = vpop.f32.mrb[7].mxu0  ;;  %v9449_v59 = vld [vmem:[#allocation29 + $0x5e8] sm:$0xff] }
0x17d8   :  { %10923 = vmatprep.subr.bf16.mxu1 %v12843_v6  ;;  %v8925_v14 = vpop.f32.mrb[203].mxu1  ;;  %v12882_v10 = vcombine.low %v9445_v39, %v9449_v59  ;;  %v9465_v47 = vld [vmem:[#allocation29 + $0x668] sm:$0xff] }
0x17d9   :  { %v9453_v14 = vld [vmem:[#allocation29 + $0x608] sm:$0xff] }
0x17da   :  { %10883 = vmatpush1.bf16.msra.mxu0 %v12714_v24 }
0x17db   :  { %10924 = vmatpush1.bf16.msra.mxu1 %v12842_v51  ;;  %10884 = vmatprep.subr.bf16.mxu0 %v12723_v56  ;;  %v12874_v51 = vcombine.low %v9437_v48, %v9441_v16  ;;  %v12755_v56 = vcombine.high %v9317_v58, %v9321_v12  ;;  %v12899_v48 = vcombine.high %v9461_v50, %v9465_v47  ;;  %v9341_v16 = vld [vmem:[#allocation29 + $0x288] sm:$0xff] }
0x17dc   :  { %10925 = vmatprep.subr.bf16.mxu1 %v12851_v41  ;;  %v16969_v15 = vpop.f32.mrb[8].mxu0  ;;  %v12883_v41 = vcombine.high %v9445_v39, %v9449_v59  ;;  %v9477_v39 = vld [vmem:[#allocation29 + $0x6c8] sm:$0xff] }
0x17dd   :  { %v16971_v45 = vpop.f32.mrb[204].mxu1  ;;  %v16973_v1 = vpop.f32.mrb[9].mxu0  ;;  %v9481_v59 = vld [vmem:[#allocation29 + $0x6e8] sm:$0xff] }
0x17de   :  { %10885 = vmatpush1.bf16.msra.mxu0 %v12722_v28  ;;  %v16975_v7 = vpop.f32.mrb[205].mxu1  ;;  %v8965_v40 = vpop.f32.mrb[10].mxu0  ;;  %v12763_v28 = vcombine.high %v9325_v55, %v9329_v42 }
0x17df   :  { %10926 = vmatpush1.bf16.msra.mxu1 %v12850_v19  ;;  %10886 = vmatprep.subr.bf16.mxu0 %v12731_v57  ;;  %v9006_v30 = vpop.f32.mrb[206].mxu1  ;;  %v8966_v46 = vpop.f32.mrb[11].mxu0  ;;  %v12891_v19 = vcombine.high %v9453_v14, %v9457_v60  ;;  %v9333_v57 = vld [vmem:[#allocation29 + $0x248] sm:$0xff]  ;;  %v12762_v40 = vcombine.low %v9325_v55, %v9329_v42 }
0x17e0   :  { %10927 = vmatprep.subr.bf16.mxu1 %v12859_v3  ;;  %v9007_v63 = vpop.f32.mrb[207].mxu1 }
0x17e2   :  { %10887 = vmatpush1.bf16.msra.mxu0 %v12730_v49 }
0x17e3   :  { %10928 = vmatpush1.bf16.msra.mxu1 %v12858_v11  ;;  %10888 = vmatprep.subr.bf16.mxu0 %v12739_v52 }
0x17e4   :  { %10929 = vmatprep.subr.bf16.mxu1 %v12867_v22  ;;  %v9126_v62 = vpop.f32.mrb[12].mxu0  ;;  %v12890_v22 = vcombine.low %v9453_v14, %v9457_v60  ;;  %v9369_v14 = vld [vmem:[#allocation29 + $0x368] sm:$0xff] }
0x17e5   :  { %v16978_v61 = vadd.f32 %v9126_v62, %v16960_v43  ;;  %v9167_v6 = vpop.f32.mrb[208].mxu1  ;;  %v9128_v54 = vpop.f32.mrb[13].mxu0  ;;  %v9349_v62 = vld [vmem:[#allocation29 + $0x2c8] sm:$0xff] }
0x17e6   :  { %10889 = vmatpush1.bf16.msra.mxu0 %v12738_v0  ;;  %v16981_v5 = vadd.f32 %v9167_v6, %v16963_v17  ;;  %v16984_v13 = vadd.f32 %v9128_v54, %v16965_v23  ;;  %v9169_v24 = vpop.f32.mrb[209].mxu1  ;;  %v9130_v26 = vpop.f32.mrb[14].mxu0  ;;  %v12754_v23 = vcombine.low %v9317_v58, %v9321_v12  ;;  %v9345_v0 = vld [vmem:[#allocation29 + $0x2a8] sm:$0xff] }
0x17e7   :  { %10930 = vmatpush1.bf16.msra.mxu1 %v12866_v31  ;;  %10890 = vmatprep.subr.bf16.mxu0 %v12747_v33  ;;  %v16987_v44 = vadd.f32 %v9169_v24, %v16967_v21  ;;  %v9171_v43 = vpop.f32.mrb[210].mxu1  ;;  %v9131_v20 = vpop.f32.mrb[15].mxu0  ;;  %v9337_v21 = vld [vmem:[#allocation29 + $0x268] sm:$0xff]  ;;  %v12779_v58 = vcombine.high %v9341_v16, %v9345_v0  ;;  %v12778_v6 = vcombine.low %v9341_v16, %v9345_v0 }
0x17e8   :  { %10931 = vmatprep.subr.bf16.mxu1 %v12875_v32  ;;  %v9172_v17 = vpop.f32.mrb[211].mxu1  ;;  %v12771_v38 = vcombine.high %v9333_v57, %v9337_v21  ;;  %v9469_v31 = vld [vmem:[#allocation29 + $0x688] sm:$0xff]  ;;  %v12898_v32 = vcombine.low %v9461_v50, %v9465_v47  ;;  %v12915_v24 = vcombine.high %v9477_v39, %v9481_v59 }
0x17e9   :  { %v9473_v33 = vld [vmem:[#allocation29 + $0x6a8] sm:$0xff] }
0x17ea   :  { %10891 = vmatpush1.bf16.msra.mxu0 %v12746_v37  ;;  %v12907_v12 = vcombine.high %v9469_v31, %v9473_v33  ;;  %v12906_v54 = vcombine.low %v9469_v31, %v9473_v33  ;;  %v9357_v26 = vld [vmem:[#allocation29 + $0x308] sm:$0xff]  ;;  %v9266_v31 = vld [vmem:[#allocation29 + $0x30] sm:$0xff] }
0x17eb   :  { %10932 = vmatpush1.bf16.msra.mxu1 %v12874_v51  ;;  %10892 = vmatprep.subr.bf16.mxu0 %v12755_v56  ;;  %v9361_v51 = vld [vmem:[#allocation29 + $0x328] sm:$0xff]  ;;  %v9390_v33 = vld [vmem:[#allocation29 + $0x410] sm:$0xff] }
0x17ec   :  { %10933 = vmatprep.subr.bf16.mxu1 %v12883_v41  ;;  %v9208_v3 = vpop.f32.mrb[16].mxu0  ;;  %v9485_v56 = vld [vmem:[#allocation29 + $0x708] sm:$0xff]  ;;  %v12914_v41 = vcombine.low %v9477_v39, %v9481_v59  ;;  %v12795_v55 = vcombine.high %v9357_v26, %v9361_v51  ;;  %v9274_v39 = vld [vmem:[#allocation29 + $0x70] sm:$0xff] }
0x17ed   :  { %v16990_v8 = vadd.f32 %v9208_v3, %v16969_v15  ;;  %v9249_v53 = vpop.f32.mrb[212].mxu1  ;;  %v9210_v49 = vpop.f32.mrb[17].mxu0  ;;  %v9489_v43 = vld [vmem:[#allocation29 + $0x728] sm:$0xff] }
0x17ee   :  { %10893 = vmatpush1.bf16.msra.mxu0 %v12754_v23  ;;  %v16993_v11 = vadd.f32 %v9249_v53, %v16971_v45  ;;  %v16996_v52 = vadd.f32 %v9210_v49, %v16973_v1  ;;  %v9251_v30 = vpop.f32.mrb[213].mxu1  ;;  %v9212_v46 = vpop.f32.mrb[18].mxu0  ;;  %v12770_v1 = vcombine.low %v9333_v57, %v9337_v21  ;;  %v12923_v42 = vcombine.high %v9485_v56, %v9489_v43  ;;  %v9365_v17 = vld [vmem:[#allocation29 + $0x348] sm:$0xff] }
0x17ef   :  { %10934 = vmatpush1.bf16.msra.mxu1 %v12882_v10  ;;  %10894 = vmatprep.subr.bf16.mxu0 %v12763_v28  ;;  %v16999_v9 = vadd.f32 %v9251_v30, %v16975_v7  ;;  %v9253_v15 = vpop.f32.mrb[214].mxu1  ;;  %v9213_v63 = vpop.f32.mrb[19].mxu0  ;;  %v9353_v7 = vld [vmem:[#allocation29 + $0x2e8] sm:$0xff]  ;;  %v12794_v10 = vcombine.low %v9357_v26, %v9361_v51  ;;  %v12922_v28 = vcombine.low %v9485_v56, %v9489_v43  ;;  %v9278_v26 = vld [vmem:[#allocation29 + $0x90] sm:$0xff] }
0x17f0   :  { %10935 = vmatprep.subr.bf16.mxu1 %v12891_v19  ;;  %v9254_v45 = vpop.f32.mrb[215].mxu1  ;;  %v12787_v37 = vcombine.high %v9349_v62, %v9353_v7  ;;  %v12786_v20 = vcombine.low %v9349_v62, %v9353_v7  ;;  %v9493_v60 = vld [vmem:[#allocation29 + $0x748] sm:$0xff]  ;;  %v12803_v19 = vcombine.high %v9365_v17, %v9369_v14  ;;  %v12802_v53 = vcombine.low %v9365_v17, %v9369_v14  ;;  %v9270_v7 = vld [vmem:[#allocation29 + $0x50] sm:$0xff] }
0x17f1   :  { %v9497_v23 = vld [vmem:[#allocation29 + $0x768] sm:$0xff]  ;;  %v9262_v45 = vld [vmem:[#allocation29 + $0x10] sm:$0xff] }
0x17f2   :  { %10895 = vmatpush1.bf16.msra.mxu0 %v12762_v40  ;;  %v12931_v57 = vcombine.high %v9493_v60, %v9497_v23  ;;  %v9373_v21 = vld [vmem:[#allocation29 + $0x388] sm:$0xff]  ;;  %v12930_v49 = vcombine.low %v9493_v60, %v9497_v23  ;;  %v12700_v59 = vcombine.low %v9262_v45, %v9266_v31  ;;  %v9282_v51 = vld [vmem:[#allocation29 + $0xb0] sm:$0xff] }
0x17f3   :  { %10936 = vmatpush1.bf16.msra.mxu1 %v12890_v22  ;;  %10896 = vmatprep.subr.bf16.mxu0 %v12771_v38  ;;  %v9377_v3 = vld [vmem:[#allocation29 + $0x3a8] sm:$0xff]  ;;  %v9406_v43 = vld [vmem:[#allocation29 + $0x490] sm:$0xff] }
0x17f4   :  { %10937 = vmatprep.subr.bf16.mxu1 %v12899_v48  ;;  %v9501_v50 = vld [vmem:[#allocation29 + $0x788] sm:$0xff]  ;;  %v12811_v40 = vcombine.high %v9373_v21, %v9377_v3  ;;  %v12810_v63 = vcombine.low %v9373_v21, %v9377_v3  ;;  %v9286_v14 = vld [vmem:[#allocation29 + $0xd0] sm:$0xff] }
0x17f5   :  { %v9505_v47 = vld [vmem:[#allocation29 + $0x7a8] sm:$0xff]  ;;  %v9290_v60 = vld [vmem:[#allocation29 + $0xf0] sm:$0xff] }
0x17f6   :  { %10897 = vmatpush1.bf16.msra.mxu0 %v12770_v1  ;;  %v12939_v30 = vcombine.high %v9501_v50, %v9505_v47  ;;  %v9381_v46 = vld [vmem:[#allocation29 + $0x3c8] sm:$0xff]  ;;  %v12938_v48 = vcombine.low %v9501_v50, %v9505_v47  ;;  %v9394_v1 = vld [vmem:[#allocation29 + $0x430] sm:$0xff] }
0x17f7   :  { %10938 = vmatpush1.bf16.msra.mxu1 %v12898_v32  ;;  %10898 = vmatprep.subr.bf16.mxu0 %v12779_v58  ;;  %v9385_v22 = vld [vmem:[#allocation29 + $0x3e8] sm:$0xff]  ;;  %v12829_v62 = vcombine.high %v9390_v33, %v9394_v1  ;;  %v9414_v23 = vld [vmem:[#allocation29 + $0x4d0] sm:$0xff] }
0x17f8   :  { %10939 = vmatprep.subr.bf16.mxu1 %v12907_v12  ;;  %v9509_v38 = vld [vmem:[#allocation29 + $0x7c8] sm:$0xff]  ;;  %v12819_v16 = vcombine.high %v9381_v46, %v9385_v22  ;;  %v12818_v32 = vcombine.low %v9381_v46, %v9385_v22  ;;  %v12701_v12 = vcombine.high %v9262_v45, %v9266_v31  ;;  %v9294_v3 = vld [vmem:[#allocation29 + $0x110] sm:$0xff] }
0x17f9   :  { %v9513_v15 = vld [vmem:[#allocation29 + $0x7e8] sm:$0xff]  ;;  %v9298_v50 = vld [vmem:[#allocation29 + $0x130] sm:$0xff] }
0x17fa   :  { %10899 = vmatpush1.bf16.msra.mxu0 %v12778_v6  ;;  %v12947_v0 = vcombine.high %v9509_v38, %v9513_v15  ;;  %v12946_v58 = vcombine.low %v9509_v38, %v9513_v15  ;;  %v9398_v6 = vld [vmem:[#allocation29 + $0x450] sm:$0xff] }
0x17fb   :  { %10940 = vmatpush1.bf16.msra.mxu1 %v12906_v54  ;;  %10900 = vmatprep.subr.bf16.mxu0 %v12787_v37  ;;  %v9402_v54 = vld [vmem:[#allocation29 + $0x470] sm:$0xff]  ;;  %v12828_v37 = vcombine.low %v9390_v33, %v9394_v1 }
0x17fc   :  { %10941 = vmatprep.subr.bf16.mxu1 %v12915_v24  ;;  %v12709_v24 = vcombine.high %v9270_v7, %v9274_v39  ;;  %v12837_v56 = vcombine.high %v9398_v6, %v9402_v54  ;;  %v9422_v47 = vld [vmem:[#allocation29 + $0x510] sm:$0xff] }
0x17fd   :  { %v9302_v22 = vld [vmem:[#allocation29 + $0x150] sm:$0xff] }
0x17fe   :  { %10901 = vmatpush1.bf16.msra.mxu0 %v12786_v20  ;;  %v9410_v20 = vld [vmem:[#allocation29 + $0x4b0] sm:$0xff] }
0x17ff   :  { %10942 = vmatpush1.bf16.msra.mxu1 %v12914_v41  ;;  %10902 = vmatprep.subr.bf16.mxu0 %v12795_v55  ;;  %v12708_v41 = vcombine.low %v9270_v7, %v9274_v39  ;;  %v12836_v55 = vcombine.low %v9398_v6, %v9402_v54  ;;  %v12845_v17 = vcombine.high %v9406_v43, %v9410_v20  ;;  %v9306_v38 = vld [vmem:[#allocation29 + $0x170] sm:$0xff] }
0x1800   :  { %10943 = vmatprep.subr.bf16.mxu1 %v12923_v42  ;;  %v12717_v42 = vcombine.high %v9278_v26, %v9282_v51  ;;  %v9430_v15 = vld [vmem:[#allocation29 + $0x550] sm:$0xff] }
0x1801   :  { %v9310_v31 = vld [vmem:[#allocation29 + $0x190] sm:$0xff] }
0x1802   :  { %10903 = vmatpush1.bf16.msra.mxu0 %v12794_v10  ;;  %v9418_v10 = vld [vmem:[#allocation29 + $0x4f0] sm:$0xff] }
0x1803   :  { %10944 = vmatpush1.bf16.msra.mxu1 %v12922_v28  ;;  %10904 = vmatprep.subr.bf16.mxu0 %v12803_v19  ;;  %v12716_v28 = vcombine.low %v9278_v26, %v9282_v51  ;;  %v12844_v19 = vcombine.low %v9406_v43, %v9410_v20  ;;  %v12853_v21 = vcombine.high %v9414_v23, %v9418_v10  ;;  %v9314_v33 = vld [vmem:[#allocation29 + $0x1b0] sm:$0xff] }
0x1804   :  { %10945 = vmatprep.subr.bf16.mxu1 %v12931_v57  ;;  %v12725_v57 = vcombine.high %v9286_v14, %v9290_v60  ;;  %v9438_v1 = vld [vmem:[#allocation29 + $0x590] sm:$0xff] }
0x1805   :  { %v9318_v39 = vld [vmem:[#allocation29 + $0x1d0] sm:$0xff] }
0x1806   :  { %10905 = vmatpush1.bf16.msra.mxu0 %v12802_v53  ;;  %v9426_v53 = vld [vmem:[#allocation29 + $0x530] sm:$0xff] }
0x1807   :  { %10946 = vmatpush1.bf16.msra.mxu1 %v12930_v49  ;;  %10906 = vmatprep.subr.bf16.mxu0 %v12811_v40  ;;  %v12724_v49 = vcombine.low %v9286_v14, %v9290_v60  ;;  %v12852_v40 = vcombine.low %v9414_v23, %v9418_v10  ;;  %v12861_v46 = vcombine.high %v9422_v47, %v9426_v53  ;;  %v9446_v6 = vld [vmem:[#allocation29 + $0x5d0] sm:$0xff] }
0x1808   :  { %10947 = vmatprep.subr.bf16.mxu1 %v12939_v30  ;;  %v12733_v30 = vcombine.high %v9294_v3, %v9298_v50  ;;  %v9450_v54 = vld [vmem:[#allocation29 + $0x5f0] sm:$0xff] }
0x1809   :  { %v12885_v51 = vcombine.high %v9446_v6, %v9450_v54  ;;  %v9330_v43 = vld [vmem:[#allocation29 + $0x230] sm:$0xff] }
0x180a   :  { %10907 = vmatpush1.bf16.msra.mxu0 %v12810_v63  ;;  %v9434_v63 = vld [vmem:[#allocation29 + $0x570] sm:$0xff] }
0x180b   :  { %10948 = vmatpush1.bf16.msra.mxu1 %v12938_v48  ;;  %10908 = vmatprep.subr.bf16.mxu0 %v12819_v16  ;;  %v12732_v48 = vcombine.low %v9294_v3, %v9298_v50  ;;  %v12860_v16 = vcombine.low %v9422_v47, %v9426_v53  ;;  %v12869_v45 = vcombine.high %v9430_v15, %v9434_v63  ;;  %v9454_v20 = vld [vmem:[#allocation29 + $0x610] sm:$0xff] }
0x180c   :  { %10949 = vmatprep.subr.bf16.mxu1 %v12947_v0  ;;  %v12741_v0 = vcombine.high %v9302_v22, %v9306_v38  ;;  %v9334_v60 = vld [vmem:[#allocation29 + $0x250] sm:$0xff] }
0x180d   :  { %v9338_v23 = vld [vmem:[#allocation29 + $0x270] sm:$0xff] }
0x180e   :  { %10909 = vmatpush1.bf16.msra.mxu0 %v12818_v32  ;;  %v9442_v32 = vld [vmem:[#allocation29 + $0x5b0] sm:$0xff] }
0x180f   :  { %10950 = vmatpush1.bf16.msra.mxu1 %v12946_v58  ;;  %10960 = vmatprep.subr.bf16.mxu0 %v12701_v12  ;;  %v12740_v58 = vcombine.low %v9302_v22, %v9306_v38  ;;  %v12868_v12 = vcombine.low %v9430_v15, %v9434_v63  ;;  %v12877_v7 = vcombine.high %v9438_v1, %v9442_v32  ;;  %v9462_v10 = vld [vmem:[#allocation29 + $0x650] sm:$0xff] }
0x1810   :  { %11001 = vmatprep.subr.bf16.mxu1 %v12829_v62  ;;  %v12749_v62 = vcombine.high %v9310_v31, %v9314_v33  ;;  %v9342_v50 = vld [vmem:[#allocation29 + $0x290] sm:$0xff] }
0x1811   :  { %10911 = vmatmul.mubr.bf16.vlgmr.msra.gmra.mrb[24].mxu0 %v16949_v29  ;;  %v9346_v47 = vld [vmem:[#allocation29 + $0x2b0] sm:$0xff] }
0x1812   :  { %10952 = vmatmul.mubr.bf16.vlgmr.msra.gmra.mrb[220].mxu1 %v16953_v4  ;;  %10961 = vmatpush1.bf16.msra.mxu0 %v12700_v59  ;;  %v9322_v59 = vld [vmem:[#allocation29 + $0x1f0] sm:$0xff] }
0x1813   :  { %10992 = vmatprep.mubr.bf16.mxu0 %v16947_v36  ;;  %11002 = vmatpush1.bf16.msra.mxu1 %v12828_v37  ;;  %v12748_v37 = vcombine.low %v9310_v31, %v9314_v33  ;;  %v12757_v26 = vcombine.high %v9318_v39, %v9322_v59  ;;  %v9470_v53 = vld [vmem:[#allocation29 + $0x690] sm:$0xff] }
0x1814   :  { %11033 = vmatprep.mubr.bf16.mxu1 %v16951_v27  ;;  %10962 = vmatprep.subr.bf16.mxu0 %v12709_v24  ;;  %v12876_v24 = vcombine.low %v9438_v1, %v9442_v32  ;;  %v9350_v38 = vld [vmem:[#allocation29 + $0x2d0] sm:$0xff] }
0x1815   :  { %11003 = vmatprep.subr.bf16.mxu1 %v12837_v56  ;;  %v9326_v56 = vld [vmem:[#allocation29 + $0x210] sm:$0xff] }
0x1816   :  { %10963 = vmatpush1.bf16.msra.mxu0 %v12708_v41  ;;  %v9458_v41 = vld [vmem:[#allocation29 + $0x630] sm:$0xff] }
0x1817   :  { %11004 = vmatpush1.bf16.msra.mxu1 %v12836_v55  ;;  %10964 = vmatprep.subr.bf16.mxu0 %v12717_v42  ;;  %v12756_v55 = vcombine.low %v9318_v39, %v9322_v59  ;;  %v12884_v42 = vcombine.low %v9446_v6, %v9450_v54  ;;  %v12893_v14 = vcombine.high %v9454_v20, %v9458_v41  ;;  %v9354_v15 = vld [vmem:[#allocation29 + $0x2f0] sm:$0xff] }
0x1818   :  { %11005 = vmatprep.subr.bf16.mxu1 %v12845_v17  ;;  %v12765_v17 = vcombine.high %v9326_v56, %v9330_v43  ;;  %v9478_v63 = vld [vmem:[#allocation29 + $0x6d0] sm:$0xff] }
0x1819   :  { %v9358_v33 = vld [vmem:[#allocation29 + $0x310] sm:$0xff] }
0x181a   :  { %10965 = vmatpush1.bf16.msra.mxu0 %v12716_v28  ;;  %v9466_v28 = vld [vmem:[#allocation29 + $0x670] sm:$0xff] }
0x181b   :  { %11006 = vmatpush1.bf16.msra.mxu1 %v12844_v19  ;;  %10966 = vmatprep.subr.bf16.mxu0 %v12725_v57  ;;  %v12764_v19 = vcombine.low %v9326_v56, %v9330_v43  ;;  %v12892_v57 = vcombine.low %v9454_v20, %v9458_v41  ;;  %v12901_v3 = vcombine.high %v9462_v10, %v9466_v28  ;;  %v9362_v1 = vld [vmem:[#allocation29 + $0x330] sm:$0xff] }
0x181c   :  { %11007 = vmatprep.subr.bf16.mxu1 %v12853_v21  ;;  %v12773_v21 = vcombine.high %v9334_v60, %v9338_v23  ;;  %v9486_v32 = vld [vmem:[#allocation29 + $0x710] sm:$0xff] }
0x181d   :  { %v9366_v59 = vld [vmem:[#allocation29 + $0x350] sm:$0xff] }
0x181e   :  { %10967 = vmatpush1.bf16.msra.mxu0 %v12724_v49  ;;  %v9474_v49 = vld [vmem:[#allocation29 + $0x6b0] sm:$0xff] }
0x181f   :  { %11008 = vmatpush1.bf16.msra.mxu1 %v12852_v40  ;;  %10968 = vmatprep.subr.bf16.mxu0 %v12733_v30  ;;  %v12772_v40 = vcombine.low %v9334_v60, %v9338_v23  ;;  %v12900_v30 = vcombine.low %v9462_v10, %v9466_v28  ;;  %v12909_v22 = vcombine.high %v9470_v53, %v9474_v49  ;;  %v9370_v6 = vld [vmem:[#allocation29 + $0x370] sm:$0xff] }
0x1820   :  { %11009 = vmatprep.subr.bf16.mxu1 %v12861_v46  ;;  %v12781_v46 = vcombine.high %v9342_v50, %v9346_v47  ;;  %v9494_v54 = vld [vmem:[#allocation29 + $0x750] sm:$0xff] }
0x1821   :  { %v9374_v43 = vld [vmem:[#allocation29 + $0x390] sm:$0xff] }
0x1822   :  { %10969 = vmatpush1.bf16.msra.mxu0 %v12732_v48  ;;  %v9482_v48 = vld [vmem:[#allocation29 + $0x6f0] sm:$0xff] }
0x1823   :  { %11010 = vmatpush1.bf16.msra.mxu1 %v12860_v16  ;;  %10970 = vmatprep.subr.bf16.mxu0 %v12741_v0  ;;  %v12780_v16 = vcombine.low %v9342_v50, %v9346_v47  ;;  %v12908_v0 = vcombine.low %v9470_v53, %v9474_v49  ;;  %v12917_v31 = vcombine.high %v9478_v63, %v9482_v48  ;;  %v9378_v20 = vld [vmem:[#allocation29 + $0x3b0] sm:$0xff]  ;;  %v9263_v47 = vld [vmem:[#allocation29 + $0x18] sm:$0xff] }
0x1824   :  { %11011 = vmatprep.subr.bf16.mxu1 %v12869_v45  ;;  %v12789_v45 = vcombine.high %v9350_v38, %v9354_v15  ;;  %v9502_v41 = vld [vmem:[#allocation29 + $0x790] sm:$0xff]  ;;  %v9267_v53 = vld [vmem:[#allocation29 + $0x38] sm:$0xff] }
0x1825   :  { %v9382_v23 = vld [vmem:[#allocation29 + $0x3d0] sm:$0xff]  ;;  %v9391_v49 = vld [vmem:[#allocation29 + $0x418] sm:$0xff] }
0x1826   :  { %10971 = vmatpush1.bf16.msra.mxu0 %v12740_v58  ;;  %v9490_v58 = vld [vmem:[#allocation29 + $0x730] sm:$0xff] }
0x1827   :  { %11012 = vmatpush1.bf16.msra.mxu1 %v12868_v12  ;;  %10972 = vmatprep.subr.bf16.mxu0 %v12749_v62  ;;  %v12788_v12 = vcombine.low %v9350_v38, %v9354_v15  ;;  %v12916_v62 = vcombine.low %v9478_v63, %v9482_v48  ;;  %v12925_v39 = vcombine.high %v9486_v32, %v9490_v58  ;;  %v9386_v10 = vld [vmem:[#allocation29 + $0x3f0] sm:$0xff]  ;;  %v9271_v15 = vld [vmem:[#allocation29 + $0x58] sm:$0xff] }
0x1828   :  { %11013 = vmatprep.subr.bf16.mxu1 %v12877_v7  ;;  %v12797_v7 = vcombine.high %v9358_v33, %v9362_v1  ;;  %v9510_v28 = vld [vmem:[#allocation29 + $0x7d0] sm:$0xff]  ;;  %v9275_v63 = vld [vmem:[#allocation29 + $0x78] sm:$0xff]  ;;  %v12702_v48 = vcombine.low %v9263_v47, %v9267_v53 }
0x182a   :  { %10973 = vmatpush1.bf16.msra.mxu0 %v12748_v37  ;;  %v9498_v37 = vld [vmem:[#allocation29 + $0x770] sm:$0xff] }
0x182b   :  { %11014 = vmatpush1.bf16.msra.mxu1 %v12876_v24  ;;  %10974 = vmatprep.subr.bf16.mxu0 %v12757_v26  ;;  %v12796_v24 = vcombine.low %v9358_v33, %v9362_v1  ;;  %v12924_v26 = vcombine.low %v9486_v32, %v9490_v58  ;;  %v12933_v56 = vcombine.high %v9494_v54, %v9498_v37  ;;  %v9279_v33 = vld [vmem:[#allocation29 + $0x98] sm:$0xff] }
0x182c   :  { %11015 = vmatprep.subr.bf16.mxu1 %v12885_v51  ;;  %v12805_v51 = vcombine.high %v9366_v59, %v9370_v6  ;;  %v9283_v1 = vld [vmem:[#allocation29 + $0xb8] sm:$0xff] }
0x182d   :  { %v9407_v58 = vld [vmem:[#allocation29 + $0x498] sm:$0xff] }
0x182e   :  { %10975 = vmatpush1.bf16.msra.mxu0 %v12756_v55  ;;  %v9506_v55 = vld [vmem:[#allocation29 + $0x7b0] sm:$0xff] }
0x182f   :  { %11016 = vmatpush1.bf16.msra.mxu1 %v12884_v42  ;;  %10976 = vmatprep.subr.bf16.mxu0 %v12765_v17  ;;  %v12804_v42 = vcombine.low %v9366_v59, %v9370_v6  ;;  %v12932_v17 = vcombine.low %v9494_v54, %v9498_v37  ;;  %v12941_v60 = vcombine.high %v9502_v41, %v9506_v55  ;;  %v9287_v6 = vld [vmem:[#allocation29 + $0xd8] sm:$0xff] }
0x1830   :  { %11017 = vmatprep.subr.bf16.mxu1 %v12893_v14  ;;  %v12813_v14 = vcombine.high %v9374_v43, %v9378_v20  ;;  %v9291_v54 = vld [vmem:[#allocation29 + $0xf8] sm:$0xff] }
0x1831   :  { %v9415_v37 = vld [vmem:[#allocation29 + $0x4d8] sm:$0xff] }
0x1832   :  { %10977 = vmatpush1.bf16.msra.mxu0 %v12764_v19  ;;  %v9514_v19 = vld [vmem:[#allocation29 + $0x7f0] sm:$0xff] }
0x1833   :  { %11018 = vmatpush1.bf16.msra.mxu1 %v12892_v57  ;;  %10978 = vmatprep.subr.bf16.mxu0 %v12773_v21  ;;  %v12812_v57 = vcombine.low %v9374_v43, %v9378_v20  ;;  %v12940_v21 = vcombine.low %v9502_v41, %v9506_v55  ;;  %v12949_v50 = vcombine.high %v9510_v28, %v9514_v19  ;;  %v9295_v43 = vld [vmem:[#allocation29 + $0x118] sm:$0xff] }
0x1834   :  { %11019 = vmatprep.subr.bf16.mxu1 %v12901_v3  ;;  %v12821_v3 = vcombine.high %v9382_v23, %v9386_v10  ;;  %v9299_v20 = vld [vmem:[#allocation29 + $0x138] sm:$0xff] }
0x1835   :  { %v9423_v41 = vld [vmem:[#allocation29 + $0x518] sm:$0xff] }
0x1836   :  { %10979 = vmatpush1.bf16.msra.mxu0 %v12772_v40  ;;  %v9395_v40 = vld [vmem:[#allocation29 + $0x438] sm:$0xff] }
0x1837   :  { %11020 = vmatpush1.bf16.msra.mxu1 %v12900_v30  ;;  %10980 = vmatprep.subr.bf16.mxu0 %v12781_v46  ;;  %v12820_v30 = vcombine.low %v9382_v23, %v9386_v10  ;;  %v12948_v46 = vcombine.low %v9510_v28, %v9514_v19  ;;  %v12831_v38 = vcombine.high %v9391_v49, %v9395_v40  ;;  %v9427_v55 = vld [vmem:[#allocation29 + $0x538] sm:$0xff] }
0x1838   :  { %11021 = vmatprep.subr.bf16.mxu1 %v12909_v22  ;;  %v12703_v22 = vcombine.high %v9263_v47, %v9267_v53  ;;  %v9307_v23 = vld [vmem:[#allocation29 + $0x178] sm:$0xff]  ;;  %v12734_v19 = vcombine.low %v9295_v43, %v9299_v20 }
0x1839   :  { %v9431_v10 = vld [vmem:[#allocation29 + $0x558] sm:$0xff] }
0x183a   :  { %10981 = vmatpush1.bf16.msra.mxu0 %v12780_v16  ;;  %v9399_v16 = vld [vmem:[#allocation29 + $0x458] sm:$0xff] }
0x183b   :  { %11022 = vmatpush1.bf16.msra.mxu1 %v12908_v0  ;;  %10982 = vmatprep.subr.bf16.mxu0 %v12789_v45  ;;  %v9403_v0 = vld [vmem:[#allocation29 + $0x478] sm:$0xff]  ;;  %v12830_v45 = vcombine.low %v9391_v49, %v9395_v40 }
0x183c   :  { %11023 = vmatprep.subr.bf16.mxu1 %v12917_v31  ;;  %v12711_v31 = vcombine.high %v9271_v15, %v9275_v63  ;;  %v12839_v32 = vcombine.high %v9399_v16, %v9403_v0  ;;  %v9435_v28 = vld [vmem:[#allocation29 + $0x578] sm:$0xff] }
0x183d   :  { %v9315_v47 = vld [vmem:[#allocation29 + $0x1b8] sm:$0xff] }
0x183e   :  { %10983 = vmatpush1.bf16.msra.mxu0 %v12788_v12  ;;  %v9411_v12 = vld [vmem:[#allocation29 + $0x4b8] sm:$0xff] }
0x183f   :  { %11024 = vmatpush1.bf16.msra.mxu1 %v12916_v62  ;;  %10984 = vmatprep.subr.bf16.mxu0 %v12797_v7  ;;  %v12710_v62 = vcombine.low %v9271_v15, %v9275_v63  ;;  %v12838_v7 = vcombine.low %v9399_v16, %v9403_v0  ;;  %v12847_v59 = vcombine.high %v9407_v58, %v9411_v12  ;;  %v9439_v53 = vld [vmem:[#allocation29 + $0x598] sm:$0xff] }
0x1840   :  { %11025 = vmatprep.subr.bf16.mxu1 %v12925_v39  ;;  %v12719_v39 = vcombine.high %v9279_v33, %v9283_v1  ;;  %v9443_v49 = vld [vmem:[#allocation29 + $0x5b8] sm:$0xff] }
0x1841   :  { %v9323_v15 = vld [vmem:[#allocation29 + $0x1f8] sm:$0xff]  ;;  %v12878_v0 = vcombine.low %v9439_v53, %v9443_v49 }
0x1842   :  { %10985 = vmatpush1.bf16.msra.mxu0 %v12796_v24  ;;  %v9419_v24 = vld [vmem:[#allocation29 + $0x4f8] sm:$0xff] }
0x1843   :  { %11026 = vmatpush1.bf16.msra.mxu1 %v12924_v26  ;;  %10986 = vmatprep.subr.bf16.mxu0 %v12805_v51  ;;  %v12718_v26 = vcombine.low %v9279_v33, %v9283_v1  ;;  %v12846_v51 = vcombine.low %v9407_v58, %v9411_v12  ;;  %v9447_v63 = vld [vmem:[#allocation29 + $0x5d8] sm:$0xff] }
0x1844   :  { %11027 = vmatprep.subr.bf16.mxu1 %v12933_v56  ;;  %v12727_v56 = vcombine.high %v9287_v6, %v9291_v54  ;;  %v9327_v33 = vld [vmem:[#allocation29 + $0x218] sm:$0xff] }
0x1845   :  { %v9331_v1 = vld [vmem:[#allocation29 + $0x238] sm:$0xff] }
0x1846   :  { %10987 = vmatpush1.bf16.msra.mxu0 %v12804_v42  ;;  %v12854_v42 = vcombine.low %v9415_v37, %v9419_v24  ;;  %v9459_v58 = vld [vmem:[#allocation29 + $0x638] sm:$0xff] }
0x1847   :  { %11028 = vmatpush1.bf16.msra.mxu1 %v12932_v17  ;;  %10988 = vmatprep.subr.bf16.mxu0 %v12813_v14  ;;  %v12735_v17 = vcombine.high %v9295_v43, %v9299_v20  ;;  %v12863_v14 = vcombine.high %v9423_v41, %v9427_v55  ;;  %v9347_v43 = vld [vmem:[#allocation29 + $0x2b8] sm:$0xff] }
0x1848   :  { %11029 = vmatprep.subr.bf16.mxu1 %v12941_v60  ;;  %v9303_v60 = vld [vmem:[#allocation29 + $0x158] sm:$0xff] }
0x1849   :  { %v12742_v40 = vcombine.low %v9303_v60, %v9307_v23  ;;  %v9471_v20 = vld [vmem:[#allocation29 + $0x698] sm:$0xff] }
0x184a   :  { %10989 = vmatpush1.bf16.msra.mxu0 %v12812_v57  ;;  %v12862_v57 = vcombine.low %v9423_v41, %v9427_v55  ;;  %v9475_v41 = vld [vmem:[#allocation29 + $0x6b8] sm:$0xff] }
0x184b   :  { %11030 = vmatpush1.bf16.msra.mxu1 %v12940_v21  ;;  %10990 = vmatprep.subr.bf16.mxu0 %v12821_v3  ;;  %v12743_v21 = vcombine.high %v9303_v60, %v9307_v23  ;;  %v12871_v3 = vcombine.high %v9431_v10, %v9435_v28  ;;  %v9355_v60 = vld [vmem:[#allocation29 + $0x2f8] sm:$0xff] }
0x184c   :  { %11031 = vmatprep.subr.bf16.mxu1 %v12949_v50  ;;  %v9311_v50 = vld [vmem:[#allocation29 + $0x198] sm:$0xff] }
0x184d   :  { %v12750_v16 = vcombine.low %v9311_v50, %v9315_v47  ;;  %v9479_v23 = vld [vmem:[#allocation29 + $0x6d8] sm:$0xff] }
0x184e   :  { %10991 = vmatpush1.bf16.msra.mxu0 %v12820_v30  ;;  %v12870_v30 = vcombine.low %v9431_v10, %v9435_v28  ;;  %v9483_v10 = vld [vmem:[#allocation29 + $0x6f8] sm:$0xff] }
0x184f   :  { %11032 = vmatpush1.bf16.msra.mxu1 %v12948_v46  ;;  %11042 = vmatprep.subr.bf16.mxu0 %v12703_v22  ;;  %v12751_v46 = vcombine.high %v9311_v50, %v9315_v47  ;;  %v12879_v22 = vcombine.high %v9439_v53, %v9443_v49  ;;  %v9363_v50 = vld [vmem:[#allocation29 + $0x338] sm:$0xff] }
0x1850   :  { %11083 = vmatprep.subr.bf16.mxu1 %v12831_v38  ;;  %v9319_v38 = vld [vmem:[#allocation29 + $0x1d8] sm:$0xff] }
0x1851   :  { %10993 = vmatmul.mubr.bf16.vlgmr.msra.gmra.mrb[28].mxu0 %v16949_v29  ;;  %v12758_v12 = vcombine.low %v9319_v38, %v9323_v15  ;;  %v9487_v47 = vld [vmem:[#allocation29 + $0x718] sm:$0xff] }
0x1852   :  { %11034 = vmatmul.mubr.bf16.vlgmr.msra.gmra.mrb[224].mxu1 %v16953_v4  ;;  %11043 = vmatpush1.bf16.msra.mxu0 %v12702_v48  ;;  %v9451_v48 = vld [vmem:[#allocation29 + $0x5f8] sm:$0xff] }
0x1853   :  { %11074 = vmatprep.mubr.bf16.mxu0 %v16947_v36  ;;  %11084 = vmatpush1.bf16.msra.mxu1 %v12830_v45  ;;  %v12855_v36 = vcombine.high %v9415_v37, %v9419_v24  ;;  %v12759_v45 = vcombine.high %v9319_v38, %v9323_v15  ;;  %v9467_v37 = vld [vmem:[#allocation29 + $0x678] sm:$0xff]  ;;  %v12766_v24 = vcombine.low %v9327_v33, %v9331_v1 }
0x1854   :  { %11115 = vmatprep.mubr.bf16.mxu1 %v16951_v27  ;;  %11044 = vmatprep.subr.bf16.mxu0 %v12711_v31  ;;  %v12726_v27 = vcombine.low %v9287_v6, %v9291_v54  ;;  %v12887_v31 = vcombine.high %v9447_v63, %v9451_v48  ;;  %v9339_v6 = vld [vmem:[#allocation29 + $0x278] sm:$0xff] }
0x1855   :  { %11085 = vmatprep.subr.bf16.mxu1 %v12839_v32  ;;  %v9455_v32 = vld [vmem:[#allocation29 + $0x618] sm:$0xff] }
0x1856   :  { %11045 = vmatpush1.bf16.msra.mxu0 %v12710_v62  ;;  %v12886_v62 = vcombine.low %v9447_v63, %v9451_v48  ;;  %v9463_v54 = vld [vmem:[#allocation29 + $0x658] sm:$0xff] }
0x1857   :  { %11086 = vmatpush1.bf16.msra.mxu1 %v12838_v7  ;;  %11046 = vmatprep.subr.bf16.mxu0 %v12719_v39  ;;  %v12767_v7 = vcombine.high %v9327_v33, %v9331_v1  ;;  %v12895_v39 = vcombine.high %v9455_v32, %v9459_v58  ;;  %v9491_v53 = vld [vmem:[#allocation29 + $0x738] sm:$0xff] }
0x1858   :  { %11087 = vmatprep.subr.bf16.mxu1 %v12847_v59  ;;  %v9335_v59 = vld [vmem:[#allocation29 + $0x258] sm:$0xff] }
0x1859   :  { %v12774_v55 = vcombine.low %v9335_v59, %v9339_v6  ;;  %v9371_v38 = vld [vmem:[#allocation29 + $0x378] sm:$0xff] }
0x185a   :  { %11047 = vmatpush1.bf16.msra.mxu0 %v12718_v26  ;;  %v12894_v26 = vcombine.low %v9455_v32, %v9459_v58  ;;  %v9495_v15 = vld [vmem:[#allocation29 + $0x758] sm:$0xff] }
0x185b   :  { %11088 = vmatpush1.bf16.msra.mxu1 %v12846_v51  ;;  %11048 = vmatprep.subr.bf16.mxu0 %v12727_v56  ;;  %v12775_v51 = vcombine.high %v9335_v59, %v9339_v6  ;;  %v12903_v56 = vcombine.high %v9463_v54, %v9467_v37  ;;  %v9499_v63 = vld [vmem:[#allocation29 + $0x778] sm:$0xff] }
0x185c   :  { %11089 = vmatprep.subr.bf16.mxu1 %v12855_v36  ;;  %v9343_v36 = vld [vmem:[#allocation29 + $0x298] sm:$0xff] }
0x185d   :  { %v12782_v28 = vcombine.low %v9343_v36, %v9347_v43  ;;  %v9379_v33 = vld [vmem:[#allocation29 + $0x3b8] sm:$0xff] }
0x185e   :  { %11049 = vmatpush1.bf16.msra.mxu0 %v12726_v27  ;;  %v12902_v27 = vcombine.low %v9463_v54, %v9467_v37  ;;  %v9503_v1 = vld [vmem:[#allocation29 + $0x798] sm:$0xff] }
0x185f   :  { %11090 = vmatpush1.bf16.msra.mxu1 %v12854_v42  ;;  %11050 = vmatprep.subr.bf16.mxu0 %v12735_v17  ;;  %v12783_v42 = vcombine.high %v9343_v36, %v9347_v43  ;;  %v12911_v17 = vcombine.high %v9471_v20, %v9475_v41  ;;  %v9507_v32 = vld [vmem:[#allocation29 + $0x7b8] sm:$0xff]  ;;  %v14625_v43 = vld [vmem:[%s15486_s9 + $0x40] sm:$0xff]  }
0x1860   :  { %11091 = vmatprep.subr.bf16.mxu1 %v12863_v14  ;;  %v9351_v14 = vld [vmem:[#allocation29 + $0x2d8] sm:$0xff] }
0x1861   :  { %v12790_v49 = vcombine.low %v9351_v14, %v9355_v60  ;;  %v9387_v59 = vld [vmem:[#allocation29 + $0x3f8] sm:$0xff] }
0x1862   :  { %11051 = vmatpush1.bf16.msra.mxu0 %v12734_v19  ;;  %v12910_v19 = vcombine.low %v9471_v20, %v9475_v41  ;;  %v9511_v6 = vld [vmem:[#allocation29 + $0x7d8] sm:$0xff]  ;;  %v14641_v20 = vld [vmem:[%s15486_s9 + $0xc0] sm:$0xff]  }
0x1863   :  { %11092 = vmatpush1.bf16.msra.mxu1 %v12862_v57  ;;  %11052 = vmatprep.subr.bf16.mxu0 %v12743_v21  ;;  %v12791_v57 = vcombine.high %v9351_v14, %v9355_v60  ;;  %v12919_v21 = vcombine.high %v9479_v23, %v9483_v10  ;;  %v9515_v54 = vld [vmem:[#allocation29 + $0x7f8] sm:$0xff]  ;;  %v14626_v41 = vld [vmem:[%s15486_s9] sm:$0xff]   ;;  %v14629_v14 = vld [vmem:[%s15486_s9 + $0x50] sm:$0xff]  }
0x1864   :  { %11093 = vmatprep.subr.bf16.mxu1 %v12871_v3  ;;  %v9359_v3 = vld [vmem:[#allocation29 + $0x318] sm:$0xff]  ;;  %v12950_v36 = vcombine.low %v9511_v6, %v9515_v54 }
0x1865   :  { %v12798_v48 = vcombine.low %v9359_v3, %v9363_v50  ;;  %v14644_v60 = vld [vmem:[%s15486_s9 + $0x88] sm:$0xff]  }
0x1866   :  { %11053 = vmatpush1.bf16.msra.mxu0 %v12742_v40  ;;  %v12918_v40 = vcombine.low %v9479_v23, %v9483_v10  ;;  %v14645_v23 = vld [vmem:[%s15486_s9 + $0xd0] sm:$0xff]  }
0x1867   :  { %11094 = vmatpush1.bf16.msra.mxu1 %v12870_v30  ;;  %11054 = vmatprep.subr.bf16.mxu0 %v12751_v46  ;;  %v12799_v30 = vcombine.high %v9359_v3, %v9363_v50  ;;  %v12927_v46 = vcombine.high %v9487_v47, %v9491_v53  ;;  %v14630_v10 = vld [vmem:[%s15486_s9 + $0x10] sm:$0xff]   ;;  %v14649_v3 = vld [vmem:[%s15486_s9 + $0xe0] sm:$0xff]  }
0x1868   :  { %11095 = vmatprep.subr.bf16.mxu1 %v12879_v22  ;;  %v9367_v22 = vld [vmem:[#allocation29 + $0x358] sm:$0xff]  ;;  %v14634_v50 = vld [vmem:[%s15486_s9 + $0x20] sm:$0xff]  }
0x1869   :  { %v12806_v58 = vcombine.low %v9367_v22, %v9371_v38 }
0x186a   :  { %11055 = vmatpush1.bf16.msra.mxu0 %v12750_v16  ;;  %v12926_v16 = vcombine.low %v9487_v47, %v9491_v53  ;;  %v14635_v47 = vld [vmem:[%s15486_s9 + $0x68] sm:$0xff]   ;;  %v14650_v53 = vld [vmem:[%s15486_s9 + $0xa0] sm:$0xff]  }
0x186b   :  { %11096 = vmatpush1.bf16.msra.mxu1 %v12878_v0  ;;  %11056 = vmatprep.subr.bf16.mxu0 %v12759_v45  ;;  %v12807_v0 = vcombine.high %v9367_v22, %v9371_v38  ;;  %v12935_v45 = vcombine.high %v9495_v15, %v9499_v63  ;;  %v14652_v22 = vld [vmem:[%s15486_s9 + $0xa8] sm:$0xff]  }
0x186c   :  { %11097 = vmatprep.subr.bf16.mxu1 %v12887_v31  ;;  %v9375_v31 = vld [vmem:[#allocation29 + $0x398] sm:$0xff] }
0x186d   :  { %v12814_v37 = vcombine.low %v9375_v31, %v9379_v33 }
0x186e   :  { %11057 = vmatpush1.bf16.msra.mxu0 %v12758_v12  ;;  %v12934_v12 = vcombine.low %v9495_v15, %v9499_v63  ;;  %v14653_v15 = vld [vmem:[%s15486_s9 + $0xf0] sm:$0xff]  }
0x186f   :  { %11098 = vmatpush1.bf16.msra.mxu1 %v12886_v62  ;;  %11058 = vmatprep.subr.bf16.mxu0 %v12767_v7  ;;  %v12815_v62 = vcombine.high %v9375_v31, %v9379_v33  ;;  %v12943_v7 = vcombine.high %v9503_v1, %v9507_v32  ;;  %v14638_v31 = vld [vmem:[%s15486_s9 + $0x30] sm:$0xff]  }
0x1870   :  { %11099 = vmatprep.subr.bf16.mxu1 %v12895_v39  ;;  %v9383_v39 = vld [vmem:[#allocation29 + $0x3d8] sm:$0xff] }
0x1872   :  { %11059 = vmatpush1.bf16.msra.mxu0 %v12766_v24  ;;  %v12942_v24 = vcombine.low %v9503_v1, %v9507_v32 }
0x1873   :  { %11100 = vmatpush1.bf16.msra.mxu1 %v12894_v26  ;;  %11060 = vmatprep.subr.bf16.mxu0 %v12775_v51  ;;  %v12823_v26 = vcombine.high %v9383_v39, %v9387_v59  ;;  %v12951_v51 = vcombine.high %v9511_v6, %v9515_v54 }
0x1874   :  { %11101 = vmatprep.subr.bf16.mxu1 %v12903_v56  ;;  %v12822_v56 = vcombine.low %v9383_v39, %v9387_v59  ;;  %v14655_v59 = vld [vmem:[%s15486_s9 + $0xf8] sm:$0xff]  }
0x1876   :  { %11061 = vmatpush1.bf16.msra.mxu0 %v12774_v55  ;;  %v14627_v55 = vld [vmem:[%s15486_s9 + $0x48] sm:$0xff]  }
0x1877   :  { %11102 = vmatpush1.bf16.msra.mxu1 %v12902_v27  ;;  %11062 = vmatprep.subr.bf16.mxu0 %v12783_v42  ;;  %v14642_v27 = vld [vmem:[%s15486_s9 + $0x80] sm:$0xff]   ;;  %v14643_v42 = vld [vmem:[%s15486_s9 + $0xc8] sm:$0xff]  }
0x1878   :  { %11103 = vmatprep.subr.bf16.mxu1 %v12911_v17  ;;  %v14628_v17 = vld [vmem:[%s15486_s9 + $0x8] sm:$0xff]  }
0x187a   :  { %11063 = vmatpush1.bf16.msra.mxu0 %v12782_v28  ;;  %v14647_v28 = vld [vmem:[%s15486_s9 + $0xd8] sm:$0xff]  }
0x187b   :  { %11104 = vmatpush1.bf16.msra.mxu1 %v12910_v19  ;;  %11064 = vmatprep.subr.bf16.mxu0 %v12791_v57  ;;  %v14632_v19 = vld [vmem:[%s15486_s9 + $0x18] sm:$0xff]   ;;  %v14633_v57 = vld [vmem:[%s15486_s9 + $0x60] sm:$0xff]  }
0x187c   :  { %11105 = vmatprep.subr.bf16.mxu1 %v12919_v21  ;;  %v14648_v21 = vld [vmem:[%s15486_s9 + $0x98] sm:$0xff]  }
0x187e   :  { %11065 = vmatpush1.bf16.msra.mxu0 %v12790_v49  ;;  %v14651_v49 = vld [vmem:[%s15486_s9 + $0xe8] sm:$0xff]  }
0x187f   :  { %11106 = vmatpush1.bf16.msra.mxu1 %v12918_v40  ;;  %11066 = vmatprep.subr.bf16.mxu0 %v12799_v30  ;;  %v14636_v40 = vld [vmem:[%s15486_s9 + $0x28] sm:$0xff]   ;;  %v17034_v30 = vld [vmem:[#allocation31] sm:$0xff] }
0x1880   :  { %11107 = vmatprep.subr.bf16.mxu1 %v12927_v46  ;;  %v14637_v46 = vld [vmem:[%s15486_s9 + $0x70] sm:$0xff]   ;;  %v11141_v32 = vrot.slane %v17034_v30, %v5288_v34  ;;  %v14640_v34 = vld [vmem:[%s15486_s9 + $0x38] sm:$0xff]  }
0x1882   :  { %11067 = vmatpush1.bf16.msra.mxu0 %v12798_v48 }
0x1883   :  { %11108 = vmatpush1.bf16.msra.mxu1 %v12926_v16  ;;  %11068 = vmatprep.subr.bf16.mxu0 %v12807_v0  ;;  %v11137_v0 = vrot.slane %v17034_v30, %v5284_v2 }
0x1884   :  { %11109 = vmatprep.subr.bf16.mxu1 %v12935_v45 }
0x1886   :  { %11069 = vmatpush1.bf16.msra.mxu0 %v12806_v58  ;;  %v14639_v58 = vld [vmem:[%s15486_s9 + $0x78] sm:$0xff]  }
0x1887   :  { %11110 = vmatpush1.bf16.msra.mxu1 %v12934_v12  ;;  %11070 = vmatprep.subr.bf16.mxu0 %v12815_v62 }
0x1888   :  { %11111 = vmatprep.subr.bf16.mxu1 %v12943_v7  ;;  %v14654_v7 = vld [vmem:[%s15486_s9 + $0xb0] sm:$0xff]  }
0x188a   :  { %11071 = vmatpush1.bf16.msra.mxu0 %v12814_v37 }
0x188b   :  { %11112 = vmatpush1.bf16.msra.mxu1 %v12942_v24  ;;  %11072 = vmatprep.subr.bf16.mxu0 %v12823_v26  ;;  %v14656_v24 = vld [vmem:[%s15486_s9 + $0xb8] sm:$0xff]   ;;  %v14657_v26 = vld [vmem:[%s15486_s9 + $0x140] sm:$0xff]  }
0x188c   :  { %11113 = vmatprep.subr.bf16.mxu1 %v12951_v51 }
0x188e   :  { %11073 = vmatpush1.bf16.msra.mxu0 %v12822_v56 }
0x188f   :  { %11114 = vmatpush1.bf16.msra.mxu1 %v12950_v36  ;;  %13144 = vmatprep.subr.bf16.mxu0 %v14625_v43  ;;  %v14659_v43 = vld [vmem:[%s15486_s9 + $0x148] sm:$0xff]  }
0x1890   :  { %13166 = vmatprep.subr.bf16.mxu1 %v14641_v20  ;;  %v14673_v20 = vld [vmem:[%s15486_s9 + $0x1c0] sm:$0xff]  }
0x1891   :  { %11075 = vmatmul.mubr.bf16.vlgmr.msra.gmra.mrb[32].mxu0 %v16949_v29  ;;  %v14631_v29 = vld [vmem:[%s15486_s9 + $0x58] sm:$0xff]  }
0x1892   :  { %11116 = vmatmul.mubr.bf16.vlgmr.msra.gmra.mrb[228].mxu1 %v16953_v4  ;;  %13145 = vmatpush3.bf16.msra.mxu0 %v14626_v41  ;;  %v14646_v4 = vld [vmem:[%s15486_s9 + $0x90] sm:$0xff]   ;;  %v14660_v41 = vld [vmem:[%s15486_s9 + $0x108] sm:$0xff]  }
0x1893   :  { %13146 = vmatprep.subr.bf16.mxu0 %v14627_v55  ;;  %13167 = vmatpush3.bf16.msra.mxu1 %v14642_v27  ;;  %v14661_v55 = vld [vmem:[%s15486_s9 + $0x150] sm:$0xff]  }
0x1894   :  { %13168 = vmatprep.subr.bf16.mxu1 %v14643_v42  ;;  %v14662_v27 = vld [vmem:[%s15486_s9 + $0x110] sm:$0xff]   ;;  %v14663_v42 = vld [vmem:[%s15486_s9 + $0x158] sm:$0xff]  }
0x1896   :  { %13147 = vmatpush3.bf16.msra.mxu0 %v14628_v17  ;;  %v14664_v17 = vld [vmem:[%s15486_s9 + $0x118] sm:$0xff]  }
0x1897   :  { %13148 = vmatprep.subr.bf16.mxu0 %v14629_v14  ;;  %13169 = vmatpush3.bf16.msra.mxu1 %v14644_v60  ;;  %v14665_v14 = vld [vmem:[%s15486_s9 + $0x160] sm:$0xff]  }
0x1898   :  { %13170 = vmatprep.subr.bf16.mxu1 %v14645_v23  ;;  %v14666_v60 = vld [vmem:[%s15486_s9 + $0x120] sm:$0xff]   ;;  %v14667_v23 = vld [vmem:[%s15486_s9 + $0x168] sm:$0xff]  }
0x189a   :  { %13149 = vmatpush3.bf16.msra.mxu0 %v14630_v10  ;;  %v14668_v10 = vld [vmem:[%s15486_s9 + $0x128] sm:$0xff]  }
0x189b   :  { %13150 = vmatprep.subr.bf16.mxu0 %v14631_v29  ;;  %13171 = vmatpush3.bf16.msra.mxu1 %v14646_v4  ;;  %v14669_v29 = vld [vmem:[%s15486_s9 + $0x170] sm:$0xff]  }
0x189c   :  { %13172 = vmatprep.subr.bf16.mxu1 %v14647_v28  ;;  %v14670_v4 = vld [vmem:[%s15486_s9 + $0x130] sm:$0xff]   ;;  %v14671_v28 = vld [vmem:[%s15486_s9 + $0x178] sm:$0xff]  }
0x189e   :  { %13151 = vmatpush3.bf16.msra.mxu0 %v14632_v19  ;;  %v14672_v19 = vld [vmem:[%s15486_s9 + $0x138] sm:$0xff]  }
0x189f   :  { %13152 = vmatprep.subr.bf16.mxu0 %v14633_v57  ;;  %13173 = vmatpush3.bf16.msra.mxu1 %v14648_v21 }
0x18a0   :  { %13174 = vmatprep.subr.bf16.mxu1 %v14649_v3 }
0x18a2   :  { %13153 = vmatpush3.bf16.msra.mxu0 %v14634_v50 }
0x18a3   :  { %13154 = vmatprep.subr.bf16.mxu0 %v14635_v47  ;;  %13175 = vmatpush3.bf16.msra.mxu1 %v14650_v53  ;;  %v11145_v47 = vrot.slane %v17034_v30, %v5292_v35 }
0x18a4   :  { %v10830_v38 = vpop.f32.mrb[20].mxu0  ;;  %13176 = vmatprep.subr.bf16.mxu1 %v14651_v49 }
0x18a5   :  { %v10871_v63 = vpop.f32.mrb[216].mxu1  ;;  %v10832_v48 = vpop.f32.mrb[21].mxu0 }
0x18a6   :  { %v10872_v16 = vadd.f32 %v10871_v63, %v10830_v38  ;;  %v10873_v45 = vpop.f32.mrb[217].mxu1  ;;  %13155 = vmatpush3.bf16.msra.mxu0 %v14636_v40  ;;  %v10834_v33 = vpop.f32.mrb[22].mxu0 }
0x18a7   :  { %v10874_v1 = vadd.f32 %v10873_v45, %v10832_v48  ;;  %13156 = vmatprep.subr.bf16.mxu0 %v14637_v46  ;;  %v10875_v12 = vpop.f32.mrb[218].mxu1  ;;  %v10835_v62 = vpop.f32.mrb[23].mxu0  ;;  %13177 = vmatpush3.bf16.msra.mxu1 %v14652_v22  ;;  %v11149_v46 = vrot.slane %v17034_v30, %v5296_v18  ;;  %v14674_v33 = vld [vmem:[%s15486_s9 + $0x180] sm:$0xff]  }
0x18a8   :  { %v11124_v2 = vadd.f32 %v10872_v16, %v16978_v61  ;;  %v10876_v39 = vpop.f32.mrb[219].mxu1  ;;  %13178 = vmatprep.subr.bf16.mxu1 %v14653_v15  ;;  %v14680_v12 = vld [vmem:[%s15486_s9 + $0x198] sm:$0xff]   ;;  %v14681_v62 = vld [vmem:[%s15486_s9 + $0x1e0] sm:$0xff]  }
0x18a9   :  { %v11125_v6 = vadd.f32 %v10874_v1, %v16984_v13  ;;  %v14658_v13 = vld [vmem:[%s15486_s9 + $0x100] sm:$0xff]   ;;  %v14675_v1 = vld [vmem:[%s15486_s9 + $0x1c8] sm:$0xff]  }
0x18aa   :  { %v11174_v54 = vadd.f32 %v11137_v0, %v11124_v2  ;;  %13157 = vmatpush3.bf16.msra.mxu0 %v14638_v31  ;;  %v14683_v2 = vld [vmem:[%s15486_s9 + $0x1e8] sm:$0xff]  }
0x18ab   :  { %v11175_v37 = vadd.f32 %v11141_v32, %v11125_v6  ;;  %13158 = vmatprep.subr.bf16.mxu0 %v14639_v58  ;;  %13179 = vmatpush3.bf16.msra.mxu1 %v14654_v7  ;;  %v14678_v32 = vld [vmem:[%s15486_s9 + $0x190] sm:$0xff]   ;;  %v14679_v58 = vld [vmem:[%s15486_s9 + $0x1d8] sm:$0xff]   ;;  %v14682_v7 = vld [vmem:[%s15486_s9 + $0x1a0] sm:$0xff]  }
0x18ac   :  { %v11182_v51 = vmax.f32 %v11174_v54, 0.0  ;;  %13180 = vmatprep.subr.bf16.mxu1 %v14655_v59  ;;  %v14684_v39 = vld [vmem:[%s15486_s9 + $0x1a8] sm:$0xff]   ;;  %v14685_v59 = vld [vmem:[%s15486_s9 + $0x1f0] sm:$0xff]   ;;  %v14687_v54 = vld [vmem:[%s15486_s9 + $0x1f8] sm:$0xff]  }
0x18ad   :  { %v11183_v61 = vmax.f32 %v11175_v37, 0.0  ;;  %v14686_v6 = vld [vmem:[%s15486_s9 + $0x1b0] sm:$0xff]   ;;  %v11152_v37 = vsub.s32 4, %v17380_v25 }
0x18ae   :  { %13159 = vmatpush3.bf16.msra.mxu0 %v14640_v34  ;;  %v11190_v36 = vpack.c.bf16 %v11182_v51, %v11182_v51  ;;  %v14688_v34 = vld [vmem:[%s15486_s9 + $0x1b8] sm:$0xff]  }
0x18af   :  { %v11191_v56 = vpack.c.bf16 %v11183_v61, %v11183_v61  ;;  %13181 = vmatpush3.bf16.msra.mxu1 %v14656_v24  ;;  %13188 = vmatprep.subr.bf16.mxu0 %v14657_v26  ;;  %v11156_v24 = vsub.s32 5, %v17380_v25 }
0x18b0   :  { %13210 = vmatprep.subr.bf16.mxu1 %v14673_v20 }
0x18b1   :  { %11749 = vmatprep.mubr.bf16.mxu0 %v11191_v56 }
0x18b2   :  { %11750 = vmatmul.mubr.bf16.vlgmr.msra.gmra.mrb[36].mxu0 %v11190_v36 }
0x18b3   :  { %13189 = vmatpush3.bf16.msra.mxu0 %v14658_v13  ;;  %v11153_v13 = vrot.slane %v17034_v30, %v11152_v37 }
0x18b4   :  { %13190 = vmatprep.subr.bf16.mxu0 %v14659_v43 }
0x18b7   :  { %13191 = vmatpush3.bf16.msra.mxu0 %v14660_v41  ;;  %v11157_v41 = vrot.slane %v17034_v30, %v11156_v24 }
0x18b8   :  { %13192 = vmatprep.subr.bf16.mxu0 %v14661_v55 }
0x18bb   :  { %13193 = vmatpush3.bf16.msra.mxu0 %v14662_v27 }
0x18bc   :  { %13194 = vmatprep.subr.bf16.mxu0 %v14663_v42 }
0x18bf   :  { %13195 = vmatpush3.bf16.msra.mxu0 %v14664_v17 }
0x18c0   :  { %13196 = vmatprep.subr.bf16.mxu0 %v14665_v14 }
0x18c3   :  { %13197 = vmatpush3.bf16.msra.mxu0 %v14666_v60 }
0x18c4   :  { %13198 = vmatprep.subr.bf16.mxu0 %v14667_v23 }
0x18c7   :  { %13199 = vmatpush3.bf16.msra.mxu0 %v14668_v10 }
0x18c8   :  { %13200 = vmatprep.subr.bf16.mxu0 %v14669_v29 }
0x18cb   :  { %13201 = vmatpush3.bf16.msra.mxu0 %v14670_v4 }
0x18cc   :  { %13202 = vmatprep.subr.bf16.mxu0 %v14671_v28 }
0x18cf   :  { %13203 = vmatpush3.bf16.msra.mxu0 %v14672_v19  ;;  %v11160_v19 = vsub.s32 6, %v17380_v25 }
0x18e4   :  { %v10912_v57 = vpop.f32.mrb[24].mxu0 }
0x18e5   :  { %v10953_v21 = vpop.f32.mrb[220].mxu1  ;;  %v10914_v3 = vpop.f32.mrb[25].mxu0 }
0x18e6   :  { %v10954_v50 = vadd.f32 %v10953_v21, %v10912_v57  ;;  %v10955_v53 = vpop.f32.mrb[221].mxu1  ;;  %v10916_v49 = vpop.f32.mrb[26].mxu0  ;;  %v11164_v57 = vsub.s32 7, %v17380_v25 }
0x18e7   :  { %v10956_v40 = vadd.f32 %v10955_v53, %v10914_v3  ;;  %v10957_v22 = vpop.f32.mrb[222].mxu1  ;;  %v10917_v38 = vpop.f32.mrb[27].mxu0 }
0x18e8   :  { %v11126_v15 = vadd.f32 %v10954_v50, %v16981_v5  ;;  %v10958_v63 = vpop.f32.mrb[223].mxu1  ;;  %v14676_v5 = vld [vmem:[%s15486_s9 + $0x188] sm:$0xff]  }
0x18e9   :  { %v11127_v48 = vadd.f32 %v10956_v40, %v16987_v44  ;;  %v14677_v44 = vld [vmem:[%s15486_s9 + $0x1d0] sm:$0xff]   ;;  %v11165_v40 = vrot.slane %v17034_v30, %v11164_v57  ;;  %s15322_s9 = smov [#allocation34]  }
0x18ea   :  { %v11176_v16 = vadd.f32 %v11145_v47, %v11126_v15  ;;  %s11885_s26 = sshll.u32 %s15322_s9, 4  ;;  %s11886_s26 = int_to_ptr.vmem [resolvable:$true] %s11885_s26 }
0x18eb   :  { %v11177_v35 = vadd.f32 %v11149_v46, %v11127_v48  ;;  %s15212_s17 = scalar_lea.vmem %s11886_s26, 32  ;;  %p15217_p7 = scmp.lt.s32.totalorder %s11886_s26, %s11886_s26 }
0x18ec   :  { %v11184_v0 = vmax.f32 %v11176_v16, 0.0  ;;  %p15213_p6 = scmp.ne.s32.totalorder %s11886_s26, %s15212_s17  ;;  %p15218_p8 = scmp.lt.s32.totalorder %s15212_s17, %s15212_s17 }
0x18ed   :  { %v11185_v45 = vmax.f32 %v11177_v35, 0.0 }
0x18ee   :  { %v11192_v18 = vpack.c.bf16 %v11184_v0, %v11184_v0  ;;  %p15219_p9 = por %p15218_p8, %p15217_p7 }
0x18ef   :  { %v11193_v31 = vpack.c.bf16 %v11185_v45, %v11185_v45 }
0x18f0   :  { %p15220_p10 = pnand %p15219_p9, %p15213_p6 }
0x18f1   :  { %11789 = vmatprep.mubr.bf16.mxu1 %v11193_v31 }
0x18f2   :  { %11790 = vmatmul.mubr.bf16.vlgmr.msra.gmra.mrb[232].mxu1 %v11192_v18 }
0x18f3   :  { %13211 = vmatpush3.bf16.msra.mxu1 %v14674_v33 }
0x18f4   :  { %13212 = vmatprep.subr.bf16.mxu1 %v14675_v1 }
0x18f7   :  { %13213 = vmatpush3.bf16.msra.mxu1 %v14676_v5  ;;  %v12952_v5 = vld [vmem:[#allocation32] ss:$0 sm:$0xff] }
0x18f8   :  { %13214 = vmatprep.subr.bf16.mxu1 %v14677_v44 }
0x18fb   :  { %13215 = vmatpush3.bf16.msra.mxu1 %v14678_v32 }
0x18fc   :  { %13216 = vmatprep.subr.bf16.mxu1 %v14679_v58 }
0x18ff   :  { %13217 = vmatpush3.bf16.msra.mxu1 %v14680_v12 }
0x1900   :  { %13218 = vmatprep.subr.bf16.mxu1 %v14681_v62 }
0x1903   :  { %13219 = vmatpush3.bf16.msra.mxu1 %v14682_v7 }
0x1904   :  { %13220 = vmatprep.subr.bf16.mxu1 %v14683_v2 }
0x1907   :  { %13221 = vmatpush3.bf16.msra.mxu1 %v14684_v39 }
0x1908   :  { %13222 = vmatprep.subr.bf16.mxu1 %v14685_v59 }
0x190b   :  { %13223 = vmatpush3.bf16.msra.mxu1 %v14686_v6 }
0x190c   :  { %13224 = vmatprep.subr.bf16.mxu1 %v14687_v54 }
0x190f   :  { %13225 = vmatpush3.bf16.msra.mxu1 %v14688_v34 }
0x1924   :  { %v10994_v26 = vpop.f32.mrb[28].mxu0 }
0x1925   :  { %v11035_v51 = vpop.f32.mrb[224].mxu1  ;;  %v10996_v61 = vpop.f32.mrb[29].mxu0 }
0x1926   :  { %v11036_v56 = vadd.f32 %v11035_v51, %v10994_v26  ;;  %v11037_v36 = vpop.f32.mrb[225].mxu1  ;;  %v10998_v43 = vpop.f32.mrb[30].mxu0 }
0x1927   :  { %v11038_v20 = vadd.f32 %v11037_v36, %v10996_v61  ;;  %v11039_v55 = vpop.f32.mrb[226].mxu1  ;;  %v10999_v27 = vpop.f32.mrb[31].mxu0 }
0x1928   :  { %v11128_v42 = vadd.f32 %v11036_v56, %v16990_v8  ;;  %v11040_v17 = vpop.f32.mrb[227].mxu1  ;;  %v11161_v8 = vrot.slane %v17034_v30, %v11160_v19 }
0x1929   :  { %v11129_v14 = vadd.f32 %v11038_v20, %v16996_v52 }
0x192a   :  { %v11178_v60 = vadd.f32 %v11153_v13, %v11128_v42 }
0x192b   :  { %v11179_v23 = vadd.f32 %v11157_v41, %v11129_v14 }
0x192c   :  { %v11186_v10 = vmax.f32 %v11178_v60, 0.0 }
0x192d   :  { %v11187_v29 = vmax.f32 %v11179_v23, 0.0 }
0x192e   :  { %v11194_v28 = vpack.c.bf16 %v11186_v10, %v11186_v10 }
0x192f   :  { %v11195_v4 = vpack.c.bf16 %v11187_v29, %v11187_v29 }
0x1931   :  { %11829 = vmatprep.mubr.bf16.mxu0 %v11195_v4 }
0x1932   :  { %11830 = vmatmul.mubr.bf16.vlgmr.msra.gmra.mrb[40].mxu0 %v11194_v28 }
0x1964   :  { %v11076_v21 = vpop.f32.mrb[32].mxu0 }
0x1965   :  { %v11117_v3 = vpop.f32.mrb[228].mxu1  ;;  %v11078_v50 = vpop.f32.mrb[33].mxu0 }
0x1966   :  { %v11118_v47 = vadd.f32 %v11117_v3, %v11076_v21  ;;  %v11119_v53 = vpop.f32.mrb[229].mxu1  ;;  %v11080_v52 = vpop.f32.mrb[34].mxu0 }
0x1967   :  { %v11120_v49 = vadd.f32 %v11119_v53, %v11078_v50  ;;  %v11121_v46 = vpop.f32.mrb[230].mxu1  ;;  %v11081_v22 = vpop.f32.mrb[35].mxu0 }
0x1968   :  { %v11130_v38 = vadd.f32 %v11118_v47, %v16993_v11  ;;  %v11122_v15 = vpop.f32.mrb[231].mxu1 }
0x1969   :  { %v11131_v63 = vadd.f32 %v11120_v49, %v16999_v9 }
0x196a   :  { %v11180_v48 = vadd.f32 %v11161_v8, %v11130_v38 }
0x196b   :  { %v11181_v25 = vadd.f32 %v11165_v40, %v11131_v63 }
0x196c   :  { %v11188_v16 = vmax.f32 %v11180_v48, 0.0 }
0x196d   :  { %v11189_v35 = vmax.f32 %v11181_v25, 0.0 }
0x196e   :  { %v11196_v45 = vpack.c.bf16 %v11188_v16, %v11188_v16 }
0x196f   :  { %v11197_v0 = vpack.c.bf16 %v11189_v35, %v11189_v35 }
0x1971   :  { %11869 = vmatprep.mubr.bf16.mxu1 %v11197_v0 }
0x1972   :  { %11870 = vmatmul.mubr.bf16.vlgmr.msra.gmra.mrb[236].mxu1 %v11196_v45 }
0x1985   :  { %v13160_v31 = vpop.f32.mrb[36].mxu0 }
0x1986   :  { %v13161_v33 = vpop.f32.mrb[37].mxu0 }
0x1987   :  { %v13162_v18 = vadd.f32 %v13161_v33, %v13160_v31  ;;  %v13163_v1 = vpop.f32.mrb[38].mxu0 }
0x1988   :  { %v13164_v30 = vpop.f32.mrb[39].mxu0 }
0x1989   :  { %v11752_v11 = vadd.f32 %v13162_v18, %v12952_v5 }
0x19c5   :  { %v13182_v44 = vpop.f32.mrb[232].mxu1 }
0x19c6   :  { %v13183_v32 = vpop.f32.mrb[233].mxu1 }
0x19c7   :  { %v13184_v58 = vadd.f32 %v13183_v32, %v13182_v44  ;;  %v13185_v12 = vpop.f32.mrb[234].mxu1 }
0x19c8   :  { %v13186_v9 = vpop.f32.mrb[235].mxu1 }
0x19c9   :  { %v11792_v62 = vadd.f32 %v13184_v58, %v11752_v11 }
0x1a05   :  { %v13204_v7 = vpop.f32.mrb[40].mxu0 }
0x1a06   :  { %v13205_v2 = vpop.f32.mrb[41].mxu0 }
0x1a07   :  { %v13206_v39 = vadd.f32 %v13205_v2, %v13204_v7  ;;  %v13207_v59 = vpop.f32.mrb[42].mxu0 }
0x1a08   :  { %v13208_v6 = vpop.f32.mrb[43].mxu0 }
0x1a09   :  { %v11832_v54 = vadd.f32 %v13206_v39, %v11792_v62 }
0x1a45   :  { %v13226_v34 = vpop.f32.mrb[236].mxu1 }
0x1a46   :  { %v13227_v37 = vpop.f32.mrb[237].mxu1 }
0x1a47   :  { %v13228_v24 = vadd.f32 %v13227_v37, %v13226_v34  ;;  %v13229_v26 = vpop.f32.mrb[238].mxu1 }
0x1a48   :  { %v13230_v51 = vpop.f32.mrb[239].mxu1 }
0x1a49   :  { %v11872_v61 = vadd.f32 %v13228_v24, %v11832_v54 }
0x1a4b   :  { %11878 = vst.msk [vmem:[#allocation34] sm:$0x3] %vm11877_vm0, %v11872_v61 }
0x1a4c   :  { %15223 = shalt.err (!%p15220_p10)
}
0x1a4d   :  { %s15224_s21 = scalar_lea.hbm %s15496_s24, 32 }
0x1a4e   :  { %p15225_p11 = scmp.ne.s32.totalorder %s15496_s24, %s15224_s21  ;;  %p15228_p12 = scmp.lt.u32.totalorder %s15224_s21, %s15496_s24 }
0x1a50   :  { %p15230_p13 = pnand %p15228_p12, %p15225_p11 }
0x1a52   :  { %15233 = shalt.err (!%p15230_p13)
}
0x1a53   :  { %11888 = dma.vmem_to_hbm [thread:$0]  %s11886_s26, 32, %s15496_s24, [#allocation4]  }
0x1a54   :  { %15256 = dma.done.wait [#allocation4], 32  }
0x1a55   :  { %15257 = vsyncadd [#allocation4], 4294967264 }
0x1a56   :  { %11892 = vsyncpa [#allocation3], 1 }
0x1a57   :  { %11893 = vsyncpa [#allocation6], 1 }
0x1a58   :  { %11894 = vsyncpa [#allocation9], 1 }
0x1a59   :  { %11895 = vsyncpa [#allocation12], 1 }
0x1a5a   :  { %11896 = vsyncpa [#allocation15], 1 }
0x1a5b   :  { %11897 = vsyncpa [#allocation18], 1 }
0x1a5c   :  { %11898 = vsyncpa [#allocation21], 1 }
0x1a5d   :  { %11899 = vsyncpa [#allocation24], 1 }
0x1a5e   :  { %11900 = vsyncpa [#allocation27], 1 }
0x1a5f   :  { %11901 = vsyncpa [#allocation30], 1 }
0x1a60   :  { %11902 = vsyncpa [#allocation33], 1 }
0x1a61   :  { %11903 = vsyncpa [#allocation4], 1 }

</bundles_post_ra>
